<compile_context>
chip_gen: v6e
topology: v6e:2x2x1
jax: 0.10.0
libtpu: 0.0.40
codegen_flags: <defaults>
</compile_context>

<pallas_src>
import numpy as np
import jax
import jax.numpy as jnp
from jax.experimental import pallas as pl
from jax.experimental.pallas import tpu as pltpu


# ---------------------------------------------------------------------------
# Fused Pallas kernel: the whole residual block in one pallas_call.
# ---------------------------------------------------------------------------
def _make_fused_kernel(layer_cfgs, c_pad, m0, w0, margin):
    """All layers; activation kept VMEM-resident on a dilated canvas."""

    def kernel(x_ref, w_ref, b_ref, sc_ref, sh_ref, hpos_ref, wpos_ref,
               out_ref, act_ref, stk_ref):
        h_pos = hpos_ref[...]                     # (1, M0) int32: canvas h coord
        w_pos = wpos_ref[...]                     # (1, M0) int32: canvas w coord

        # Zero the haloed canvas and place the input image in its centre.
        act_ref[...] = jnp.zeros(act_ref.shape, jnp.float32)
        act_ref[:, pl.ds(margin, m0)] = x_ref[...]

        for l, cfg in enumerate(layer_cfgs):
            s_in, s_out = cfg["dil_in"], cfg["dil_out"]
            h_in, w_in = cfg["h_in"], cfg["w_in"]
            h_out, w_out = cfg["h_out"], cfg["w_out"]

            x_cur = act_ref[:, pl.ds(margin, m0)]           # residual source

            # im2col: 9 shifted lane-window reads + border masks (VPU only).
            for t in range(9):
                dh, dw = t // 3 - 1, t % 3 - 1
                off = dh * s_in * w0 + dw * s_in            # static flat offset
                tap = act_ref[:, pl.ds(margin + off, m0)]   # (Cpad, M0)
                hin = h_pos + dh * s_in
                win = w_pos + dw * s_in
                valid = ((hin >= 0) & (hin <= (h_in - 1) * s_in) &
                         (win >= 0) & (win <= (w_in - 1) * s_in))
                stk_ref[pl.ds(t * c_pad, c_pad), :] = jnp.where(valid, tap, 0.0)

            # Conv2d (3x3 + bias) == a single MXU matmul with K = 9*Cpad.
            y = jnp.dot(w_ref[l], stk_ref[...],
                        preferred_element_type=jnp.float32)  # (Cpad, M0)
            y = y + b_ref[l]                                 # conv bias
            y = jnp.maximum(y, 0.0)                          # ReLU
            y = y * sc_ref[l] + sh_ref[l]                    # BatchNorm2d (eval)
            # Keep only this layer's (dilated) output-grid canvas positions.
            o_valid = (((h_pos & (s_out - 1)) == 0) &
                       (h_pos <= (h_out - 1) * s_out) &
                       ((w_pos & (s_out - 1)) == 0) &
                       (w_pos <= (w_out - 1) * s_out))
            y = jnp.where(o_valid, y, 0.0)
            if cfg["add_res"]:                  # residual.shape == x.shape
                y = y + x_cur
            act_ref[:, pl.ds(margin, m0)] = y   # Dropout2d eval == identity

        out_ref[...] = act_ref[:, pl.ds(margin, m0)]

    return kernel


# ---------------------------------------------------------------------------
# Forward: matches ResidualBlock.forward (eval mode), one pallas_call total.
# ---------------------------------------------------------------------------
def residual_block_forward(x_nchw, params_list, kernel_sizes=(3, 3),
                           strides=(2, 1), pad=1):
    x = jnp.asarray(x_nchw, jnp.float32)
    B, C, H0, W0 = x.shape
    M0 = B * H0 * W0
    eps = 1e-5
    n_pairs = len(kernel_sizes)
    c_pad = max(8, -(-C // 8) * 8)             # channels rounded to sublane multiple

    layer_cfgs = []
    w_stack, b_stack, sc_stack, sh_stack = [], [], [], []
    cur_h, cur_w, cur_dil = H0, W0, 1
    for idx, params in enumerate(params_list):
        ks = kernel_sizes[idx % n_pairs]
        st = strides[idx % n_pairs]
        assert ks == 3 and pad == 1 and st in (1, 2), "supports 3x3, stride 1/2, pad 1"
        wt, bias, gamma, beta, rmean, rvar = params
        cout, cin = wt.shape[0], wt.shape[1]
        assert cin == C and cout == C, "fused block assumes in_ch == out_ch"
        h_out = (cur_h + 2 * pad - ks) // st + 1
        w_out = (cur_w + 2 * pad - ks) // st + 1
        dil_out = cur_dil * st
        assert (h_out - 1) * dil_out < H0 and (w_out - 1) * dil_out < W0
        layer_cfgs.append(dict(dil_in=cur_dil, dil_out=dil_out,
                               h_in=cur_h, w_in=cur_w, h_out=h_out, w_out=w_out,
                               add_res=(h_out == cur_h and w_out == cur_w
                                        and cout == cin)))
        # PyTorch (Cout, Cin, KH, KW) -> (Cpad, 9*Cpad); flat column index is
        # kh*3*Cpad + kw*Cpad + ci, matching the im2col stack row order.
        wt_p = jnp.pad(wt, ((0, c_pad - cout), (0, c_pad - cin), (0, 0), (0, 0)))
        w_stack.append(jnp.transpose(wt_p, (0, 2, 3, 1)).reshape(c_pad, 9 * c_pad))
        scale = gamma / jnp.sqrt(rvar + eps)
        shift = beta - rmean * scale
        b_stack.append(jnp.pad(bias, (0, c_pad - cout)).reshape(c_pad, 1))
        sc_stack.append(jnp.pad(scale, (0, c_pad - cout)).reshape(c_pad, 1))
        sh_stack.append(jnp.pad(shift, (0, c_pad - cout)).reshape(c_pad, 1))
        cur_h, cur_w, cur_dil = h_out, w_out, dil_out

    w_all = jnp.stack(w_stack)        # (L, Cpad, 9*Cpad)
    b_all = jnp.stack(b_stack)        # (L, Cpad, 1)
    sc_all = jnp.stack(sc_stack)      # (L, Cpad, 1)
    sh_all = jnp.stack(sh_stack)      # (L, Cpad, 1)

    # Lane-dense canvas layout: channels on sublanes, flattened (b,h,w) on lanes.
    x_canvas = jnp.pad(jnp.transpose(x, (1, 0, 2, 3)).reshape(C, M0),
                       ((0, c_pad - C), (0, 0)))

    hw = np.arange(M0, dtype=np.int64) % (H0 * W0)
    h_pos = jnp.asarray((hw // W0).astype(np.int32).reshape(1, M0))
    w_pos = jnp.asarray((hw % W0).astype(np.int32).reshape(1, M0))

    max_off = max(cfg["dil_in"] * (W0 + 1) for cfg in layer_cfgs)
    margin = -(-max_off // 128) * 128            # lane-aligned halo on the canvas

    kernel = _make_fused_kernel(layer_cfgs, c_pad, M0, W0, margin)
    vmem = pl.BlockSpec(memory_space=pltpu.MemorySpace.VMEM)
    out_canvas = pl.pallas_call(
        kernel,
        out_shape=jax.ShapeDtypeStruct((c_pad, M0), jnp.float32),
        in_specs=[vmem] * 7,
        out_specs=vmem,
        scratch_shapes=[
            pltpu.VMEM((c_pad, M0 + 2 * margin), jnp.float32),   # activation canvas
            pltpu.VMEM((9 * c_pad, M0), jnp.float32),            # im2col stack
        ],
    )(x_canvas, w_all, b_all, sc_all, sh_all, h_pos, w_pos)

    # Gather the final (dilated) grid positions off the canvas -> NCHW.
    Hf, Wf, Sf = cur_h, cur_w, cur_dil
    idx = np.asarray([b * H0 * W0 + hh * Sf * W0 + ww * Sf
                      for b in range(B) for hh in range(Hf) for ww in range(Wf)],
                     dtype=np.int32)
    out = jnp.take(out_canvas[:C], jnp.asarray(idx), axis=1)
    return out.reshape(C, B, Hf, Wf).transpose(1, 0, 2, 3)


# ---------------------------------------------------------------------------
# Deterministic parameter init (shapes per ResidualBlock.__init__)
# ---------------------------------------------------------------------------
def init_params(key, in_channels, out_channels, ksize, num_layers):
    params = []
    fan_in = in_channels * ksize * ksize
    for _ in range(num_layers):
        key, k1, k2, k3, k4, k5, k6 = jax.random.split(key, 7)
        w = jax.random.normal(k1, (out_channels, in_channels, ksize, ksize),
                              jnp.float32) / jnp.sqrt(float(fan_in))
        b = 0.05 * jax.random.normal(k2, (out_channels,), jnp.float32)
        gamma = 1.0 + 0.1 * jax.random.normal(k3, (out_channels,), jnp.float32)
        beta = 0.1 * jax.random.normal(k4, (out_channels,), jnp.float32)
        rmean = 0.1 * jax.random.normal(k5, (out_channels,), jnp.float32)
        rvar = 1.0 + 0.1 * jax.random.uniform(k6, (out_channels,), jnp.float32)
        params.append((w, b, gamma, beta, rmean, rvar))
    return params


if __name__ == "__main__":
    # ResidualBlock(in_channels=4, out_channels=4): num_res=4 x (stride 2, 1)
    # pairs -> 8 conv layers; spatial 16 -> 8 -> 8 -> 4 -> 4 -> 2 -> 2 -> 1 -> 1.
    B, C, H, W = 2, 4, 16, 16
    ksize, pad = 3, 1
    kernel_sizes, strides, num_res = (3, 3), (2, 1), 4
    num_layers = num_res * len(kernel_sizes)

    key = jax.random.PRNGKey(0)
    key, xkey = jax.random.split(key)
    x = jax.random.normal(xkey, (B, C, H, W), jnp.float32)
    params_list = init_params(key, C, C, ksize, num_layers)

    out = residual_block_forward(x, params_list, kernel_sizes, strides, pad)
    out = jax.block_until_ready(out)

    assert out.shape == (B, C, 1, 1), out.shape
    assert bool(jnp.all(jnp.isfinite(out)))
    print("KERNEL_OK")
</pallas_src>

<mosaic_0001>
module attributes {stable_mosaic.version = 11 : i64} {
  func.func @kernel(%arg0: memref<8x512xf32, #tpu.memory_space<vmem>>, %arg1: memref<8x8x72xf32, #tpu.memory_space<vmem>>, %arg2: memref<8x8x1xf32, #tpu.memory_space<vmem>>, %arg3: memref<8x8x1xf32, #tpu.memory_space<vmem>>, %arg4: memref<8x8x1xf32, #tpu.memory_space<vmem>>, %arg5: memref<1x512xi32, #tpu.memory_space<vmem>>, %arg6: memref<1x512xi32, #tpu.memory_space<vmem>>, %arg7: memref<8x512xf32, #tpu.memory_space<vmem>>, %arg8: memref<8x1280xf32, #tpu.memory_space<vmem>>, %arg9: memref<72x512xf32, #tpu.memory_space<vmem>>) attributes {dimension_semantics = [], scalar_prefetch = 0 : i64, scratch_operands = 2 : i64, tpu.core_type = #tpu.core_type<tc>} {
    %c0 = arith.constant 0 : index
    %c0_0 = arith.constant 0 : index
    %0 = vector.load %arg5[%c0, %c0_0] : memref<1x512xi32, #tpu.memory_space<vmem>>, vector<1x512xi32>
    %c0_1 = arith.constant 0 : index
    %c0_2 = arith.constant 0 : index
    %1 = vector.load %arg6[%c0_1, %c0_2] : memref<1x512xi32, #tpu.memory_space<vmem>>, vector<1x512xi32>
    %cst = arith.constant 0.000000e+00 : f32
    %2 = vector.broadcast %cst : f32 to vector<8x1280xf32>
    %c0_3 = arith.constant 0 : index
    %c0_4 = arith.constant 0 : index
    %3 = vector.load %arg8[%c0_3, %c0_4] : memref<8x1280xf32, #tpu.memory_space<vmem>>, vector<8x1280xf32>
    tpu.vector_store %arg8[%c0_3, %c0_4], %2 {strides = array<i32>} : memref<8x1280xf32, #tpu.memory_space<vmem>>, vector<8x1280xf32>,
    %c0_5 = arith.constant 0 : index
    %c0_6 = arith.constant 0 : index
    %4 = vector.load %arg0[%c0_5, %c0_6] : memref<8x512xf32, #tpu.memory_space<vmem>>, vector<8x512xf32>
    %c0_7 = arith.constant 0 : index
    %c384 = arith.constant 384 : index
    %5 = vector.load %arg8[%c0_7, %c384] : memref<8x1280xf32, #tpu.memory_space<vmem>>, vector<8x512xf32>
    tpu.vector_store %arg8[%c0_7, %c384], %4 {strides = array<i32>} : memref<8x1280xf32, #tpu.memory_space<vmem>>, vector<8x512xf32>,
    %c0_8 = arith.constant 0 : index
    %c367 = arith.constant 367 : index
    %6 = vector.load %arg8[%c0_8, %c367] : memref<8x1280xf32, #tpu.memory_space<vmem>>, vector<8x512xf32>
    %c-1_i32 = arith.constant -1 : i32
    %7 = vector.broadcast %c-1_i32 : i32 to vector<1x512xi32>
    %8 = arith.addi %0, %7 : vector<1x512xi32>
    %c-1_i32_9 = arith.constant -1 : i32
    %9 = vector.broadcast %c-1_i32_9 : i32 to vector<1x512xi32>
    %10 = arith.addi %1, %9 : vector<1x512xi32>
    %c0_i32 = arith.constant 0 : i32
    %11 = vector.broadcast %c0_i32 : i32 to vector<1x512xi32>
    %12 = arith.cmpi sge, %8, %11 : vector<1x512xi32>
    %c15_i32 = arith.constant 15 : i32
    %13 = vector.broadcast %c15_i32 : i32 to vector<1x512xi32>
    %14 = arith.cmpi sle, %8, %13 : vector<1x512xi32>
    %15 = arith.andi %12, %14 : vector<1x512xi1>
    %c0_i32_10 = arith.constant 0 : i32
    %16 = vector.broadcast %c0_i32_10 : i32 to vector<1x512xi32>
    %17 = arith.cmpi sge, %10, %16 : vector<1x512xi32>
    %18 = arith.andi %15, %17 : vector<1x512xi1>
    %c15_i32_11 = arith.constant 15 : i32
    %19 = vector.broadcast %c15_i32_11 : i32 to vector<1x512xi32>
    %20 = arith.cmpi sle, %10, %19 : vector<1x512xi32>
    %21 = arith.andi %18, %20 : vector<1x512xi1>
    %cst_12 = arith.constant 0.000000e+00 : f32
    %22 = vector.shape_cast %21 : vector<1x512xi1> to vector<1x512xi1>
    %23 = vector.broadcast %22 : vector<1x512xi1> to vector<8x512xi1>
    %24 = vector.broadcast %cst_12 : f32 to vector<8x512xf32>
    %25 = arith.select %23, %6, %24 : vector<8x512xi1>, vector<8x512xf32>
    %c0_13 = arith.constant 0 : index
    %c0_14 = arith.constant 0 : index
    %26 = vector.load %arg9[%c0_13, %c0_14] : memref<72x512xf32, #tpu.memory_space<vmem>>, vector<8x512xf32>
    tpu.vector_store %arg9[%c0_13, %c0_14], %25 {strides = array<i32>} : memref<72x512xf32, #tpu.memory_space<vmem>>, vector<8x512xf32>,
    %c0_15 = arith.constant 0 : index
    %c368 = arith.constant 368 : index
    %27 = vector.load %arg8[%c0_15, %c368] : memref<8x1280xf32, #tpu.memory_space<vmem>>, vector<8x512xf32>
    %c-1_i32_16 = arith.constant -1 : i32
    %28 = vector.broadcast %c-1_i32_16 : i32 to vector<1x512xi32>
    %29 = arith.addi %0, %28 : vector<1x512xi32>
    %c0_i32_17 = arith.constant 0 : i32
    %30 = vector.broadcast %c0_i32_17 : i32 to vector<1x512xi32>
    %31 = arith.addi %1, %30 : vector<1x512xi32>
    %c0_i32_18 = arith.constant 0 : i32
    %32 = vector.broadcast %c0_i32_18 : i32 to vector<1x512xi32>
    %33 = arith.cmpi sge, %29, %32 : vector<1x512xi32>
    %c15_i32_19 = arith.constant 15 : i32
    %34 = vector.broadcast %c15_i32_19 : i32 to vector<1x512xi32>
    %35 = arith.cmpi sle, %29, %34 : vector<1x512xi32>
    %36 = arith.andi %33, %35 : vector<1x512xi1>
    %c0_i32_20 = arith.constant 0 : i32
    %37 = vector.broadcast %c0_i32_20 : i32 to vector<1x512xi32>
    %38 = arith.cmpi sge, %31, %37 : vector<1x512xi32>
    %39 = arith.andi %36, %38 : vector<1x512xi1>
    %c15_i32_21 = arith.constant 15 : i32
    %40 = vector.broadcast %c15_i32_21 : i32 to vector<1x512xi32>
    %41 = arith.cmpi sle, %31, %40 : vector<1x512xi32>
    %42 = arith.andi %39, %41 : vector<1x512xi1>
    %cst_22 = arith.constant 0.000000e+00 : f32
    %43 = vector.shape_cast %42 : vector<1x512xi1> to vector<1x512xi1>
    %44 = vector.broadcast %43 : vector<1x512xi1> to vector<8x512xi1>
    %45 = vector.broadcast %cst_22 : f32 to vector<8x512xf32>
    %46 = arith.select %44, %27, %45 : vector<8x512xi1>, vector<8x512xf32>
    %c8 = arith.constant 8 : index
    %c0_23 = arith.constant 0 : index
    %47 = vector.load %arg9[%c8, %c0_23] : memref<72x512xf32, #tpu.memory_space<vmem>>, vector<8x512xf32>
    tpu.vector_store %arg9[%c8, %c0_23], %46 {strides = array<i32>} : memref<72x512xf32, #tpu.memory_space<vmem>>, vector<8x512xf32>,
    %c0_24 = arith.constant 0 : index
    %c369 = arith.constant 369 : index
    %48 = vector.load %arg8[%c0_24, %c369] : memref<8x1280xf32, #tpu.memory_space<vmem>>, vector<8x512xf32>
    %c-1_i32_25 = arith.constant -1 : i32
    %49 = vector.broadcast %c-1_i32_25 : i32 to vector<1x512xi32>
    %50 = arith.addi %0, %49 : vector<1x512xi32>
    %c1_i32 = arith.constant 1 : i32
    %51 = vector.broadcast %c1_i32 : i32 to vector<1x512xi32>
    %52 = arith.addi %1, %51 : vector<1x512xi32>
    %c0_i32_26 = arith.constant 0 : i32
    %53 = vector.broadcast %c0_i32_26 : i32 to vector<1x512xi32>
    %54 = arith.cmpi sge, %50, %53 : vector<1x512xi32>
    %c15_i32_27 = arith.constant 15 : i32
    %55 = vector.broadcast %c15_i32_27 : i32 to vector<1x512xi32>
    %56 = arith.cmpi sle, %50, %55 : vector<1x512xi32>
    %57 = arith.andi %54, %56 : vector<1x512xi1>
    %c0_i32_28 = arith.constant 0 : i32
    %58 = vector.broadcast %c0_i32_28 : i32 to vector<1x512xi32>
    %59 = arith.cmpi sge, %52, %58 : vector<1x512xi32>
    %60 = arith.andi %57, %59 : vector<1x512xi1>
    %c15_i32_29 = arith.constant 15 : i32
    %61 = vector.broadcast %c15_i32_29 : i32 to vector<1x512xi32>
    %62 = arith.cmpi sle, %52, %61 : vector<1x512xi32>
    %63 = arith.andi %60, %62 : vector<1x512xi1>
    %cst_30 = arith.constant 0.000000e+00 : f32
    %64 = vector.shape_cast %63 : vector<1x512xi1> to vector<1x512xi1>
    %65 = vector.broadcast %64 : vector<1x512xi1> to vector<8x512xi1>
    %66 = vector.broadcast %cst_30 : f32 to vector<8x512xf32>
    %67 = arith.select %65, %48, %66 : vector<8x512xi1>, vector<8x512xf32>
    %c16 = arith.constant 16 : index
    %c0_31 = arith.constant 0 : index
    %68 = vector.load %arg9[%c16, %c0_31] : memref<72x512xf32, #tpu.memory_space<vmem>>, vector<8x512xf32>
    tpu.vector_store %arg9[%c16, %c0_31], %67 {strides = array<i32>} : memref<72x512xf32, #tpu.memory_space<vmem>>, vector<8x512xf32>,
    %c0_32 = arith.constant 0 : index
    %c383 = arith.constant 383 : index
    %69 = vector.load %arg8[%c0_32, %c383] : memref<8x1280xf32, #tpu.memory_space<vmem>>, vector<8x512xf32>
    %c0_i32_33 = arith.constant 0 : i32
    %70 = vector.broadcast %c0_i32_33 : i32 to vector<1x512xi32>
    %71 = arith.addi %0, %70 : vector<1x512xi32>
    %c-1_i32_34 = arith.constant -1 : i32
    %72 = vector.broadcast %c-1_i32_34 : i32 to vector<1x512xi32>
    %73 = arith.addi %1, %72 : vector<1x512xi32>
    %c0_i32_35 = arith.constant 0 : i32
    %74 = vector.broadcast %c0_i32_35 : i32 to vector<1x512xi32>
    %75 = arith.cmpi sge, %71, %74 : vector<1x512xi32>
    %c15_i32_36 = arith.constant 15 : i32
    %76 = vector.broadcast %c15_i32_36 : i32 to vector<1x512xi32>
    %77 = arith.cmpi sle, %71, %76 : vector<1x512xi32>
    %78 = arith.andi %75, %77 : vector<1x512xi1>
    %c0_i32_37 = arith.constant 0 : i32
    %79 = vector.broadcast %c0_i32_37 : i32 to vector<1x512xi32>
    %80 = arith.cmpi sge, %73, %79 : vector<1x512xi32>
    %81 = arith.andi %78, %80 : vector<1x512xi1>
    %c15_i32_38 = arith.constant 15 : i32
    %82 = vector.broadcast %c15_i32_38 : i32 to vector<1x512xi32>
    %83 = arith.cmpi sle, %73, %82 : vector<1x512xi32>
    %84 = arith.andi %81, %83 : vector<1x512xi1>
    %cst_39 = arith.constant 0.000000e+00 : f32
    %85 = vector.shape_cast %84 : vector<1x512xi1> to vector<1x512xi1>
    %86 = vector.broadcast %85 : vector<1x512xi1> to vector<8x512xi1>
    %87 = vector.broadcast %cst_39 : f32 to vector<8x512xf32>
    %88 = arith.select %86, %69, %87 : vector<8x512xi1>, vector<8x512xf32>
    %c24 = arith.constant 24 : index
    %c0_40 = arith.constant 0 : index
    %89 = vector.load %arg9[%c24, %c0_40] : memref<72x512xf32, #tpu.memory_space<vmem>>, vector<8x512xf32>
    tpu.vector_store %arg9[%c24, %c0_40], %88 {strides = array<i32>} : memref<72x512xf32, #tpu.memory_space<vmem>>, vector<8x512xf32>,
    %c0_41 = arith.constant 0 : index
    %c384_42 = arith.constant 384 : index
    %90 = vector.load %arg8[%c0_41, %c384_42] : memref<8x1280xf32, #tpu.memory_space<vmem>>, vector<8x512xf32>
    %c0_i32_43 = arith.constant 0 : i32
    %91 = vector.broadcast %c0_i32_43 : i32 to vector<1x512xi32>
    %92 = arith.addi %0, %91 : vector<1x512xi32>
    %c0_i32_44 = arith.constant 0 : i32
    %93 = vector.broadcast %c0_i32_44 : i32 to vector<1x512xi32>
    %94 = arith.addi %1, %93 : vector<1x512xi32>
    %c0_i32_45 = arith.constant 0 : i32
    %95 = vector.broadcast %c0_i32_45 : i32 to vector<1x512xi32>
    %96 = arith.cmpi sge, %92, %95 : vector<1x512xi32>
    %c15_i32_46 = arith.constant 15 : i32
    %97 = vector.broadcast %c15_i32_46 : i32 to vector<1x512xi32>
    %98 = arith.cmpi sle, %92, %97 : vector<1x512xi32>
    %99 = arith.andi %96, %98 : vector<1x512xi1>
    %c0_i32_47 = arith.constant 0 : i32
    %100 = vector.broadcast %c0_i32_47 : i32 to vector<1x512xi32>
    %101 = arith.cmpi sge, %94, %100 : vector<1x512xi32>
    %102 = arith.andi %99, %101 : vector<1x512xi1>
    %c15_i32_48 = arith.constant 15 : i32
    %103 = vector.broadcast %c15_i32_48 : i32 to vector<1x512xi32>
    %104 = arith.cmpi sle, %94, %103 : vector<1x512xi32>
    %105 = arith.andi %102, %104 : vector<1x512xi1>
    %cst_49 = arith.constant 0.000000e+00 : f32
    %106 = vector.shape_cast %105 : vector<1x512xi1> to vector<1x512xi1>
    %107 = vector.broadcast %106 : vector<1x512xi1> to vector<8x512xi1>
    %108 = vector.broadcast %cst_49 : f32 to vector<8x512xf32>
    %109 = arith.select %107, %90, %108 : vector<8x512xi1>, vector<8x512xf32>
    %c32 = arith.constant 32 : index
    %c0_50 = arith.constant 0 : index
    %110 = vector.load %arg9[%c32, %c0_50] : memref<72x512xf32, #tpu.memory_space<vmem>>, vector<8x512xf32>
    tpu.vector_store %arg9[%c32, %c0_50], %109 {strides = array<i32>} : memref<72x512xf32, #tpu.memory_space<vmem>>, vector<8x512xf32>,
    %c0_51 = arith.constant 0 : index
    %c385 = arith.constant 385 : index
    %111 = vector.load %arg8[%c0_51, %c385] : memref<8x1280xf32, #tpu.memory_space<vmem>>, vector<8x512xf32>
    %c0_i32_52 = arith.constant 0 : i32
    %112 = vector.broadcast %c0_i32_52 : i32 to vector<1x512xi32>
    %113 = arith.addi %0, %112 : vector<1x512xi32>
    %c1_i32_53 = arith.constant 1 : i32
    %114 = vector.broadcast %c1_i32_53 : i32 to vector<1x512xi32>
    %115 = arith.addi %1, %114 : vector<1x512xi32>
    %c0_i32_54 = arith.constant 0 : i32
    %116 = vector.broadcast %c0_i32_54 : i32 to vector<1x512xi32>
    %117 = arith.cmpi sge, %113, %116 : vector<1x512xi32>
    %c15_i32_55 = arith.constant 15 : i32
    %118 = vector.broadcast %c15_i32_55 : i32 to vector<1x512xi32>
    %119 = arith.cmpi sle, %113, %118 : vector<1x512xi32>
    %120 = arith.andi %117, %119 : vector<1x512xi1>
    %c0_i32_56 = arith.constant 0 : i32
    %121 = vector.broadcast %c0_i32_56 : i32 to vector<1x512xi32>
    %122 = arith.cmpi sge, %115, %121 : vector<1x512xi32>
    %123 = arith.andi %120, %122 : vector<1x512xi1>
    %c15_i32_57 = arith.constant 15 : i32
    %124 = vector.broadcast %c15_i32_57 : i32 to vector<1x512xi32>
    %125 = arith.cmpi sle, %115, %124 : vector<1x512xi32>
    %126 = arith.andi %123, %125 : vector<1x512xi1>
    %cst_58 = arith.constant 0.000000e+00 : f32
    %127 = vector.shape_cast %126 : vector<1x512xi1> to vector<1x512xi1>
    %128 = vector.broadcast %127 : vector<1x512xi1> to vector<8x512xi1>
    %129 = vector.broadcast %cst_58 : f32 to vector<8x512xf32>
    %130 = arith.select %128, %111, %129 : vector<8x512xi1>, vector<8x512xf32>
    %c40 = arith.constant 40 : index
    %c0_59 = arith.constant 0 : index
    %131 = vector.load %arg9[%c40, %c0_59] : memref<72x512xf32, #tpu.memory_space<vmem>>, vector<8x512xf32>
    tpu.vector_store %arg9[%c40, %c0_59], %130 {strides = array<i32>} : memref<72x512xf32, #tpu.memory_space<vmem>>, vector<8x512xf32>,
    %c0_60 = arith.constant 0 : index
    %c399 = arith.constant 399 : index
    %132 = vector.load %arg8[%c0_60, %c399] : memref<8x1280xf32, #tpu.memory_space<vmem>>, vector<8x512xf32>
    %c1_i32_61 = arith.constant 1 : i32
    %133 = vector.broadcast %c1_i32_61 : i32 to vector<1x512xi32>
    %134 = arith.addi %0, %133 : vector<1x512xi32>
    %c-1_i32_62 = arith.constant -1 : i32
    %135 = vector.broadcast %c-1_i32_62 : i32 to vector<1x512xi32>
    %136 = arith.addi %1, %135 : vector<1x512xi32>
    %c0_i32_63 = arith.constant 0 : i32
    %137 = vector.broadcast %c0_i32_63 : i32 to vector<1x512xi32>
    %138 = arith.cmpi sge, %134, %137 : vector<1x512xi32>
    %c15_i32_64 = arith.constant 15 : i32
    %139 = vector.broadcast %c15_i32_64 : i32 to vector<1x512xi32>
    %140 = arith.cmpi sle, %134, %139 : vector<1x512xi32>
    %141 = arith.andi %138, %140 : vector<1x512xi1>
    %c0_i32_65 = arith.constant 0 : i32
    %142 = vector.broadcast %c0_i32_65 : i32 to vector<1x512xi32>
    %143 = arith.cmpi sge, %136, %142 : vector<1x512xi32>
    %144 = arith.andi %141, %143 : vector<1x512xi1>
    %c15_i32_66 = arith.constant 15 : i32
    %145 = vector.broadcast %c15_i32_66 : i32 to vector<1x512xi32>
    %146 = arith.cmpi sle, %136, %145 : vector<1x512xi32>
    %147 = arith.andi %144, %146 : vector<1x512xi1>
    %cst_67 = arith.constant 0.000000e+00 : f32
    %148 = vector.shape_cast %147 : vector<1x512xi1> to vector<1x512xi1>
    %149 = vector.broadcast %148 : vector<1x512xi1> to vector<8x512xi1>
    %150 = vector.broadcast %cst_67 : f32 to vector<8x512xf32>
    %151 = arith.select %149, %132, %150 : vector<8x512xi1>, vector<8x512xf32>
    %c48 = arith.constant 48 : index
    %c0_68 = arith.constant 0 : index
    %152 = vector.load %arg9[%c48, %c0_68] : memref<72x512xf32, #tpu.memory_space<vmem>>, vector<8x512xf32>
    tpu.vector_store %arg9[%c48, %c0_68], %151 {strides = array<i32>} : memref<72x512xf32, #tpu.memory_space<vmem>>, vector<8x512xf32>,
    %c0_69 = arith.constant 0 : index
    %c400 = arith.constant 400 : index
    %153 = vector.load %arg8[%c0_69, %c400] : memref<8x1280xf32, #tpu.memory_space<vmem>>, vector<8x512xf32>
    %c1_i32_70 = arith.constant 1 : i32
    %154 = vector.broadcast %c1_i32_70 : i32 to vector<1x512xi32>
    %155 = arith.addi %0, %154 : vector<1x512xi32>
    %c0_i32_71 = arith.constant 0 : i32
    %156 = vector.broadcast %c0_i32_71 : i32 to vector<1x512xi32>
    %157 = arith.addi %1, %156 : vector<1x512xi32>
    %c0_i32_72 = arith.constant 0 : i32
    %158 = vector.broadcast %c0_i32_72 : i32 to vector<1x512xi32>
    %159 = arith.cmpi sge, %155, %158 : vector<1x512xi32>
    %c15_i32_73 = arith.constant 15 : i32
    %160 = vector.broadcast %c15_i32_73 : i32 to vector<1x512xi32>
    %161 = arith.cmpi sle, %155, %160 : vector<1x512xi32>
    %162 = arith.andi %159, %161 : vector<1x512xi1>
    %c0_i32_74 = arith.constant 0 : i32
    %163 = vector.broadcast %c0_i32_74 : i32 to vector<1x512xi32>
    %164 = arith.cmpi sge, %157, %163 : vector<1x512xi32>
    %165 = arith.andi %162, %164 : vector<1x512xi1>
    %c15_i32_75 = arith.constant 15 : i32
    %166 = vector.broadcast %c15_i32_75 : i32 to vector<1x512xi32>
    %167 = arith.cmpi sle, %157, %166 : vector<1x512xi32>
    %168 = arith.andi %165, %167 : vector<1x512xi1>
    %cst_76 = arith.constant 0.000000e+00 : f32
    %169 = vector.shape_cast %168 : vector<1x512xi1> to vector<1x512xi1>
    %170 = vector.broadcast %169 : vector<1x512xi1> to vector<8x512xi1>
    %171 = vector.broadcast %cst_76 : f32 to vector<8x512xf32>
    %172 = arith.select %170, %153, %171 : vector<8x512xi1>, vector<8x512xf32>
    %c56 = arith.constant 56 : index
    %c0_77 = arith.constant 0 : index
    %173 = vector.load %arg9[%c56, %c0_77] : memref<72x512xf32, #tpu.memory_space<vmem>>, vector<8x512xf32>
    tpu.vector_store %arg9[%c56, %c0_77], %172 {strides = array<i32>} : memref<72x512xf32, #tpu.memory_space<vmem>>, vector<8x512xf32>,
    %c0_78 = arith.constant 0 : index
    %c401 = arith.constant 401 : index
    %174 = vector.load %arg8[%c0_78, %c401] : memref<8x1280xf32, #tpu.memory_space<vmem>>, vector<8x512xf32>
    %c1_i32_79 = arith.constant 1 : i32
    %175 = vector.broadcast %c1_i32_79 : i32 to vector<1x512xi32>
    %176 = arith.addi %0, %175 : vector<1x512xi32>
    %c1_i32_80 = arith.constant 1 : i32
    %177 = vector.broadcast %c1_i32_80 : i32 to vector<1x512xi32>
    %178 = arith.addi %1, %177 : vector<1x512xi32>
    %c0_i32_81 = arith.constant 0 : i32
    %179 = vector.broadcast %c0_i32_81 : i32 to vector<1x512xi32>
    %180 = arith.cmpi sge, %176, %179 : vector<1x512xi32>
    %c15_i32_82 = arith.constant 15 : i32
    %181 = vector.broadcast %c15_i32_82 : i32 to vector<1x512xi32>
    %182 = arith.cmpi sle, %176, %181 : vector<1x512xi32>
    %183 = arith.andi %180, %182 : vector<1x512xi1>
    %c0_i32_83 = arith.constant 0 : i32
    %184 = vector.broadcast %c0_i32_83 : i32 to vector<1x512xi32>
    %185 = arith.cmpi sge, %178, %184 : vector<1x512xi32>
    %186 = arith.andi %183, %185 : vector<1x512xi1>
    %c15_i32_84 = arith.constant 15 : i32
    %187 = vector.broadcast %c15_i32_84 : i32 to vector<1x512xi32>
    %188 = arith.cmpi sle, %178, %187 : vector<1x512xi32>
    %189 = arith.andi %186, %188 : vector<1x512xi1>
    %cst_85 = arith.constant 0.000000e+00 : f32
    %190 = vector.shape_cast %189 : vector<1x512xi1> to vector<1x512xi1>
    %191 = vector.broadcast %190 : vector<1x512xi1> to vector<8x512xi1>
    %192 = vector.broadcast %cst_85 : f32 to vector<8x512xf32>
    %193 = arith.select %191, %174, %192 : vector<8x512xi1>, vector<8x512xf32>
    %c64 = arith.constant 64 : index
    %c0_86 = arith.constant 0 : index
    %194 = vector.load %arg9[%c64, %c0_86] : memref<72x512xf32, #tpu.memory_space<vmem>>, vector<8x512xf32>
    tpu.vector_store %arg9[%c64, %c0_86], %193 {strides = array<i32>} : memref<72x512xf32, #tpu.memory_space<vmem>>, vector<8x512xf32>,
    %c0_87 = arith.constant 0 : index
    %c0_88 = arith.constant 0 : index
    %c0_89 = arith.constant 0 : index
    %195 = vector.load %arg1[%c0_87, %c0_88, %c0_89] : memref<8x8x72xf32, #tpu.memory_space<vmem>>, vector<1x8x72xf32>
    %196 = vector.shape_cast %195 : vector<1x8x72xf32> to vector<8x72xf32>
    %c0_90 = arith.constant 0 : index
    %c0_91 = arith.constant 0 : index
    %197 = vector.load %arg9[%c0_90, %c0_91] : memref<72x512xf32, #tpu.memory_space<vmem>>, vector<72x512xf32>
    %cst_92 = arith.constant dense<0.000000e+00> : vector<8x512xf32>
    %198 = tpu.matmul %196, %197, %cst_92 {dimension_numbers = #tpu.dot_dimension_numbers<[1], [0], [0], [1], [0, 0, 1, 1], [], []>} : vector<8x72xf32>, vector<72x512xf32>, vector<8x512xf32> -> vector<8x512xf32>
    %c0_93 = arith.constant 0 : index
    %c0_94 = arith.constant 0 : index
    %c0_95 = arith.constant 0 : index
    %199 = vector.load %arg2[%c0_93, %c0_94, %c0_95] : memref<8x8x1xf32, #tpu.memory_space<vmem>>, vector<1x8x1xf32>
    %200 = vector.shape_cast %199 : vector<1x8x1xf32> to vector<8x1xf32>
    %201 = vector.broadcast %200 : vector<8x1xf32> to vector<8x512xf32>
    %202 = arith.addf %198, %201 : vector<8x512xf32>
    %cst_96 = arith.constant 0.000000e+00 : f32
    %203 = vector.broadcast %cst_96 : f32 to vector<8x512xf32>
    %204 = arith.maximumf %202, %203 : vector<8x512xf32>
    %c0_97 = arith.constant 0 : index
    %c0_98 = arith.constant 0 : index
    %c0_99 = arith.constant 0 : index
    %205 = vector.load %arg3[%c0_97, %c0_98, %c0_99] : memref<8x8x1xf32, #tpu.memory_space<vmem>>, vector<1x8x1xf32>
    %206 = vector.shape_cast %205 : vector<1x8x1xf32> to vector<8x1xf32>
    %207 = vector.broadcast %206 : vector<8x1xf32> to vector<8x512xf32>
    %208 = arith.mulf %204, %207 : vector<8x512xf32>
    %c0_100 = arith.constant 0 : index
    %c0_101 = arith.constant 0 : index
    %c0_102 = arith.constant 0 : index
    %209 = vector.load %arg4[%c0_100, %c0_101, %c0_102] : memref<8x8x1xf32, #tpu.memory_space<vmem>>, vector<1x8x1xf32>
    %210 = vector.shape_cast %209 : vector<1x8x1xf32> to vector<8x1xf32>
    %211 = vector.broadcast %210 : vector<8x1xf32> to vector<8x512xf32>
    %212 = arith.addf %208, %211 : vector<8x512xf32>
    %c1_i32_103 = arith.constant 1 : i32
    %213 = vector.broadcast %c1_i32_103 : i32 to vector<1x512xi32>
    %214 = arith.andi %0, %213 : vector<1x512xi32>
    %c0_i32_104 = arith.constant 0 : i32
    %215 = vector.broadcast %c0_i32_104 : i32 to vector<1x512xi32>
    %216 = arith.cmpi eq, %214, %215 : vector<1x512xi32>
    %c14_i32 = arith.constant 14 : i32
    %217 = vector.broadcast %c14_i32 : i32 to vector<1x512xi32>
    %218 = arith.cmpi sle, %0, %217 : vector<1x512xi32>
    %219 = arith.andi %216, %218 : vector<1x512xi1>
    %c1_i32_105 = arith.constant 1 : i32
    %220 = vector.broadcast %c1_i32_105 : i32 to vector<1x512xi32>
    %221 = arith.andi %1, %220 : vector<1x512xi32>
    %c0_i32_106 = arith.constant 0 : i32
    %222 = vector.broadcast %c0_i32_106 : i32 to vector<1x512xi32>
    %223 = arith.cmpi eq, %221, %222 : vector<1x512xi32>
    %224 = arith.andi %219, %223 : vector<1x512xi1>
    %c14_i32_107 = arith.constant 14 : i32
    %225 = vector.broadcast %c14_i32_107 : i32 to vector<1x512xi32>
    %226 = arith.cmpi sle, %1, %225 : vector<1x512xi32>
    %227 = arith.andi %224, %226 : vector<1x512xi1>
    %cst_108 = arith.constant 0.000000e+00 : f32
    %228 = vector.shape_cast %227 : vector<1x512xi1> to vector<1x512xi1>
    %229 = vector.broadcast %228 : vector<1x512xi1> to vector<8x512xi1>
    %230 = vector.broadcast %cst_108 : f32 to vector<8x512xf32>
    %231 = arith.select %229, %212, %230 : vector<8x512xi1>, vector<8x512xf32>
    %c0_109 = arith.constant 0 : index
    %c384_110 = arith.constant 384 : index
    %232 = vector.load %arg8[%c0_109, %c384_110] : memref<8x1280xf32, #tpu.memory_space<vmem>>, vector<8x512xf32>
    tpu.vector_store %arg8[%c0_109, %c384_110], %231 {strides = array<i32>} : memref<8x1280xf32, #tpu.memory_space<vmem>>, vector<8x512xf32>,
    %c0_111 = arith.constant 0 : index
    %c384_112 = arith.constant 384 : index
    %233 = vector.load %arg8[%c0_111, %c384_112] : memref<8x1280xf32, #tpu.memory_space<vmem>>, vector<8x512xf32>
    %c0_113 = arith.constant 0 : index
    %c350 = arith.constant 350 : index
    %234 = vector.load %arg8[%c0_113, %c350] : memref<8x1280xf32, #tpu.memory_space<vmem>>, vector<8x512xf32>
    %c-2_i32 = arith.constant -2 : i32
    %235 = vector.broadcast %c-2_i32 : i32 to vector<1x512xi32>
    %236 = arith.addi %0, %235 : vector<1x512xi32>
    %c-2_i32_114 = arith.constant -2 : i32
    %237 = vector.broadcast %c-2_i32_114 : i32 to vector<1x512xi32>
    %238 = arith.addi %1, %237 : vector<1x512xi32>
    %c0_i32_115 = arith.constant 0 : i32
    %239 = vector.broadcast %c0_i32_115 : i32 to vector<1x512xi32>
    %240 = arith.cmpi sge, %236, %239 : vector<1x512xi32>
    %c14_i32_116 = arith.constant 14 : i32
    %241 = vector.broadcast %c14_i32_116 : i32 to vector<1x512xi32>
    %242 = arith.cmpi sle, %236, %241 : vector<1x512xi32>
    %243 = arith.andi %240, %242 : vector<1x512xi1>
    %c0_i32_117 = arith.constant 0 : i32
    %244 = vector.broadcast %c0_i32_117 : i32 to vector<1x512xi32>
    %245 = arith.cmpi sge, %238, %244 : vector<1x512xi32>
    %246 = arith.andi %243, %245 : vector<1x512xi1>
    %c14_i32_118 = arith.constant 14 : i32
    %247 = vector.broadcast %c14_i32_118 : i32 to vector<1x512xi32>
    %248 = arith.cmpi sle, %238, %247 : vector<1x512xi32>
    %249 = arith.andi %246, %248 : vector<1x512xi1>
    %cst_119 = arith.constant 0.000000e+00 : f32
    %250 = vector.shape_cast %249 : vector<1x512xi1> to vector<1x512xi1>
    %251 = vector.broadcast %250 : vector<1x512xi1> to vector<8x512xi1>
    %252 = vector.broadcast %cst_119 : f32 to vector<8x512xf32>
    %253 = arith.select %251, %234, %252 : vector<8x512xi1>, vector<8x512xf32>
    %c0_120 = arith.constant 0 : index
    %c0_121 = arith.constant 0 : index
    %254 = vector.load %arg9[%c0_120, %c0_121] : memref<72x512xf32, #tpu.memory_space<vmem>>, vector<8x512xf32>
    tpu.vector_store %arg9[%c0_120, %c0_121], %253 {strides = array<i32>} : memref<72x512xf32, #tpu.memory_space<vmem>>, vector<8x512xf32>,
    %c0_122 = arith.constant 0 : index
    %c352 = arith.constant 352 : index
    %255 = vector.load %arg8[%c0_122, %c352] : memref<8x1280xf32, #tpu.memory_space<vmem>>, vector<8x512xf32>
    %c-2_i32_123 = arith.constant -2 : i32
    %256 = vector.broadcast %c-2_i32_123 : i32 to vector<1x512xi32>
    %257 = arith.addi %0, %256 : vector<1x512xi32>
    %c0_i32_124 = arith.constant 0 : i32
    %258 = vector.broadcast %c0_i32_124 : i32 to vector<1x512xi32>
    %259 = arith.addi %1, %258 : vector<1x512xi32>
    %c0_i32_125 = arith.constant 0 : i32
    %260 = vector.broadcast %c0_i32_125 : i32 to vector<1x512xi32>
    %261 = arith.cmpi sge, %257, %260 : vector<1x512xi32>
    %c14_i32_126 = arith.constant 14 : i32
    %262 = vector.broadcast %c14_i32_126 : i32 to vector<1x512xi32>
    %263 = arith.cmpi sle, %257, %262 : vector<1x512xi32>
    %264 = arith.andi %261, %263 : vector<1x512xi1>
    %c0_i32_127 = arith.constant 0 : i32
    %265 = vector.broadcast %c0_i32_127 : i32 to vector<1x512xi32>
    %266 = arith.cmpi sge, %259, %265 : vector<1x512xi32>
    %267 = arith.andi %264, %266 : vector<1x512xi1>
    %c14_i32_128 = arith.constant 14 : i32
    %268 = vector.broadcast %c14_i32_128 : i32 to vector<1x512xi32>
    %269 = arith.cmpi sle, %259, %268 : vector<1x512xi32>
    %270 = arith.andi %267, %269 : vector<1x512xi1>
    %cst_129 = arith.constant 0.000000e+00 : f32
    %271 = vector.shape_cast %270 : vector<1x512xi1> to vector<1x512xi1>
    %272 = vector.broadcast %271 : vector<1x512xi1> to vector<8x512xi1>
    %273 = vector.broadcast %cst_129 : f32 to vector<8x512xf32>
    %274 = arith.select %272, %255, %273 : vector<8x512xi1>, vector<8x512xf32>
    %c8_130 = arith.constant 8 : index
    %c0_131 = arith.constant 0 : index
    %275 = vector.load %arg9[%c8_130, %c0_131] : memref<72x512xf32, #tpu.memory_space<vmem>>, vector<8x512xf32>
    tpu.vector_store %arg9[%c8_130, %c0_131], %274 {strides = array<i32>} : memref<72x512xf32, #tpu.memory_space<vmem>>, vector<8x512xf32>,
    %c0_132 = arith.constant 0 : index
    %c354 = arith.constant 354 : index
    %276 = vector.load %arg8[%c0_132, %c354] : memref<8x1280xf32, #tpu.memory_space<vmem>>, vector<8x512xf32>
    %c-2_i32_133 = arith.constant -2 : i32
    %277 = vector.broadcast %c-2_i32_133 : i32 to vector<1x512xi32>
    %278 = arith.addi %0, %277 : vector<1x512xi32>
    %c2_i32 = arith.constant 2 : i32
    %279 = vector.broadcast %c2_i32 : i32 to vector<1x512xi32>
    %280 = arith.addi %1, %279 : vector<1x512xi32>
    %c0_i32_134 = arith.constant 0 : i32
    %281 = vector.broadcast %c0_i32_134 : i32 to vector<1x512xi32>
    %282 = arith.cmpi sge, %278, %281 : vector<1x512xi32>
    %c14_i32_135 = arith.constant 14 : i32
    %283 = vector.broadcast %c14_i32_135 : i32 to vector<1x512xi32>
    %284 = arith.cmpi sle, %278, %283 : vector<1x512xi32>
    %285 = arith.andi %282, %284 : vector<1x512xi1>
    %c0_i32_136 = arith.constant 0 : i32
    %286 = vector.broadcast %c0_i32_136 : i32 to vector<1x512xi32>
    %287 = arith.cmpi sge, %280, %286 : vector<1x512xi32>
    %288 = arith.andi %285, %287 : vector<1x512xi1>
    %c14_i32_137 = arith.constant 14 : i32
    %289 = vector.broadcast %c14_i32_137 : i32 to vector<1x512xi32>
    %290 = arith.cmpi sle, %280, %289 : vector<1x512xi32>
    %291 = arith.andi %288, %290 : vector<1x512xi1>
    %cst_138 = arith.constant 0.000000e+00 : f32
    %292 = vector.shape_cast %291 : vector<1x512xi1> to vector<1x512xi1>
    %293 = vector.broadcast %292 : vector<1x512xi1> to vector<8x512xi1>
    %294 = vector.broadcast %cst_138 : f32 to vector<8x512xf32>
    %295 = arith.select %293, %276, %294 : vector<8x512xi1>, vector<8x512xf32>
    %c16_139 = arith.constant 16 : index
    %c0_140 = arith.constant 0 : index
    %296 = vector.load %arg9[%c16_139, %c0_140] : memref<72x512xf32, #tpu.memory_space<vmem>>, vector<8x512xf32>
    tpu.vector_store %arg9[%c16_139, %c0_140], %295 {strides = array<i32>} : memref<72x512xf32, #tpu.memory_space<vmem>>, vector<8x512xf32>,
    %c0_141 = arith.constant 0 : index
    %c382 = arith.constant 382 : index
    %297 = vector.load %arg8[%c0_141, %c382] : memref<8x1280xf32, #tpu.memory_space<vmem>>, vector<8x512xf32>
    %c0_i32_142 = arith.constant 0 : i32
    %298 = vector.broadcast %c0_i32_142 : i32 to vector<1x512xi32>
    %299 = arith.addi %0, %298 : vector<1x512xi32>
    %c-2_i32_143 = arith.constant -2 : i32
    %300 = vector.broadcast %c-2_i32_143 : i32 to vector<1x512xi32>
    %301 = arith.addi %1, %300 : vector<1x512xi32>
    %c0_i32_144 = arith.constant 0 : i32
    %302 = vector.broadcast %c0_i32_144 : i32 to vector<1x512xi32>
    %303 = arith.cmpi sge, %299, %302 : vector<1x512xi32>
    %c14_i32_145 = arith.constant 14 : i32
    %304 = vector.broadcast %c14_i32_145 : i32 to vector<1x512xi32>
    %305 = arith.cmpi sle, %299, %304 : vector<1x512xi32>
    %306 = arith.andi %303, %305 : vector<1x512xi1>
    %c0_i32_146 = arith.constant 0 : i32
    %307 = vector.broadcast %c0_i32_146 : i32 to vector<1x512xi32>
    %308 = arith.cmpi sge, %301, %307 : vector<1x512xi32>
    %309 = arith.andi %306, %308 : vector<1x512xi1>
    %c14_i32_147 = arith.constant 14 : i32
    %310 = vector.broadcast %c14_i32_147 : i32 to vector<1x512xi32>
    %311 = arith.cmpi sle, %301, %310 : vector<1x512xi32>
    %312 = arith.andi %309, %311 : vector<1x512xi1>
    %cst_148 = arith.constant 0.000000e+00 : f32
    %313 = vector.shape_cast %312 : vector<1x512xi1> to vector<1x512xi1>
    %314 = vector.broadcast %313 : vector<1x512xi1> to vector<8x512xi1>
    %315 = vector.broadcast %cst_148 : f32 to vector<8x512xf32>
    %316 = arith.select %314, %297, %315 : vector<8x512xi1>, vector<8x512xf32>
    %c24_149 = arith.constant 24 : index
    %c0_150 = arith.constant 0 : index
    %317 = vector.load %arg9[%c24_149, %c0_150] : memref<72x512xf32, #tpu.memory_space<vmem>>, vector<8x512xf32>
    tpu.vector_store %arg9[%c24_149, %c0_150], %316 {strides = array<i32>} : memref<72x512xf32, #tpu.memory_space<vmem>>, vector<8x512xf32>,
    %c0_151 = arith.constant 0 : index
    %c384_152 = arith.constant 384 : index
    %318 = vector.load %arg8[%c0_151, %c384_152] : memref<8x1280xf32, #tpu.memory_space<vmem>>, vector<8x512xf32>
    %c0_i32_153 = arith.constant 0 : i32
    %319 = vector.broadcast %c0_i32_153 : i32 to vector<1x512xi32>
    %320 = arith.addi %0, %319 : vector<1x512xi32>
    %c0_i32_154 = arith.constant 0 : i32
    %321 = vector.broadcast %c0_i32_154 : i32 to vector<1x512xi32>
    %322 = arith.addi %1, %321 : vector<1x512xi32>
    %c0_i32_155 = arith.constant 0 : i32
    %323 = vector.broadcast %c0_i32_155 : i32 to vector<1x512xi32>
    %324 = arith.cmpi sge, %320, %323 : vector<1x512xi32>
    %c14_i32_156 = arith.constant 14 : i32
    %325 = vector.broadcast %c14_i32_156 : i32 to vector<1x512xi32>
    %326 = arith.cmpi sle, %320, %325 : vector<1x512xi32>
    %327 = arith.andi %324, %326 : vector<1x512xi1>
    %c0_i32_157 = arith.constant 0 : i32
    %328 = vector.broadcast %c0_i32_157 : i32 to vector<1x512xi32>
    %329 = arith.cmpi sge, %322, %328 : vector<1x512xi32>
    %330 = arith.andi %327, %329 : vector<1x512xi1>
    %c14_i32_158 = arith.constant 14 : i32
    %331 = vector.broadcast %c14_i32_158 : i32 to vector<1x512xi32>
    %332 = arith.cmpi sle, %322, %331 : vector<1x512xi32>
    %333 = arith.andi %330, %332 : vector<1x512xi1>
    %cst_159 = arith.constant 0.000000e+00 : f32
    %334 = vector.shape_cast %333 : vector<1x512xi1> to vector<1x512xi1>
    %335 = vector.broadcast %334 : vector<1x512xi1> to vector<8x512xi1>
    %336 = vector.broadcast %cst_159 : f32 to vector<8x512xf32>
    %337 = arith.select %335, %318, %336 : vector<8x512xi1>, vector<8x512xf32>
    %c32_160 = arith.constant 32 : index
    %c0_161 = arith.constant 0 : index
    %338 = vector.load %arg9[%c32_160, %c0_161] : memref<72x512xf32, #tpu.memory_space<vmem>>, vector<8x512xf32>
    tpu.vector_store %arg9[%c32_160, %c0_161], %337 {strides = array<i32>} : memref<72x512xf32, #tpu.memory_space<vmem>>, vector<8x512xf32>,
    %c0_162 = arith.constant 0 : index
    %c386 = arith.constant 386 : index
    %339 = vector.load %arg8[%c0_162, %c386] : memref<8x1280xf32, #tpu.memory_space<vmem>>, vector<8x512xf32>
    %c0_i32_163 = arith.constant 0 : i32
    %340 = vector.broadcast %c0_i32_163 : i32 to vector<1x512xi32>
    %341 = arith.addi %0, %340 : vector<1x512xi32>
    %c2_i32_164 = arith.constant 2 : i32
    %342 = vector.broadcast %c2_i32_164 : i32 to vector<1x512xi32>
    %343 = arith.addi %1, %342 : vector<1x512xi32>
    %c0_i32_165 = arith.constant 0 : i32
    %344 = vector.broadcast %c0_i32_165 : i32 to vector<1x512xi32>
    %345 = arith.cmpi sge, %341, %344 : vector<1x512xi32>
    %c14_i32_166 = arith.constant 14 : i32
    %346 = vector.broadcast %c14_i32_166 : i32 to vector<1x512xi32>
    %347 = arith.cmpi sle, %341, %346 : vector<1x512xi32>
    %348 = arith.andi %345, %347 : vector<1x512xi1>
    %c0_i32_167 = arith.constant 0 : i32
    %349 = vector.broadcast %c0_i32_167 : i32 to vector<1x512xi32>
    %350 = arith.cmpi sge, %343, %349 : vector<1x512xi32>
    %351 = arith.andi %348, %350 : vector<1x512xi1>
    %c14_i32_168 = arith.constant 14 : i32
    %352 = vector.broadcast %c14_i32_168 : i32 to vector<1x512xi32>
    %353 = arith.cmpi sle, %343, %352 : vector<1x512xi32>
    %354 = arith.andi %351, %353 : vector<1x512xi1>
    %cst_169 = arith.constant 0.000000e+00 : f32
    %355 = vector.shape_cast %354 : vector<1x512xi1> to vector<1x512xi1>
    %356 = vector.broadcast %355 : vector<1x512xi1> to vector<8x512xi1>
    %357 = vector.broadcast %cst_169 : f32 to vector<8x512xf32>
    %358 = arith.select %356, %339, %357 : vector<8x512xi1>, vector<8x512xf32>
    %c40_170 = arith.constant 40 : index
    %c0_171 = arith.constant 0 : index
    %359 = vector.load %arg9[%c40_170, %c0_171] : memref<72x512xf32, #tpu.memory_space<vmem>>, vector<8x512xf32>
    tpu.vector_store %arg9[%c40_170, %c0_171], %358 {strides = array<i32>} : memref<72x512xf32, #tpu.memory_space<vmem>>, vector<8x512xf32>,
    %c0_172 = arith.constant 0 : index
    %c414 = arith.constant 414 : index
    %360 = vector.load %arg8[%c0_172, %c414] : memref<8x1280xf32, #tpu.memory_space<vmem>>, vector<8x512xf32>
    %c2_i32_173 = arith.constant 2 : i32
    %361 = vector.broadcast %c2_i32_173 : i32 to vector<1x512xi32>
    %362 = arith.addi %0, %361 : vector<1x512xi32>
    %c-2_i32_174 = arith.constant -2 : i32
    %363 = vector.broadcast %c-2_i32_174 : i32 to vector<1x512xi32>
    %364 = arith.addi %1, %363 : vector<1x512xi32>
    %c0_i32_175 = arith.constant 0 : i32
    %365 = vector.broadcast %c0_i32_175 : i32 to vector<1x512xi32>
    %366 = arith.cmpi sge, %362, %365 : vector<1x512xi32>
    %c14_i32_176 = arith.constant 14 : i32
    %367 = vector.broadcast %c14_i32_176 : i32 to vector<1x512xi32>
    %368 = arith.cmpi sle, %362, %367 : vector<1x512xi32>
    %369 = arith.andi %366, %368 : vector<1x512xi1>
    %c0_i32_177 = arith.constant 0 : i32
    %370 = vector.broadcast %c0_i32_177 : i32 to vector<1x512xi32>
    %371 = arith.cmpi sge, %364, %370 : vector<1x512xi32>
    %372 = arith.andi %369, %371 : vector<1x512xi1>
    %c14_i32_178 = arith.constant 14 : i32
    %373 = vector.broadcast %c14_i32_178 : i32 to vector<1x512xi32>
    %374 = arith.cmpi sle, %364, %373 : vector<1x512xi32>
    %375 = arith.andi %372, %374 : vector<1x512xi1>
    %cst_179 = arith.constant 0.000000e+00 : f32
    %376 = vector.shape_cast %375 : vector<1x512xi1> to vector<1x512xi1>
    %377 = vector.broadcast %376 : vector<1x512xi1> to vector<8x512xi1>
    %378 = vector.broadcast %cst_179 : f32 to vector<8x512xf32>
    %379 = arith.select %377, %360, %378 : vector<8x512xi1>, vector<8x512xf32>
    %c48_180 = arith.constant 48 : index
    %c0_181 = arith.constant 0 : index
    %380 = vector.load %arg9[%c48_180, %c0_181] : memref<72x512xf32, #tpu.memory_space<vmem>>, vector<8x512xf32>
    tpu.vector_store %arg9[%c48_180, %c0_181], %379 {strides = array<i32>} : memref<72x512xf32, #tpu.memory_space<vmem>>, vector<8x512xf32>,
    %c0_182 = arith.constant 0 : index
    %c416 = arith.constant 416 : index
    %381 = vector.load %arg8[%c0_182, %c416] : memref<8x1280xf32, #tpu.memory_space<vmem>>, vector<8x512xf32>
    %c2_i32_183 = arith.constant 2 : i32
    %382 = vector.broadcast %c2_i32_183 : i32 to vector<1x512xi32>
    %383 = arith.addi %0, %382 : vector<1x512xi32>
    %c0_i32_184 = arith.constant 0 : i32
    %384 = vector.broadcast %c0_i32_184 : i32 to vector<1x512xi32>
    %385 = arith.addi %1, %384 : vector<1x512xi32>
    %c0_i32_185 = arith.constant 0 : i32
    %386 = vector.broadcast %c0_i32_185 : i32 to vector<1x512xi32>
    %387 = arith.cmpi sge, %383, %386 : vector<1x512xi32>
    %c14_i32_186 = arith.constant 14 : i32
    %388 = vector.broadcast %c14_i32_186 : i32 to vector<1x512xi32>
    %389 = arith.cmpi sle, %383, %388 : vector<1x512xi32>
    %390 = arith.andi %387, %389 : vector<1x512xi1>
    %c0_i32_187 = arith.constant 0 : i32
    %391 = vector.broadcast %c0_i32_187 : i32 to vector<1x512xi32>
    %392 = arith.cmpi sge, %385, %391 : vector<1x512xi32>
    %393 = arith.andi %390, %392 : vector<1x512xi1>
    %c14_i32_188 = arith.constant 14 : i32
    %394 = vector.broadcast %c14_i32_188 : i32 to vector<1x512xi32>
    %395 = arith.cmpi sle, %385, %394 : vector<1x512xi32>
    %396 = arith.andi %393, %395 : vector<1x512xi1>
    %cst_189 = arith.constant 0.000000e+00 : f32
    %397 = vector.shape_cast %396 : vector<1x512xi1> to vector<1x512xi1>
    %398 = vector.broadcast %397 : vector<1x512xi1> to vector<8x512xi1>
    %399 = vector.broadcast %cst_189 : f32 to vector<8x512xf32>
    %400 = arith.select %398, %381, %399 : vector<8x512xi1>, vector<8x512xf32>
    %c56_190 = arith.constant 56 : index
    %c0_191 = arith.constant 0 : index
    %401 = vector.load %arg9[%c56_190, %c0_191] : memref<72x512xf32, #tpu.memory_space<vmem>>, vector<8x512xf32>
    tpu.vector_store %arg9[%c56_190, %c0_191], %400 {strides = array<i32>} : memref<72x512xf32, #tpu.memory_space<vmem>>, vector<8x512xf32>,
    %c0_192 = arith.constant 0 : index
    %c418 = arith.constant 418 : index
    %402 = vector.load %arg8[%c0_192, %c418] : memref<8x1280xf32, #tpu.memory_space<vmem>>, vector<8x512xf32>
    %c2_i32_193 = arith.constant 2 : i32
    %403 = vector.broadcast %c2_i32_193 : i32 to vector<1x512xi32>
    %404 = arith.addi %0, %403 : vector<1x512xi32>
    %c2_i32_194 = arith.constant 2 : i32
    %405 = vector.broadcast %c2_i32_194 : i32 to vector<1x512xi32>
    %406 = arith.addi %1, %405 : vector<1x512xi32>
    %c0_i32_195 = arith.constant 0 : i32
    %407 = vector.broadcast %c0_i32_195 : i32 to vector<1x512xi32>
    %408 = arith.cmpi sge, %404, %407 : vector<1x512xi32>
    %c14_i32_196 = arith.constant 14 : i32
    %409 = vector.broadcast %c14_i32_196 : i32 to vector<1x512xi32>
    %410 = arith.cmpi sle, %404, %409 : vector<1x512xi32>
    %411 = arith.andi %408, %410 : vector<1x512xi1>
    %c0_i32_197 = arith.constant 0 : i32
    %412 = vector.broadcast %c0_i32_197 : i32 to vector<1x512xi32>
    %413 = arith.cmpi sge, %406, %412 : vector<1x512xi32>
    %414 = arith.andi %411, %413 : vector<1x512xi1>
    %c14_i32_198 = arith.constant 14 : i32
    %415 = vector.broadcast %c14_i32_198 : i32 to vector<1x512xi32>
    %416 = arith.cmpi sle, %406, %415 : vector<1x512xi32>
    %417 = arith.andi %414, %416 : vector<1x512xi1>
    %cst_199 = arith.constant 0.000000e+00 : f32
    %418 = vector.shape_cast %417 : vector<1x512xi1> to vector<1x512xi1>
    %419 = vector.broadcast %418 : vector<1x512xi1> to vector<8x512xi1>
    %420 = vector.broadcast %cst_199 : f32 to vector<8x512xf32>
    %421 = arith.select %419, %402, %420 : vector<8x512xi1>, vector<8x512xf32>
    %c64_200 = arith.constant 64 : index
    %c0_201 = arith.constant 0 : index
    %422 = vector.load %arg9[%c64_200, %c0_201] : memref<72x512xf32, #tpu.memory_space<vmem>>, vector<8x512xf32>
    tpu.vector_store %arg9[%c64_200, %c0_201], %421 {strides = array<i32>} : memref<72x512xf32, #tpu.memory_space<vmem>>, vector<8x512xf32>,
    %c1 = arith.constant 1 : index
    %c0_202 = arith.constant 0 : index
    %c0_203 = arith.constant 0 : index
    %423 = vector.load %arg1[%c1, %c0_202, %c0_203] : memref<8x8x72xf32, #tpu.memory_space<vmem>>, vector<1x8x72xf32>
    %424 = vector.shape_cast %423 : vector<1x8x72xf32> to vector<8x72xf32>
    %c0_204 = arith.constant 0 : index
    %c0_205 = arith.constant 0 : index
    %425 = vector.load %arg9[%c0_204, %c0_205] : memref<72x512xf32, #tpu.memory_space<vmem>>, vector<72x512xf32>
    %cst_206 = arith.constant dense<0.000000e+00> : vector<8x512xf32>
    %426 = tpu.matmul %424, %425, %cst_206 {dimension_numbers = #tpu.dot_dimension_numbers<[1], [0], [0], [1], [0, 0, 1, 1], [], []>} : vector<8x72xf32>, vector<72x512xf32>, vector<8x512xf32> -> vector<8x512xf32>
    %c1_207 = arith.constant 1 : index
    %c0_208 = arith.constant 0 : index
    %c0_209 = arith.constant 0 : index
    %427 = vector.load %arg2[%c1_207, %c0_208, %c0_209] : memref<8x8x1xf32, #tpu.memory_space<vmem>>, vector<1x8x1xf32>
    %428 = vector.shape_cast %427 : vector<1x8x1xf32> to vector<8x1xf32>
    %429 = vector.broadcast %428 : vector<8x1xf32> to vector<8x512xf32>
    %430 = arith.addf %426, %429 : vector<8x512xf32>
    %cst_210 = arith.constant 0.000000e+00 : f32
    %431 = vector.broadcast %cst_210 : f32 to vector<8x512xf32>
    %432 = arith.maximumf %430, %431 : vector<8x512xf32>
    %c1_211 = arith.constant 1 : index
    %c0_212 = arith.constant 0 : index
    %c0_213 = arith.constant 0 : index
    %433 = vector.load %arg3[%c1_211, %c0_212, %c0_213] : memref<8x8x1xf32, #tpu.memory_space<vmem>>, vector<1x8x1xf32>
    %434 = vector.shape_cast %433 : vector<1x8x1xf32> to vector<8x1xf32>
    %435 = vector.broadcast %434 : vector<8x1xf32> to vector<8x512xf32>
    %436 = arith.mulf %432, %435 : vector<8x512xf32>
    %c1_214 = arith.constant 1 : index
    %c0_215 = arith.constant 0 : index
    %c0_216 = arith.constant 0 : index
    %437 = vector.load %arg4[%c1_214, %c0_215, %c0_216] : memref<8x8x1xf32, #tpu.memory_space<vmem>>, vector<1x8x1xf32>
    %438 = vector.shape_cast %437 : vector<1x8x1xf32> to vector<8x1xf32>
    %439 = vector.broadcast %438 : vector<8x1xf32> to vector<8x512xf32>
    %440 = arith.addf %436, %439 : vector<8x512xf32>
    %c1_i32_217 = arith.constant 1 : i32
    %441 = vector.broadcast %c1_i32_217 : i32 to vector<1x512xi32>
    %442 = arith.andi %0, %441 : vector<1x512xi32>
    %c0_i32_218 = arith.constant 0 : i32
    %443 = vector.broadcast %c0_i32_218 : i32 to vector<1x512xi32>
    %444 = arith.cmpi eq, %442, %443 : vector<1x512xi32>
    %c14_i32_219 = arith.constant 14 : i32
    %445 = vector.broadcast %c14_i32_219 : i32 to vector<1x512xi32>
    %446 = arith.cmpi sle, %0, %445 : vector<1x512xi32>
    %447 = arith.andi %444, %446 : vector<1x512xi1>
    %c1_i32_220 = arith.constant 1 : i32
    %448 = vector.broadcast %c1_i32_220 : i32 to vector<1x512xi32>
    %449 = arith.andi %1, %448 : vector<1x512xi32>
    %c0_i32_221 = arith.constant 0 : i32
    %450 = vector.broadcast %c0_i32_221 : i32 to vector<1x512xi32>
    %451 = arith.cmpi eq, %449, %450 : vector<1x512xi32>
    %452 = arith.andi %447, %451 : vector<1x512xi1>
    %c14_i32_222 = arith.constant 14 : i32
    %453 = vector.broadcast %c14_i32_222 : i32 to vector<1x512xi32>
    %454 = arith.cmpi sle, %1, %453 : vector<1x512xi32>
    %455 = arith.andi %452, %454 : vector<1x512xi1>
    %cst_223 = arith.constant 0.000000e+00 : f32
    %456 = vector.shape_cast %455 : vector<1x512xi1> to vector<1x512xi1>
    %457 = vector.broadcast %456 : vector<1x512xi1> to vector<8x512xi1>
    %458 = vector.broadcast %cst_223 : f32 to vector<8x512xf32>
    %459 = arith.select %457, %440, %458 : vector<8x512xi1>, vector<8x512xf32>
    %460 = arith.addf %459, %233 : vector<8x512xf32>
    %c0_224 = arith.constant 0 : index
    %c384_225 = arith.constant 384 : index
    %461 = vector.load %arg8[%c0_224, %c384_225] : memref<8x1280xf32, #tpu.memory_space<vmem>>, vector<8x512xf32>
    tpu.vector_store %arg8[%c0_224, %c384_225], %460 {strides = array<i32>} : memref<8x1280xf32, #tpu.memory_space<vmem>>, vector<8x512xf32>,
    %c0_226 = arith.constant 0 : index
    %c350_227 = arith.constant 350 : index
    %462 = vector.load %arg8[%c0_226, %c350_227] : memref<8x1280xf32, #tpu.memory_space<vmem>>, vector<8x512xf32>
    %c-2_i32_228 = arith.constant -2 : i32
    %463 = vector.broadcast %c-2_i32_228 : i32 to vector<1x512xi32>
    %464 = arith.addi %0, %463 : vector<1x512xi32>
    %c-2_i32_229 = arith.constant -2 : i32
    %465 = vector.broadcast %c-2_i32_229 : i32 to vector<1x512xi32>
    %466 = arith.addi %1, %465 : vector<1x512xi32>
    %c0_i32_230 = arith.constant 0 : i32
    %467 = vector.broadcast %c0_i32_230 : i32 to vector<1x512xi32>
    %468 = arith.cmpi sge, %464, %467 : vector<1x512xi32>
    %c14_i32_231 = arith.constant 14 : i32
    %469 = vector.broadcast %c14_i32_231 : i32 to vector<1x512xi32>
    %470 = arith.cmpi sle, %464, %469 : vector<1x512xi32>
    %471 = arith.andi %468, %470 : vector<1x512xi1>
    %c0_i32_232 = arith.constant 0 : i32
    %472 = vector.broadcast %c0_i32_232 : i32 to vector<1x512xi32>
    %473 = arith.cmpi sge, %466, %472 : vector<1x512xi32>
    %474 = arith.andi %471, %473 : vector<1x512xi1>
    %c14_i32_233 = arith.constant 14 : i32
    %475 = vector.broadcast %c14_i32_233 : i32 to vector<1x512xi32>
    %476 = arith.cmpi sle, %466, %475 : vector<1x512xi32>
    %477 = arith.andi %474, %476 : vector<1x512xi1>
    %cst_234 = arith.constant 0.000000e+00 : f32
    %478 = vector.shape_cast %477 : vector<1x512xi1> to vector<1x512xi1>
    %479 = vector.broadcast %478 : vector<1x512xi1> to vector<8x512xi1>
    %480 = vector.broadcast %cst_234 : f32 to vector<8x512xf32>
    %481 = arith.select %479, %462, %480 : vector<8x512xi1>, vector<8x512xf32>
    %c0_235 = arith.constant 0 : index
    %c0_236 = arith.constant 0 : index
    %482 = vector.load %arg9[%c0_235, %c0_236] : memref<72x512xf32, #tpu.memory_space<vmem>>, vector<8x512xf32>
    tpu.vector_store %arg9[%c0_235, %c0_236], %481 {strides = array<i32>} : memref<72x512xf32, #tpu.memory_space<vmem>>, vector<8x512xf32>,
    %c0_237 = arith.constant 0 : index
    %c352_238 = arith.constant 352 : index
    %483 = vector.load %arg8[%c0_237, %c352_238] : memref<8x1280xf32, #tpu.memory_space<vmem>>, vector<8x512xf32>
    %c-2_i32_239 = arith.constant -2 : i32
    %484 = vector.broadcast %c-2_i32_239 : i32 to vector<1x512xi32>
    %485 = arith.addi %0, %484 : vector<1x512xi32>
    %c0_i32_240 = arith.constant 0 : i32
    %486 = vector.broadcast %c0_i32_240 : i32 to vector<1x512xi32>
    %487 = arith.addi %1, %486 : vector<1x512xi32>
    %c0_i32_241 = arith.constant 0 : i32
    %488 = vector.broadcast %c0_i32_241 : i32 to vector<1x512xi32>
    %489 = arith.cmpi sge, %485, %488 : vector<1x512xi32>
    %c14_i32_242 = arith.constant 14 : i32
    %490 = vector.broadcast %c14_i32_242 : i32 to vector<1x512xi32>
    %491 = arith.cmpi sle, %485, %490 : vector<1x512xi32>
    %492 = arith.andi %489, %491 : vector<1x512xi1>
    %c0_i32_243 = arith.constant 0 : i32
    %493 = vector.broadcast %c0_i32_243 : i32 to vector<1x512xi32>
    %494 = arith.cmpi sge, %487, %493 : vector<1x512xi32>
    %495 = arith.andi %492, %494 : vector<1x512xi1>
    %c14_i32_244 = arith.constant 14 : i32
    %496 = vector.broadcast %c14_i32_244 : i32 to vector<1x512xi32>
    %497 = arith.cmpi sle, %487, %496 : vector<1x512xi32>
    %498 = arith.andi %495, %497 : vector<1x512xi1>
    %cst_245 = arith.constant 0.000000e+00 : f32
    %499 = vector.shape_cast %498 : vector<1x512xi1> to vector<1x512xi1>
    %500 = vector.broadcast %499 : vector<1x512xi1> to vector<8x512xi1>
    %501 = vector.broadcast %cst_245 : f32 to vector<8x512xf32>
    %502 = arith.select %500, %483, %501 : vector<8x512xi1>, vector<8x512xf32>
    %c8_246 = arith.constant 8 : index
    %c0_247 = arith.constant 0 : index
    %503 = vector.load %arg9[%c8_246, %c0_247] : memref<72x512xf32, #tpu.memory_space<vmem>>, vector<8x512xf32>
    tpu.vector_store %arg9[%c8_246, %c0_247], %502 {strides = array<i32>} : memref<72x512xf32, #tpu.memory_space<vmem>>, vector<8x512xf32>,
    %c0_248 = arith.constant 0 : index
    %c354_249 = arith.constant 354 : index
    %504 = vector.load %arg8[%c0_248, %c354_249] : memref<8x1280xf32, #tpu.memory_space<vmem>>, vector<8x512xf32>
    %c-2_i32_250 = arith.constant -2 : i32
    %505 = vector.broadcast %c-2_i32_250 : i32 to vector<1x512xi32>
    %506 = arith.addi %0, %505 : vector<1x512xi32>
    %c2_i32_251 = arith.constant 2 : i32
    %507 = vector.broadcast %c2_i32_251 : i32 to vector<1x512xi32>
    %508 = arith.addi %1, %507 : vector<1x512xi32>
    %c0_i32_252 = arith.constant 0 : i32
    %509 = vector.broadcast %c0_i32_252 : i32 to vector<1x512xi32>
    %510 = arith.cmpi sge, %506, %509 : vector<1x512xi32>
    %c14_i32_253 = arith.constant 14 : i32
    %511 = vector.broadcast %c14_i32_253 : i32 to vector<1x512xi32>
    %512 = arith.cmpi sle, %506, %511 : vector<1x512xi32>
    %513 = arith.andi %510, %512 : vector<1x512xi1>
    %c0_i32_254 = arith.constant 0 : i32
    %514 = vector.broadcast %c0_i32_254 : i32 to vector<1x512xi32>
    %515 = arith.cmpi sge, %508, %514 : vector<1x512xi32>
    %516 = arith.andi %513, %515 : vector<1x512xi1>
    %c14_i32_255 = arith.constant 14 : i32
    %517 = vector.broadcast %c14_i32_255 : i32 to vector<1x512xi32>
    %518 = arith.cmpi sle, %508, %517 : vector<1x512xi32>
    %519 = arith.andi %516, %518 : vector<1x512xi1>
    %cst_256 = arith.constant 0.000000e+00 : f32
    %520 = vector.shape_cast %519 : vector<1x512xi1> to vector<1x512xi1>
    %521 = vector.broadcast %520 : vector<1x512xi1> to vector<8x512xi1>
    %522 = vector.broadcast %cst_256 : f32 to vector<8x512xf32>
    %523 = arith.select %521, %504, %522 : vector<8x512xi1>, vector<8x512xf32>
    %c16_257 = arith.constant 16 : index
    %c0_258 = arith.constant 0 : index
    %524 = vector.load %arg9[%c16_257, %c0_258] : memref<72x512xf32, #tpu.memory_space<vmem>>, vector<8x512xf32>
    tpu.vector_store %arg9[%c16_257, %c0_258], %523 {strides = array<i32>} : memref<72x512xf32, #tpu.memory_space<vmem>>, vector<8x512xf32>,
    %c0_259 = arith.constant 0 : index
    %c382_260 = arith.constant 382 : index
    %525 = vector.load %arg8[%c0_259, %c382_260] : memref<8x1280xf32, #tpu.memory_space<vmem>>, vector<8x512xf32>
    %c0_i32_261 = arith.constant 0 : i32
    %526 = vector.broadcast %c0_i32_261 : i32 to vector<1x512xi32>
    %527 = arith.addi %0, %526 : vector<1x512xi32>
    %c-2_i32_262 = arith.constant -2 : i32
    %528 = vector.broadcast %c-2_i32_262 : i32 to vector<1x512xi32>
    %529 = arith.addi %1, %528 : vector<1x512xi32>
    %c0_i32_263 = arith.constant 0 : i32
    %530 = vector.broadcast %c0_i32_263 : i32 to vector<1x512xi32>
    %531 = arith.cmpi sge, %527, %530 : vector<1x512xi32>
    %c14_i32_264 = arith.constant 14 : i32
    %532 = vector.broadcast %c14_i32_264 : i32 to vector<1x512xi32>
    %533 = arith.cmpi sle, %527, %532 : vector<1x512xi32>
    %534 = arith.andi %531, %533 : vector<1x512xi1>
    %c0_i32_265 = arith.constant 0 : i32
    %535 = vector.broadcast %c0_i32_265 : i32 to vector<1x512xi32>
    %536 = arith.cmpi sge, %529, %535 : vector<1x512xi32>
    %537 = arith.andi %534, %536 : vector<1x512xi1>
    %c14_i32_266 = arith.constant 14 : i32
    %538 = vector.broadcast %c14_i32_266 : i32 to vector<1x512xi32>
    %539 = arith.cmpi sle, %529, %538 : vector<1x512xi32>
    %540 = arith.andi %537, %539 : vector<1x512xi1>
    %cst_267 = arith.constant 0.000000e+00 : f32
    %541 = vector.shape_cast %540 : vector<1x512xi1> to vector<1x512xi1>
    %542 = vector.broadcast %541 : vector<1x512xi1> to vector<8x512xi1>
    %543 = vector.broadcast %cst_267 : f32 to vector<8x512xf32>
    %544 = arith.select %542, %525, %543 : vector<8x512xi1>, vector<8x512xf32>
    %c24_268 = arith.constant 24 : index
    %c0_269 = arith.constant 0 : index
    %545 = vector.load %arg9[%c24_268, %c0_269] : memref<72x512xf32, #tpu.memory_space<vmem>>, vector<8x512xf32>
    tpu.vector_store %arg9[%c24_268, %c0_269], %544 {strides = array<i32>} : memref<72x512xf32, #tpu.memory_space<vmem>>, vector<8x512xf32>,
    %c0_270 = arith.constant 0 : index
    %c384_271 = arith.constant 384 : index
    %546 = vector.load %arg8[%c0_270, %c384_271] : memref<8x1280xf32, #tpu.memory_space<vmem>>, vector<8x512xf32>
    %c0_i32_272 = arith.constant 0 : i32
    %547 = vector.broadcast %c0_i32_272 : i32 to vector<1x512xi32>
    %548 = arith.addi %0, %547 : vector<1x512xi32>
    %c0_i32_273 = arith.constant 0 : i32
    %549 = vector.broadcast %c0_i32_273 : i32 to vector<1x512xi32>
    %550 = arith.addi %1, %549 : vector<1x512xi32>
    %c0_i32_274 = arith.constant 0 : i32
    %551 = vector.broadcast %c0_i32_274 : i32 to vector<1x512xi32>
    %552 = arith.cmpi sge, %548, %551 : vector<1x512xi32>
    %c14_i32_275 = arith.constant 14 : i32
    %553 = vector.broadcast %c14_i32_275 : i32 to vector<1x512xi32>
    %554 = arith.cmpi sle, %548, %553 : vector<1x512xi32>
    %555 = arith.andi %552, %554 : vector<1x512xi1>
    %c0_i32_276 = arith.constant 0 : i32
    %556 = vector.broadcast %c0_i32_276 : i32 to vector<1x512xi32>
    %557 = arith.cmpi sge, %550, %556 : vector<1x512xi32>
    %558 = arith.andi %555, %557 : vector<1x512xi1>
    %c14_i32_277 = arith.constant 14 : i32
    %559 = vector.broadcast %c14_i32_277 : i32 to vector<1x512xi32>
    %560 = arith.cmpi sle, %550, %559 : vector<1x512xi32>
    %561 = arith.andi %558, %560 : vector<1x512xi1>
    %cst_278 = arith.constant 0.000000e+00 : f32
    %562 = vector.shape_cast %561 : vector<1x512xi1> to vector<1x512xi1>
    %563 = vector.broadcast %562 : vector<1x512xi1> to vector<8x512xi1>
    %564 = vector.broadcast %cst_278 : f32 to vector<8x512xf32>
    %565 = arith.select %563, %546, %564 : vector<8x512xi1>, vector<8x512xf32>
    %c32_279 = arith.constant 32 : index
    %c0_280 = arith.constant 0 : index
    %566 = vector.load %arg9[%c32_279, %c0_280] : memref<72x512xf32, #tpu.memory_space<vmem>>, vector<8x512xf32>
    tpu.vector_store %arg9[%c32_279, %c0_280], %565 {strides = array<i32>} : memref<72x512xf32, #tpu.memory_space<vmem>>, vector<8x512xf32>,
    %c0_281 = arith.constant 0 : index
    %c386_282 = arith.constant 386 : index
    %567 = vector.load %arg8[%c0_281, %c386_282] : memref<8x1280xf32, #tpu.memory_space<vmem>>, vector<8x512xf32>
    %c0_i32_283 = arith.constant 0 : i32
    %568 = vector.broadcast %c0_i32_283 : i32 to vector<1x512xi32>
    %569 = arith.addi %0, %568 : vector<1x512xi32>
    %c2_i32_284 = arith.constant 2 : i32
    %570 = vector.broadcast %c2_i32_284 : i32 to vector<1x512xi32>
    %571 = arith.addi %1, %570 : vector<1x512xi32>
    %c0_i32_285 = arith.constant 0 : i32
    %572 = vector.broadcast %c0_i32_285 : i32 to vector<1x512xi32>
    %573 = arith.cmpi sge, %569, %572 : vector<1x512xi32>
    %c14_i32_286 = arith.constant 14 : i32
    %574 = vector.broadcast %c14_i32_286 : i32 to vector<1x512xi32>
    %575 = arith.cmpi sle, %569, %574 : vector<1x512xi32>
    %576 = arith.andi %573, %575 : vector<1x512xi1>
    %c0_i32_287 = arith.constant 0 : i32
    %577 = vector.broadcast %c0_i32_287 : i32 to vector<1x512xi32>
    %578 = arith.cmpi sge, %571, %577 : vector<1x512xi32>
    %579 = arith.andi %576, %578 : vector<1x512xi1>
    %c14_i32_288 = arith.constant 14 : i32
    %580 = vector.broadcast %c14_i32_288 : i32 to vector<1x512xi32>
    %581 = arith.cmpi sle, %571, %580 : vector<1x512xi32>
    %582 = arith.andi %579, %581 : vector<1x512xi1>
    %cst_289 = arith.constant 0.000000e+00 : f32
    %583 = vector.shape_cast %582 : vector<1x512xi1> to vector<1x512xi1>
    %584 = vector.broadcast %583 : vector<1x512xi1> to vector<8x512xi1>
    %585 = vector.broadcast %cst_289 : f32 to vector<8x512xf32>
    %586 = arith.select %584, %567, %585 : vector<8x512xi1>, vector<8x512xf32>
    %c40_290 = arith.constant 40 : index
    %c0_291 = arith.constant 0 : index
    %587 = vector.load %arg9[%c40_290, %c0_291] : memref<72x512xf32, #tpu.memory_space<vmem>>, vector<8x512xf32>
    tpu.vector_store %arg9[%c40_290, %c0_291], %586 {strides = array<i32>} : memref<72x512xf32, #tpu.memory_space<vmem>>, vector<8x512xf32>,
    %c0_292 = arith.constant 0 : index
    %c414_293 = arith.constant 414 : index
    %588 = vector.load %arg8[%c0_292, %c414_293] : memref<8x1280xf32, #tpu.memory_space<vmem>>, vector<8x512xf32>
    %c2_i32_294 = arith.constant 2 : i32
    %589 = vector.broadcast %c2_i32_294 : i32 to vector<1x512xi32>
    %590 = arith.addi %0, %589 : vector<1x512xi32>
    %c-2_i32_295 = arith.constant -2 : i32
    %591 = vector.broadcast %c-2_i32_295 : i32 to vector<1x512xi32>
    %592 = arith.addi %1, %591 : vector<1x512xi32>
    %c0_i32_296 = arith.constant 0 : i32
    %593 = vector.broadcast %c0_i32_296 : i32 to vector<1x512xi32>
    %594 = arith.cmpi sge, %590, %593 : vector<1x512xi32>
    %c14_i32_297 = arith.constant 14 : i32
    %595 = vector.broadcast %c14_i32_297 : i32 to vector<1x512xi32>
    %596 = arith.cmpi sle, %590, %595 : vector<1x512xi32>
    %597 = arith.andi %594, %596 : vector<1x512xi1>
    %c0_i32_298 = arith.constant 0 : i32
    %598 = vector.broadcast %c0_i32_298 : i32 to vector<1x512xi32>
    %599 = arith.cmpi sge, %592, %598 : vector<1x512xi32>
    %600 = arith.andi %597, %599 : vector<1x512xi1>
    %c14_i32_299 = arith.constant 14 : i32
    %601 = vector.broadcast %c14_i32_299 : i32 to vector<1x512xi32>
    %602 = arith.cmpi sle, %592, %601 : vector<1x512xi32>
    %603 = arith.andi %600, %602 : vector<1x512xi1>
    %cst_300 = arith.constant 0.000000e+00 : f32
    %604 = vector.shape_cast %603 : vector<1x512xi1> to vector<1x512xi1>
    %605 = vector.broadcast %604 : vector<1x512xi1> to vector<8x512xi1>
    %606 = vector.broadcast %cst_300 : f32 to vector<8x512xf32>
    %607 = arith.select %605, %588, %606 : vector<8x512xi1>, vector<8x512xf32>
    %c48_301 = arith.constant 48 : index
    %c0_302 = arith.constant 0 : index
    %608 = vector.load %arg9[%c48_301, %c0_302] : memref<72x512xf32, #tpu.memory_space<vmem>>, vector<8x512xf32>
    tpu.vector_store %arg9[%c48_301, %c0_302], %607 {strides = array<i32>} : memref<72x512xf32, #tpu.memory_space<vmem>>, vector<8x512xf32>,
    %c0_303 = arith.constant 0 : index
    %c416_304 = arith.constant 416 : index
    %609 = vector.load %arg8[%c0_303, %c416_304] : memref<8x1280xf32, #tpu.memory_space<vmem>>, vector<8x512xf32>
    %c2_i32_305 = arith.constant 2 : i32
    %610 = vector.broadcast %c2_i32_305 : i32 to vector<1x512xi32>
    %611 = arith.addi %0, %610 : vector<1x512xi32>
    %c0_i32_306 = arith.constant 0 : i32
    %612 = vector.broadcast %c0_i32_306 : i32 to vector<1x512xi32>
    %613 = arith.addi %1, %612 : vector<1x512xi32>
    %c0_i32_307 = arith.constant 0 : i32
    %614 = vector.broadcast %c0_i32_307 : i32 to vector<1x512xi32>
    %615 = arith.cmpi sge, %611, %614 : vector<1x512xi32>
    %c14_i32_308 = arith.constant 14 : i32
    %616 = vector.broadcast %c14_i32_308 : i32 to vector<1x512xi32>
    %617 = arith.cmpi sle, %611, %616 : vector<1x512xi32>
    %618 = arith.andi %615, %617 : vector<1x512xi1>
    %c0_i32_309 = arith.constant 0 : i32
    %619 = vector.broadcast %c0_i32_309 : i32 to vector<1x512xi32>
    %620 = arith.cmpi sge, %613, %619 : vector<1x512xi32>
    %621 = arith.andi %618, %620 : vector<1x512xi1>
    %c14_i32_310 = arith.constant 14 : i32
    %622 = vector.broadcast %c14_i32_310 : i32 to vector<1x512xi32>
    %623 = arith.cmpi sle, %613, %622 : vector<1x512xi32>
    %624 = arith.andi %621, %623 : vector<1x512xi1>
    %cst_311 = arith.constant 0.000000e+00 : f32
    %625 = vector.shape_cast %624 : vector<1x512xi1> to vector<1x512xi1>
    %626 = vector.broadcast %625 : vector<1x512xi1> to vector<8x512xi1>
    %627 = vector.broadcast %cst_311 : f32 to vector<8x512xf32>
    %628 = arith.select %626, %609, %627 : vector<8x512xi1>, vector<8x512xf32>
    %c56_312 = arith.constant 56 : index
    %c0_313 = arith.constant 0 : index
    %629 = vector.load %arg9[%c56_312, %c0_313] : memref<72x512xf32, #tpu.memory_space<vmem>>, vector<8x512xf32>
    tpu.vector_store %arg9[%c56_312, %c0_313], %628 {strides = array<i32>} : memref<72x512xf32, #tpu.memory_space<vmem>>, vector<8x512xf32>,
    %c0_314 = arith.constant 0 : index
    %c418_315 = arith.constant 418 : index
    %630 = vector.load %arg8[%c0_314, %c418_315] : memref<8x1280xf32, #tpu.memory_space<vmem>>, vector<8x512xf32>
    %c2_i32_316 = arith.constant 2 : i32
    %631 = vector.broadcast %c2_i32_316 : i32 to vector<1x512xi32>
    %632 = arith.addi %0, %631 : vector<1x512xi32>
    %c2_i32_317 = arith.constant 2 : i32
    %633 = vector.broadcast %c2_i32_317 : i32 to vector<1x512xi32>
    %634 = arith.addi %1, %633 : vector<1x512xi32>
    %c0_i32_318 = arith.constant 0 : i32
    %635 = vector.broadcast %c0_i32_318 : i32 to vector<1x512xi32>
    %636 = arith.cmpi sge, %632, %635 : vector<1x512xi32>
    %c14_i32_319 = arith.constant 14 : i32
    %637 = vector.broadcast %c14_i32_319 : i32 to vector<1x512xi32>
    %638 = arith.cmpi sle, %632, %637 : vector<1x512xi32>
    %639 = arith.andi %636, %638 : vector<1x512xi1>
    %c0_i32_320 = arith.constant 0 : i32
    %640 = vector.broadcast %c0_i32_320 : i32 to vector<1x512xi32>
    %641 = arith.cmpi sge, %634, %640 : vector<1x512xi32>
    %642 = arith.andi %639, %641 : vector<1x512xi1>
    %c14_i32_321 = arith.constant 14 : i32
    %643 = vector.broadcast %c14_i32_321 : i32 to vector<1x512xi32>
    %644 = arith.cmpi sle, %634, %643 : vector<1x512xi32>
    %645 = arith.andi %642, %644 : vector<1x512xi1>
    %cst_322 = arith.constant 0.000000e+00 : f32
    %646 = vector.shape_cast %645 : vector<1x512xi1> to vector<1x512xi1>
    %647 = vector.broadcast %646 : vector<1x512xi1> to vector<8x512xi1>
    %648 = vector.broadcast %cst_322 : f32 to vector<8x512xf32>
    %649 = arith.select %647, %630, %648 : vector<8x512xi1>, vector<8x512xf32>
    %c64_323 = arith.constant 64 : index
    %c0_324 = arith.constant 0 : index
    %650 = vector.load %arg9[%c64_323, %c0_324] : memref<72x512xf32, #tpu.memory_space<vmem>>, vector<8x512xf32>
    tpu.vector_store %arg9[%c64_323, %c0_324], %649 {strides = array<i32>} : memref<72x512xf32, #tpu.memory_space<vmem>>, vector<8x512xf32>,
    %c2 = arith.constant 2 : index
    %c0_325 = arith.constant 0 : index
    %c0_326 = arith.constant 0 : index
    %651 = vector.load %arg1[%c2, %c0_325, %c0_326] : memref<8x8x72xf32, #tpu.memory_space<vmem>>, vector<1x8x72xf32>
    %652 = vector.shape_cast %651 : vector<1x8x72xf32> to vector<8x72xf32>
    %c0_327 = arith.constant 0 : index
    %c0_328 = arith.constant 0 : index
    %653 = vector.load %arg9[%c0_327, %c0_328] : memref<72x512xf32, #tpu.memory_space<vmem>>, vector<72x512xf32>
    %cst_329 = arith.constant dense<0.000000e+00> : vector<8x512xf32>
    %654 = tpu.matmul %652, %653, %cst_329 {dimension_numbers = #tpu.dot_dimension_numbers<[1], [0], [0], [1], [0, 0, 1, 1], [], []>} : vector<8x72xf32>, vector<72x512xf32>, vector<8x512xf32> -> vector<8x512xf32>
    %c2_330 = arith.constant 2 : index
    %c0_331 = arith.constant 0 : index
    %c0_332 = arith.constant 0 : index
    %655 = vector.load %arg2[%c2_330, %c0_331, %c0_332] : memref<8x8x1xf32, #tpu.memory_space<vmem>>, vector<1x8x1xf32>
    %656 = vector.shape_cast %655 : vector<1x8x1xf32> to vector<8x1xf32>
    %657 = vector.broadcast %656 : vector<8x1xf32> to vector<8x512xf32>
    %658 = arith.addf %654, %657 : vector<8x512xf32>
    %cst_333 = arith.constant 0.000000e+00 : f32
    %659 = vector.broadcast %cst_333 : f32 to vector<8x512xf32>
    %660 = arith.maximumf %658, %659 : vector<8x512xf32>
    %c2_334 = arith.constant 2 : index
    %c0_335 = arith.constant 0 : index
    %c0_336 = arith.constant 0 : index
    %661 = vector.load %arg3[%c2_334, %c0_335, %c0_336] : memref<8x8x1xf32, #tpu.memory_space<vmem>>, vector<1x8x1xf32>
    %662 = vector.shape_cast %661 : vector<1x8x1xf32> to vector<8x1xf32>
    %663 = vector.broadcast %662 : vector<8x1xf32> to vector<8x512xf32>
    %664 = arith.mulf %660, %663 : vector<8x512xf32>
    %c2_337 = arith.constant 2 : index
    %c0_338 = arith.constant 0 : index
    %c0_339 = arith.constant 0 : index
    %665 = vector.load %arg4[%c2_337, %c0_338, %c0_339] : memref<8x8x1xf32, #tpu.memory_space<vmem>>, vector<1x8x1xf32>
    %666 = vector.shape_cast %665 : vector<1x8x1xf32> to vector<8x1xf32>
    %667 = vector.broadcast %666 : vector<8x1xf32> to vector<8x512xf32>
    %668 = arith.addf %664, %667 : vector<8x512xf32>
    %c3_i32 = arith.constant 3 : i32
    %669 = vector.broadcast %c3_i32 : i32 to vector<1x512xi32>
    %670 = arith.andi %0, %669 : vector<1x512xi32>
    %c0_i32_340 = arith.constant 0 : i32
    %671 = vector.broadcast %c0_i32_340 : i32 to vector<1x512xi32>
    %672 = arith.cmpi eq, %670, %671 : vector<1x512xi32>
    %c12_i32 = arith.constant 12 : i32
    %673 = vector.broadcast %c12_i32 : i32 to vector<1x512xi32>
    %674 = arith.cmpi sle, %0, %673 : vector<1x512xi32>
    %675 = arith.andi %672, %674 : vector<1x512xi1>
    %c3_i32_341 = arith.constant 3 : i32
    %676 = vector.broadcast %c3_i32_341 : i32 to vector<1x512xi32>
    %677 = arith.andi %1, %676 : vector<1x512xi32>
    %c0_i32_342 = arith.constant 0 : i32
    %678 = vector.broadcast %c0_i32_342 : i32 to vector<1x512xi32>
    %679 = arith.cmpi eq, %677, %678 : vector<1x512xi32>
    %680 = arith.andi %675, %679 : vector<1x512xi1>
    %c12_i32_343 = arith.constant 12 : i32
    %681 = vector.broadcast %c12_i32_343 : i32 to vector<1x512xi32>
    %682 = arith.cmpi sle, %1, %681 : vector<1x512xi32>
    %683 = arith.andi %680, %682 : vector<1x512xi1>
    %cst_344 = arith.constant 0.000000e+00 : f32
    %684 = vector.shape_cast %683 : vector<1x512xi1> to vector<1x512xi1>
    %685 = vector.broadcast %684 : vector<1x512xi1> to vector<8x512xi1>
    %686 = vector.broadcast %cst_344 : f32 to vector<8x512xf32>
    %687 = arith.select %685, %668, %686 : vector<8x512xi1>, vector<8x512xf32>
    %c0_345 = arith.constant 0 : index
    %c384_346 = arith.constant 384 : index
    %688 = vector.load %arg8[%c0_345, %c384_346] : memref<8x1280xf32, #tpu.memory_space<vmem>>, vector<8x512xf32>
    tpu.vector_store %arg8[%c0_345, %c384_346], %687 {strides = array<i32>} : memref<8x1280xf32, #tpu.memory_space<vmem>>, vector<8x512xf32>,
    %c0_347 = arith.constant 0 : index
    %c384_348 = arith.constant 384 : index
    %689 = vector.load %arg8[%c0_347, %c384_348] : memref<8x1280xf32, #tpu.memory_space<vmem>>, vector<8x512xf32>
    %c0_349 = arith.constant 0 : index
    %c316 = arith.constant 316 : index
    %690 = vector.load %arg8[%c0_349, %c316] : memref<8x1280xf32, #tpu.memory_space<vmem>>, vector<8x512xf32>
    %c-4_i32 = arith.constant -4 : i32
    %691 = vector.broadcast %c-4_i32 : i32 to vector<1x512xi32>
    %692 = arith.addi %0, %691 : vector<1x512xi32>
    %c-4_i32_350 = arith.constant -4 : i32
    %693 = vector.broadcast %c-4_i32_350 : i32 to vector<1x512xi32>
    %694 = arith.addi %1, %693 : vector<1x512xi32>
    %c0_i32_351 = arith.constant 0 : i32
    %695 = vector.broadcast %c0_i32_351 : i32 to vector<1x512xi32>
    %696 = arith.cmpi sge, %692, %695 : vector<1x512xi32>
    %c12_i32_352 = arith.constant 12 : i32
    %697 = vector.broadcast %c12_i32_352 : i32 to vector<1x512xi32>
    %698 = arith.cmpi sle, %692, %697 : vector<1x512xi32>
    %699 = arith.andi %696, %698 : vector<1x512xi1>
    %c0_i32_353 = arith.constant 0 : i32
    %700 = vector.broadcast %c0_i32_353 : i32 to vector<1x512xi32>
    %701 = arith.cmpi sge, %694, %700 : vector<1x512xi32>
    %702 = arith.andi %699, %701 : vector<1x512xi1>
    %c12_i32_354 = arith.constant 12 : i32
    %703 = vector.broadcast %c12_i32_354 : i32 to vector<1x512xi32>
    %704 = arith.cmpi sle, %694, %703 : vector<1x512xi32>
    %705 = arith.andi %702, %704 : vector<1x512xi1>
    %cst_355 = arith.constant 0.000000e+00 : f32
    %706 = vector.shape_cast %705 : vector<1x512xi1> to vector<1x512xi1>
    %707 = vector.broadcast %706 : vector<1x512xi1> to vector<8x512xi1>
    %708 = vector.broadcast %cst_355 : f32 to vector<8x512xf32>
    %709 = arith.select %707, %690, %708 : vector<8x512xi1>, vector<8x512xf32>
    %c0_356 = arith.constant 0 : index
    %c0_357 = arith.constant 0 : index
    %710 = vector.load %arg9[%c0_356, %c0_357] : memref<72x512xf32, #tpu.memory_space<vmem>>, vector<8x512xf32>
    tpu.vector_store %arg9[%c0_356, %c0_357], %709 {strides = array<i32>} : memref<72x512xf32, #tpu.memory_space<vmem>>, vector<8x512xf32>,
    %c0_358 = arith.constant 0 : index
    %c320 = arith.constant 320 : index
    %711 = vector.load %arg8[%c0_358, %c320] : memref<8x1280xf32, #tpu.memory_space<vmem>>, vector<8x512xf32>
    %c-4_i32_359 = arith.constant -4 : i32
    %712 = vector.broadcast %c-4_i32_359 : i32 to vector<1x512xi32>
    %713 = arith.addi %0, %712 : vector<1x512xi32>
    %c0_i32_360 = arith.constant 0 : i32
    %714 = vector.broadcast %c0_i32_360 : i32 to vector<1x512xi32>
    %715 = arith.addi %1, %714 : vector<1x512xi32>
    %c0_i32_361 = arith.constant 0 : i32
    %716 = vector.broadcast %c0_i32_361 : i32 to vector<1x512xi32>
    %717 = arith.cmpi sge, %713, %716 : vector<1x512xi32>
    %c12_i32_362 = arith.constant 12 : i32
    %718 = vector.broadcast %c12_i32_362 : i32 to vector<1x512xi32>
    %719 = arith.cmpi sle, %713, %718 : vector<1x512xi32>
    %720 = arith.andi %717, %719 : vector<1x512xi1>
    %c0_i32_363 = arith.constant 0 : i32
    %721 = vector.broadcast %c0_i32_363 : i32 to vector<1x512xi32>
    %722 = arith.cmpi sge, %715, %721 : vector<1x512xi32>
    %723 = arith.andi %720, %722 : vector<1x512xi1>
    %c12_i32_364 = arith.constant 12 : i32
    %724 = vector.broadcast %c12_i32_364 : i32 to vector<1x512xi32>
    %725 = arith.cmpi sle, %715, %724 : vector<1x512xi32>
    %726 = arith.andi %723, %725 : vector<1x512xi1>
    %cst_365 = arith.constant 0.000000e+00 : f32
    %727 = vector.shape_cast %726 : vector<1x512xi1> to vector<1x512xi1>
    %728 = vector.broadcast %727 : vector<1x512xi1> to vector<8x512xi1>
    %729 = vector.broadcast %cst_365 : f32 to vector<8x512xf32>
    %730 = arith.select %728, %711, %729 : vector<8x512xi1>, vector<8x512xf32>
    %c8_366 = arith.constant 8 : index
    %c0_367 = arith.constant 0 : index
    %731 = vector.load %arg9[%c8_366, %c0_367] : memref<72x512xf32, #tpu.memory_space<vmem>>, vector<8x512xf32>
    tpu.vector_store %arg9[%c8_366, %c0_367], %730 {strides = array<i32>} : memref<72x512xf32, #tpu.memory_space<vmem>>, vector<8x512xf32>,
    %c0_368 = arith.constant 0 : index
    %c324 = arith.constant 324 : index
    %732 = vector.load %arg8[%c0_368, %c324] : memref<8x1280xf32, #tpu.memory_space<vmem>>, vector<8x512xf32>
    %c-4_i32_369 = arith.constant -4 : i32
    %733 = vector.broadcast %c-4_i32_369 : i32 to vector<1x512xi32>
    %734 = arith.addi %0, %733 : vector<1x512xi32>
    %c4_i32 = arith.constant 4 : i32
    %735 = vector.broadcast %c4_i32 : i32 to vector<1x512xi32>
    %736 = arith.addi %1, %735 : vector<1x512xi32>
    %c0_i32_370 = arith.constant 0 : i32
    %737 = vector.broadcast %c0_i32_370 : i32 to vector<1x512xi32>
    %738 = arith.cmpi sge, %734, %737 : vector<1x512xi32>
    %c12_i32_371 = arith.constant 12 : i32
    %739 = vector.broadcast %c12_i32_371 : i32 to vector<1x512xi32>
    %740 = arith.cmpi sle, %734, %739 : vector<1x512xi32>
    %741 = arith.andi %738, %740 : vector<1x512xi1>
    %c0_i32_372 = arith.constant 0 : i32
    %742 = vector.broadcast %c0_i32_372 : i32 to vector<1x512xi32>
    %743 = arith.cmpi sge, %736, %742 : vector<1x512xi32>
    %744 = arith.andi %741, %743 : vector<1x512xi1>
    %c12_i32_373 = arith.constant 12 : i32
    %745 = vector.broadcast %c12_i32_373 : i32 to vector<1x512xi32>
    %746 = arith.cmpi sle, %736, %745 : vector<1x512xi32>
    %747 = arith.andi %744, %746 : vector<1x512xi1>
    %cst_374 = arith.constant 0.000000e+00 : f32
    %748 = vector.shape_cast %747 : vector<1x512xi1> to vector<1x512xi1>
    %749 = vector.broadcast %748 : vector<1x512xi1> to vector<8x512xi1>
    %750 = vector.broadcast %cst_374 : f32 to vector<8x512xf32>
    %751 = arith.select %749, %732, %750 : vector<8x512xi1>, vector<8x512xf32>
    %c16_375 = arith.constant 16 : index
    %c0_376 = arith.constant 0 : index
    %752 = vector.load %arg9[%c16_375, %c0_376] : memref<72x512xf32, #tpu.memory_space<vmem>>, vector<8x512xf32>
    tpu.vector_store %arg9[%c16_375, %c0_376], %751 {strides = array<i32>} : memref<72x512xf32, #tpu.memory_space<vmem>>, vector<8x512xf32>,
    %c0_377 = arith.constant 0 : index
    %c380 = arith.constant 380 : index
    %753 = vector.load %arg8[%c0_377, %c380] : memref<8x1280xf32, #tpu.memory_space<vmem>>, vector<8x512xf32>
    %c0_i32_378 = arith.constant 0 : i32
    %754 = vector.broadcast %c0_i32_378 : i32 to vector<1x512xi32>
    %755 = arith.addi %0, %754 : vector<1x512xi32>
    %c-4_i32_379 = arith.constant -4 : i32
    %756 = vector.broadcast %c-4_i32_379 : i32 to vector<1x512xi32>
    %757 = arith.addi %1, %756 : vector<1x512xi32>
    %c0_i32_380 = arith.constant 0 : i32
    %758 = vector.broadcast %c0_i32_380 : i32 to vector<1x512xi32>
    %759 = arith.cmpi sge, %755, %758 : vector<1x512xi32>
    %c12_i32_381 = arith.constant 12 : i32
    %760 = vector.broadcast %c12_i32_381 : i32 to vector<1x512xi32>
    %761 = arith.cmpi sle, %755, %760 : vector<1x512xi32>
    %762 = arith.andi %759, %761 : vector<1x512xi1>
    %c0_i32_382 = arith.constant 0 : i32
    %763 = vector.broadcast %c0_i32_382 : i32 to vector<1x512xi32>
    %764 = arith.cmpi sge, %757, %763 : vector<1x512xi32>
    %765 = arith.andi %762, %764 : vector<1x512xi1>
    %c12_i32_383 = arith.constant 12 : i32
    %766 = vector.broadcast %c12_i32_383 : i32 to vector<1x512xi32>
    %767 = arith.cmpi sle, %757, %766 : vector<1x512xi32>
    %768 = arith.andi %765, %767 : vector<1x512xi1>
    %cst_384 = arith.constant 0.000000e+00 : f32
    %769 = vector.shape_cast %768 : vector<1x512xi1> to vector<1x512xi1>
    %770 = vector.broadcast %769 : vector<1x512xi1> to vector<8x512xi1>
    %771 = vector.broadcast %cst_384 : f32 to vector<8x512xf32>
    %772 = arith.select %770, %753, %771 : vector<8x512xi1>, vector<8x512xf32>
    %c24_385 = arith.constant 24 : index
    %c0_386 = arith.constant 0 : index
    %773 = vector.load %arg9[%c24_385, %c0_386] : memref<72x512xf32, #tpu.memory_space<vmem>>, vector<8x512xf32>
    tpu.vector_store %arg9[%c24_385, %c0_386], %772 {strides = array<i32>} : memref<72x512xf32, #tpu.memory_space<vmem>>, vector<8x512xf32>,
    %c0_387 = arith.constant 0 : index
    %c384_388 = arith.constant 384 : index
    %774 = vector.load %arg8[%c0_387, %c384_388] : memref<8x1280xf32, #tpu.memory_space<vmem>>, vector<8x512xf32>
    %c0_i32_389 = arith.constant 0 : i32
    %775 = vector.broadcast %c0_i32_389 : i32 to vector<1x512xi32>
    %776 = arith.addi %0, %775 : vector<1x512xi32>
    %c0_i32_390 = arith.constant 0 : i32
    %777 = vector.broadcast %c0_i32_390 : i32 to vector<1x512xi32>
    %778 = arith.addi %1, %777 : vector<1x512xi32>
    %c0_i32_391 = arith.constant 0 : i32
    %779 = vector.broadcast %c0_i32_391 : i32 to vector<1x512xi32>
    %780 = arith.cmpi sge, %776, %779 : vector<1x512xi32>
    %c12_i32_392 = arith.constant 12 : i32
    %781 = vector.broadcast %c12_i32_392 : i32 to vector<1x512xi32>
    %782 = arith.cmpi sle, %776, %781 : vector<1x512xi32>
    %783 = arith.andi %780, %782 : vector<1x512xi1>
    %c0_i32_393 = arith.constant 0 : i32
    %784 = vector.broadcast %c0_i32_393 : i32 to vector<1x512xi32>
    %785 = arith.cmpi sge, %778, %784 : vector<1x512xi32>
    %786 = arith.andi %783, %785 : vector<1x512xi1>
    %c12_i32_394 = arith.constant 12 : i32
    %787 = vector.broadcast %c12_i32_394 : i32 to vector<1x512xi32>
    %788 = arith.cmpi sle, %778, %787 : vector<1x512xi32>
    %789 = arith.andi %786, %788 : vector<1x512xi1>
    %cst_395 = arith.constant 0.000000e+00 : f32
    %790 = vector.shape_cast %789 : vector<1x512xi1> to vector<1x512xi1>
    %791 = vector.broadcast %790 : vector<1x512xi1> to vector<8x512xi1>
    %792 = vector.broadcast %cst_395 : f32 to vector<8x512xf32>
    %793 = arith.select %791, %774, %792 : vector<8x512xi1>, vector<8x512xf32>
    %c32_396 = arith.constant 32 : index
    %c0_397 = arith.constant 0 : index
    %794 = vector.load %arg9[%c32_396, %c0_397] : memref<72x512xf32, #tpu.memory_space<vmem>>, vector<8x512xf32>
    tpu.vector_store %arg9[%c32_396, %c0_397], %793 {strides = array<i32>} : memref<72x512xf32, #tpu.memory_space<vmem>>, vector<8x512xf32>,
    %c0_398 = arith.constant 0 : index
    %c388 = arith.constant 388 : index
    %795 = vector.load %arg8[%c0_398, %c388] : memref<8x1280xf32, #tpu.memory_space<vmem>>, vector<8x512xf32>
    %c0_i32_399 = arith.constant 0 : i32
    %796 = vector.broadcast %c0_i32_399 : i32 to vector<1x512xi32>
    %797 = arith.addi %0, %796 : vector<1x512xi32>
    %c4_i32_400 = arith.constant 4 : i32
    %798 = vector.broadcast %c4_i32_400 : i32 to vector<1x512xi32>
    %799 = arith.addi %1, %798 : vector<1x512xi32>
    %c0_i32_401 = arith.constant 0 : i32
    %800 = vector.broadcast %c0_i32_401 : i32 to vector<1x512xi32>
    %801 = arith.cmpi sge, %797, %800 : vector<1x512xi32>
    %c12_i32_402 = arith.constant 12 : i32
    %802 = vector.broadcast %c12_i32_402 : i32 to vector<1x512xi32>
    %803 = arith.cmpi sle, %797, %802 : vector<1x512xi32>
    %804 = arith.andi %801, %803 : vector<1x512xi1>
    %c0_i32_403 = arith.constant 0 : i32
    %805 = vector.broadcast %c0_i32_403 : i32 to vector<1x512xi32>
    %806 = arith.cmpi sge, %799, %805 : vector<1x512xi32>
    %807 = arith.andi %804, %806 : vector<1x512xi1>
    %c12_i32_404 = arith.constant 12 : i32
    %808 = vector.broadcast %c12_i32_404 : i32 to vector<1x512xi32>
    %809 = arith.cmpi sle, %799, %808 : vector<1x512xi32>
    %810 = arith.andi %807, %809 : vector<1x512xi1>
    %cst_405 = arith.constant 0.000000e+00 : f32
    %811 = vector.shape_cast %810 : vector<1x512xi1> to vector<1x512xi1>
    %812 = vector.broadcast %811 : vector<1x512xi1> to vector<8x512xi1>
    %813 = vector.broadcast %cst_405 : f32 to vector<8x512xf32>
    %814 = arith.select %812, %795, %813 : vector<8x512xi1>, vector<8x512xf32>
    %c40_406 = arith.constant 40 : index
    %c0_407 = arith.constant 0 : index
    %815 = vector.load %arg9[%c40_406, %c0_407] : memref<72x512xf32, #tpu.memory_space<vmem>>, vector<8x512xf32>
    tpu.vector_store %arg9[%c40_406, %c0_407], %814 {strides = array<i32>} : memref<72x512xf32, #tpu.memory_space<vmem>>, vector<8x512xf32>,
    %c0_408 = arith.constant 0 : index
    %c444 = arith.constant 444 : index
    %816 = vector.load %arg8[%c0_408, %c444] : memref<8x1280xf32, #tpu.memory_space<vmem>>, vector<8x512xf32>
    %c4_i32_409 = arith.constant 4 : i32
    %817 = vector.broadcast %c4_i32_409 : i32 to vector<1x512xi32>
    %818 = arith.addi %0, %817 : vector<1x512xi32>
    %c-4_i32_410 = arith.constant -4 : i32
    %819 = vector.broadcast %c-4_i32_410 : i32 to vector<1x512xi32>
    %820 = arith.addi %1, %819 : vector<1x512xi32>
    %c0_i32_411 = arith.constant 0 : i32
    %821 = vector.broadcast %c0_i32_411 : i32 to vector<1x512xi32>
    %822 = arith.cmpi sge, %818, %821 : vector<1x512xi32>
    %c12_i32_412 = arith.constant 12 : i32
    %823 = vector.broadcast %c12_i32_412 : i32 to vector<1x512xi32>
    %824 = arith.cmpi sle, %818, %823 : vector<1x512xi32>
    %825 = arith.andi %822, %824 : vector<1x512xi1>
    %c0_i32_413 = arith.constant 0 : i32
    %826 = vector.broadcast %c0_i32_413 : i32 to vector<1x512xi32>
    %827 = arith.cmpi sge, %820, %826 : vector<1x512xi32>
    %828 = arith.andi %825, %827 : vector<1x512xi1>
    %c12_i32_414 = arith.constant 12 : i32
    %829 = vector.broadcast %c12_i32_414 : i32 to vector<1x512xi32>
    %830 = arith.cmpi sle, %820, %829 : vector<1x512xi32>
    %831 = arith.andi %828, %830 : vector<1x512xi1>
    %cst_415 = arith.constant 0.000000e+00 : f32
    %832 = vector.shape_cast %831 : vector<1x512xi1> to vector<1x512xi1>
    %833 = vector.broadcast %832 : vector<1x512xi1> to vector<8x512xi1>
    %834 = vector.broadcast %cst_415 : f32 to vector<8x512xf32>
    %835 = arith.select %833, %816, %834 : vector<8x512xi1>, vector<8x512xf32>
    %c48_416 = arith.constant 48 : index
    %c0_417 = arith.constant 0 : index
    %836 = vector.load %arg9[%c48_416, %c0_417] : memref<72x512xf32, #tpu.memory_space<vmem>>, vector<8x512xf32>
    tpu.vector_store %arg9[%c48_416, %c0_417], %835 {strides = array<i32>} : memref<72x512xf32, #tpu.memory_space<vmem>>, vector<8x512xf32>,
    %c0_418 = arith.constant 0 : index
    %c448 = arith.constant 448 : index
    %837 = vector.load %arg8[%c0_418, %c448] : memref<8x1280xf32, #tpu.memory_space<vmem>>, vector<8x512xf32>
    %c4_i32_419 = arith.constant 4 : i32
    %838 = vector.broadcast %c4_i32_419 : i32 to vector<1x512xi32>
    %839 = arith.addi %0, %838 : vector<1x512xi32>
    %c0_i32_420 = arith.constant 0 : i32
    %840 = vector.broadcast %c0_i32_420 : i32 to vector<1x512xi32>
    %841 = arith.addi %1, %840 : vector<1x512xi32>
    %c0_i32_421 = arith.constant 0 : i32
    %842 = vector.broadcast %c0_i32_421 : i32 to vector<1x512xi32>
    %843 = arith.cmpi sge, %839, %842 : vector<1x512xi32>
    %c12_i32_422 = arith.constant 12 : i32
    %844 = vector.broadcast %c12_i32_422 : i32 to vector<1x512xi32>
    %845 = arith.cmpi sle, %839, %844 : vector<1x512xi32>
    %846 = arith.andi %843, %845 : vector<1x512xi1>
    %c0_i32_423 = arith.constant 0 : i32
    %847 = vector.broadcast %c0_i32_423 : i32 to vector<1x512xi32>
    %848 = arith.cmpi sge, %841, %847 : vector<1x512xi32>
    %849 = arith.andi %846, %848 : vector<1x512xi1>
    %c12_i32_424 = arith.constant 12 : i32
    %850 = vector.broadcast %c12_i32_424 : i32 to vector<1x512xi32>
    %851 = arith.cmpi sle, %841, %850 : vector<1x512xi32>
    %852 = arith.andi %849, %851 : vector<1x512xi1>
    %cst_425 = arith.constant 0.000000e+00 : f32
    %853 = vector.shape_cast %852 : vector<1x512xi1> to vector<1x512xi1>
    %854 = vector.broadcast %853 : vector<1x512xi1> to vector<8x512xi1>
    %855 = vector.broadcast %cst_425 : f32 to vector<8x512xf32>
    %856 = arith.select %854, %837, %855 : vector<8x512xi1>, vector<8x512xf32>
    %c56_426 = arith.constant 56 : index
    %c0_427 = arith.constant 0 : index
    %857 = vector.load %arg9[%c56_426, %c0_427] : memref<72x512xf32, #tpu.memory_space<vmem>>, vector<8x512xf32>
    tpu.vector_store %arg9[%c56_426, %c0_427], %856 {strides = array<i32>} : memref<72x512xf32, #tpu.memory_space<vmem>>, vector<8x512xf32>,
    %c0_428 = arith.constant 0 : index
    %c452 = arith.constant 452 : index
    %858 = vector.load %arg8[%c0_428, %c452] : memref<8x1280xf32, #tpu.memory_space<vmem>>, vector<8x512xf32>
    %c4_i32_429 = arith.constant 4 : i32
    %859 = vector.broadcast %c4_i32_429 : i32 to vector<1x512xi32>
    %860 = arith.addi %0, %859 : vector<1x512xi32>
    %c4_i32_430 = arith.constant 4 : i32
    %861 = vector.broadcast %c4_i32_430 : i32 to vector<1x512xi32>
    %862 = arith.addi %1, %861 : vector<1x512xi32>
    %c0_i32_431 = arith.constant 0 : i32
    %863 = vector.broadcast %c0_i32_431 : i32 to vector<1x512xi32>
    %864 = arith.cmpi sge, %860, %863 : vector<1x512xi32>
    %c12_i32_432 = arith.constant 12 : i32
    %865 = vector.broadcast %c12_i32_432 : i32 to vector<1x512xi32>
    %866 = arith.cmpi sle, %860, %865 : vector<1x512xi32>
    %867 = arith.andi %864, %866 : vector<1x512xi1>
    %c0_i32_433 = arith.constant 0 : i32
    %868 = vector.broadcast %c0_i32_433 : i32 to vector<1x512xi32>
    %869 = arith.cmpi sge, %862, %868 : vector<1x512xi32>
    %870 = arith.andi %867, %869 : vector<1x512xi1>
    %c12_i32_434 = arith.constant 12 : i32
    %871 = vector.broadcast %c12_i32_434 : i32 to vector<1x512xi32>
    %872 = arith.cmpi sle, %862, %871 : vector<1x512xi32>
    %873 = arith.andi %870, %872 : vector<1x512xi1>
    %cst_435 = arith.constant 0.000000e+00 : f32
    %874 = vector.shape_cast %873 : vector<1x512xi1> to vector<1x512xi1>
    %875 = vector.broadcast %874 : vector<1x512xi1> to vector<8x512xi1>
    %876 = vector.broadcast %cst_435 : f32 to vector<8x512xf32>
    %877 = arith.select %875, %858, %876 : vector<8x512xi1>, vector<8x512xf32>
    %c64_436 = arith.constant 64 : index
    %c0_437 = arith.constant 0 : index
    %878 = vector.load %arg9[%c64_436, %c0_437] : memref<72x512xf32, #tpu.memory_space<vmem>>, vector<8x512xf32>
    tpu.vector_store %arg9[%c64_436, %c0_437], %877 {strides = array<i32>} : memref<72x512xf32, #tpu.memory_space<vmem>>, vector<8x512xf32>,
    %c3 = arith.constant 3 : index
    %c0_438 = arith.constant 0 : index
    %c0_439 = arith.constant 0 : index
    %879 = vector.load %arg1[%c3, %c0_438, %c0_439] : memref<8x8x72xf32, #tpu.memory_space<vmem>>, vector<1x8x72xf32>
    %880 = vector.shape_cast %879 : vector<1x8x72xf32> to vector<8x72xf32>
    %c0_440 = arith.constant 0 : index
    %c0_441 = arith.constant 0 : index
    %881 = vector.load %arg9[%c0_440, %c0_441] : memref<72x512xf32, #tpu.memory_space<vmem>>, vector<72x512xf32>
    %cst_442 = arith.constant dense<0.000000e+00> : vector<8x512xf32>
    %882 = tpu.matmul %880, %881, %cst_442 {dimension_numbers = #tpu.dot_dimension_numbers<[1], [0], [0], [1], [0, 0, 1, 1], [], []>} : vector<8x72xf32>, vector<72x512xf32>, vector<8x512xf32> -> vector<8x512xf32>
    %c3_443 = arith.constant 3 : index
    %c0_444 = arith.constant 0 : index
    %c0_445 = arith.constant 0 : index
    %883 = vector.load %arg2[%c3_443, %c0_444, %c0_445] : memref<8x8x1xf32, #tpu.memory_space<vmem>>, vector<1x8x1xf32>
    %884 = vector.shape_cast %883 : vector<1x8x1xf32> to vector<8x1xf32>
    %885 = vector.broadcast %884 : vector<8x1xf32> to vector<8x512xf32>
    %886 = arith.addf %882, %885 : vector<8x512xf32>
    %cst_446 = arith.constant 0.000000e+00 : f32
    %887 = vector.broadcast %cst_446 : f32 to vector<8x512xf32>
    %888 = arith.maximumf %886, %887 : vector<8x512xf32>
    %c3_447 = arith.constant 3 : index
    %c0_448 = arith.constant 0 : index
    %c0_449 = arith.constant 0 : index
    %889 = vector.load %arg3[%c3_447, %c0_448, %c0_449] : memref<8x8x1xf32, #tpu.memory_space<vmem>>, vector<1x8x1xf32>
    %890 = vector.shape_cast %889 : vector<1x8x1xf32> to vector<8x1xf32>
    %891 = vector.broadcast %890 : vector<8x1xf32> to vector<8x512xf32>
    %892 = arith.mulf %888, %891 : vector<8x512xf32>
    %c3_450 = arith.constant 3 : index
    %c0_451 = arith.constant 0 : index
    %c0_452 = arith.constant 0 : index
    %893 = vector.load %arg4[%c3_450, %c0_451, %c0_452] : memref<8x8x1xf32, #tpu.memory_space<vmem>>, vector<1x8x1xf32>
    %894 = vector.shape_cast %893 : vector<1x8x1xf32> to vector<8x1xf32>
    %895 = vector.broadcast %894 : vector<8x1xf32> to vector<8x512xf32>
    %896 = arith.addf %892, %895 : vector<8x512xf32>
    %c3_i32_453 = arith.constant 3 : i32
    %897 = vector.broadcast %c3_i32_453 : i32 to vector<1x512xi32>
    %898 = arith.andi %0, %897 : vector<1x512xi32>
    %c0_i32_454 = arith.constant 0 : i32
    %899 = vector.broadcast %c0_i32_454 : i32 to vector<1x512xi32>
    %900 = arith.cmpi eq, %898, %899 : vector<1x512xi32>
    %c12_i32_455 = arith.constant 12 : i32
    %901 = vector.broadcast %c12_i32_455 : i32 to vector<1x512xi32>
    %902 = arith.cmpi sle, %0, %901 : vector<1x512xi32>
    %903 = arith.andi %900, %902 : vector<1x512xi1>
    %c3_i32_456 = arith.constant 3 : i32
    %904 = vector.broadcast %c3_i32_456 : i32 to vector<1x512xi32>
    %905 = arith.andi %1, %904 : vector<1x512xi32>
    %c0_i32_457 = arith.constant 0 : i32
    %906 = vector.broadcast %c0_i32_457 : i32 to vector<1x512xi32>
    %907 = arith.cmpi eq, %905, %906 : vector<1x512xi32>
    %908 = arith.andi %903, %907 : vector<1x512xi1>
    %c12_i32_458 = arith.constant 12 : i32
    %909 = vector.broadcast %c12_i32_458 : i32 to vector<1x512xi32>
    %910 = arith.cmpi sle, %1, %909 : vector<1x512xi32>
    %911 = arith.andi %908, %910 : vector<1x512xi1>
    %cst_459 = arith.constant 0.000000e+00 : f32
    %912 = vector.shape_cast %911 : vector<1x512xi1> to vector<1x512xi1>
    %913 = vector.broadcast %912 : vector<1x512xi1> to vector<8x512xi1>
    %914 = vector.broadcast %cst_459 : f32 to vector<8x512xf32>
    %915 = arith.select %913, %896, %914 : vector<8x512xi1>, vector<8x512xf32>
    %916 = arith.addf %915, %689 : vector<8x512xf32>
    %c0_460 = arith.constant 0 : index
    %c384_461 = arith.constant 384 : index
    %917 = vector.load %arg8[%c0_460, %c384_461] : memref<8x1280xf32, #tpu.memory_space<vmem>>, vector<8x512xf32>
    tpu.vector_store %arg8[%c0_460, %c384_461], %916 {strides = array<i32>} : memref<8x1280xf32, #tpu.memory_space<vmem>>, vector<8x512xf32>,
    %c0_462 = arith.constant 0 : index
    %c316_463 = arith.constant 316 : index
    %918 = vector.load %arg8[%c0_462, %c316_463] : memref<8x1280xf32, #tpu.memory_space<vmem>>, vector<8x512xf32>
    %c-4_i32_464 = arith.constant -4 : i32
    %919 = vector.broadcast %c-4_i32_464 : i32 to vector<1x512xi32>
    %920 = arith.addi %0, %919 : vector<1x512xi32>
    %c-4_i32_465 = arith.constant -4 : i32
    %921 = vector.broadcast %c-4_i32_465 : i32 to vector<1x512xi32>
    %922 = arith.addi %1, %921 : vector<1x512xi32>
    %c0_i32_466 = arith.constant 0 : i32
    %923 = vector.broadcast %c0_i32_466 : i32 to vector<1x512xi32>
    %924 = arith.cmpi sge, %920, %923 : vector<1x512xi32>
    %c12_i32_467 = arith.constant 12 : i32
    %925 = vector.broadcast %c12_i32_467 : i32 to vector<1x512xi32>
    %926 = arith.cmpi sle, %920, %925 : vector<1x512xi32>
    %927 = arith.andi %924, %926 : vector<1x512xi1>
    %c0_i32_468 = arith.constant 0 : i32
    %928 = vector.broadcast %c0_i32_468 : i32 to vector<1x512xi32>
    %929 = arith.cmpi sge, %922, %928 : vector<1x512xi32>
    %930 = arith.andi %927, %929 : vector<1x512xi1>
    %c12_i32_469 = arith.constant 12 : i32
    %931 = vector.broadcast %c12_i32_469 : i32 to vector<1x512xi32>
    %932 = arith.cmpi sle, %922, %931 : vector<1x512xi32>
    %933 = arith.andi %930, %932 : vector<1x512xi1>
    %cst_470 = arith.constant 0.000000e+00 : f32
    %934 = vector.shape_cast %933 : vector<1x512xi1> to vector<1x512xi1>
    %935 = vector.broadcast %934 : vector<1x512xi1> to vector<8x512xi1>
    %936 = vector.broadcast %cst_470 : f32 to vector<8x512xf32>
    %937 = arith.select %935, %918, %936 : vector<8x512xi1>, vector<8x512xf32>
    %c0_471 = arith.constant 0 : index
    %c0_472 = arith.constant 0 : index
    %938 = vector.load %arg9[%c0_471, %c0_472] : memref<72x512xf32, #tpu.memory_space<vmem>>, vector<8x512xf32>
    tpu.vector_store %arg9[%c0_471, %c0_472], %937 {strides = array<i32>} : memref<72x512xf32, #tpu.memory_space<vmem>>, vector<8x512xf32>,
    %c0_473 = arith.constant 0 : index
    %c320_474 = arith.constant 320 : index
    %939 = vector.load %arg8[%c0_473, %c320_474] : memref<8x1280xf32, #tpu.memory_space<vmem>>, vector<8x512xf32>
    %c-4_i32_475 = arith.constant -4 : i32
    %940 = vector.broadcast %c-4_i32_475 : i32 to vector<1x512xi32>
    %941 = arith.addi %0, %940 : vector<1x512xi32>
    %c0_i32_476 = arith.constant 0 : i32
    %942 = vector.broadcast %c0_i32_476 : i32 to vector<1x512xi32>
    %943 = arith.addi %1, %942 : vector<1x512xi32>
    %c0_i32_477 = arith.constant 0 : i32
    %944 = vector.broadcast %c0_i32_477 : i32 to vector<1x512xi32>
    %945 = arith.cmpi sge, %941, %944 : vector<1x512xi32>
    %c12_i32_478 = arith.constant 12 : i32
    %946 = vector.broadcast %c12_i32_478 : i32 to vector<1x512xi32>
    %947 = arith.cmpi sle, %941, %946 : vector<1x512xi32>
    %948 = arith.andi %945, %947 : vector<1x512xi1>
    %c0_i32_479 = arith.constant 0 : i32
    %949 = vector.broadcast %c0_i32_479 : i32 to vector<1x512xi32>
    %950 = arith.cmpi sge, %943, %949 : vector<1x512xi32>
    %951 = arith.andi %948, %950 : vector<1x512xi1>
    %c12_i32_480 = arith.constant 12 : i32
    %952 = vector.broadcast %c12_i32_480 : i32 to vector<1x512xi32>
    %953 = arith.cmpi sle, %943, %952 : vector<1x512xi32>
    %954 = arith.andi %951, %953 : vector<1x512xi1>
    %cst_481 = arith.constant 0.000000e+00 : f32
    %955 = vector.shape_cast %954 : vector<1x512xi1> to vector<1x512xi1>
    %956 = vector.broadcast %955 : vector<1x512xi1> to vector<8x512xi1>
    %957 = vector.broadcast %cst_481 : f32 to vector<8x512xf32>
    %958 = arith.select %956, %939, %957 : vector<8x512xi1>, vector<8x512xf32>
    %c8_482 = arith.constant 8 : index
    %c0_483 = arith.constant 0 : index
    %959 = vector.load %arg9[%c8_482, %c0_483] : memref<72x512xf32, #tpu.memory_space<vmem>>, vector<8x512xf32>
    tpu.vector_store %arg9[%c8_482, %c0_483], %958 {strides = array<i32>} : memref<72x512xf32, #tpu.memory_space<vmem>>, vector<8x512xf32>,
    %c0_484 = arith.constant 0 : index
    %c324_485 = arith.constant 324 : index
    %960 = vector.load %arg8[%c0_484, %c324_485] : memref<8x1280xf32, #tpu.memory_space<vmem>>, vector<8x512xf32>
    %c-4_i32_486 = arith.constant -4 : i32
    %961 = vector.broadcast %c-4_i32_486 : i32 to vector<1x512xi32>
    %962 = arith.addi %0, %961 : vector<1x512xi32>
    %c4_i32_487 = arith.constant 4 : i32
    %963 = vector.broadcast %c4_i32_487 : i32 to vector<1x512xi32>
    %964 = arith.addi %1, %963 : vector<1x512xi32>
    %c0_i32_488 = arith.constant 0 : i32
    %965 = vector.broadcast %c0_i32_488 : i32 to vector<1x512xi32>
    %966 = arith.cmpi sge, %962, %965 : vector<1x512xi32>
    %c12_i32_489 = arith.constant 12 : i32
    %967 = vector.broadcast %c12_i32_489 : i32 to vector<1x512xi32>
    %968 = arith.cmpi sle, %962, %967 : vector<1x512xi32>
    %969 = arith.andi %966, %968 : vector<1x512xi1>
    %c0_i32_490 = arith.constant 0 : i32
    %970 = vector.broadcast %c0_i32_490 : i32 to vector<1x512xi32>
    %971 = arith.cmpi sge, %964, %970 : vector<1x512xi32>
    %972 = arith.andi %969, %971 : vector<1x512xi1>
    %c12_i32_491 = arith.constant 12 : i32
    %973 = vector.broadcast %c12_i32_491 : i32 to vector<1x512xi32>
    %974 = arith.cmpi sle, %964, %973 : vector<1x512xi32>
    %975 = arith.andi %972, %974 : vector<1x512xi1>
    %cst_492 = arith.constant 0.000000e+00 : f32
    %976 = vector.shape_cast %975 : vector<1x512xi1> to vector<1x512xi1>
    %977 = vector.broadcast %976 : vector<1x512xi1> to vector<8x512xi1>
    %978 = vector.broadcast %cst_492 : f32 to vector<8x512xf32>
    %979 = arith.select %977, %960, %978 : vector<8x512xi1>, vector<8x512xf32>
    %c16_493 = arith.constant 16 : index
    %c0_494 = arith.constant 0 : index
    %980 = vector.load %arg9[%c16_493, %c0_494] : memref<72x512xf32, #tpu.memory_space<vmem>>, vector<8x512xf32>
    tpu.vector_store %arg9[%c16_493, %c0_494], %979 {strides = array<i32>} : memref<72x512xf32, #tpu.memory_space<vmem>>, vector<8x512xf32>,
    %c0_495 = arith.constant 0 : index
    %c380_496 = arith.constant 380 : index
    %981 = vector.load %arg8[%c0_495, %c380_496] : memref<8x1280xf32, #tpu.memory_space<vmem>>, vector<8x512xf32>
    %c0_i32_497 = arith.constant 0 : i32
    %982 = vector.broadcast %c0_i32_497 : i32 to vector<1x512xi32>
    %983 = arith.addi %0, %982 : vector<1x512xi32>
    %c-4_i32_498 = arith.constant -4 : i32
    %984 = vector.broadcast %c-4_i32_498 : i32 to vector<1x512xi32>
    %985 = arith.addi %1, %984 : vector<1x512xi32>
    %c0_i32_499 = arith.constant 0 : i32
    %986 = vector.broadcast %c0_i32_499 : i32 to vector<1x512xi32>
    %987 = arith.cmpi sge, %983, %986 : vector<1x512xi32>
    %c12_i32_500 = arith.constant 12 : i32
    %988 = vector.broadcast %c12_i32_500 : i32 to vector<1x512xi32>
    %989 = arith.cmpi sle, %983, %988 : vector<1x512xi32>
    %990 = arith.andi %987, %989 : vector<1x512xi1>
    %c0_i32_501 = arith.constant 0 : i32
    %991 = vector.broadcast %c0_i32_501 : i32 to vector<1x512xi32>
    %992 = arith.cmpi sge, %985, %991 : vector<1x512xi32>
    %993 = arith.andi %990, %992 : vector<1x512xi1>
    %c12_i32_502 = arith.constant 12 : i32
    %994 = vector.broadcast %c12_i32_502 : i32 to vector<1x512xi32>
    %995 = arith.cmpi sle, %985, %994 : vector<1x512xi32>
    %996 = arith.andi %993, %995 : vector<1x512xi1>
    %cst_503 = arith.constant 0.000000e+00 : f32
    %997 = vector.shape_cast %996 : vector<1x512xi1> to vector<1x512xi1>
    %998 = vector.broadcast %997 : vector<1x512xi1> to vector<8x512xi1>
    %999 = vector.broadcast %cst_503 : f32 to vector<8x512xf32>
    %1000 = arith.select %998, %981, %999 : vector<8x512xi1>, vector<8x512xf32>
    %c24_504 = arith.constant 24 : index
    %c0_505 = arith.constant 0 : index
    %1001 = vector.load %arg9[%c24_504, %c0_505] : memref<72x512xf32, #tpu.memory_space<vmem>>, vector<8x512xf32>
    tpu.vector_store %arg9[%c24_504, %c0_505], %1000 {strides = array<i32>} : memref<72x512xf32, #tpu.memory_space<vmem>>, vector<8x512xf32>,
    %c0_506 = arith.constant 0 : index
    %c384_507 = arith.constant 384 : index
    %1002 = vector.load %arg8[%c0_506, %c384_507] : memref<8x1280xf32, #tpu.memory_space<vmem>>, vector<8x512xf32>
    %c0_i32_508 = arith.constant 0 : i32
    %1003 = vector.broadcast %c0_i32_508 : i32 to vector<1x512xi32>
    %1004 = arith.addi %0, %1003 : vector<1x512xi32>
    %c0_i32_509 = arith.constant 0 : i32
    %1005 = vector.broadcast %c0_i32_509 : i32 to vector<1x512xi32>
    %1006 = arith.addi %1, %1005 : vector<1x512xi32>
    %c0_i32_510 = arith.constant 0 : i32
    %1007 = vector.broadcast %c0_i32_510 : i32 to vector<1x512xi32>
    %1008 = arith.cmpi sge, %1004, %1007 : vector<1x512xi32>
    %c12_i32_511 = arith.constant 12 : i32
    %1009 = vector.broadcast %c12_i32_511 : i32 to vector<1x512xi32>
    %1010 = arith.cmpi sle, %1004, %1009 : vector<1x512xi32>
    %1011 = arith.andi %1008, %1010 : vector<1x512xi1>
    %c0_i32_512 = arith.constant 0 : i32
    %1012 = vector.broadcast %c0_i32_512 : i32 to vector<1x512xi32>
    %1013 = arith.cmpi sge, %1006, %1012 : vector<1x512xi32>
    %1014 = arith.andi %1011, %1013 : vector<1x512xi1>
    %c12_i32_513 = arith.constant 12 : i32
    %1015 = vector.broadcast %c12_i32_513 : i32 to vector<1x512xi32>
    %1016 = arith.cmpi sle, %1006, %1015 : vector<1x512xi32>
    %1017 = arith.andi %1014, %1016 : vector<1x512xi1>
    %cst_514 = arith.constant 0.000000e+00 : f32
    %1018 = vector.shape_cast %1017 : vector<1x512xi1> to vector<1x512xi1>
    %1019 = vector.broadcast %1018 : vector<1x512xi1> to vector<8x512xi1>
    %1020 = vector.broadcast %cst_514 : f32 to vector<8x512xf32>
    %1021 = arith.select %1019, %1002, %1020 : vector<8x512xi1>, vector<8x512xf32>
    %c32_515 = arith.constant 32 : index
    %c0_516 = arith.constant 0 : index
    %1022 = vector.load %arg9[%c32_515, %c0_516] : memref<72x512xf32, #tpu.memory_space<vmem>>, vector<8x512xf32>
    tpu.vector_store %arg9[%c32_515, %c0_516], %1021 {strides = array<i32>} : memref<72x512xf32, #tpu.memory_space<vmem>>, vector<8x512xf32>,
    %c0_517 = arith.constant 0 : index
    %c388_518 = arith.constant 388 : index
    %1023 = vector.load %arg8[%c0_517, %c388_518] : memref<8x1280xf32, #tpu.memory_space<vmem>>, vector<8x512xf32>
    %c0_i32_519 = arith.constant 0 : i32
    %1024 = vector.broadcast %c0_i32_519 : i32 to vector<1x512xi32>
    %1025 = arith.addi %0, %1024 : vector<1x512xi32>
    %c4_i32_520 = arith.constant 4 : i32
    %1026 = vector.broadcast %c4_i32_520 : i32 to vector<1x512xi32>
    %1027 = arith.addi %1, %1026 : vector<1x512xi32>
    %c0_i32_521 = arith.constant 0 : i32
    %1028 = vector.broadcast %c0_i32_521 : i32 to vector<1x512xi32>
    %1029 = arith.cmpi sge, %1025, %1028 : vector<1x512xi32>
    %c12_i32_522 = arith.constant 12 : i32
    %1030 = vector.broadcast %c12_i32_522 : i32 to vector<1x512xi32>
    %1031 = arith.cmpi sle, %1025, %1030 : vector<1x512xi32>
    %1032 = arith.andi %1029, %1031 : vector<1x512xi1>
    %c0_i32_523 = arith.constant 0 : i32
    %1033 = vector.broadcast %c0_i32_523 : i32 to vector<1x512xi32>
    %1034 = arith.cmpi sge, %1027, %1033 : vector<1x512xi32>
    %1035 = arith.andi %1032, %1034 : vector<1x512xi1>
    %c12_i32_524 = arith.constant 12 : i32
    %1036 = vector.broadcast %c12_i32_524 : i32 to vector<1x512xi32>
    %1037 = arith.cmpi sle, %1027, %1036 : vector<1x512xi32>
    %1038 = arith.andi %1035, %1037 : vector<1x512xi1>
    %cst_525 = arith.constant 0.000000e+00 : f32
    %1039 = vector.shape_cast %1038 : vector<1x512xi1> to vector<1x512xi1>
    %1040 = vector.broadcast %1039 : vector<1x512xi1> to vector<8x512xi1>
    %1041 = vector.broadcast %cst_525 : f32 to vector<8x512xf32>
    %1042 = arith.select %1040, %1023, %1041 : vector<8x512xi1>, vector<8x512xf32>
    %c40_526 = arith.constant 40 : index
    %c0_527 = arith.constant 0 : index
    %1043 = vector.load %arg9[%c40_526, %c0_527] : memref<72x512xf32, #tpu.memory_space<vmem>>, vector<8x512xf32>
    tpu.vector_store %arg9[%c40_526, %c0_527], %1042 {strides = array<i32>} : memref<72x512xf32, #tpu.memory_space<vmem>>, vector<8x512xf32>,
    %c0_528 = arith.constant 0 : index
    %c444_529 = arith.constant 444 : index
    %1044 = vector.load %arg8[%c0_528, %c444_529] : memref<8x1280xf32, #tpu.memory_space<vmem>>, vector<8x512xf32>
    %c4_i32_530 = arith.constant 4 : i32
    %1045 = vector.broadcast %c4_i32_530 : i32 to vector<1x512xi32>
    %1046 = arith.addi %0, %1045 : vector<1x512xi32>
    %c-4_i32_531 = arith.constant -4 : i32
    %1047 = vector.broadcast %c-4_i32_531 : i32 to vector<1x512xi32>
    %1048 = arith.addi %1, %1047 : vector<1x512xi32>
    %c0_i32_532 = arith.constant 0 : i32
    %1049 = vector.broadcast %c0_i32_532 : i32 to vector<1x512xi32>
    %1050 = arith.cmpi sge, %1046, %1049 : vector<1x512xi32>
    %c12_i32_533 = arith.constant 12 : i32
    %1051 = vector.broadcast %c12_i32_533 : i32 to vector<1x512xi32>
    %1052 = arith.cmpi sle, %1046, %1051 : vector<1x512xi32>
    %1053 = arith.andi %1050, %1052 : vector<1x512xi1>
    %c0_i32_534 = arith.constant 0 : i32
    %1054 = vector.broadcast %c0_i32_534 : i32 to vector<1x512xi32>
    %1055 = arith.cmpi sge, %1048, %1054 : vector<1x512xi32>
    %1056 = arith.andi %1053, %1055 : vector<1x512xi1>
    %c12_i32_535 = arith.constant 12 : i32
    %1057 = vector.broadcast %c12_i32_535 : i32 to vector<1x512xi32>
    %1058 = arith.cmpi sle, %1048, %1057 : vector<1x512xi32>
    %1059 = arith.andi %1056, %1058 : vector<1x512xi1>
    %cst_536 = arith.constant 0.000000e+00 : f32
    %1060 = vector.shape_cast %1059 : vector<1x512xi1> to vector<1x512xi1>
    %1061 = vector.broadcast %1060 : vector<1x512xi1> to vector<8x512xi1>
    %1062 = vector.broadcast %cst_536 : f32 to vector<8x512xf32>
    %1063 = arith.select %1061, %1044, %1062 : vector<8x512xi1>, vector<8x512xf32>
    %c48_537 = arith.constant 48 : index
    %c0_538 = arith.constant 0 : index
    %1064 = vector.load %arg9[%c48_537, %c0_538] : memref<72x512xf32, #tpu.memory_space<vmem>>, vector<8x512xf32>
    tpu.vector_store %arg9[%c48_537, %c0_538], %1063 {strides = array<i32>} : memref<72x512xf32, #tpu.memory_space<vmem>>, vector<8x512xf32>,
    %c0_539 = arith.constant 0 : index
    %c448_540 = arith.constant 448 : index
    %1065 = vector.load %arg8[%c0_539, %c448_540] : memref<8x1280xf32, #tpu.memory_space<vmem>>, vector<8x512xf32>
    %c4_i32_541 = arith.constant 4 : i32
    %1066 = vector.broadcast %c4_i32_541 : i32 to vector<1x512xi32>
    %1067 = arith.addi %0, %1066 : vector<1x512xi32>
    %c0_i32_542 = arith.constant 0 : i32
    %1068 = vector.broadcast %c0_i32_542 : i32 to vector<1x512xi32>
    %1069 = arith.addi %1, %1068 : vector<1x512xi32>
    %c0_i32_543 = arith.constant 0 : i32
    %1070 = vector.broadcast %c0_i32_543 : i32 to vector<1x512xi32>
    %1071 = arith.cmpi sge, %1067, %1070 : vector<1x512xi32>
    %c12_i32_544 = arith.constant 12 : i32
    %1072 = vector.broadcast %c12_i32_544 : i32 to vector<1x512xi32>
    %1073 = arith.cmpi sle, %1067, %1072 : vector<1x512xi32>
    %1074 = arith.andi %1071, %1073 : vector<1x512xi1>
    %c0_i32_545 = arith.constant 0 : i32
    %1075 = vector.broadcast %c0_i32_545 : i32 to vector<1x512xi32>
    %1076 = arith.cmpi sge, %1069, %1075 : vector<1x512xi32>
    %1077 = arith.andi %1074, %1076 : vector<1x512xi1>
    %c12_i32_546 = arith.constant 12 : i32
    %1078 = vector.broadcast %c12_i32_546 : i32 to vector<1x512xi32>
    %1079 = arith.cmpi sle, %1069, %1078 : vector<1x512xi32>
    %1080 = arith.andi %1077, %1079 : vector<1x512xi1>
    %cst_547 = arith.constant 0.000000e+00 : f32
    %1081 = vector.shape_cast %1080 : vector<1x512xi1> to vector<1x512xi1>
    %1082 = vector.broadcast %1081 : vector<1x512xi1> to vector<8x512xi1>
    %1083 = vector.broadcast %cst_547 : f32 to vector<8x512xf32>
    %1084 = arith.select %1082, %1065, %1083 : vector<8x512xi1>, vector<8x512xf32>
    %c56_548 = arith.constant 56 : index
    %c0_549 = arith.constant 0 : index
    %1085 = vector.load %arg9[%c56_548, %c0_549] : memref<72x512xf32, #tpu.memory_space<vmem>>, vector<8x512xf32>
    tpu.vector_store %arg9[%c56_548, %c0_549], %1084 {strides = array<i32>} : memref<72x512xf32, #tpu.memory_space<vmem>>, vector<8x512xf32>,
    %c0_550 = arith.constant 0 : index
    %c452_551 = arith.constant 452 : index
    %1086 = vector.load %arg8[%c0_550, %c452_551] : memref<8x1280xf32, #tpu.memory_space<vmem>>, vector<8x512xf32>
    %c4_i32_552 = arith.constant 4 : i32
    %1087 = vector.broadcast %c4_i32_552 : i32 to vector<1x512xi32>
    %1088 = arith.addi %0, %1087 : vector<1x512xi32>
    %c4_i32_553 = arith.constant 4 : i32
    %1089 = vector.broadcast %c4_i32_553 : i32 to vector<1x512xi32>
    %1090 = arith.addi %1, %1089 : vector<1x512xi32>
    %c0_i32_554 = arith.constant 0 : i32
    %1091 = vector.broadcast %c0_i32_554 : i32 to vector<1x512xi32>
    %1092 = arith.cmpi sge, %1088, %1091 : vector<1x512xi32>
    %c12_i32_555 = arith.constant 12 : i32
    %1093 = vector.broadcast %c12_i32_555 : i32 to vector<1x512xi32>
    %1094 = arith.cmpi sle, %1088, %1093 : vector<1x512xi32>
    %1095 = arith.andi %1092, %1094 : vector<1x512xi1>
    %c0_i32_556 = arith.constant 0 : i32
    %1096 = vector.broadcast %c0_i32_556 : i32 to vector<1x512xi32>
    %1097 = arith.cmpi sge, %1090, %1096 : vector<1x512xi32>
    %1098 = arith.andi %1095, %1097 : vector<1x512xi1>
    %c12_i32_557 = arith.constant 12 : i32
    %1099 = vector.broadcast %c12_i32_557 : i32 to vector<1x512xi32>
    %1100 = arith.cmpi sle, %1090, %1099 : vector<1x512xi32>
    %1101 = arith.andi %1098, %1100 : vector<1x512xi1>
    %cst_558 = arith.constant 0.000000e+00 : f32
    %1102 = vector.shape_cast %1101 : vector<1x512xi1> to vector<1x512xi1>
    %1103 = vector.broadcast %1102 : vector<1x512xi1> to vector<8x512xi1>
    %1104 = vector.broadcast %cst_558 : f32 to vector<8x512xf32>
    %1105 = arith.select %1103, %1086, %1104 : vector<8x512xi1>, vector<8x512xf32>
    %c64_559 = arith.constant 64 : index
    %c0_560 = arith.constant 0 : index
    %1106 = vector.load %arg9[%c64_559, %c0_560] : memref<72x512xf32, #tpu.memory_space<vmem>>, vector<8x512xf32>
    tpu.vector_store %arg9[%c64_559, %c0_560], %1105 {strides = array<i32>} : memref<72x512xf32, #tpu.memory_space<vmem>>, vector<8x512xf32>,
    %c4 = arith.constant 4 : index
    %c0_561 = arith.constant 0 : index
    %c0_562 = arith.constant 0 : index
    %1107 = vector.load %arg1[%c4, %c0_561, %c0_562] : memref<8x8x72xf32, #tpu.memory_space<vmem>>, vector<1x8x72xf32>
    %1108 = vector.shape_cast %1107 : vector<1x8x72xf32> to vector<8x72xf32>
    %c0_563 = arith.constant 0 : index
    %c0_564 = arith.constant 0 : index
    %1109 = vector.load %arg9[%c0_563, %c0_564] : memref<72x512xf32, #tpu.memory_space<vmem>>, vector<72x512xf32>
    %cst_565 = arith.constant dense<0.000000e+00> : vector<8x512xf32>
    %1110 = tpu.matmul %1108, %1109, %cst_565 {dimension_numbers = #tpu.dot_dimension_numbers<[1], [0], [0], [1], [0, 0, 1, 1], [], []>} : vector<8x72xf32>, vector<72x512xf32>, vector<8x512xf32> -> vector<8x512xf32>
    %c4_566 = arith.constant 4 : index
    %c0_567 = arith.constant 0 : index
    %c0_568 = arith.constant 0 : index
    %1111 = vector.load %arg2[%c4_566, %c0_567, %c0_568] : memref<8x8x1xf32, #tpu.memory_space<vmem>>, vector<1x8x1xf32>
    %1112 = vector.shape_cast %1111 : vector<1x8x1xf32> to vector<8x1xf32>
    %1113 = vector.broadcast %1112 : vector<8x1xf32> to vector<8x512xf32>
    %1114 = arith.addf %1110, %1113 : vector<8x512xf32>
    %cst_569 = arith.constant 0.000000e+00 : f32
    %1115 = vector.broadcast %cst_569 : f32 to vector<8x512xf32>
    %1116 = arith.maximumf %1114, %1115 : vector<8x512xf32>
    %c4_570 = arith.constant 4 : index
    %c0_571 = arith.constant 0 : index
    %c0_572 = arith.constant 0 : index
    %1117 = vector.load %arg3[%c4_570, %c0_571, %c0_572] : memref<8x8x1xf32, #tpu.memory_space<vmem>>, vector<1x8x1xf32>
    %1118 = vector.shape_cast %1117 : vector<1x8x1xf32> to vector<8x1xf32>
    %1119 = vector.broadcast %1118 : vector<8x1xf32> to vector<8x512xf32>
    %1120 = arith.mulf %1116, %1119 : vector<8x512xf32>
    %c4_573 = arith.constant 4 : index
    %c0_574 = arith.constant 0 : index
    %c0_575 = arith.constant 0 : index
    %1121 = vector.load %arg4[%c4_573, %c0_574, %c0_575] : memref<8x8x1xf32, #tpu.memory_space<vmem>>, vector<1x8x1xf32>
    %1122 = vector.shape_cast %1121 : vector<1x8x1xf32> to vector<8x1xf32>
    %1123 = vector.broadcast %1122 : vector<8x1xf32> to vector<8x512xf32>
    %1124 = arith.addf %1120, %1123 : vector<8x512xf32>
    %c7_i32 = arith.constant 7 : i32
    %1125 = vector.broadcast %c7_i32 : i32 to vector<1x512xi32>
    %1126 = arith.andi %0, %1125 : vector<1x512xi32>
    %c0_i32_576 = arith.constant 0 : i32
    %1127 = vector.broadcast %c0_i32_576 : i32 to vector<1x512xi32>
    %1128 = arith.cmpi eq, %1126, %1127 : vector<1x512xi32>
    %c8_i32 = arith.constant 8 : i32
    %1129 = vector.broadcast %c8_i32 : i32 to vector<1x512xi32>
    %1130 = arith.cmpi sle, %0, %1129 : vector<1x512xi32>
    %1131 = arith.andi %1128, %1130 : vector<1x512xi1>
    %c7_i32_577 = arith.constant 7 : i32
    %1132 = vector.broadcast %c7_i32_577 : i32 to vector<1x512xi32>
    %1133 = arith.andi %1, %1132 : vector<1x512xi32>
    %c0_i32_578 = arith.constant 0 : i32
    %1134 = vector.broadcast %c0_i32_578 : i32 to vector<1x512xi32>
    %1135 = arith.cmpi eq, %1133, %1134 : vector<1x512xi32>
    %1136 = arith.andi %1131, %1135 : vector<1x512xi1>
    %c8_i32_579 = arith.constant 8 : i32
    %1137 = vector.broadcast %c8_i32_579 : i32 to vector<1x512xi32>
    %1138 = arith.cmpi sle, %1, %1137 : vector<1x512xi32>
    %1139 = arith.andi %1136, %1138 : vector<1x512xi1>
    %cst_580 = arith.constant 0.000000e+00 : f32
    %1140 = vector.shape_cast %1139 : vector<1x512xi1> to vector<1x512xi1>
    %1141 = vector.broadcast %1140 : vector<1x512xi1> to vector<8x512xi1>
    %1142 = vector.broadcast %cst_580 : f32 to vector<8x512xf32>
    %1143 = arith.select %1141, %1124, %1142 : vector<8x512xi1>, vector<8x512xf32>
    %c0_581 = arith.constant 0 : index
    %c384_582 = arith.constant 384 : index
    %1144 = vector.load %arg8[%c0_581, %c384_582] : memref<8x1280xf32, #tpu.memory_space<vmem>>, vector<8x512xf32>
    tpu.vector_store %arg8[%c0_581, %c384_582], %1143 {strides = array<i32>} : memref<8x1280xf32, #tpu.memory_space<vmem>>, vector<8x512xf32>,
    %c0_583 = arith.constant 0 : index
    %c384_584 = arith.constant 384 : index
    %1145 = vector.load %arg8[%c0_583, %c384_584] : memref<8x1280xf32, #tpu.memory_space<vmem>>, vector<8x512xf32>
    %c0_585 = arith.constant 0 : index
    %c248 = arith.constant 248 : index
    %1146 = vector.load %arg8[%c0_585, %c248] : memref<8x1280xf32, #tpu.memory_space<vmem>>, vector<8x512xf32>
    %c-8_i32 = arith.constant -8 : i32
    %1147 = vector.broadcast %c-8_i32 : i32 to vector<1x512xi32>
    %1148 = arith.addi %0, %1147 : vector<1x512xi32>
    %c-8_i32_586 = arith.constant -8 : i32
    %1149 = vector.broadcast %c-8_i32_586 : i32 to vector<1x512xi32>
    %1150 = arith.addi %1, %1149 : vector<1x512xi32>
    %c0_i32_587 = arith.constant 0 : i32
    %1151 = vector.broadcast %c0_i32_587 : i32 to vector<1x512xi32>
    %1152 = arith.cmpi sge, %1148, %1151 : vector<1x512xi32>
    %c8_i32_588 = arith.constant 8 : i32
    %1153 = vector.broadcast %c8_i32_588 : i32 to vector<1x512xi32>
    %1154 = arith.cmpi sle, %1148, %1153 : vector<1x512xi32>
    %1155 = arith.andi %1152, %1154 : vector<1x512xi1>
    %c0_i32_589 = arith.constant 0 : i32
    %1156 = vector.broadcast %c0_i32_589 : i32 to vector<1x512xi32>
    %1157 = arith.cmpi sge, %1150, %1156 : vector<1x512xi32>
    %1158 = arith.andi %1155, %1157 : vector<1x512xi1>
    %c8_i32_590 = arith.constant 8 : i32
    %1159 = vector.broadcast %c8_i32_590 : i32 to vector<1x512xi32>
    %1160 = arith.cmpi sle, %1150, %1159 : vector<1x512xi32>
    %1161 = arith.andi %1158, %1160 : vector<1x512xi1>
    %cst_591 = arith.constant 0.000000e+00 : f32
    %1162 = vector.shape_cast %1161 : vector<1x512xi1> to vector<1x512xi1>
    %1163 = vector.broadcast %1162 : vector<1x512xi1> to vector<8x512xi1>
    %1164 = vector.broadcast %cst_591 : f32 to vector<8x512xf32>
    %1165 = arith.select %1163, %1146, %1164 : vector<8x512xi1>, vector<8x512xf32>
    %c0_592 = arith.constant 0 : index
    %c0_593 = arith.constant 0 : index
    %1166 = vector.load %arg9[%c0_592, %c0_593] : memref<72x512xf32, #tpu.memory_space<vmem>>, vector<8x512xf32>
    tpu.vector_store %arg9[%c0_592, %c0_593], %1165 {strides = array<i32>} : memref<72x512xf32, #tpu.memory_space<vmem>>, vector<8x512xf32>,
    %c0_594 = arith.constant 0 : index
    %c256 = arith.constant 256 : index
    %1167 = vector.load %arg8[%c0_594, %c256] : memref<8x1280xf32, #tpu.memory_space<vmem>>, vector<8x512xf32>
    %c-8_i32_595 = arith.constant -8 : i32
    %1168 = vector.broadcast %c-8_i32_595 : i32 to vector<1x512xi32>
    %1169 = arith.addi %0, %1168 : vector<1x512xi32>
    %c0_i32_596 = arith.constant 0 : i32
    %1170 = vector.broadcast %c0_i32_596 : i32 to vector<1x512xi32>
    %1171 = arith.addi %1, %1170 : vector<1x512xi32>
    %c0_i32_597 = arith.constant 0 : i32
    %1172 = vector.broadcast %c0_i32_597 : i32 to vector<1x512xi32>
    %1173 = arith.cmpi sge, %1169, %1172 : vector<1x512xi32>
    %c8_i32_598 = arith.constant 8 : i32
    %1174 = vector.broadcast %c8_i32_598 : i32 to vector<1x512xi32>
    %1175 = arith.cmpi sle, %1169, %1174 : vector<1x512xi32>
    %1176 = arith.andi %1173, %1175 : vector<1x512xi1>
    %c0_i32_599 = arith.constant 0 : i32
    %1177 = vector.broadcast %c0_i32_599 : i32 to vector<1x512xi32>
    %1178 = arith.cmpi sge, %1171, %1177 : vector<1x512xi32>
    %1179 = arith.andi %1176, %1178 : vector<1x512xi1>
    %c8_i32_600 = arith.constant 8 : i32
    %1180 = vector.broadcast %c8_i32_600 : i32 to vector<1x512xi32>
    %1181 = arith.cmpi sle, %1171, %1180 : vector<1x512xi32>
    %1182 = arith.andi %1179, %1181 : vector<1x512xi1>
    %cst_601 = arith.constant 0.000000e+00 : f32
    %1183 = vector.shape_cast %1182 : vector<1x512xi1> to vector<1x512xi1>
    %1184 = vector.broadcast %1183 : vector<1x512xi1> to vector<8x512xi1>
    %1185 = vector.broadcast %cst_601 : f32 to vector<8x512xf32>
    %1186 = arith.select %1184, %1167, %1185 : vector<8x512xi1>, vector<8x512xf32>
    %c8_602 = arith.constant 8 : index
    %c0_603 = arith.constant 0 : index
    %1187 = vector.load %arg9[%c8_602, %c0_603] : memref<72x512xf32, #tpu.memory_space<vmem>>, vector<8x512xf32>
    tpu.vector_store %arg9[%c8_602, %c0_603], %1186 {strides = array<i32>} : memref<72x512xf32, #tpu.memory_space<vmem>>, vector<8x512xf32>,
    %c0_604 = arith.constant 0 : index
    %c264 = arith.constant 264 : index
    %1188 = vector.load %arg8[%c0_604, %c264] : memref<8x1280xf32, #tpu.memory_space<vmem>>, vector<8x512xf32>
    %c-8_i32_605 = arith.constant -8 : i32
    %1189 = vector.broadcast %c-8_i32_605 : i32 to vector<1x512xi32>
    %1190 = arith.addi %0, %1189 : vector<1x512xi32>
    %c8_i32_606 = arith.constant 8 : i32
    %1191 = vector.broadcast %c8_i32_606 : i32 to vector<1x512xi32>
    %1192 = arith.addi %1, %1191 : vector<1x512xi32>
    %c0_i32_607 = arith.constant 0 : i32
    %1193 = vector.broadcast %c0_i32_607 : i32 to vector<1x512xi32>
    %1194 = arith.cmpi sge, %1190, %1193 : vector<1x512xi32>
    %c8_i32_608 = arith.constant 8 : i32
    %1195 = vector.broadcast %c8_i32_608 : i32 to vector<1x512xi32>
    %1196 = arith.cmpi sle, %1190, %1195 : vector<1x512xi32>
    %1197 = arith.andi %1194, %1196 : vector<1x512xi1>
    %c0_i32_609 = arith.constant 0 : i32
    %1198 = vector.broadcast %c0_i32_609 : i32 to vector<1x512xi32>
    %1199 = arith.cmpi sge, %1192, %1198 : vector<1x512xi32>
    %1200 = arith.andi %1197, %1199 : vector<1x512xi1>
    %c8_i32_610 = arith.constant 8 : i32
    %1201 = vector.broadcast %c8_i32_610 : i32 to vector<1x512xi32>
    %1202 = arith.cmpi sle, %1192, %1201 : vector<1x512xi32>
    %1203 = arith.andi %1200, %1202 : vector<1x512xi1>
    %cst_611 = arith.constant 0.000000e+00 : f32
    %1204 = vector.shape_cast %1203 : vector<1x512xi1> to vector<1x512xi1>
    %1205 = vector.broadcast %1204 : vector<1x512xi1> to vector<8x512xi1>
    %1206 = vector.broadcast %cst_611 : f32 to vector<8x512xf32>
    %1207 = arith.select %1205, %1188, %1206 : vector<8x512xi1>, vector<8x512xf32>
    %c16_612 = arith.constant 16 : index
    %c0_613 = arith.constant 0 : index
    %1208 = vector.load %arg9[%c16_612, %c0_613] : memref<72x512xf32, #tpu.memory_space<vmem>>, vector<8x512xf32>
    tpu.vector_store %arg9[%c16_612, %c0_613], %1207 {strides = array<i32>} : memref<72x512xf32, #tpu.memory_space<vmem>>, vector<8x512xf32>,
    %c0_614 = arith.constant 0 : index
    %c376 = arith.constant 376 : index
    %1209 = vector.load %arg8[%c0_614, %c376] : memref<8x1280xf32, #tpu.memory_space<vmem>>, vector<8x512xf32>
    %c0_i32_615 = arith.constant 0 : i32
    %1210 = vector.broadcast %c0_i32_615 : i32 to vector<1x512xi32>
    %1211 = arith.addi %0, %1210 : vector<1x512xi32>
    %c-8_i32_616 = arith.constant -8 : i32
    %1212 = vector.broadcast %c-8_i32_616 : i32 to vector<1x512xi32>
    %1213 = arith.addi %1, %1212 : vector<1x512xi32>
    %c0_i32_617 = arith.constant 0 : i32
    %1214 = vector.broadcast %c0_i32_617 : i32 to vector<1x512xi32>
    %1215 = arith.cmpi sge, %1211, %1214 : vector<1x512xi32>
    %c8_i32_618 = arith.constant 8 : i32
    %1216 = vector.broadcast %c8_i32_618 : i32 to vector<1x512xi32>
    %1217 = arith.cmpi sle, %1211, %1216 : vector<1x512xi32>
    %1218 = arith.andi %1215, %1217 : vector<1x512xi1>
    %c0_i32_619 = arith.constant 0 : i32
    %1219 = vector.broadcast %c0_i32_619 : i32 to vector<1x512xi32>
    %1220 = arith.cmpi sge, %1213, %1219 : vector<1x512xi32>
    %1221 = arith.andi %1218, %1220 : vector<1x512xi1>
    %c8_i32_620 = arith.constant 8 : i32
    %1222 = vector.broadcast %c8_i32_620 : i32 to vector<1x512xi32>
    %1223 = arith.cmpi sle, %1213, %1222 : vector<1x512xi32>
    %1224 = arith.andi %1221, %1223 : vector<1x512xi1>
    %cst_621 = arith.constant 0.000000e+00 : f32
    %1225 = vector.shape_cast %1224 : vector<1x512xi1> to vector<1x512xi1>
    %1226 = vector.broadcast %1225 : vector<1x512xi1> to vector<8x512xi1>
    %1227 = vector.broadcast %cst_621 : f32 to vector<8x512xf32>
    %1228 = arith.select %1226, %1209, %1227 : vector<8x512xi1>, vector<8x512xf32>
    %c24_622 = arith.constant 24 : index
    %c0_623 = arith.constant 0 : index
    %1229 = vector.load %arg9[%c24_622, %c0_623] : memref<72x512xf32, #tpu.memory_space<vmem>>, vector<8x512xf32>
    tpu.vector_store %arg9[%c24_622, %c0_623], %1228 {strides = array<i32>} : memref<72x512xf32, #tpu.memory_space<vmem>>, vector<8x512xf32>,
    %c0_624 = arith.constant 0 : index
    %c384_625 = arith.constant 384 : index
    %1230 = vector.load %arg8[%c0_624, %c384_625] : memref<8x1280xf32, #tpu.memory_space<vmem>>, vector<8x512xf32>
    %c0_i32_626 = arith.constant 0 : i32
    %1231 = vector.broadcast %c0_i32_626 : i32 to vector<1x512xi32>
    %1232 = arith.addi %0, %1231 : vector<1x512xi32>
    %c0_i32_627 = arith.constant 0 : i32
    %1233 = vector.broadcast %c0_i32_627 : i32 to vector<1x512xi32>
    %1234 = arith.addi %1, %1233 : vector<1x512xi32>
    %c0_i32_628 = arith.constant 0 : i32
    %1235 = vector.broadcast %c0_i32_628 : i32 to vector<1x512xi32>
    %1236 = arith.cmpi sge, %1232, %1235 : vector<1x512xi32>
    %c8_i32_629 = arith.constant 8 : i32
    %1237 = vector.broadcast %c8_i32_629 : i32 to vector<1x512xi32>
    %1238 = arith.cmpi sle, %1232, %1237 : vector<1x512xi32>
    %1239 = arith.andi %1236, %1238 : vector<1x512xi1>
    %c0_i32_630 = arith.constant 0 : i32
    %1240 = vector.broadcast %c0_i32_630 : i32 to vector<1x512xi32>
    %1241 = arith.cmpi sge, %1234, %1240 : vector<1x512xi32>
    %1242 = arith.andi %1239, %1241 : vector<1x512xi1>
    %c8_i32_631 = arith.constant 8 : i32
    %1243 = vector.broadcast %c8_i32_631 : i32 to vector<1x512xi32>
    %1244 = arith.cmpi sle, %1234, %1243 : vector<1x512xi32>
    %1245 = arith.andi %1242, %1244 : vector<1x512xi1>
    %cst_632 = arith.constant 0.000000e+00 : f32
    %1246 = vector.shape_cast %1245 : vector<1x512xi1> to vector<1x512xi1>
    %1247 = vector.broadcast %1246 : vector<1x512xi1> to vector<8x512xi1>
    %1248 = vector.broadcast %cst_632 : f32 to vector<8x512xf32>
    %1249 = arith.select %1247, %1230, %1248 : vector<8x512xi1>, vector<8x512xf32>
    %c32_633 = arith.constant 32 : index
    %c0_634 = arith.constant 0 : index
    %1250 = vector.load %arg9[%c32_633, %c0_634] : memref<72x512xf32, #tpu.memory_space<vmem>>, vector<8x512xf32>
    tpu.vector_store %arg9[%c32_633, %c0_634], %1249 {strides = array<i32>} : memref<72x512xf32, #tpu.memory_space<vmem>>, vector<8x512xf32>,
    %c0_635 = arith.constant 0 : index
    %c392 = arith.constant 392 : index
    %1251 = vector.load %arg8[%c0_635, %c392] : memref<8x1280xf32, #tpu.memory_space<vmem>>, vector<8x512xf32>
    %c0_i32_636 = arith.constant 0 : i32
    %1252 = vector.broadcast %c0_i32_636 : i32 to vector<1x512xi32>
    %1253 = arith.addi %0, %1252 : vector<1x512xi32>
    %c8_i32_637 = arith.constant 8 : i32
    %1254 = vector.broadcast %c8_i32_637 : i32 to vector<1x512xi32>
    %1255 = arith.addi %1, %1254 : vector<1x512xi32>
    %c0_i32_638 = arith.constant 0 : i32
    %1256 = vector.broadcast %c0_i32_638 : i32 to vector<1x512xi32>
    %1257 = arith.cmpi sge, %1253, %1256 : vector<1x512xi32>
    %c8_i32_639 = arith.constant 8 : i32
    %1258 = vector.broadcast %c8_i32_639 : i32 to vector<1x512xi32>
    %1259 = arith.cmpi sle, %1253, %1258 : vector<1x512xi32>
    %1260 = arith.andi %1257, %1259 : vector<1x512xi1>
    %c0_i32_640 = arith.constant 0 : i32
    %1261 = vector.broadcast %c0_i32_640 : i32 to vector<1x512xi32>
    %1262 = arith.cmpi sge, %1255, %1261 : vector<1x512xi32>
    %1263 = arith.andi %1260, %1262 : vector<1x512xi1>
    %c8_i32_641 = arith.constant 8 : i32
    %1264 = vector.broadcast %c8_i32_641 : i32 to vector<1x512xi32>
    %1265 = arith.cmpi sle, %1255, %1264 : vector<1x512xi32>
    %1266 = arith.andi %1263, %1265 : vector<1x512xi1>
    %cst_642 = arith.constant 0.000000e+00 : f32
    %1267 = vector.shape_cast %1266 : vector<1x512xi1> to vector<1x512xi1>
    %1268 = vector.broadcast %1267 : vector<1x512xi1> to vector<8x512xi1>
    %1269 = vector.broadcast %cst_642 : f32 to vector<8x512xf32>
    %1270 = arith.select %1268, %1251, %1269 : vector<8x512xi1>, vector<8x512xf32>
    %c40_643 = arith.constant 40 : index
    %c0_644 = arith.constant 0 : index
    %1271 = vector.load %arg9[%c40_643, %c0_644] : memref<72x512xf32, #tpu.memory_space<vmem>>, vector<8x512xf32>
    tpu.vector_store %arg9[%c40_643, %c0_644], %1270 {strides = array<i32>} : memref<72x512xf32, #tpu.memory_space<vmem>>, vector<8x512xf32>,
    %c0_645 = arith.constant 0 : index
    %c504 = arith.constant 504 : index
    %1272 = vector.load %arg8[%c0_645, %c504] : memref<8x1280xf32, #tpu.memory_space<vmem>>, vector<8x512xf32>
    %c8_i32_646 = arith.constant 8 : i32
    %1273 = vector.broadcast %c8_i32_646 : i32 to vector<1x512xi32>
    %1274 = arith.addi %0, %1273 : vector<1x512xi32>
    %c-8_i32_647 = arith.constant -8 : i32
    %1275 = vector.broadcast %c-8_i32_647 : i32 to vector<1x512xi32>
    %1276 = arith.addi %1, %1275 : vector<1x512xi32>
    %c0_i32_648 = arith.constant 0 : i32
    %1277 = vector.broadcast %c0_i32_648 : i32 to vector<1x512xi32>
    %1278 = arith.cmpi sge, %1274, %1277 : vector<1x512xi32>
    %c8_i32_649 = arith.constant 8 : i32
    %1279 = vector.broadcast %c8_i32_649 : i32 to vector<1x512xi32>
    %1280 = arith.cmpi sle, %1274, %1279 : vector<1x512xi32>
    %1281 = arith.andi %1278, %1280 : vector<1x512xi1>
    %c0_i32_650 = arith.constant 0 : i32
    %1282 = vector.broadcast %c0_i32_650 : i32 to vector<1x512xi32>
    %1283 = arith.cmpi sge, %1276, %1282 : vector<1x512xi32>
    %1284 = arith.andi %1281, %1283 : vector<1x512xi1>
    %c8_i32_651 = arith.constant 8 : i32
    %1285 = vector.broadcast %c8_i32_651 : i32 to vector<1x512xi32>
    %1286 = arith.cmpi sle, %1276, %1285 : vector<1x512xi32>
    %1287 = arith.andi %1284, %1286 : vector<1x512xi1>
    %cst_652 = arith.constant 0.000000e+00 : f32
    %1288 = vector.shape_cast %1287 : vector<1x512xi1> to vector<1x512xi1>
    %1289 = vector.broadcast %1288 : vector<1x512xi1> to vector<8x512xi1>
    %1290 = vector.broadcast %cst_652 : f32 to vector<8x512xf32>
    %1291 = arith.select %1289, %1272, %1290 : vector<8x512xi1>, vector<8x512xf32>
    %c48_653 = arith.constant 48 : index
    %c0_654 = arith.constant 0 : index
    %1292 = vector.load %arg9[%c48_653, %c0_654] : memref<72x512xf32, #tpu.memory_space<vmem>>, vector<8x512xf32>
    tpu.vector_store %arg9[%c48_653, %c0_654], %1291 {strides = array<i32>} : memref<72x512xf32, #tpu.memory_space<vmem>>, vector<8x512xf32>,
    %c0_655 = arith.constant 0 : index
    %c512 = arith.constant 512 : index
    %1293 = vector.load %arg8[%c0_655, %c512] : memref<8x1280xf32, #tpu.memory_space<vmem>>, vector<8x512xf32>
    %c8_i32_656 = arith.constant 8 : i32
    %1294 = vector.broadcast %c8_i32_656 : i32 to vector<1x512xi32>
    %1295 = arith.addi %0, %1294 : vector<1x512xi32>
    %c0_i32_657 = arith.constant 0 : i32
    %1296 = vector.broadcast %c0_i32_657 : i32 to vector<1x512xi32>
    %1297 = arith.addi %1, %1296 : vector<1x512xi32>
    %c0_i32_658 = arith.constant 0 : i32
    %1298 = vector.broadcast %c0_i32_658 : i32 to vector<1x512xi32>
    %1299 = arith.cmpi sge, %1295, %1298 : vector<1x512xi32>
    %c8_i32_659 = arith.constant 8 : i32
    %1300 = vector.broadcast %c8_i32_659 : i32 to vector<1x512xi32>
    %1301 = arith.cmpi sle, %1295, %1300 : vector<1x512xi32>
    %1302 = arith.andi %1299, %1301 : vector<1x512xi1>
    %c0_i32_660 = arith.constant 0 : i32
    %1303 = vector.broadcast %c0_i32_660 : i32 to vector<1x512xi32>
    %1304 = arith.cmpi sge, %1297, %1303 : vector<1x512xi32>
    %1305 = arith.andi %1302, %1304 : vector<1x512xi1>
    %c8_i32_661 = arith.constant 8 : i32
    %1306 = vector.broadcast %c8_i32_661 : i32 to vector<1x512xi32>
    %1307 = arith.cmpi sle, %1297, %1306 : vector<1x512xi32>
    %1308 = arith.andi %1305, %1307 : vector<1x512xi1>
    %cst_662 = arith.constant 0.000000e+00 : f32
    %1309 = vector.shape_cast %1308 : vector<1x512xi1> to vector<1x512xi1>
    %1310 = vector.broadcast %1309 : vector<1x512xi1> to vector<8x512xi1>
    %1311 = vector.broadcast %cst_662 : f32 to vector<8x512xf32>
    %1312 = arith.select %1310, %1293, %1311 : vector<8x512xi1>, vector<8x512xf32>
    %c56_663 = arith.constant 56 : index
    %c0_664 = arith.constant 0 : index
    %1313 = vector.load %arg9[%c56_663, %c0_664] : memref<72x512xf32, #tpu.memory_space<vmem>>, vector<8x512xf32>
    tpu.vector_store %arg9[%c56_663, %c0_664], %1312 {strides = array<i32>} : memref<72x512xf32, #tpu.memory_space<vmem>>, vector<8x512xf32>,
    %c0_665 = arith.constant 0 : index
    %c520 = arith.constant 520 : index
    %1314 = vector.load %arg8[%c0_665, %c520] : memref<8x1280xf32, #tpu.memory_space<vmem>>, vector<8x512xf32>
    %c8_i32_666 = arith.constant 8 : i32
    %1315 = vector.broadcast %c8_i32_666 : i32 to vector<1x512xi32>
    %1316 = arith.addi %0, %1315 : vector<1x512xi32>
    %c8_i32_667 = arith.constant 8 : i32
    %1317 = vector.broadcast %c8_i32_667 : i32 to vector<1x512xi32>
    %1318 = arith.addi %1, %1317 : vector<1x512xi32>
    %c0_i32_668 = arith.constant 0 : i32
    %1319 = vector.broadcast %c0_i32_668 : i32 to vector<1x512xi32>
    %1320 = arith.cmpi sge, %1316, %1319 : vector<1x512xi32>
    %c8_i32_669 = arith.constant 8 : i32
    %1321 = vector.broadcast %c8_i32_669 : i32 to vector<1x512xi32>
    %1322 = arith.cmpi sle, %1316, %1321 : vector<1x512xi32>
    %1323 = arith.andi %1320, %1322 : vector<1x512xi1>
    %c0_i32_670 = arith.constant 0 : i32
    %1324 = vector.broadcast %c0_i32_670 : i32 to vector<1x512xi32>
    %1325 = arith.cmpi sge, %1318, %1324 : vector<1x512xi32>
    %1326 = arith.andi %1323, %1325 : vector<1x512xi1>
    %c8_i32_671 = arith.constant 8 : i32
    %1327 = vector.broadcast %c8_i32_671 : i32 to vector<1x512xi32>
    %1328 = arith.cmpi sle, %1318, %1327 : vector<1x512xi32>
    %1329 = arith.andi %1326, %1328 : vector<1x512xi1>
    %cst_672 = arith.constant 0.000000e+00 : f32
    %1330 = vector.shape_cast %1329 : vector<1x512xi1> to vector<1x512xi1>
    %1331 = vector.broadcast %1330 : vector<1x512xi1> to vector<8x512xi1>
    %1332 = vector.broadcast %cst_672 : f32 to vector<8x512xf32>
    %1333 = arith.select %1331, %1314, %1332 : vector<8x512xi1>, vector<8x512xf32>
    %c64_673 = arith.constant 64 : index
    %c0_674 = arith.constant 0 : index
    %1334 = vector.load %arg9[%c64_673, %c0_674] : memref<72x512xf32, #tpu.memory_space<vmem>>, vector<8x512xf32>
    tpu.vector_store %arg9[%c64_673, %c0_674], %1333 {strides = array<i32>} : memref<72x512xf32, #tpu.memory_space<vmem>>, vector<8x512xf32>,
    %c5 = arith.constant 5 : index
    %c0_675 = arith.constant 0 : index
    %c0_676 = arith.constant 0 : index
    %1335 = vector.load %arg1[%c5, %c0_675, %c0_676] : memref<8x8x72xf32, #tpu.memory_space<vmem>>, vector<1x8x72xf32>
    %1336 = vector.shape_cast %1335 : vector<1x8x72xf32> to vector<8x72xf32>
    %c0_677 = arith.constant 0 : index
    %c0_678 = arith.constant 0 : index
    %1337 = vector.load %arg9[%c0_677, %c0_678] : memref<72x512xf32, #tpu.memory_space<vmem>>, vector<72x512xf32>
    %cst_679 = arith.constant dense<0.000000e+00> : vector<8x512xf32>
    %1338 = tpu.matmul %1336, %1337, %cst_679 {dimension_numbers = #tpu.dot_dimension_numbers<[1], [0], [0], [1], [0, 0, 1, 1], [], []>} : vector<8x72xf32>, vector<72x512xf32>, vector<8x512xf32> -> vector<8x512xf32>
    %c5_680 = arith.constant 5 : index
    %c0_681 = arith.constant 0 : index
    %c0_682 = arith.constant 0 : index
    %1339 = vector.load %arg2[%c5_680, %c0_681, %c0_682] : memref<8x8x1xf32, #tpu.memory_space<vmem>>, vector<1x8x1xf32>
    %1340 = vector.shape_cast %1339 : vector<1x8x1xf32> to vector<8x1xf32>
    %1341 = vector.broadcast %1340 : vector<8x1xf32> to vector<8x512xf32>
    %1342 = arith.addf %1338, %1341 : vector<8x512xf32>
    %cst_683 = arith.constant 0.000000e+00 : f32
    %1343 = vector.broadcast %cst_683 : f32 to vector<8x512xf32>
    %1344 = arith.maximumf %1342, %1343 : vector<8x512xf32>
    %c5_684 = arith.constant 5 : index
    %c0_685 = arith.constant 0 : index
    %c0_686 = arith.constant 0 : index
    %1345 = vector.load %arg3[%c5_684, %c0_685, %c0_686] : memref<8x8x1xf32, #tpu.memory_space<vmem>>, vector<1x8x1xf32>
    %1346 = vector.shape_cast %1345 : vector<1x8x1xf32> to vector<8x1xf32>
    %1347 = vector.broadcast %1346 : vector<8x1xf32> to vector<8x512xf32>
    %1348 = arith.mulf %1344, %1347 : vector<8x512xf32>
    %c5_687 = arith.constant 5 : index
    %c0_688 = arith.constant 0 : index
    %c0_689 = arith.constant 0 : index
    %1349 = vector.load %arg4[%c5_687, %c0_688, %c0_689] : memref<8x8x1xf32, #tpu.memory_space<vmem>>, vector<1x8x1xf32>
    %1350 = vector.shape_cast %1349 : vector<1x8x1xf32> to vector<8x1xf32>
    %1351 = vector.broadcast %1350 : vector<8x1xf32> to vector<8x512xf32>
    %1352 = arith.addf %1348, %1351 : vector<8x512xf32>
    %c7_i32_690 = arith.constant 7 : i32
    %1353 = vector.broadcast %c7_i32_690 : i32 to vector<1x512xi32>
    %1354 = arith.andi %0, %1353 : vector<1x512xi32>
    %c0_i32_691 = arith.constant 0 : i32
    %1355 = vector.broadcast %c0_i32_691 : i32 to vector<1x512xi32>
    %1356 = arith.cmpi eq, %1354, %1355 : vector<1x512xi32>
    %c8_i32_692 = arith.constant 8 : i32
    %1357 = vector.broadcast %c8_i32_692 : i32 to vector<1x512xi32>
    %1358 = arith.cmpi sle, %0, %1357 : vector<1x512xi32>
    %1359 = arith.andi %1356, %1358 : vector<1x512xi1>
    %c7_i32_693 = arith.constant 7 : i32
    %1360 = vector.broadcast %c7_i32_693 : i32 to vector<1x512xi32>
    %1361 = arith.andi %1, %1360 : vector<1x512xi32>
    %c0_i32_694 = arith.constant 0 : i32
    %1362 = vector.broadcast %c0_i32_694 : i32 to vector<1x512xi32>
    %1363 = arith.cmpi eq, %1361, %1362 : vector<1x512xi32>
    %1364 = arith.andi %1359, %1363 : vector<1x512xi1>
    %c8_i32_695 = arith.constant 8 : i32
    %1365 = vector.broadcast %c8_i32_695 : i32 to vector<1x512xi32>
    %1366 = arith.cmpi sle, %1, %1365 : vector<1x512xi32>
    %1367 = arith.andi %1364, %1366 : vector<1x512xi1>
    %cst_696 = arith.constant 0.000000e+00 : f32
    %1368 = vector.shape_cast %1367 : vector<1x512xi1> to vector<1x512xi1>
    %1369 = vector.broadcast %1368 : vector<1x512xi1> to vector<8x512xi1>
    %1370 = vector.broadcast %cst_696 : f32 to vector<8x512xf32>
    %1371 = arith.select %1369, %1352, %1370 : vector<8x512xi1>, vector<8x512xf32>
    %1372 = arith.addf %1371, %1145 : vector<8x512xf32>
    %c0_697 = arith.constant 0 : index
    %c384_698 = arith.constant 384 : index
    %1373 = vector.load %arg8[%c0_697, %c384_698] : memref<8x1280xf32, #tpu.memory_space<vmem>>, vector<8x512xf32>
    tpu.vector_store %arg8[%c0_697, %c384_698], %1372 {strides = array<i32>} : memref<8x1280xf32, #tpu.memory_space<vmem>>, vector<8x512xf32>,
    %c0_699 = arith.constant 0 : index
    %c248_700 = arith.constant 248 : index
    %1374 = vector.load %arg8[%c0_699, %c248_700] : memref<8x1280xf32, #tpu.memory_space<vmem>>, vector<8x512xf32>
    %c-8_i32_701 = arith.constant -8 : i32
    %1375 = vector.broadcast %c-8_i32_701 : i32 to vector<1x512xi32>
    %1376 = arith.addi %0, %1375 : vector<1x512xi32>
    %c-8_i32_702 = arith.constant -8 : i32
    %1377 = vector.broadcast %c-8_i32_702 : i32 to vector<1x512xi32>
    %1378 = arith.addi %1, %1377 : vector<1x512xi32>
    %c0_i32_703 = arith.constant 0 : i32
    %1379 = vector.broadcast %c0_i32_703 : i32 to vector<1x512xi32>
    %1380 = arith.cmpi sge, %1376, %1379 : vector<1x512xi32>
    %c8_i32_704 = arith.constant 8 : i32
    %1381 = vector.broadcast %c8_i32_704 : i32 to vector<1x512xi32>
    %1382 = arith.cmpi sle, %1376, %1381 : vector<1x512xi32>
    %1383 = arith.andi %1380, %1382 : vector<1x512xi1>
    %c0_i32_705 = arith.constant 0 : i32
    %1384 = vector.broadcast %c0_i32_705 : i32 to vector<1x512xi32>
    %1385 = arith.cmpi sge, %1378, %1384 : vector<1x512xi32>
    %1386 = arith.andi %1383, %1385 : vector<1x512xi1>
    %c8_i32_706 = arith.constant 8 : i32
    %1387 = vector.broadcast %c8_i32_706 : i32 to vector<1x512xi32>
    %1388 = arith.cmpi sle, %1378, %1387 : vector<1x512xi32>
    %1389 = arith.andi %1386, %1388 : vector<1x512xi1>
    %cst_707 = arith.constant 0.000000e+00 : f32
    %1390 = vector.shape_cast %1389 : vector<1x512xi1> to vector<1x512xi1>
    %1391 = vector.broadcast %1390 : vector<1x512xi1> to vector<8x512xi1>
    %1392 = vector.broadcast %cst_707 : f32 to vector<8x512xf32>
    %1393 = arith.select %1391, %1374, %1392 : vector<8x512xi1>, vector<8x512xf32>
    %c0_708 = arith.constant 0 : index
    %c0_709 = arith.constant 0 : index
    %1394 = vector.load %arg9[%c0_708, %c0_709] : memref<72x512xf32, #tpu.memory_space<vmem>>, vector<8x512xf32>
    tpu.vector_store %arg9[%c0_708, %c0_709], %1393 {strides = array<i32>} : memref<72x512xf32, #tpu.memory_space<vmem>>, vector<8x512xf32>,
    %c0_710 = arith.constant 0 : index
    %c256_711 = arith.constant 256 : index
    %1395 = vector.load %arg8[%c0_710, %c256_711] : memref<8x1280xf32, #tpu.memory_space<vmem>>, vector<8x512xf32>
    %c-8_i32_712 = arith.constant -8 : i32
    %1396 = vector.broadcast %c-8_i32_712 : i32 to vector<1x512xi32>
    %1397 = arith.addi %0, %1396 : vector<1x512xi32>
    %c0_i32_713 = arith.constant 0 : i32
    %1398 = vector.broadcast %c0_i32_713 : i32 to vector<1x512xi32>
    %1399 = arith.addi %1, %1398 : vector<1x512xi32>
    %c0_i32_714 = arith.constant 0 : i32
    %1400 = vector.broadcast %c0_i32_714 : i32 to vector<1x512xi32>
    %1401 = arith.cmpi sge, %1397, %1400 : vector<1x512xi32>
    %c8_i32_715 = arith.constant 8 : i32
    %1402 = vector.broadcast %c8_i32_715 : i32 to vector<1x512xi32>
    %1403 = arith.cmpi sle, %1397, %1402 : vector<1x512xi32>
    %1404 = arith.andi %1401, %1403 : vector<1x512xi1>
    %c0_i32_716 = arith.constant 0 : i32
    %1405 = vector.broadcast %c0_i32_716 : i32 to vector<1x512xi32>
    %1406 = arith.cmpi sge, %1399, %1405 : vector<1x512xi32>
    %1407 = arith.andi %1404, %1406 : vector<1x512xi1>
    %c8_i32_717 = arith.constant 8 : i32
    %1408 = vector.broadcast %c8_i32_717 : i32 to vector<1x512xi32>
    %1409 = arith.cmpi sle, %1399, %1408 : vector<1x512xi32>
    %1410 = arith.andi %1407, %1409 : vector<1x512xi1>
    %cst_718 = arith.constant 0.000000e+00 : f32
    %1411 = vector.shape_cast %1410 : vector<1x512xi1> to vector<1x512xi1>
    %1412 = vector.broadcast %1411 : vector<1x512xi1> to vector<8x512xi1>
    %1413 = vector.broadcast %cst_718 : f32 to vector<8x512xf32>
    %1414 = arith.select %1412, %1395, %1413 : vector<8x512xi1>, vector<8x512xf32>
    %c8_719 = arith.constant 8 : index
    %c0_720 = arith.constant 0 : index
    %1415 = vector.load %arg9[%c8_719, %c0_720] : memref<72x512xf32, #tpu.memory_space<vmem>>, vector<8x512xf32>
    tpu.vector_store %arg9[%c8_719, %c0_720], %1414 {strides = array<i32>} : memref<72x512xf32, #tpu.memory_space<vmem>>, vector<8x512xf32>,
    %c0_721 = arith.constant 0 : index
    %c264_722 = arith.constant 264 : index
    %1416 = vector.load %arg8[%c0_721, %c264_722] : memref<8x1280xf32, #tpu.memory_space<vmem>>, vector<8x512xf32>
    %c-8_i32_723 = arith.constant -8 : i32
    %1417 = vector.broadcast %c-8_i32_723 : i32 to vector<1x512xi32>
    %1418 = arith.addi %0, %1417 : vector<1x512xi32>
    %c8_i32_724 = arith.constant 8 : i32
    %1419 = vector.broadcast %c8_i32_724 : i32 to vector<1x512xi32>
    %1420 = arith.addi %1, %1419 : vector<1x512xi32>
    %c0_i32_725 = arith.constant 0 : i32
    %1421 = vector.broadcast %c0_i32_725 : i32 to vector<1x512xi32>
    %1422 = arith.cmpi sge, %1418, %1421 : vector<1x512xi32>
    %c8_i32_726 = arith.constant 8 : i32
    %1423 = vector.broadcast %c8_i32_726 : i32 to vector<1x512xi32>
    %1424 = arith.cmpi sle, %1418, %1423 : vector<1x512xi32>
    %1425 = arith.andi %1422, %1424 : vector<1x512xi1>
    %c0_i32_727 = arith.constant 0 : i32
    %1426 = vector.broadcast %c0_i32_727 : i32 to vector<1x512xi32>
    %1427 = arith.cmpi sge, %1420, %1426 : vector<1x512xi32>
    %1428 = arith.andi %1425, %1427 : vector<1x512xi1>
    %c8_i32_728 = arith.constant 8 : i32
    %1429 = vector.broadcast %c8_i32_728 : i32 to vector<1x512xi32>
    %1430 = arith.cmpi sle, %1420, %1429 : vector<1x512xi32>
    %1431 = arith.andi %1428, %1430 : vector<1x512xi1>
    %cst_729 = arith.constant 0.000000e+00 : f32
    %1432 = vector.shape_cast %1431 : vector<1x512xi1> to vector<1x512xi1>
    %1433 = vector.broadcast %1432 : vector<1x512xi1> to vector<8x512xi1>
    %1434 = vector.broadcast %cst_729 : f32 to vector<8x512xf32>
    %1435 = arith.select %1433, %1416, %1434 : vector<8x512xi1>, vector<8x512xf32>
    %c16_730 = arith.constant 16 : index
    %c0_731 = arith.constant 0 : index
    %1436 = vector.load %arg9[%c16_730, %c0_731] : memref<72x512xf32, #tpu.memory_space<vmem>>, vector<8x512xf32>
    tpu.vector_store %arg9[%c16_730, %c0_731], %1435 {strides = array<i32>} : memref<72x512xf32, #tpu.memory_space<vmem>>, vector<8x512xf32>,
    %c0_732 = arith.constant 0 : index
    %c376_733 = arith.constant 376 : index
    %1437 = vector.load %arg8[%c0_732, %c376_733] : memref<8x1280xf32, #tpu.memory_space<vmem>>, vector<8x512xf32>
    %c0_i32_734 = arith.constant 0 : i32
    %1438 = vector.broadcast %c0_i32_734 : i32 to vector<1x512xi32>
    %1439 = arith.addi %0, %1438 : vector<1x512xi32>
    %c-8_i32_735 = arith.constant -8 : i32
    %1440 = vector.broadcast %c-8_i32_735 : i32 to vector<1x512xi32>
    %1441 = arith.addi %1, %1440 : vector<1x512xi32>
    %c0_i32_736 = arith.constant 0 : i32
    %1442 = vector.broadcast %c0_i32_736 : i32 to vector<1x512xi32>
    %1443 = arith.cmpi sge, %1439, %1442 : vector<1x512xi32>
    %c8_i32_737 = arith.constant 8 : i32
    %1444 = vector.broadcast %c8_i32_737 : i32 to vector<1x512xi32>
    %1445 = arith.cmpi sle, %1439, %1444 : vector<1x512xi32>
    %1446 = arith.andi %1443, %1445 : vector<1x512xi1>
    %c0_i32_738 = arith.constant 0 : i32
    %1447 = vector.broadcast %c0_i32_738 : i32 to vector<1x512xi32>
    %1448 = arith.cmpi sge, %1441, %1447 : vector<1x512xi32>
    %1449 = arith.andi %1446, %1448 : vector<1x512xi1>
    %c8_i32_739 = arith.constant 8 : i32
    %1450 = vector.broadcast %c8_i32_739 : i32 to vector<1x512xi32>
    %1451 = arith.cmpi sle, %1441, %1450 : vector<1x512xi32>
    %1452 = arith.andi %1449, %1451 : vector<1x512xi1>
    %cst_740 = arith.constant 0.000000e+00 : f32
    %1453 = vector.shape_cast %1452 : vector<1x512xi1> to vector<1x512xi1>
    %1454 = vector.broadcast %1453 : vector<1x512xi1> to vector<8x512xi1>
    %1455 = vector.broadcast %cst_740 : f32 to vector<8x512xf32>
    %1456 = arith.select %1454, %1437, %1455 : vector<8x512xi1>, vector<8x512xf32>
    %c24_741 = arith.constant 24 : index
    %c0_742 = arith.constant 0 : index
    %1457 = vector.load %arg9[%c24_741, %c0_742] : memref<72x512xf32, #tpu.memory_space<vmem>>, vector<8x512xf32>
    tpu.vector_store %arg9[%c24_741, %c0_742], %1456 {strides = array<i32>} : memref<72x512xf32, #tpu.memory_space<vmem>>, vector<8x512xf32>,
    %c0_743 = arith.constant 0 : index
    %c384_744 = arith.constant 384 : index
    %1458 = vector.load %arg8[%c0_743, %c384_744] : memref<8x1280xf32, #tpu.memory_space<vmem>>, vector<8x512xf32>
    %c0_i32_745 = arith.constant 0 : i32
    %1459 = vector.broadcast %c0_i32_745 : i32 to vector<1x512xi32>
    %1460 = arith.addi %0, %1459 : vector<1x512xi32>
    %c0_i32_746 = arith.constant 0 : i32
    %1461 = vector.broadcast %c0_i32_746 : i32 to vector<1x512xi32>
    %1462 = arith.addi %1, %1461 : vector<1x512xi32>
    %c0_i32_747 = arith.constant 0 : i32
    %1463 = vector.broadcast %c0_i32_747 : i32 to vector<1x512xi32>
    %1464 = arith.cmpi sge, %1460, %1463 : vector<1x512xi32>
    %c8_i32_748 = arith.constant 8 : i32
    %1465 = vector.broadcast %c8_i32_748 : i32 to vector<1x512xi32>
    %1466 = arith.cmpi sle, %1460, %1465 : vector<1x512xi32>
    %1467 = arith.andi %1464, %1466 : vector<1x512xi1>
    %c0_i32_749 = arith.constant 0 : i32
    %1468 = vector.broadcast %c0_i32_749 : i32 to vector<1x512xi32>
    %1469 = arith.cmpi sge, %1462, %1468 : vector<1x512xi32>
    %1470 = arith.andi %1467, %1469 : vector<1x512xi1>
    %c8_i32_750 = arith.constant 8 : i32
    %1471 = vector.broadcast %c8_i32_750 : i32 to vector<1x512xi32>
    %1472 = arith.cmpi sle, %1462, %1471 : vector<1x512xi32>
    %1473 = arith.andi %1470, %1472 : vector<1x512xi1>
    %cst_751 = arith.constant 0.000000e+00 : f32
    %1474 = vector.shape_cast %1473 : vector<1x512xi1> to vector<1x512xi1>
    %1475 = vector.broadcast %1474 : vector<1x512xi1> to vector<8x512xi1>
    %1476 = vector.broadcast %cst_751 : f32 to vector<8x512xf32>
    %1477 = arith.select %1475, %1458, %1476 : vector<8x512xi1>, vector<8x512xf32>
    %c32_752 = arith.constant 32 : index
    %c0_753 = arith.constant 0 : index
    %1478 = vector.load %arg9[%c32_752, %c0_753] : memref<72x512xf32, #tpu.memory_space<vmem>>, vector<8x512xf32>
    tpu.vector_store %arg9[%c32_752, %c0_753], %1477 {strides = array<i32>} : memref<72x512xf32, #tpu.memory_space<vmem>>, vector<8x512xf32>,
    %c0_754 = arith.constant 0 : index
    %c392_755 = arith.constant 392 : index
    %1479 = vector.load %arg8[%c0_754, %c392_755] : memref<8x1280xf32, #tpu.memory_space<vmem>>, vector<8x512xf32>
    %c0_i32_756 = arith.constant 0 : i32
    %1480 = vector.broadcast %c0_i32_756 : i32 to vector<1x512xi32>
    %1481 = arith.addi %0, %1480 : vector<1x512xi32>
    %c8_i32_757 = arith.constant 8 : i32
    %1482 = vector.broadcast %c8_i32_757 : i32 to vector<1x512xi32>
    %1483 = arith.addi %1, %1482 : vector<1x512xi32>
    %c0_i32_758 = arith.constant 0 : i32
    %1484 = vector.broadcast %c0_i32_758 : i32 to vector<1x512xi32>
    %1485 = arith.cmpi sge, %1481, %1484 : vector<1x512xi32>
    %c8_i32_759 = arith.constant 8 : i32
    %1486 = vector.broadcast %c8_i32_759 : i32 to vector<1x512xi32>
    %1487 = arith.cmpi sle, %1481, %1486 : vector<1x512xi32>
    %1488 = arith.andi %1485, %1487 : vector<1x512xi1>
    %c0_i32_760 = arith.constant 0 : i32
    %1489 = vector.broadcast %c0_i32_760 : i32 to vector<1x512xi32>
    %1490 = arith.cmpi sge, %1483, %1489 : vector<1x512xi32>
    %1491 = arith.andi %1488, %1490 : vector<1x512xi1>
    %c8_i32_761 = arith.constant 8 : i32
    %1492 = vector.broadcast %c8_i32_761 : i32 to vector<1x512xi32>
    %1493 = arith.cmpi sle, %1483, %1492 : vector<1x512xi32>
    %1494 = arith.andi %1491, %1493 : vector<1x512xi1>
    %cst_762 = arith.constant 0.000000e+00 : f32
    %1495 = vector.shape_cast %1494 : vector<1x512xi1> to vector<1x512xi1>
    %1496 = vector.broadcast %1495 : vector<1x512xi1> to vector<8x512xi1>
    %1497 = vector.broadcast %cst_762 : f32 to vector<8x512xf32>
    %1498 = arith.select %1496, %1479, %1497 : vector<8x512xi1>, vector<8x512xf32>
    %c40_763 = arith.constant 40 : index
    %c0_764 = arith.constant 0 : index
    %1499 = vector.load %arg9[%c40_763, %c0_764] : memref<72x512xf32, #tpu.memory_space<vmem>>, vector<8x512xf32>
    tpu.vector_store %arg9[%c40_763, %c0_764], %1498 {strides = array<i32>} : memref<72x512xf32, #tpu.memory_space<vmem>>, vector<8x512xf32>,
    %c0_765 = arith.constant 0 : index
    %c504_766 = arith.constant 504 : index
    %1500 = vector.load %arg8[%c0_765, %c504_766] : memref<8x1280xf32, #tpu.memory_space<vmem>>, vector<8x512xf32>
    %c8_i32_767 = arith.constant 8 : i32
    %1501 = vector.broadcast %c8_i32_767 : i32 to vector<1x512xi32>
    %1502 = arith.addi %0, %1501 : vector<1x512xi32>
    %c-8_i32_768 = arith.constant -8 : i32
    %1503 = vector.broadcast %c-8_i32_768 : i32 to vector<1x512xi32>
    %1504 = arith.addi %1, %1503 : vector<1x512xi32>
    %c0_i32_769 = arith.constant 0 : i32
    %1505 = vector.broadcast %c0_i32_769 : i32 to vector<1x512xi32>
    %1506 = arith.cmpi sge, %1502, %1505 : vector<1x512xi32>
    %c8_i32_770 = arith.constant 8 : i32
    %1507 = vector.broadcast %c8_i32_770 : i32 to vector<1x512xi32>
    %1508 = arith.cmpi sle, %1502, %1507 : vector<1x512xi32>
    %1509 = arith.andi %1506, %1508 : vector<1x512xi1>
    %c0_i32_771 = arith.constant 0 : i32
    %1510 = vector.broadcast %c0_i32_771 : i32 to vector<1x512xi32>
    %1511 = arith.cmpi sge, %1504, %1510 : vector<1x512xi32>
    %1512 = arith.andi %1509, %1511 : vector<1x512xi1>
    %c8_i32_772 = arith.constant 8 : i32
    %1513 = vector.broadcast %c8_i32_772 : i32 to vector<1x512xi32>
    %1514 = arith.cmpi sle, %1504, %1513 : vector<1x512xi32>
    %1515 = arith.andi %1512, %1514 : vector<1x512xi1>
    %cst_773 = arith.constant 0.000000e+00 : f32
    %1516 = vector.shape_cast %1515 : vector<1x512xi1> to vector<1x512xi1>
    %1517 = vector.broadcast %1516 : vector<1x512xi1> to vector<8x512xi1>
    %1518 = vector.broadcast %cst_773 : f32 to vector<8x512xf32>
    %1519 = arith.select %1517, %1500, %1518 : vector<8x512xi1>, vector<8x512xf32>
    %c48_774 = arith.constant 48 : index
    %c0_775 = arith.constant 0 : index
    %1520 = vector.load %arg9[%c48_774, %c0_775] : memref<72x512xf32, #tpu.memory_space<vmem>>, vector<8x512xf32>
    tpu.vector_store %arg9[%c48_774, %c0_775], %1519 {strides = array<i32>} : memref<72x512xf32, #tpu.memory_space<vmem>>, vector<8x512xf32>,
    %c0_776 = arith.constant 0 : index
    %c512_777 = arith.constant 512 : index
    %1521 = vector.load %arg8[%c0_776, %c512_777] : memref<8x1280xf32, #tpu.memory_space<vmem>>, vector<8x512xf32>
    %c8_i32_778 = arith.constant 8 : i32
    %1522 = vector.broadcast %c8_i32_778 : i32 to vector<1x512xi32>
    %1523 = arith.addi %0, %1522 : vector<1x512xi32>
    %c0_i32_779 = arith.constant 0 : i32
    %1524 = vector.broadcast %c0_i32_779 : i32 to vector<1x512xi32>
    %1525 = arith.addi %1, %1524 : vector<1x512xi32>
    %c0_i32_780 = arith.constant 0 : i32
    %1526 = vector.broadcast %c0_i32_780 : i32 to vector<1x512xi32>
    %1527 = arith.cmpi sge, %1523, %1526 : vector<1x512xi32>
    %c8_i32_781 = arith.constant 8 : i32
    %1528 = vector.broadcast %c8_i32_781 : i32 to vector<1x512xi32>
    %1529 = arith.cmpi sle, %1523, %1528 : vector<1x512xi32>
    %1530 = arith.andi %1527, %1529 : vector<1x512xi1>
    %c0_i32_782 = arith.constant 0 : i32
    %1531 = vector.broadcast %c0_i32_782 : i32 to vector<1x512xi32>
    %1532 = arith.cmpi sge, %1525, %1531 : vector<1x512xi32>
    %1533 = arith.andi %1530, %1532 : vector<1x512xi1>
    %c8_i32_783 = arith.constant 8 : i32
    %1534 = vector.broadcast %c8_i32_783 : i32 to vector<1x512xi32>
    %1535 = arith.cmpi sle, %1525, %1534 : vector<1x512xi32>
    %1536 = arith.andi %1533, %1535 : vector<1x512xi1>
    %cst_784 = arith.constant 0.000000e+00 : f32
    %1537 = vector.shape_cast %1536 : vector<1x512xi1> to vector<1x512xi1>
    %1538 = vector.broadcast %1537 : vector<1x512xi1> to vector<8x512xi1>
    %1539 = vector.broadcast %cst_784 : f32 to vector<8x512xf32>
    %1540 = arith.select %1538, %1521, %1539 : vector<8x512xi1>, vector<8x512xf32>
    %c56_785 = arith.constant 56 : index
    %c0_786 = arith.constant 0 : index
    %1541 = vector.load %arg9[%c56_785, %c0_786] : memref<72x512xf32, #tpu.memory_space<vmem>>, vector<8x512xf32>
    tpu.vector_store %arg9[%c56_785, %c0_786], %1540 {strides = array<i32>} : memref<72x512xf32, #tpu.memory_space<vmem>>, vector<8x512xf32>,
    %c0_787 = arith.constant 0 : index
    %c520_788 = arith.constant 520 : index
    %1542 = vector.load %arg8[%c0_787, %c520_788] : memref<8x1280xf32, #tpu.memory_space<vmem>>, vector<8x512xf32>
    %c8_i32_789 = arith.constant 8 : i32
    %1543 = vector.broadcast %c8_i32_789 : i32 to vector<1x512xi32>
    %1544 = arith.addi %0, %1543 : vector<1x512xi32>
    %c8_i32_790 = arith.constant 8 : i32
    %1545 = vector.broadcast %c8_i32_790 : i32 to vector<1x512xi32>
    %1546 = arith.addi %1, %1545 : vector<1x512xi32>
    %c0_i32_791 = arith.constant 0 : i32
    %1547 = vector.broadcast %c0_i32_791 : i32 to vector<1x512xi32>
    %1548 = arith.cmpi sge, %1544, %1547 : vector<1x512xi32>
    %c8_i32_792 = arith.constant 8 : i32
    %1549 = vector.broadcast %c8_i32_792 : i32 to vector<1x512xi32>
    %1550 = arith.cmpi sle, %1544, %1549 : vector<1x512xi32>
    %1551 = arith.andi %1548, %1550 : vector<1x512xi1>
    %c0_i32_793 = arith.constant 0 : i32
    %1552 = vector.broadcast %c0_i32_793 : i32 to vector<1x512xi32>
    %1553 = arith.cmpi sge, %1546, %1552 : vector<1x512xi32>
    %1554 = arith.andi %1551, %1553 : vector<1x512xi1>
    %c8_i32_794 = arith.constant 8 : i32
    %1555 = vector.broadcast %c8_i32_794 : i32 to vector<1x512xi32>
    %1556 = arith.cmpi sle, %1546, %1555 : vector<1x512xi32>
    %1557 = arith.andi %1554, %1556 : vector<1x512xi1>
    %cst_795 = arith.constant 0.000000e+00 : f32
    %1558 = vector.shape_cast %1557 : vector<1x512xi1> to vector<1x512xi1>
    %1559 = vector.broadcast %1558 : vector<1x512xi1> to vector<8x512xi1>
    %1560 = vector.broadcast %cst_795 : f32 to vector<8x512xf32>
    %1561 = arith.select %1559, %1542, %1560 : vector<8x512xi1>, vector<8x512xf32>
    %c64_796 = arith.constant 64 : index
    %c0_797 = arith.constant 0 : index
    %1562 = vector.load %arg9[%c64_796, %c0_797] : memref<72x512xf32, #tpu.memory_space<vmem>>, vector<8x512xf32>
    tpu.vector_store %arg9[%c64_796, %c0_797], %1561 {strides = array<i32>} : memref<72x512xf32, #tpu.memory_space<vmem>>, vector<8x512xf32>,
    %c6 = arith.constant 6 : index
    %c0_798 = arith.constant 0 : index
    %c0_799 = arith.constant 0 : index
    %1563 = vector.load %arg1[%c6, %c0_798, %c0_799] : memref<8x8x72xf32, #tpu.memory_space<vmem>>, vector<1x8x72xf32>
    %1564 = vector.shape_cast %1563 : vector<1x8x72xf32> to vector<8x72xf32>
    %c0_800 = arith.constant 0 : index
    %c0_801 = arith.constant 0 : index
    %1565 = vector.load %arg9[%c0_800, %c0_801] : memref<72x512xf32, #tpu.memory_space<vmem>>, vector<72x512xf32>
    %cst_802 = arith.constant dense<0.000000e+00> : vector<8x512xf32>
    %1566 = tpu.matmul %1564, %1565, %cst_802 {dimension_numbers = #tpu.dot_dimension_numbers<[1], [0], [0], [1], [0, 0, 1, 1], [], []>} : vector<8x72xf32>, vector<72x512xf32>, vector<8x512xf32> -> vector<8x512xf32>
    %c6_803 = arith.constant 6 : index
    %c0_804 = arith.constant 0 : index
    %c0_805 = arith.constant 0 : index
    %1567 = vector.load %arg2[%c6_803, %c0_804, %c0_805] : memref<8x8x1xf32, #tpu.memory_space<vmem>>, vector<1x8x1xf32>
    %1568 = vector.shape_cast %1567 : vector<1x8x1xf32> to vector<8x1xf32>
    %1569 = vector.broadcast %1568 : vector<8x1xf32> to vector<8x512xf32>
    %1570 = arith.addf %1566, %1569 : vector<8x512xf32>
    %cst_806 = arith.constant 0.000000e+00 : f32
    %1571 = vector.broadcast %cst_806 : f32 to vector<8x512xf32>
    %1572 = arith.maximumf %1570, %1571 : vector<8x512xf32>
    %c6_807 = arith.constant 6 : index
    %c0_808 = arith.constant 0 : index
    %c0_809 = arith.constant 0 : index
    %1573 = vector.load %arg3[%c6_807, %c0_808, %c0_809] : memref<8x8x1xf32, #tpu.memory_space<vmem>>, vector<1x8x1xf32>
    %1574 = vector.shape_cast %1573 : vector<1x8x1xf32> to vector<8x1xf32>
    %1575 = vector.broadcast %1574 : vector<8x1xf32> to vector<8x512xf32>
    %1576 = arith.mulf %1572, %1575 : vector<8x512xf32>
    %c6_810 = arith.constant 6 : index
    %c0_811 = arith.constant 0 : index
    %c0_812 = arith.constant 0 : index
    %1577 = vector.load %arg4[%c6_810, %c0_811, %c0_812] : memref<8x8x1xf32, #tpu.memory_space<vmem>>, vector<1x8x1xf32>
    %1578 = vector.shape_cast %1577 : vector<1x8x1xf32> to vector<8x1xf32>
    %1579 = vector.broadcast %1578 : vector<8x1xf32> to vector<8x512xf32>
    %1580 = arith.addf %1576, %1579 : vector<8x512xf32>
    %c15_i32_813 = arith.constant 15 : i32
    %1581 = vector.broadcast %c15_i32_813 : i32 to vector<1x512xi32>
    %1582 = arith.andi %0, %1581 : vector<1x512xi32>
    %c0_i32_814 = arith.constant 0 : i32
    %1583 = vector.broadcast %c0_i32_814 : i32 to vector<1x512xi32>
    %1584 = arith.cmpi eq, %1582, %1583 : vector<1x512xi32>
    %c0_i32_815 = arith.constant 0 : i32
    %1585 = vector.broadcast %c0_i32_815 : i32 to vector<1x512xi32>
    %1586 = arith.cmpi sle, %0, %1585 : vector<1x512xi32>
    %1587 = arith.andi %1584, %1586 : vector<1x512xi1>
    %c15_i32_816 = arith.constant 15 : i32
    %1588 = vector.broadcast %c15_i32_816 : i32 to vector<1x512xi32>
    %1589 = arith.andi %1, %1588 : vector<1x512xi32>
    %c0_i32_817 = arith.constant 0 : i32
    %1590 = vector.broadcast %c0_i32_817 : i32 to vector<1x512xi32>
    %1591 = arith.cmpi eq, %1589, %1590 : vector<1x512xi32>
    %1592 = arith.andi %1587, %1591 : vector<1x512xi1>
    %c0_i32_818 = arith.constant 0 : i32
    %1593 = vector.broadcast %c0_i32_818 : i32 to vector<1x512xi32>
    %1594 = arith.cmpi sle, %1, %1593 : vector<1x512xi32>
    %1595 = arith.andi %1592, %1594 : vector<1x512xi1>
    %cst_819 = arith.constant 0.000000e+00 : f32
    %1596 = vector.shape_cast %1595 : vector<1x512xi1> to vector<1x512xi1>
    %1597 = vector.broadcast %1596 : vector<1x512xi1> to vector<8x512xi1>
    %1598 = vector.broadcast %cst_819 : f32 to vector<8x512xf32>
    %1599 = arith.select %1597, %1580, %1598 : vector<8x512xi1>, vector<8x512xf32>
    %c0_820 = arith.constant 0 : index
    %c384_821 = arith.constant 384 : index
    %1600 = vector.load %arg8[%c0_820, %c384_821] : memref<8x1280xf32, #tpu.memory_space<vmem>>, vector<8x512xf32>
    tpu.vector_store %arg8[%c0_820, %c384_821], %1599 {strides = array<i32>} : memref<8x1280xf32, #tpu.memory_space<vmem>>, vector<8x512xf32>,
    %c0_822 = arith.constant 0 : index
    %c384_823 = arith.constant 384 : index
    %1601 = vector.load %arg8[%c0_822, %c384_823] : memref<8x1280xf32, #tpu.memory_space<vmem>>, vector<8x512xf32>
    %c0_824 = arith.constant 0 : index
    %c112 = arith.constant 112 : index
    %1602 = vector.load %arg8[%c0_824, %c112] : memref<8x1280xf32, #tpu.memory_space<vmem>>, vector<8x512xf32>
    %c-16_i32 = arith.constant -16 : i32
    %1603 = vector.broadcast %c-16_i32 : i32 to vector<1x512xi32>
    %1604 = arith.addi %0, %1603 : vector<1x512xi32>
    %c-16_i32_825 = arith.constant -16 : i32
    %1605 = vector.broadcast %c-16_i32_825 : i32 to vector<1x512xi32>
    %1606 = arith.addi %1, %1605 : vector<1x512xi32>
    %c0_i32_826 = arith.constant 0 : i32
    %1607 = vector.broadcast %c0_i32_826 : i32 to vector<1x512xi32>
    %1608 = arith.cmpi sge, %1604, %1607 : vector<1x512xi32>
    %c0_i32_827 = arith.constant 0 : i32
    %1609 = vector.broadcast %c0_i32_827 : i32 to vector<1x512xi32>
    %1610 = arith.cmpi sle, %1604, %1609 : vector<1x512xi32>
    %1611 = arith.andi %1608, %1610 : vector<1x512xi1>
    %c0_i32_828 = arith.constant 0 : i32
    %1612 = vector.broadcast %c0_i32_828 : i32 to vector<1x512xi32>
    %1613 = arith.cmpi sge, %1606, %1612 : vector<1x512xi32>
    %1614 = arith.andi %1611, %1613 : vector<1x512xi1>
    %c0_i32_829 = arith.constant 0 : i32
    %1615 = vector.broadcast %c0_i32_829 : i32 to vector<1x512xi32>
    %1616 = arith.cmpi sle, %1606, %1615 : vector<1x512xi32>
    %1617 = arith.andi %1614, %1616 : vector<1x512xi1>
    %cst_830 = arith.constant 0.000000e+00 : f32
    %1618 = vector.shape_cast %1617 : vector<1x512xi1> to vector<1x512xi1>
    %1619 = vector.broadcast %1618 : vector<1x512xi1> to vector<8x512xi1>
    %1620 = vector.broadcast %cst_830 : f32 to vector<8x512xf32>
    %1621 = arith.select %1619, %1602, %1620 : vector<8x512xi1>, vector<8x512xf32>
    %c0_831 = arith.constant 0 : index
    %c0_832 = arith.constant 0 : index
    %1622 = vector.load %arg9[%c0_831, %c0_832] : memref<72x512xf32, #tpu.memory_space<vmem>>, vector<8x512xf32>
    tpu.vector_store %arg9[%c0_831, %c0_832], %1621 {strides = array<i32>} : memref<72x512xf32, #tpu.memory_space<vmem>>, vector<8x512xf32>,
    %c0_833 = arith.constant 0 : index
    %c128 = arith.constant 128 : index
    %1623 = vector.load %arg8[%c0_833, %c128] : memref<8x1280xf32, #tpu.memory_space<vmem>>, vector<8x512xf32>
    %c-16_i32_834 = arith.constant -16 : i32
    %1624 = vector.broadcast %c-16_i32_834 : i32 to vector<1x512xi32>
    %1625 = arith.addi %0, %1624 : vector<1x512xi32>
    %c0_i32_835 = arith.constant 0 : i32
    %1626 = vector.broadcast %c0_i32_835 : i32 to vector<1x512xi32>
    %1627 = arith.addi %1, %1626 : vector<1x512xi32>
    %c0_i32_836 = arith.constant 0 : i32
    %1628 = vector.broadcast %c0_i32_836 : i32 to vector<1x512xi32>
    %1629 = arith.cmpi sge, %1625, %1628 : vector<1x512xi32>
    %c0_i32_837 = arith.constant 0 : i32
    %1630 = vector.broadcast %c0_i32_837 : i32 to vector<1x512xi32>
    %1631 = arith.cmpi sle, %1625, %1630 : vector<1x512xi32>
    %1632 = arith.andi %1629, %1631 : vector<1x512xi1>
    %c0_i32_838 = arith.constant 0 : i32
    %1633 = vector.broadcast %c0_i32_838 : i32 to vector<1x512xi32>
    %1634 = arith.cmpi sge, %1627, %1633 : vector<1x512xi32>
    %1635 = arith.andi %1632, %1634 : vector<1x512xi1>
    %c0_i32_839 = arith.constant 0 : i32
    %1636 = vector.broadcast %c0_i32_839 : i32 to vector<1x512xi32>
    %1637 = arith.cmpi sle, %1627, %1636 : vector<1x512xi32>
    %1638 = arith.andi %1635, %1637 : vector<1x512xi1>
    %cst_840 = arith.constant 0.000000e+00 : f32
    %1639 = vector.shape_cast %1638 : vector<1x512xi1> to vector<1x512xi1>
    %1640 = vector.broadcast %1639 : vector<1x512xi1> to vector<8x512xi1>
    %1641 = vector.broadcast %cst_840 : f32 to vector<8x512xf32>
    %1642 = arith.select %1640, %1623, %1641 : vector<8x512xi1>, vector<8x512xf32>
    %c8_841 = arith.constant 8 : index
    %c0_842 = arith.constant 0 : index
    %1643 = vector.load %arg9[%c8_841, %c0_842] : memref<72x512xf32, #tpu.memory_space<vmem>>, vector<8x512xf32>
    tpu.vector_store %arg9[%c8_841, %c0_842], %1642 {strides = array<i32>} : memref<72x512xf32, #tpu.memory_space<vmem>>, vector<8x512xf32>,
    %c0_843 = arith.constant 0 : index
    %c144 = arith.constant 144 : index
    %1644 = vector.load %arg8[%c0_843, %c144] : memref<8x1280xf32, #tpu.memory_space<vmem>>, vector<8x512xf32>
    %c-16_i32_844 = arith.constant -16 : i32
    %1645 = vector.broadcast %c-16_i32_844 : i32 to vector<1x512xi32>
    %1646 = arith.addi %0, %1645 : vector<1x512xi32>
    %c16_i32 = arith.constant 16 : i32
    %1647 = vector.broadcast %c16_i32 : i32 to vector<1x512xi32>
    %1648 = arith.addi %1, %1647 : vector<1x512xi32>
    %c0_i32_845 = arith.constant 0 : i32
    %1649 = vector.broadcast %c0_i32_845 : i32 to vector<1x512xi32>
    %1650 = arith.cmpi sge, %1646, %1649 : vector<1x512xi32>
    %c0_i32_846 = arith.constant 0 : i32
    %1651 = vector.broadcast %c0_i32_846 : i32 to vector<1x512xi32>
    %1652 = arith.cmpi sle, %1646, %1651 : vector<1x512xi32>
    %1653 = arith.andi %1650, %1652 : vector<1x512xi1>
    %c0_i32_847 = arith.constant 0 : i32
    %1654 = vector.broadcast %c0_i32_847 : i32 to vector<1x512xi32>
    %1655 = arith.cmpi sge, %1648, %1654 : vector<1x512xi32>
    %1656 = arith.andi %1653, %1655 : vector<1x512xi1>
    %c0_i32_848 = arith.constant 0 : i32
    %1657 = vector.broadcast %c0_i32_848 : i32 to vector<1x512xi32>
    %1658 = arith.cmpi sle, %1648, %1657 : vector<1x512xi32>
    %1659 = arith.andi %1656, %1658 : vector<1x512xi1>
    %cst_849 = arith.constant 0.000000e+00 : f32
    %1660 = vector.shape_cast %1659 : vector<1x512xi1> to vector<1x512xi1>
    %1661 = vector.broadcast %1660 : vector<1x512xi1> to vector<8x512xi1>
    %1662 = vector.broadcast %cst_849 : f32 to vector<8x512xf32>
    %1663 = arith.select %1661, %1644, %1662 : vector<8x512xi1>, vector<8x512xf32>
    %c16_850 = arith.constant 16 : index
    %c0_851 = arith.constant 0 : index
    %1664 = vector.load %arg9[%c16_850, %c0_851] : memref<72x512xf32, #tpu.memory_space<vmem>>, vector<8x512xf32>
    tpu.vector_store %arg9[%c16_850, %c0_851], %1663 {strides = array<i32>} : memref<72x512xf32, #tpu.memory_space<vmem>>, vector<8x512xf32>,
    %c0_852 = arith.constant 0 : index
    %c368_853 = arith.constant 368 : index
    %1665 = vector.load %arg8[%c0_852, %c368_853] : memref<8x1280xf32, #tpu.memory_space<vmem>>, vector<8x512xf32>
    %c0_i32_854 = arith.constant 0 : i32
    %1666 = vector.broadcast %c0_i32_854 : i32 to vector<1x512xi32>
    %1667 = arith.addi %0, %1666 : vector<1x512xi32>
    %c-16_i32_855 = arith.constant -16 : i32
    %1668 = vector.broadcast %c-16_i32_855 : i32 to vector<1x512xi32>
    %1669 = arith.addi %1, %1668 : vector<1x512xi32>
    %c0_i32_856 = arith.constant 0 : i32
    %1670 = vector.broadcast %c0_i32_856 : i32 to vector<1x512xi32>
    %1671 = arith.cmpi sge, %1667, %1670 : vector<1x512xi32>
    %c0_i32_857 = arith.constant 0 : i32
    %1672 = vector.broadcast %c0_i32_857 : i32 to vector<1x512xi32>
    %1673 = arith.cmpi sle, %1667, %1672 : vector<1x512xi32>
    %1674 = arith.andi %1671, %1673 : vector<1x512xi1>
    %c0_i32_858 = arith.constant 0 : i32
    %1675 = vector.broadcast %c0_i32_858 : i32 to vector<1x512xi32>
    %1676 = arith.cmpi sge, %1669, %1675 : vector<1x512xi32>
    %1677 = arith.andi %1674, %1676 : vector<1x512xi1>
    %c0_i32_859 = arith.constant 0 : i32
    %1678 = vector.broadcast %c0_i32_859 : i32 to vector<1x512xi32>
    %1679 = arith.cmpi sle, %1669, %1678 : vector<1x512xi32>
    %1680 = arith.andi %1677, %1679 : vector<1x512xi1>
    %cst_860 = arith.constant 0.000000e+00 : f32
    %1681 = vector.shape_cast %1680 : vector<1x512xi1> to vector<1x512xi1>
    %1682 = vector.broadcast %1681 : vector<1x512xi1> to vector<8x512xi1>
    %1683 = vector.broadcast %cst_860 : f32 to vector<8x512xf32>
    %1684 = arith.select %1682, %1665, %1683 : vector<8x512xi1>, vector<8x512xf32>
    %c24_861 = arith.constant 24 : index
    %c0_862 = arith.constant 0 : index
    %1685 = vector.load %arg9[%c24_861, %c0_862] : memref<72x512xf32, #tpu.memory_space<vmem>>, vector<8x512xf32>
    tpu.vector_store %arg9[%c24_861, %c0_862], %1684 {strides = array<i32>} : memref<72x512xf32, #tpu.memory_space<vmem>>, vector<8x512xf32>,
    %c0_863 = arith.constant 0 : index
    %c384_864 = arith.constant 384 : index
    %1686 = vector.load %arg8[%c0_863, %c384_864] : memref<8x1280xf32, #tpu.memory_space<vmem>>, vector<8x512xf32>
    %c0_i32_865 = arith.constant 0 : i32
    %1687 = vector.broadcast %c0_i32_865 : i32 to vector<1x512xi32>
    %1688 = arith.addi %0, %1687 : vector<1x512xi32>
    %c0_i32_866 = arith.constant 0 : i32
    %1689 = vector.broadcast %c0_i32_866 : i32 to vector<1x512xi32>
    %1690 = arith.addi %1, %1689 : vector<1x512xi32>
    %c0_i32_867 = arith.constant 0 : i32
    %1691 = vector.broadcast %c0_i32_867 : i32 to vector<1x512xi32>
    %1692 = arith.cmpi sge, %1688, %1691 : vector<1x512xi32>
    %c0_i32_868 = arith.constant 0 : i32
    %1693 = vector.broadcast %c0_i32_868 : i32 to vector<1x512xi32>
    %1694 = arith.cmpi sle, %1688, %1693 : vector<1x512xi32>
    %1695 = arith.andi %1692, %1694 : vector<1x512xi1>
    %c0_i32_869 = arith.constant 0 : i32
    %1696 = vector.broadcast %c0_i32_869 : i32 to vector<1x512xi32>
    %1697 = arith.cmpi sge, %1690, %1696 : vector<1x512xi32>
    %1698 = arith.andi %1695, %1697 : vector<1x512xi1>
    %c0_i32_870 = arith.constant 0 : i32
    %1699 = vector.broadcast %c0_i32_870 : i32 to vector<1x512xi32>
    %1700 = arith.cmpi sle, %1690, %1699 : vector<1x512xi32>
    %1701 = arith.andi %1698, %1700 : vector<1x512xi1>
    %cst_871 = arith.constant 0.000000e+00 : f32
    %1702 = vector.shape_cast %1701 : vector<1x512xi1> to vector<1x512xi1>
    %1703 = vector.broadcast %1702 : vector<1x512xi1> to vector<8x512xi1>
    %1704 = vector.broadcast %cst_871 : f32 to vector<8x512xf32>
    %1705 = arith.select %1703, %1686, %1704 : vector<8x512xi1>, vector<8x512xf32>
    %c32_872 = arith.constant 32 : index
    %c0_873 = arith.constant 0 : index
    %1706 = vector.load %arg9[%c32_872, %c0_873] : memref<72x512xf32, #tpu.memory_space<vmem>>, vector<8x512xf32>
    tpu.vector_store %arg9[%c32_872, %c0_873], %1705 {strides = array<i32>} : memref<72x512xf32, #tpu.memory_space<vmem>>, vector<8x512xf32>,
    %c0_874 = arith.constant 0 : index
    %c400_875 = arith.constant 400 : index
    %1707 = vector.load %arg8[%c0_874, %c400_875] : memref<8x1280xf32, #tpu.memory_space<vmem>>, vector<8x512xf32>
    %c0_i32_876 = arith.constant 0 : i32
    %1708 = vector.broadcast %c0_i32_876 : i32 to vector<1x512xi32>
    %1709 = arith.addi %0, %1708 : vector<1x512xi32>
    %c16_i32_877 = arith.constant 16 : i32
    %1710 = vector.broadcast %c16_i32_877 : i32 to vector<1x512xi32>
    %1711 = arith.addi %1, %1710 : vector<1x512xi32>
    %c0_i32_878 = arith.constant 0 : i32
    %1712 = vector.broadcast %c0_i32_878 : i32 to vector<1x512xi32>
    %1713 = arith.cmpi sge, %1709, %1712 : vector<1x512xi32>
    %c0_i32_879 = arith.constant 0 : i32
    %1714 = vector.broadcast %c0_i32_879 : i32 to vector<1x512xi32>
    %1715 = arith.cmpi sle, %1709, %1714 : vector<1x512xi32>
    %1716 = arith.andi %1713, %1715 : vector<1x512xi1>
    %c0_i32_880 = arith.constant 0 : i32
    %1717 = vector.broadcast %c0_i32_880 : i32 to vector<1x512xi32>
    %1718 = arith.cmpi sge, %1711, %1717 : vector<1x512xi32>
    %1719 = arith.andi %1716, %1718 : vector<1x512xi1>
    %c0_i32_881 = arith.constant 0 : i32
    %1720 = vector.broadcast %c0_i32_881 : i32 to vector<1x512xi32>
    %1721 = arith.cmpi sle, %1711, %1720 : vector<1x512xi32>
    %1722 = arith.andi %1719, %1721 : vector<1x512xi1>
    %cst_882 = arith.constant 0.000000e+00 : f32
    %1723 = vector.shape_cast %1722 : vector<1x512xi1> to vector<1x512xi1>
    %1724 = vector.broadcast %1723 : vector<1x512xi1> to vector<8x512xi1>
    %1725 = vector.broadcast %cst_882 : f32 to vector<8x512xf32>
    %1726 = arith.select %1724, %1707, %1725 : vector<8x512xi1>, vector<8x512xf32>
    %c40_883 = arith.constant 40 : index
    %c0_884 = arith.constant 0 : index
    %1727 = vector.load %arg9[%c40_883, %c0_884] : memref<72x512xf32, #tpu.memory_space<vmem>>, vector<8x512xf32>
    tpu.vector_store %arg9[%c40_883, %c0_884], %1726 {strides = array<i32>} : memref<72x512xf32, #tpu.memory_space<vmem>>, vector<8x512xf32>,
    %c0_885 = arith.constant 0 : index
    %c624 = arith.constant 624 : index
    %1728 = vector.load %arg8[%c0_885, %c624] : memref<8x1280xf32, #tpu.memory_space<vmem>>, vector<8x512xf32>
    %c16_i32_886 = arith.constant 16 : i32
    %1729 = vector.broadcast %c16_i32_886 : i32 to vector<1x512xi32>
    %1730 = arith.addi %0, %1729 : vector<1x512xi32>
    %c-16_i32_887 = arith.constant -16 : i32
    %1731 = vector.broadcast %c-16_i32_887 : i32 to vector<1x512xi32>
    %1732 = arith.addi %1, %1731 : vector<1x512xi32>
    %c0_i32_888 = arith.constant 0 : i32
    %1733 = vector.broadcast %c0_i32_888 : i32 to vector<1x512xi32>
    %1734 = arith.cmpi sge, %1730, %1733 : vector<1x512xi32>
    %c0_i32_889 = arith.constant 0 : i32
    %1735 = vector.broadcast %c0_i32_889 : i32 to vector<1x512xi32>
    %1736 = arith.cmpi sle, %1730, %1735 : vector<1x512xi32>
    %1737 = arith.andi %1734, %1736 : vector<1x512xi1>
    %c0_i32_890 = arith.constant 0 : i32
    %1738 = vector.broadcast %c0_i32_890 : i32 to vector<1x512xi32>
    %1739 = arith.cmpi sge, %1732, %1738 : vector<1x512xi32>
    %1740 = arith.andi %1737, %1739 : vector<1x512xi1>
    %c0_i32_891 = arith.constant 0 : i32
    %1741 = vector.broadcast %c0_i32_891 : i32 to vector<1x512xi32>
    %1742 = arith.cmpi sle, %1732, %1741 : vector<1x512xi32>
    %1743 = arith.andi %1740, %1742 : vector<1x512xi1>
    %cst_892 = arith.constant 0.000000e+00 : f32
    %1744 = vector.shape_cast %1743 : vector<1x512xi1> to vector<1x512xi1>
    %1745 = vector.broadcast %1744 : vector<1x512xi1> to vector<8x512xi1>
    %1746 = vector.broadcast %cst_892 : f32 to vector<8x512xf32>
    %1747 = arith.select %1745, %1728, %1746 : vector<8x512xi1>, vector<8x512xf32>
    %c48_893 = arith.constant 48 : index
    %c0_894 = arith.constant 0 : index
    %1748 = vector.load %arg9[%c48_893, %c0_894] : memref<72x512xf32, #tpu.memory_space<vmem>>, vector<8x512xf32>
    tpu.vector_store %arg9[%c48_893, %c0_894], %1747 {strides = array<i32>} : memref<72x512xf32, #tpu.memory_space<vmem>>, vector<8x512xf32>,
    %c0_895 = arith.constant 0 : index
    %c640 = arith.constant 640 : index
    %1749 = vector.load %arg8[%c0_895, %c640] : memref<8x1280xf32, #tpu.memory_space<vmem>>, vector<8x512xf32>
    %c16_i32_896 = arith.constant 16 : i32
    %1750 = vector.broadcast %c16_i32_896 : i32 to vector<1x512xi32>
    %1751 = arith.addi %0, %1750 : vector<1x512xi32>
    %c0_i32_897 = arith.constant 0 : i32
    %1752 = vector.broadcast %c0_i32_897 : i32 to vector<1x512xi32>
    %1753 = arith.addi %1, %1752 : vector<1x512xi32>
    %c0_i32_898 = arith.constant 0 : i32
    %1754 = vector.broadcast %c0_i32_898 : i32 to vector<1x512xi32>
    %1755 = arith.cmpi sge, %1751, %1754 : vector<1x512xi32>
    %c0_i32_899 = arith.constant 0 : i32
    %1756 = vector.broadcast %c0_i32_899 : i32 to vector<1x512xi32>
    %1757 = arith.cmpi sle, %1751, %1756 : vector<1x512xi32>
    %1758 = arith.andi %1755, %1757 : vector<1x512xi1>
    %c0_i32_900 = arith.constant 0 : i32
    %1759 = vector.broadcast %c0_i32_900 : i32 to vector<1x512xi32>
    %1760 = arith.cmpi sge, %1753, %1759 : vector<1x512xi32>
    %1761 = arith.andi %1758, %1760 : vector<1x512xi1>
    %c0_i32_901 = arith.constant 0 : i32
    %1762 = vector.broadcast %c0_i32_901 : i32 to vector<1x512xi32>
    %1763 = arith.cmpi sle, %1753, %1762 : vector<1x512xi32>
    %1764 = arith.andi %1761, %1763 : vector<1x512xi1>
    %cst_902 = arith.constant 0.000000e+00 : f32
    %1765 = vector.shape_cast %1764 : vector<1x512xi1> to vector<1x512xi1>
    %1766 = vector.broadcast %1765 : vector<1x512xi1> to vector<8x512xi1>
    %1767 = vector.broadcast %cst_902 : f32 to vector<8x512xf32>
    %1768 = arith.select %1766, %1749, %1767 : vector<8x512xi1>, vector<8x512xf32>
    %c56_903 = arith.constant 56 : index
    %c0_904 = arith.constant 0 : index
    %1769 = vector.load %arg9[%c56_903, %c0_904] : memref<72x512xf32, #tpu.memory_space<vmem>>, vector<8x512xf32>
    tpu.vector_store %arg9[%c56_903, %c0_904], %1768 {strides = array<i32>} : memref<72x512xf32, #tpu.memory_space<vmem>>, vector<8x512xf32>,
    %c0_905 = arith.constant 0 : index
    %c656 = arith.constant 656 : index
    %1770 = vector.load %arg8[%c0_905, %c656] : memref<8x1280xf32, #tpu.memory_space<vmem>>, vector<8x512xf32>
    %c16_i32_906 = arith.constant 16 : i32
    %1771 = vector.broadcast %c16_i32_906 : i32 to vector<1x512xi32>
    %1772 = arith.addi %0, %1771 : vector<1x512xi32>
    %c16_i32_907 = arith.constant 16 : i32
    %1773 = vector.broadcast %c16_i32_907 : i32 to vector<1x512xi32>
    %1774 = arith.addi %1, %1773 : vector<1x512xi32>
    %c0_i32_908 = arith.constant 0 : i32
    %1775 = vector.broadcast %c0_i32_908 : i32 to vector<1x512xi32>
    %1776 = arith.cmpi sge, %1772, %1775 : vector<1x512xi32>
    %c0_i32_909 = arith.constant 0 : i32
    %1777 = vector.broadcast %c0_i32_909 : i32 to vector<1x512xi32>
    %1778 = arith.cmpi sle, %1772, %1777 : vector<1x512xi32>
    %1779 = arith.andi %1776, %1778 : vector<1x512xi1>
    %c0_i32_910 = arith.constant 0 : i32
    %1780 = vector.broadcast %c0_i32_910 : i32 to vector<1x512xi32>
    %1781 = arith.cmpi sge, %1774, %1780 : vector<1x512xi32>
    %1782 = arith.andi %1779, %1781 : vector<1x512xi1>
    %c0_i32_911 = arith.constant 0 : i32
    %1783 = vector.broadcast %c0_i32_911 : i32 to vector<1x512xi32>
    %1784 = arith.cmpi sle, %1774, %1783 : vector<1x512xi32>
    %1785 = arith.andi %1782, %1784 : vector<1x512xi1>
    %cst_912 = arith.constant 0.000000e+00 : f32
    %1786 = vector.shape_cast %1785 : vector<1x512xi1> to vector<1x512xi1>
    %1787 = vector.broadcast %1786 : vector<1x512xi1> to vector<8x512xi1>
    %1788 = vector.broadcast %cst_912 : f32 to vector<8x512xf32>
    %1789 = arith.select %1787, %1770, %1788 : vector<8x512xi1>, vector<8x512xf32>
    %c64_913 = arith.constant 64 : index
    %c0_914 = arith.constant 0 : index
    %1790 = vector.load %arg9[%c64_913, %c0_914] : memref<72x512xf32, #tpu.memory_space<vmem>>, vector<8x512xf32>
    tpu.vector_store %arg9[%c64_913, %c0_914], %1789 {strides = array<i32>} : memref<72x512xf32, #tpu.memory_space<vmem>>, vector<8x512xf32>,
    %c7 = arith.constant 7 : index
    %c0_915 = arith.constant 0 : index
    %c0_916 = arith.constant 0 : index
    %1791 = vector.load %arg1[%c7, %c0_915, %c0_916] : memref<8x8x72xf32, #tpu.memory_space<vmem>>, vector<1x8x72xf32>
    %1792 = vector.shape_cast %1791 : vector<1x8x72xf32> to vector<8x72xf32>
    %c0_917 = arith.constant 0 : index
    %c0_918 = arith.constant 0 : index
    %1793 = vector.load %arg9[%c0_917, %c0_918] : memref<72x512xf32, #tpu.memory_space<vmem>>, vector<72x512xf32>
    %cst_919 = arith.constant dense<0.000000e+00> : vector<8x512xf32>
    %1794 = tpu.matmul %1792, %1793, %cst_919 {dimension_numbers = #tpu.dot_dimension_numbers<[1], [0], [0], [1], [0, 0, 1, 1], [], []>} : vector<8x72xf32>, vector<72x512xf32>, vector<8x512xf32> -> vector<8x512xf32>
    %c7_920 = arith.constant 7 : index
    %c0_921 = arith.constant 0 : index
    %c0_922 = arith.constant 0 : index
    %1795 = vector.load %arg2[%c7_920, %c0_921, %c0_922] : memref<8x8x1xf32, #tpu.memory_space<vmem>>, vector<1x8x1xf32>
    %1796 = vector.shape_cast %1795 : vector<1x8x1xf32> to vector<8x1xf32>
    %1797 = vector.broadcast %1796 : vector<8x1xf32> to vector<8x512xf32>
    %1798 = arith.addf %1794, %1797 : vector<8x512xf32>
    %cst_923 = arith.constant 0.000000e+00 : f32
    %1799 = vector.broadcast %cst_923 : f32 to vector<8x512xf32>
    %1800 = arith.maximumf %1798, %1799 : vector<8x512xf32>
    %c7_924 = arith.constant 7 : index
    %c0_925 = arith.constant 0 : index
    %c0_926 = arith.constant 0 : index
    %1801 = vector.load %arg3[%c7_924, %c0_925, %c0_926] : memref<8x8x1xf32, #tpu.memory_space<vmem>>, vector<1x8x1xf32>
    %1802 = vector.shape_cast %1801 : vector<1x8x1xf32> to vector<8x1xf32>
    %1803 = vector.broadcast %1802 : vector<8x1xf32> to vector<8x512xf32>
    %1804 = arith.mulf %1800, %1803 : vector<8x512xf32>
    %c7_927 = arith.constant 7 : index
    %c0_928 = arith.constant 0 : index
    %c0_929 = arith.constant 0 : index
    %1805 = vector.load %arg4[%c7_927, %c0_928, %c0_929] : memref<8x8x1xf32, #tpu.memory_space<vmem>>, vector<1x8x1xf32>
    %1806 = vector.shape_cast %1805 : vector<1x8x1xf32> to vector<8x1xf32>
    %1807 = vector.broadcast %1806 : vector<8x1xf32> to vector<8x512xf32>
    %1808 = arith.addf %1804, %1807 : vector<8x512xf32>
    %c15_i32_930 = arith.constant 15 : i32
    %1809 = vector.broadcast %c15_i32_930 : i32 to vector<1x512xi32>
    %1810 = arith.andi %0, %1809 : vector<1x512xi32>
    %c0_i32_931 = arith.constant 0 : i32
    %1811 = vector.broadcast %c0_i32_931 : i32 to vector<1x512xi32>
    %1812 = arith.cmpi eq, %1810, %1811 : vector<1x512xi32>
    %c0_i32_932 = arith.constant 0 : i32
    %1813 = vector.broadcast %c0_i32_932 : i32 to vector<1x512xi32>
    %1814 = arith.cmpi sle, %0, %1813 : vector<1x512xi32>
    %1815 = arith.andi %1812, %1814 : vector<1x512xi1>
    %c15_i32_933 = arith.constant 15 : i32
    %1816 = vector.broadcast %c15_i32_933 : i32 to vector<1x512xi32>
    %1817 = arith.andi %1, %1816 : vector<1x512xi32>
    %c0_i32_934 = arith.constant 0 : i32
    %1818 = vector.broadcast %c0_i32_934 : i32 to vector<1x512xi32>
    %1819 = arith.cmpi eq, %1817, %1818 : vector<1x512xi32>
    %1820 = arith.andi %1815, %1819 : vector<1x512xi1>
    %c0_i32_935 = arith.constant 0 : i32
    %1821 = vector.broadcast %c0_i32_935 : i32 to vector<1x512xi32>
    %1822 = arith.cmpi sle, %1, %1821 : vector<1x512xi32>
    %1823 = arith.andi %1820, %1822 : vector<1x512xi1>
    %cst_936 = arith.constant 0.000000e+00 : f32
    %1824 = vector.shape_cast %1823 : vector<1x512xi1> to vector<1x512xi1>
    %1825 = vector.broadcast %1824 : vector<1x512xi1> to vector<8x512xi1>
    %1826 = vector.broadcast %cst_936 : f32 to vector<8x512xf32>
    %1827 = arith.select %1825, %1808, %1826 : vector<8x512xi1>, vector<8x512xf32>
    %1828 = arith.addf %1827, %1601 : vector<8x512xf32>
    %c0_937 = arith.constant 0 : index
    %c384_938 = arith.constant 384 : index
    %1829 = vector.load %arg8[%c0_937, %c384_938] : memref<8x1280xf32, #tpu.memory_space<vmem>>, vector<8x512xf32>
    tpu.vector_store %arg8[%c0_937, %c384_938], %1828 {strides = array<i32>} : memref<8x1280xf32, #tpu.memory_space<vmem>>, vector<8x512xf32>,
    %c0_939 = arith.constant 0 : index
    %c384_940 = arith.constant 384 : index
    %1830 = vector.load %arg8[%c0_939, %c384_940] : memref<8x1280xf32, #tpu.memory_space<vmem>>, vector<8x512xf32>
    %c0_941 = arith.constant 0 : index
    %c0_942 = arith.constant 0 : index
    %1831 = vector.load %arg7[%c0_941, %c0_942] : memref<8x512xf32, #tpu.memory_space<vmem>>, vector<8x512xf32>
    tpu.vector_store %arg7[%c0_941, %c0_942], %1830 {strides = array<i32>} : memref<8x512xf32, #tpu.memory_space<vmem>>, vector<8x512xf32>,
    return
  }
}

</mosaic_0001>

<bundles_post_ra>
// kernel: tpu_custom_call.1
= control target key start
LH: loop header
LB: loop body
LE: loop exit
PB: predicated region body
PF: predicated region fallthrough
CT: control target
= control target key end

     0   :  { %s5819_s28 = smov 111   ;;  %v9330_v2 = vmov 0.0   ;;  %v9328_v3 = vmov 0   ;;  %s9289_s0 = inlined_call_operand.vmem [shape: f32[8,512], index: 0, kind: input, shape index: {}]   ;;  %s9290_s1 = inlined_call_operand.vmem [shape: f32[8,8,72], index: 1, kind: input, shape index: {}]   ;;  %s9291_s2 = inlined_call_operand.vmem [shape: f32[8,8,1], index: 2, kind: input, shape index: {}]   ;;  %s9292_s3 = inlined_call_operand.vmem [shape: f32[8,8,1], index: 3, kind: input, shape index: {}]   ;;  %s9293_s4 = inlined_call_operand.vmem [shape: f32[8,8,1], index: 4, kind: input, shape index: {}]   ;;  %s9294_s5 = inlined_call_operand.vmem [shape: s32[1,512], index: 5, kind: input, shape index: {}]   ;;  %s9295_s6 = inlined_call_operand.vmem [shape: s32[1,512], index: 6, kind: input, shape index: {}]   ;;  %s9296_s7 = inlined_call_operand.hbm [shape: f32[8,512], index: 7, kind: output, shape index: {}]  }
   0x1   :  { %v5888_v0 = vld [vmem:[%s9289_s0 + $0x18] sm:$0xff]  ;;  %v5893_v1 = vld [vmem:[%s9289_s0 + $0x10] sm:$0xff]  ;;  %763 = vmatprep.mubr.f32.mxu1 %v9330_v2  ;;  %692 = vmatprep.mubr.f32.mxu0 %v9330_v2 }
   0x2   :  { %560 = vrot.lane.b32.xlu0 %v5888_v0, %s5819_s28  ;;  %558 = vrot.lane.b32.xlu1 %v5893_v1, %s5819_s28 }
   0x3   :  { %5740 = vset.pattern.permute.xlu0 %v9328_v3  ;;  %5741 = vset.pattern.permute.xlu1 %v9328_v3 }
   0x4   :  { %12 = vsyncpa [#allocation5], 0  ;;  %s5822_s29 = smov 112   ;;  %s5823_s30 = smov 113   ;;  %v5913_v4 = vld [vmem:[%s9289_s0 + $0x8] sm:$0xff]  ;;  %v5922_v5 = vld [vmem:[%s9289_s0] sm:$0xff]  ;;  %v62_v13 = vlaneseq }
   0x5   :  { %s5824_s10 = smov 127   ;;  %s5825_s13 = smov 1   ;;  %v618_v6 = vld [vmem:[%s9291_s2] sm:$0xff] }
   0x6   :  { %562 = vrot.lane.b32.xlu0 %v9330_v2, %s5819_s28  ;;  %500 = vrot.lane.b32.xlu1 %v5888_v0, %s5822_s29  ;;  %s5826_s0 = smov 15   ;;  %s5827_s14 = smov 16   ;;  %v774_v7 = vld [vmem:[%s9292_s3] sm:$0xff]  ;;  %v63_v15 = vshrl.u32 %v62_v13, 7 }
   0x7   :  { %s5828_s15 = smov 17   ;;  %v784_v8 = vld [vmem:[%s9293_s4] sm:$0xff]  ;;  %s5829_s22 = smov 94  }
   0x8   :  { %v5973_v9 = vld [vmem:[%s9294_s5] sm:$0xf]  ;;  %s5830_s25 = smov 98   ;;  %v6007_v17 = vsub.s32 3, %v63_v15  ;;  %v6010_v18 = vsub.s32 2, %v63_v15  ;;  %v6052_v33 = vsub.s32 1, %v63_v15 }
   0x9   :  { %9451 = vst [vmem:[#allocation7_spill] sm:$0xff] %v5973_v9  ;;  %v5980_v10 = vld [vmem:[%s9295_s6] sm:$0xf]  ;;  %v402_v11 = vadd.s32 1, %v5973_v9  ;;  %vm9297_vm14 = vcmp.ge.s32.totalorder %v5973_v9, 0  ;;  %vm245_vm15 = vcmp.le.s32.totalorder %v5973_v9, 15 }
   0xa   :  { %502 = vrot.lane.b32.xlu0 %v9330_v2, %s5822_s29  ;;  %498 = vrot.lane.b32.xlu1 %v5893_v1, %s5822_s29  ;;  %9452 = vst [vmem:[#allocation8_spill] sm:$0xff] %v5980_v10  ;;  %v5984_v12 = vadd.s32 1, %v5980_v10  ;;  %vm9299_vm6 = vcmp.ge.s32.totalorder %v5980_v10, 0  ;;  %v5998_v16 = vadd.s32 4294967295, %v5980_v10  ;;  %vm9298_vm8 = vcmp.le.s32.totalorder %v5980_v10, 15  ;;  %9455 = vst [vmem:[#allocation9_spill] sm:$0xff] %v6007_v17 }
   0xb   :  { %vm403_vm0 = vcmp.ge.s32.totalorder %v402_v11, 0  ;;  %vm404_vm1 = vcmp.le.s32.totalorder %v402_v11, 15  ;;  %9456 = vst [vmem:[#allocation10_spill] sm:$0xff] %v6010_v18  ;;  %9459 = vst [vmem:[#allocation11_spill] sm:$0xff] %v6052_v33  ;;  %v6079_v46 = vsub.s32 0, %v63_v15  ;;  %v52_v57 = vadd.s32 4294967295, %v5973_v9 }
   0xc   :  { %vm182_vm2 = vcmp.ge.s32.totalorder %v5984_v12, 0  ;;  %vm5987_vm3 = vmand %vm403_vm0, %vm404_vm1  ;;  %vm9301_vm4 = vcmp.le.s32.totalorder %v5984_v12, 15  ;;  %vm9300_vm10 = vcmp.ge.s32.totalorder %v5998_v16, 0  ;;  %vm59_vm12 = vcmp.le.s32.totalorder %v5998_v16, 15  ;;  %s5831_s8 = smov 126   ;;  %s5832_s9 = smov 96  }
   0xd   :  { %vm526_vm5 = vmand %vm5987_vm3, %vm182_vm2  ;;  %9460 = vst [vmem:[#allocation12_spill] sm:$0xff] %v6079_v46  ;;  %s5834_s11 = smov 2   ;;  %s5835_s12 = smov 32  }
   0xe   :  { %440 = vrot.lane.b32.xlu0 %v5888_v0, %s5823_s30  ;;  %442 = vrot.lane.b32.xlu1 %v9330_v2, %s5823_s30  ;;  %vm527_vm7 = vmand %vm526_vm5, %vm9301_vm4 }
   0xf   :  { %vm466_vm9 = vmand %vm5987_vm3, %vm9299_vm6  ;;  %v6013_v19 = vsel %vm527_vm7, 1, %v9328_v3 }
  0x10   :  { %vm467_vm11 = vmand %vm466_vm9, %vm9298_vm8  ;;  %v544_v20 = vrot.slane %v6013_v19, %v6007_v17  ;;  %v540_v23 = vrot.slane %v6013_v19, %v6010_v18  ;;  %vm9303_vm9 = vcmask 916480   ;;  %v536_v39 = vrot.slane %v6013_v19, %v6052_v33 }
  0x11   :  { %vm406_vm13 = vmand %vm5987_vm3, %vm9300_vm10  ;;  %v6027_v24 = vsel %vm467_vm11, 1, %v9328_v3  ;;  %vm564_vm3 = vcmask 908288   ;;  %v532_v52 = vrot.slane %v6013_v19, %v6079_v46 }
  0x12   :  { %438 = vrot.lane.b32.xlu0 %v5893_v1, %s5823_s30  ;;  %556 = vrot.lane.b32.xlu1 %v5913_v4, %s5819_s28  ;;  %vm407_vm0 = vmand %vm406_vm13, %vm59_vm12  ;;  %vm548_vm1 = vcmp.eq.s32.totalorder %v544_v20, 1  ;;  %v484_v25 = vrot.slane %v6027_v24, %v6007_v17  ;;  %vm547_vm7 = vcmp.eq.s32.totalorder %v540_v23, 1  ;;  %v480_v29 = vrot.slane %v6027_v24, %v6010_v18 }
  0x13   :  { %vm6037_vm5 = vmand %vm9297_vm14, %vm245_vm15  ;;  %v6044_v30 = vsel %vm407_vm0, 1, %v9328_v3  ;;  %v476_v60 = vrot.slane %v6027_v24, %v6052_v33  ;;  %v472_v63 = vrot.slane %v6027_v24, %v6079_v46 }
  0x14   :  { %vm342_vm11 = vmand %vm6037_vm5, %vm182_vm2  ;;  %vm488_vm13 = vcmp.eq.s32.totalorder %v484_v25, 1  ;;  %v424_v34 = vrot.slane %v6044_v30, %v6007_v17  ;;  %vm487_vm15 = vcmp.eq.s32.totalorder %v480_v29, 1  ;;  %v420_v40 = vrot.slane %v6044_v30, %v6010_v18 }
  0x15   :  { %vm343_vm0 = vmand %vm342_vm11, %vm9301_vm4 }
  0x16   :  { %376 = vrot.lane.b32.xlu0 %v5888_v0, %s5824_s10  ;;  %378 = vrot.lane.b32.xlu1 %v9330_v2, %s5824_s10  ;;  %vm306_vm14 = vmand %vm6037_vm5, %vm9299_vm6  ;;  %v6072_v43 = vsel %vm343_vm0, 1, %v9328_v3  ;;  %vm380_vm0 = vcmask 1039360   ;;  %vm55_vm6 = vcmp.le.s32.totalorder %v52_v57, 15 }
  0x17   :  { %vm307_vm11 = vmand %vm306_vm14, %vm9298_vm8  ;;  %v360_v45 = vrot.slane %v6072_v43, %v6007_v17  ;;  %v356_v53 = vrot.slane %v6072_v43, %v6010_v18  ;;  %vm54_vm8 = vcmp.ge.s32.totalorder %v52_v57, 0  ;;  %v352_v24 = vrot.slane %v6072_v43, %v6052_v33 }
  0x18   :  { %v6084_v51 = vsel %vm307_vm11, 1, %v9328_v3  ;;  %vm545_vm11 = vcmp.eq.s32.totalorder %v532_v52, 1  ;;  %vm6111_vm4 = vmand %vm54_vm8, %vm55_vm6 }
  0x19   :  { %vm364_vm14 = vcmp.eq.s32.totalorder %v360_v45, 1  ;;  %v324_v56 = vrot.slane %v6084_v51, %v6007_v17  ;;  %v320_v59 = vrot.slane %v6084_v51, %v6010_v18  ;;  %vm183_vm6 = vmand %vm6111_vm4, %vm182_vm2  ;;  %vm9464_vm2 = vcmp.ge.s32.totalorder %v5980_v10, 0 }
  0x1a   :  { %374 = vrot.lane.b32.xlu1 %v5893_v1, %s5824_s10  ;;  %554 = vrot.lane.b32.xlu0 %v5922_v5, %s5819_s28  ;;  %s5837_s28 = smov 60  }
  0x1e   :  { %494 = vrot.lane.b32.xlu1 %v5922_v5, %s5822_s29  ;;  %496 = vrot.lane.b32.xlu0 %v5913_v4, %s5822_s29 }
  0x22   :  { %281 = vrot.lane.b32.xlu1 %v5893_v1, %s5825_s13  ;;  %436 = vrot.lane.b32.xlu0 %v5913_v4, %s5823_s30 }
  0x26   :  { %434 = vrot.lane.b32.xlu1 %v5922_v5, %s5823_s30  ;;  %283 = vrot.lane.b32.xlu0 %v5888_v0, %s5825_s13  ;;  %s5838_s30 = smov 68  }
  0x2a   :  { %372 = vrot.lane.b32.xlu1 %v5913_v4, %s5824_s10  ;;  %279 = vrot.lane.b32.xlu0 %v5913_v4, %s5825_s13 }
  0x2e   :  { %220 = vrot.lane.b32.xlu1 %v5888_v0, %s5826_s0  ;;  %218 = vrot.lane.b32.xlu0 %v5893_v1, %s5826_s0 }
  0x32   :  { %216 = vrot.lane.b32.xlu1 %v5913_v4, %s5826_s0  ;;  %370 = vrot.lane.b32.xlu0 %v5922_v5, %s5824_s10  ;;  %s5833_s10 = smov 30  }
  0x36   :  { %157 = vrot.lane.b32.xlu1 %v5888_v0, %s5827_s14  ;;  %155 = vrot.lane.b32.xlu0 %v5893_v1, %s5827_s14 }
  0x3a   :  { %277 = vrot.lane.b32.xlu1 %v5922_v5, %s5825_s13  ;;  %153 = vrot.lane.b32.xlu0 %v5913_v4, %s5827_s14 }
  0x3e   :  { %95 = vrot.lane.b32.xlu1 %v5888_v0, %s5828_s15  ;;  %93 = vrot.lane.b32.xlu0 %v5893_v1, %s5828_s15 }
  0x42   :  { %91 = vrot.lane.b32.xlu1 %v5913_v4, %s5828_s15  ;;  %275 = vrot.lane.b32.xlu0 %v9330_v2, %s5825_s13  ;;  %s5836_s13 = smov 34  }
  0x46   :  { %212 = vrot.lane.b32.xlu1 %v9330_v2, %s5826_s0  ;;  %214 = vrot.lane.b32.xlu0 %v5922_v5, %s5826_s0 }
  0x4a   :  { %149 = vrot.lane.b32.xlu1 %v9330_v2, %s5827_s14  ;;  %151 = vrot.lane.b32.xlu0 %v5922_v5, %s5827_s14 }
  0x4e   :  { %87 = vrot.lane.b32.xlu1 %v9330_v2, %s5828_s15  ;;  %89 = vrot.lane.b32.xlu0 %v5922_v5, %s5828_s15 }
  0x52   :  { %621 = vperm.xlu0 %5740, %v618_v6   ;;  %777 = vperm.xlu1 %5741, %v774_v7  }
  0x56   :  { %787 = vperm.xlu1 %5741, %v784_v8   ;;  %v416_v8 = vrot.slane %v6044_v30, %v6052_v33  ;;  %1283 = vrot.lane.b32.xlu0 %v9330_v2, %s5832_s9 }
  0x58   :  { %vm426_vm8 = vcmp.eq.s32.totalorder %v416_v8, 1  ;;  %v581_v8 = vld [vmem:[%s9290_s1] sm:$0xff] }
  0x5a   :  { %1343 = vrot.lane.b32.xlu1 %v9330_v2, %s5829_s22  ;;  %1056 = vrot.lane.b32.xlu0 %v9330_v2, %s5834_s11 }
  0x5e   :  { %1223 = vrot.lane.b32.xlu1 %v9330_v2, %s5830_s25 }
  0x62   :  { %1159 = vrot.lane.b32.xlu1 %v9330_v2, %s5831_s8 }
  0x66   :  { %995 = vrot.lane.b32.xlu1 %v9330_v2, %s5833_s10 }
  0x74   :  { %v561_v21 = vpop.permute.xlu0 %560  ;;  %v559_v22 = vpop.permute.xlu1 %558 }
  0x75   :  { %v567_v32 = vsel %vm564_vm3, %v559_v22, %v561_v21 }
  0x78   :  { %v563_v27 = vpop.permute.xlu0 %562  ;;  %v501_v28 = vpop.permute.xlu1 %500 }
  0x79   :  { %v568_v31 = vsel %vm564_vm3, %v561_v21, %v563_v27 }
  0x7a   :  { %5452 = vmatprep.subr.msk.mxu1 %vm548_vm1, %v568_v31  ;;  %vm444_vm1 = vcmask 924672  }
  0x7b   :  { %5453 = vmatpush1.msk.msra.mxu1 %vm547_vm7, %v567_v32  ;;  %vm428_vm7 = vcmp.eq.s32.totalorder %v424_v34, 1 }
  0x7c   :  { %v503_v35 = vpop.permute.xlu0 %502  ;;  %v6056_v36 = vpop.permute.xlu1 %498 }
  0x7d   :  { %v508_v37 = vsel %vm9303_vm9, %v501_v28, %v503_v35  ;;  %v507_v38 = vsel %vm9303_vm9, %v6056_v36, %v501_v28 }
  0x7e   :  { %5454 = vmatprep.subr.msk.mxu1 %vm488_vm13, %v508_v37  ;;  %vm546_vm13 = vcmp.eq.s32.totalorder %v536_v39, 1 }
  0x7f   :  { %5455 = vmatpush1.msk.msra.mxu1 %vm487_vm15, %v507_v38  ;;  %vm427_vm15 = vcmp.eq.s32.totalorder %v420_v40, 1 }
  0x80   :  { %v441_v41 = vpop.permute.xlu0 %440  ;;  %v443_v42 = vpop.permute.xlu1 %442 }
  0x81   :  { %v448_v44 = vsel %vm444_vm1, %v441_v41, %v443_v42 }
  0x82   :  { %5456 = vmatprep.subr.msk.mxu1 %vm428_vm7, %v448_v44  ;;  %vm247_vm7 = vmand %vm6037_vm5, %vm9300_vm10  ;;  %vm486_vm10 = vcmp.eq.s32.totalorder %v476_v60, 1  ;;  %v312_v44 = vrot.slane %v6084_v51, %v6079_v46 }
  0x83   :  { %vm248_vm5 = vmand %vm247_vm7, %vm59_vm12  ;;  %vm9463_vm7 = vcmp.le.s32.totalorder %v5984_v12, 15 }
  0x84   :  { %v439_v47 = vpop.permute.xlu0 %438  ;;  %v557_v48 = vpop.permute.xlu1 %556  ;;  %v6117_v15 = vsel %vm248_vm5, 1, %v9328_v3  ;;  %vm362_vm5 = vcmp.eq.s32.totalorder %v352_v24, 1 }
  0x85   :  { %v566_v49 = vsel %vm564_vm3, %v557_v48, %v559_v22  ;;  %v447_v50 = vsel %vm444_vm1, %v439_v47, %v441_v41  ;;  %v261_v25 = vrot.slane %v6117_v15, %v6010_v18  ;;  %v316_v41 = vrot.slane %v6084_v51, %v6052_v33 }
  0x86   :  { %5434 = vmatprep.subr.msk.mxu0 %vm546_vm13, %v566_v49  ;;  %5457 = vmatpush1.msk.msra.mxu1 %vm427_vm15, %v447_v50  ;;  %vm363_vm13 = vcmp.eq.s32.totalorder %v356_v53, 1  ;;  %vm328_vm15 = vcmp.eq.s32.totalorder %v324_v56, 1  ;;  %v257_v50 = vrot.slane %v6117_v15, %v6052_v33 }
  0x88   :  { %v377_v54 = vpop.permute.xlu0 %376  ;;  %v379_v55 = vpop.permute.xlu1 %378 }
  0x89   :  { %v384_v58 = vsel %vm380_vm0, %v377_v54, %v379_v55 }
  0x8a   :  { %5458 = vmatprep.subr.msk.mxu1 %vm364_vm14, %v384_v58  ;;  %vm327_vm14 = vcmp.eq.s32.totalorder %v320_v59, 1 }
  0x8c   :  { %v375_v61 = vpop.permute.xlu1 %374  ;;  %v555_v62 = vpop.permute.xlu0 %554 }
  0x8d   :  { %v565_v6 = vsel %vm564_vm3, %v555_v62, %v557_v48  ;;  %v383_v7 = vsel %vm380_vm0, %v375_v61, %v377_v54  ;;  %vm485_vm3 = vcmp.eq.s32.totalorder %v472_v63, 1 }
  0x8e   :  { %5435 = vmatpush1.msk.msra.mxu0 %vm545_vm11, %v565_v6  ;;  %5459 = vmatpush1.msk.msra.mxu1 %vm363_vm13, %v383_v7  ;;  %vm285_vm11 = vcmask 7168  }
  0x8f   :  { %5460 = vmatprep.subr.msk.mxu1 %vm328_vm15, %v5888_v0  ;;  %v412_v0 = vrot.slane %v6044_v30, %v6079_v46 }
  0x90   :  { %v495_v13 = vpop.permute.xlu1 %494  ;;  %v497_v14 = vpop.permute.xlu0 %496  ;;  %5461 = vmatpush1.msk.msra.mxu1 %vm327_vm14, %v5893_v1  ;;  %v265_v1 = vrot.slane %v6117_v15, %v6007_v17  ;;  %vm120_vm14 = vmand %vm6111_vm4, %vm9464_vm2 }
  0x91   :  { %v506_v19 = vsel %vm9303_vm9, %v497_v14, %v6056_v36  ;;  %v505_v20 = vsel %vm9303_vm9, %v495_v13, %v497_v14  ;;  %vm425_vm13 = vcmp.eq.s32.totalorder %v412_v0, 1  ;;  %v348_v36 = vrot.slane %v6072_v43, %v6079_v46 }
  0x92   :  { %5436 = vmatprep.subr.msk.mxu0 %vm486_vm10, %v506_v19  ;;  %vm185_vm10 = vmand %vm183_vm6, %vm9463_vm7  ;;  %vm269_vm15 = vcmp.eq.s32.totalorder %v265_v1, 1 }
  0x93   :  { %5437 = vmatpush1.msk.msra.mxu0 %vm485_vm3, %v505_v20  ;;  %v6138_v28 = vsel %vm185_vm10, 1, %v9328_v3  ;;  %vm268_vm3 = vcmp.eq.s32.totalorder %v261_v25, 1  ;;  %vm9466_vm10 = vcmp.ge.s32.totalorder %v5998_v16, 0 }
  0x94   :  { %v282_v21 = vpop.permute.xlu1 %281  ;;  %v437_v22 = vpop.permute.xlu0 %436  ;;  %v202_v30 = vrot.slane %v6138_v28, %v6007_v17  ;;  %v198_v37 = vrot.slane %v6138_v28, %v6010_v18  ;;  %v194_v63 = vrot.slane %v6138_v28, %v6052_v33  ;;  %v190_v11 = vrot.slane %v6138_v28, %v6079_v46 }
  0x95   :  { %v446_v23 = vsel %vm444_vm1, %v437_v22, %v439_v47 }
  0x96   :  { %5438 = vmatprep.subr.msk.mxu0 %vm426_vm8, %v446_v23  ;;  %vm222_vm8 = vcmask 121856   ;;  %vm206_vm7 = vcmp.eq.s32.totalorder %v202_v30, 1  ;;  %vm205_vm2 = vcmp.eq.s32.totalorder %v198_v37, 1 }
  0x98   :  { %v435_v26 = vpop.permute.xlu1 %434  ;;  %v284_v27 = vpop.permute.xlu0 %283 }
  0x99   :  { %v445_v29 = vsel %vm444_vm1, %v435_v26, %v437_v22  ;;  %v289_v12 = vsel %vm285_vm11, %v282_v21, %v284_v27  ;;  %vm9465_vm1 = vcmp.le.s32.totalorder %v5980_v10, 15 }
  0x9a   :  { %5439 = vmatpush1.msk.msra.mxu0 %vm425_vm13, %v445_v29  ;;  %5462 = vmatprep.subr.msk.mxu1 %vm269_vm15, %v289_v12  ;;  %vm122_vm6 = vmand %vm120_vm14, %vm9465_vm1  ;;  %vm361_vm15 = vcmp.eq.s32.totalorder %v348_v36, 1  ;;  %vm326_vm14 = vcmp.eq.s32.totalorder %v316_v41, 1  ;;  %vm9302_vm1 = vcmask 130048  }
  0x9b   :  { %v6157_v40 = vsel %vm122_vm6, 1, %v9328_v3  ;;  %vm58_vm13 = vmand %vm6111_vm4, %vm9466_vm10  ;;  %vm97_vm6 = vcmask 138240  }
  0x9c   :  { %v373_v31 = vpop.permute.xlu1 %372  ;;  %v280_v32 = vpop.permute.xlu0 %279  ;;  %v139_v43 = vrot.slane %v6157_v40, %v6007_v17  ;;  %v135_v51 = vrot.slane %v6157_v40, %v6010_v18  ;;  %v127_v0 = vrot.slane %v6157_v40, %v6079_v46 }
  0x9d   :  { %v382_v34 = vsel %vm380_vm0, %v373_v31, %v375_v61  ;;  %v288_v35 = vsel %vm285_vm11, %v280_v32, %v282_v21 }
  0x9e   :  { %5440 = vmatprep.subr.msk.mxu0 %vm362_vm5, %v382_v34  ;;  %5463 = vmatpush1.msk.msra.mxu1 %vm268_vm3, %v288_v35  ;;  %vm325_vm5 = vcmp.eq.s32.totalorder %v312_v44, 1  ;;  %vm60_vm3 = vmand %vm58_vm13, %vm59_vm12  ;;  %vm143_vm4 = vcmp.eq.s32.totalorder %v139_v43, 1  ;;  %vm267_vm12 = vcmp.eq.s32.totalorder %v257_v50, 1 }
  0x9f   :  { %v61_v54 = vsel %vm60_vm3, 1, %v9328_v3 }
  0xa0   :  { %v221_v38 = vpop.permute.xlu1 %220  ;;  %v219_v39 = vpop.permute.xlu0 %218  ;;  %v77_v55 = vrot.slane %v61_v54, %v6007_v17  ;;  %v73_v59 = vrot.slane %v61_v54, %v6010_v18  ;;  %v69_v22 = vrot.slane %v61_v54, %v6052_v33  ;;  %v65_v25 = vrot.slane %v61_v54, %v6079_v46 }
  0xa1   :  { %v226_v42 = vsel %vm222_vm8, %v219_v39, %v221_v38 }
  0xa2   :  { %5464 = vmatprep.subr.msk.mxu1 %vm206_vm7, %v226_v42  ;;  %vm81_vm7 = vcmp.eq.s32.totalorder %v77_v55, 1  ;;  %vm80_vm13 = vcmp.eq.s32.totalorder %v73_v59, 1  ;;  %vm79_vm3 = vcmp.eq.s32.totalorder %v69_v22, 1 }
  0xa4   :  { %v217_v45 = vpop.permute.xlu1 %216  ;;  %v371_v47 = vpop.permute.xlu0 %370 }
  0xa5   :  { %v381_v48 = vsel %vm380_vm0, %v371_v47, %v373_v31  ;;  %v225_v49 = vsel %vm222_vm8, %v217_v45, %v219_v39  ;;  %vm142_vm0 = vcmp.eq.s32.totalorder %v135_v51, 1  ;;  %v794_v31 = vand.u32 1, %v5973_v9 }
  0xa6   :  { %5441 = vmatpush1.msk.msra.mxu0 %vm361_vm15, %v381_v48  ;;  %5465 = vmatpush1.msk.msra.mxu1 %vm205_vm2, %v225_v49  ;;  %vm9304_vm15 = vcmask 588800   ;;  %vm204_vm2 = vcmp.eq.s32.totalorder %v194_v63, 1 }
  0xa7   :  { %5442 = vmatprep.subr.msk.mxu0 %vm326_vm14, %v5913_v4  ;;  %vm203_vm14 = vcmp.eq.s32.totalorder %v190_v11, 1 }
  0xa8   :  { %v158_v52 = vpop.permute.xlu1 %157  ;;  %v156_v53 = vpop.permute.xlu0 %155  ;;  %5443 = vmatpush1.msk.msra.mxu0 %vm325_vm5, %v5922_v5  ;;  %v253_v5 = vrot.slane %v6117_v15, %v6079_v46  ;;  %v131_v15 = vrot.slane %v6157_v40, %v6052_v33  ;;  %vm140_vm5 = vcmp.eq.s32.totalorder %v127_v0, 1 }
  0xa9   :  { %v163_v16 = vsel %vm9302_vm1, %v156_v53, %v158_v52 }
  0xaa   :  { %5466 = vmatprep.subr.msk.mxu1 %vm143_vm4, %v163_v16  ;;  %vm266_vm10 = vcmp.eq.s32.totalorder %v253_v5, 1  ;;  %vm795_vm4 = vcmp.eq.s32.totalorder %v794_v31, 0 }
  0xac   :  { %v278_v4 = vpop.permute.xlu1 %277  ;;  %v154_v56 = vpop.permute.xlu0 %153 }
  0xad   :  { %v287_v57 = vsel %vm285_vm11, %v278_v4, %v280_v32  ;;  %v162_v58 = vsel %vm9302_vm1, %v154_v56, %v156_v53  ;;  %v798_v32 = vand.u32 1, %v5980_v10 }
  0xae   :  { %5444 = vmatprep.subr.msk.mxu0 %vm267_vm12, %v287_v57  ;;  %5467 = vmatpush1.msk.msra.mxu1 %vm142_vm0, %v162_v58  ;;  %vm796_vm12 = vcmp.le.s32.totalorder %v5973_v9, 14 }
  0xaf   :  { %vm797_vm0 = vmand %vm795_vm4, %vm796_vm12 }
  0xb0   :  { %v96_v60 = vpop.permute.xlu1 %95  ;;  %v94_v61 = vpop.permute.xlu0 %93 }
  0xb1   :  { %v101_v62 = vsel %vm97_vm6, %v94_v61, %v96_v60 }
  0xb2   :  { %5468 = vmatprep.subr.msk.mxu1 %vm81_vm7, %v101_v62 }
  0xb4   :  { %v92_v6 = vpop.permute.xlu1 %91  ;;  %v276_v7 = vpop.permute.xlu0 %275 }
  0xb5   :  { %v286_v13 = vsel %vm285_vm11, %v276_v7, %v278_v4  ;;  %v100_v14 = vsel %vm97_vm6, %v92_v6, %v94_v61  ;;  %vm141_vm11 = vcmp.eq.s32.totalorder %v131_v15, 1  ;;  %v5397_v15 = vld [vmem:[%s9293_s4 + $0x8] sm:$0xff] }
  0xb6   :  { %5445 = vmatpush1.msk.msra.mxu0 %vm266_vm10, %v286_v13  ;;  %5469 = vmatpush1.msk.msra.mxu1 %vm80_vm13, %v100_v14  ;;  %vm9309_vm10 = vcmp.le.s32.totalorder %v5980_v10, 14  ;;  %v5396_v13 = vld [vmem:[%s9292_s3 + $0x8] sm:$0xff] }
  0xb7   :  { %5391 = vmatmul.mubr.msk.f32.vlgmr.msra.gmra.mxu1 %vm9304_vm15, %v581_v8  ;;  %v5393_v14 = vld [vmem:[%s9291_s2 + $0x8] sm:$0xff] }
  0xb8   :  { %v213_v19 = vpop.permute.xlu1 %212  ;;  %v215_v20 = vpop.permute.xlu0 %214  ;;  %1545 = vmatprep.mubr.f32.mxu1 %v9330_v2 }
  0xb9   :  { %v224_v1 = vsel %vm222_vm8, %v215_v20, %v217_v45  ;;  %v223_v21 = vsel %vm222_vm8, %v213_v19, %v215_v20  ;;  %vm78_vm8 = vcmp.eq.s32.totalorder %v65_v25, 1 }
  0xba   :  { %5446 = vmatprep.subr.msk.mxu0 %vm204_vm2, %v224_v1 }
  0xbb   :  { %5447 = vmatpush1.msk.msra.mxu0 %vm203_vm14, %v223_v21 }
  0xbc   :  { %v150_v23 = vpop.permute.xlu1 %149  ;;  %v152_v24 = vpop.permute.xlu0 %151 }
  0xbd   :  { %v161_v26 = vsel %vm9302_vm1, %v152_v24, %v154_v56  ;;  %v160_v27 = vsel %vm9302_vm1, %v150_v23, %v152_v24 }
  0xbe   :  { %5448 = vmatprep.subr.msk.mxu0 %vm141_vm11, %v161_v26 }
  0xbf   :  { %5449 = vmatpush1.msk.msra.mxu0 %vm140_vm5, %v160_v27  ;;  %v1183_v27 = vadd.s32 2, %v5973_v9 }
  0xc0   :  { %v88_v28 = vpop.permute.xlu1 %87  ;;  %v90_v29 = vpop.permute.xlu0 %89 }
  0xc1   :  { %v99_v12 = vsel %vm97_vm6, %v90_v29, %v92_v6  ;;  %v98_v30 = vsel %vm97_vm6, %v88_v28, %v90_v29  ;;  %vm799_vm6 = vcmp.eq.s32.totalorder %v798_v32, 0  ;;  %v6376_v28 = vadd.s32 2, %v5980_v10 }
  0xc2   :  { %5450 = vmatprep.subr.msk.mxu0 %vm79_vm3, %v99_v12  ;;  %vm800_vm7 = vmand %vm797_vm0, %vm799_vm6  ;;  %vm1184_vm3 = vcmp.ge.s32.totalorder %v1183_v27, 0 }
  0xc3   :  { %5451 = vmatpush1.msk.msra.mxu0 %vm78_vm8, %v98_v30  ;;  %vm802_vm13 = vmand %vm800_vm7, %vm9309_vm10  ;;  %vm1185_vm8 = vcmp.le.s32.totalorder %v1183_v27, 14  ;;  %vm9306_vm4 = vcmp.ge.s32.totalorder %v6376_v28, 0  ;;  %vm9305_vm6 = vcmp.le.s32.totalorder %v6376_v28, 14 }
  0xc4   :  { %5390 = vmatmul.mubr.msk.f32.vlgmr.msra.gmra.mxu0 %vm9304_vm15, %v581_v8  ;;  %v803_v36 = vsel %vm802_vm13, 1, %v9328_v3  ;;  %vm6381_vm0 = vmand %vm1184_vm3, %vm1185_vm8  ;;  %vm9477_vm3 = vcmp.ge.s32.totalorder %v5980_v10, 0  ;;  %v5399_v8 = vld [vmem:[%s9291_s2 + $0x10] sm:$0xff] }
  0xc5   :  { %1474 = vmatprep.mubr.f32.mxu0 %v9330_v2  ;;  %v815_v39 = vrot.slane %v803_v36, %v6010_v18  ;;  %v807_v49 = vrot.slane %v803_v36, %v6079_v46  ;;  %v819_v59 = vrot.slane %v803_v36, %v6007_v17  ;;  %v811_v63 = vrot.slane %v803_v36, %v6052_v33  ;;  %vm1307_vm7 = vmand %vm6381_vm0, %vm9306_vm4 }
  0xc6   :  { %vm1308_vm13 = vmand %vm1307_vm7, %vm9305_vm6 }
  0xc7   :  { %vm6232_vm2 = vcmp.eq.s32.totalorder %v815_v39, 1  ;;  %vm6249_vm14 = vcmp.eq.s32.totalorder %v807_v49, 1  ;;  %vm6270_vm11 = vcmp.eq.s32.totalorder %v819_v59, 1  ;;  %vm6283_vm5 = vcmp.eq.s32.totalorder %v811_v63, 1  ;;  %vm1247_vm8 = vmand %vm6381_vm0, %vm9477_vm3 }
  0xc8   :  { %v1309_v39 = vsel %vm1308_vm13, 1, %v9328_v3  ;;  %vm1248_vm9 = vmand %vm1247_vm8, %vm9309_vm10  ;;  %vm9478_vm3 = vcmp.ge.s32.totalorder %v5973_v9, 0  ;;  %vm9310_vm13 = vcmask 769024   ;;  %v9487_v59 = vmov 0 }
  0xc9   :  { %vm6425_vm6 = vmand %vm9478_vm3, %vm796_vm12  ;;  %vm9483_vm3 = vcmp.ge.s32.totalorder %v5980_v10, 0 }
  0xca   :  { %vm1123_vm12 = vmand %vm6425_vm6, %vm9306_vm4 }
  0xcd   :  { %v622_v34 = vpop.permute.xlu0 %621  ;;  %v778_v35 = vpop.permute.xlu1 %777 }
  0xd1   :  { %v788_v41 = vpop.permute.xlu1 %787  ;;  %v6362_v1 = vpop.permute.xlu0 %1283 }
  0xd5   :  { %v6352_v19 = vpop.permute.xlu1 %1343  ;;  %v6366_v22 = vpop.permute.xlu0 %1056 }
  0xd9   :  { %v6358_v20 = vpop.permute.xlu1 %1223 }
  0xdd   :  { %v6360_v0 = vpop.permute.xlu1 %1159 }
  0xe1   :  { %v6364_v21 = vpop.permute.xlu1 %995 }
 0x177   :  { %v765_v37 = vpop.f32.mrf.mxu1 }
 0x178   :  { %v766_v38 = vadd.f32 %v765_v37, %v622_v34 }
 0x179   :  { %v767_v52 = vpop.f32.mrf.mxu1 }
 0x17a   :  { %v772_v40 = vmax.f32 %v766_v38, 0.0  ;;  %v768_v16 = vadd.f32 %v767_v52, %v622_v34 }
 0x17c   :  { %v782_v42 = vmul.f32 %v778_v35, %v772_v40  ;;  %v773_v56 = vmax.f32 %v768_v16, 0.0  ;;  %v1317_v40 = vrot.slane %v1309_v39, %v6052_v33  ;;  %v1321_v16 = vrot.slane %v1309_v39, %v6010_v18 }
 0x17e   :  { %v792_v43 = vadd.f32 %v788_v41, %v782_v42  ;;  %v783_v58 = vmul.f32 %v778_v35, %v773_v56  ;;  %vm6441_vm8 = vcmp.eq.s32.totalorder %v1317_v40, 1  ;;  %v9493_v40 = vmov 0 }
 0x180   :  { %v6238_v45 = vsel %vm6232_vm2, %v792_v43, 0.0  ;;  %v793_v60 = vadd.f32 %v788_v41, %v783_v58 }
 0x181   :  { %1279 = vrot.lane.b32.xlu1 %v6238_v45, %s5832_s9  ;;  %1339 = vrot.lane.b32.xlu0 %v6238_v45, %s5829_s22 }
 0x182   :  { %v6281_v6 = vsel %vm6270_vm11, %v793_v60, 0.0 }
 0x184   :  { %v694_v47 = vpop.f32.mrf.mxu0 }
 0x185   :  { %v695_v48 = vadd.f32 %v694_v47, %v622_v34  ;;  %1155 = vrot.lane.b32.xlu1 %v6238_v45, %s5831_s8  ;;  %1219 = vrot.lane.b32.xlu0 %v6238_v45, %s5830_s25  ;;  %v1313_v47 = vrot.slane %v1309_v39, %v6079_v46 }
 0x186   :  { %v696_v4 = vpop.f32.mrf.mxu0 }
 0x187   :  { %v770_v50 = vmax.f32 %v695_v48, 0.0  ;;  %v697_v57 = vadd.f32 %v696_v4, %v622_v34  ;;  %v6395_v34 = vadd.s32 4294967294, %v5980_v10  ;;  %v6433_v48 = vsel %vm1248_vm9, 1, %v9328_v3  ;;  %vm1087_vm9 = vmand %vm6425_vm6, %vm9483_vm3 }
 0x188   :  { %v1265_v4 = vrot.slane %v6433_v48, %v6007_v17  ;;  %vm9486_vm3 = vcmp.le.s32.totalorder %v6376_v28, 14 }
 0x189   :  { %v780_v51 = vmul.f32 %v778_v35, %v770_v50  ;;  %v771_v5 = vmax.f32 %v697_v57, 0.0  ;;  %vm9308_vm1 = vcmp.ge.s32.totalorder %v6395_v34, 0  ;;  %vm9307_vm15 = vcmp.le.s32.totalorder %v6395_v34, 14  ;;  %vm1124_vm4 = vmand %vm1123_vm12, %vm9486_vm3 }
 0x18a   :  { %vm1187_vm7 = vmand %vm6381_vm0, %vm9308_vm1  ;;  %v1325_v50 = vrot.slane %v1309_v39, %v6007_v17  ;;  %vm9311_vm1 = vcmask 785408   ;;  %vm6482_vm12 = vcmp.eq.s32.totalorder %v1321_v16, 1  ;;  %vm6486_vm3 = vcmp.eq.s32.totalorder %v1265_v4, 1 }
 0x18b   :  { %v790_v54 = vadd.f32 %v788_v41, %v780_v51  ;;  %v781_v61 = vmul.f32 %v778_v35, %v771_v5  ;;  %vm1188_vm0 = vmand %vm1187_vm7, %vm9307_vm15  ;;  %vm6452_vm7 = vcmp.eq.s32.totalorder %v1313_v47, 1  ;;  %v1261_v5 = vrot.slane %v6433_v48, %v6010_v18 }
 0x18c   :  { %v6460_v56 = vsel %vm1188_vm0, 1, %v9328_v3  ;;  %vm1088_vm15 = vmand %vm1087_vm9, %vm9309_vm10  ;;  %vm6474_vm0 = vcmp.eq.s32.totalorder %v1325_v50, 1  ;;  %v837_v39 = vadd.s32 4294967294, %v5973_v9  ;;  %vm9314_vm9 = vcmask 801792  }
 0x18d   :  { %v6255_v55 = vsel %vm6249_vm14, %v790_v54, 0.0  ;;  %v791_v7 = vadd.f32 %v788_v41, %v781_v61  ;;  %v9484_v54 = vmov 0  ;;  %v9488_v59 = vsel %vm6474_vm0, 4294967295, %v9487_v59 }
 0x18e   :  { %1275 = vrot.lane.b32.xlu1 %v6255_v55, %s5832_s9  ;;  %1335 = vrot.lane.b32.xlu0 %v6255_v55, %s5829_s22  ;;  %v9485_v54 = vsel %vm6452_vm7, 4294967295, %v9484_v54  ;;  %v1205_v60 = vrot.slane %v6460_v56, %v6007_v17  ;;  %v6499_v30 = vsel %vm1088_vm15, 1, %v9328_v3  ;;  %vm6504_vm10 = vcmp.eq.s32.totalorder %v1261_v5, 1 }
 0x18f   :  { %v6293_v11 = vsel %vm6283_vm5, %v791_v7, 0.0  ;;  %v9489_v7 = vmov 0  ;;  %v9494_v40 = vsel %vm6504_vm10, 4294967295, %v9493_v40  ;;  %v9497_v4 = vmov 0 }
 0x190   :  { %v9490_v7 = vsel %vm6482_vm12, 4294967295, %v9489_v7  ;;  %v1101_v5 = vrot.slane %v6499_v30, %v6010_v18  ;;  %v9500_v41 = vmov 0 }
 0x192   :  { %1062 = vrot.lane.b32.xlu1 %v6238_v45, %s5834_s11  ;;  %1001 = vrot.lane.b32.xlu0 %v6238_v45, %s5833_s10 }
 0x196   :  { %1215 = vrot.lane.b32.xlu1 %v6255_v55, %s5830_s25  ;;  %1151 = vrot.lane.b32.xlu0 %v6255_v55, %s5831_s8 }
 0x19a   :  { %1058 = vrot.lane.b32.xlu1 %v6255_v55, %s5834_s11  ;;  %938 = vrot.lane.b32.xlu0 %v6238_v45, %s5835_s12 }
 0x19e   :  { %1281 = vrot.lane.b32.xlu1 %v6281_v6, %s5832_s9  ;;  %878 = vrot.lane.b32.xlu0 %v6238_v45, %s5836_s13 }
 0x1a2   :  { %1337 = vrot.lane.b32.xlu1 %v6293_v11, %s5829_s22  ;;  %997 = vrot.lane.b32.xlu0 %v6255_v55, %s5833_s10 }
 0x1a6   :  { %1153 = vrot.lane.b32.xlu1 %v6293_v11, %s5831_s8  ;;  %1341 = vrot.lane.b32.xlu0 %v6281_v6, %s5829_s22 }
 0x1aa   :  { %1003 = vrot.lane.b32.xlu1 %v6281_v6, %s5833_s10  ;;  %1221 = vrot.lane.b32.xlu0 %v6281_v6, %s5830_s25 }
 0x1ae   :  { %999 = vrot.lane.b32.xlu1 %v6293_v11, %s5833_s10  ;;  %1157 = vrot.lane.b32.xlu0 %v6281_v6, %s5831_s8 }
 0x1b2   :  { %940 = vrot.lane.b32.xlu1 %v6281_v6, %s5835_s12  ;;  %1277 = vrot.lane.b32.xlu0 %v6293_v11, %s5832_s9 }
 0x1b6   :  { %880 = vrot.lane.b32.xlu1 %v6281_v6, %s5836_s13  ;;  %1217 = vrot.lane.b32.xlu0 %v6293_v11, %s5830_s25 }
 0x1ba   :  { %876 = vrot.lane.b32.xlu1 %v6293_v11, %s5836_s13  ;;  %1064 = vrot.lane.b32.xlu0 %v6281_v6, %s5834_s11 }
 0x1be   :  { %932 = vrot.lane.b32.xlu1 %v9330_v2, %s5835_s12  ;;  %1060 = vrot.lane.b32.xlu0 %v6293_v11, %s5834_s11 }
 0x1c2   :  { %872 = vrot.lane.b32.xlu1 %v9330_v2, %s5836_s13  ;;  %936 = vrot.lane.b32.xlu0 %v6293_v11, %s5835_s12 }
 0x1c6   :  { %1560 = vperm.xlu1 %5741, %v5396_v13   ;;  %934 = vrot.lane.b32.xlu0 %v6255_v55, %s5835_s12  ;;  %v9491_v13 = vmov 0 }
 0x1c7   :  { %v9492_v13 = vsel %vm6486_vm3, 4294967295, %v9491_v13 }
 0x1ca   :  { %874 = vrot.lane.b32.xlu0 %v6255_v55, %s5836_s13  ;;  %1836 = vrot.lane.b32.xlu1 %v9330_v2, %s5832_s9 }
 0x1ce   :  { %1404 = vperm.xlu0 %5740, %v5393_v14   ;;  %1708 = vrot.lane.b32.xlu1 %v9330_v2, %s5834_s11  ;;  %v1201_v14 = vrot.slane %v6460_v56, %v6010_v18 }
 0x1d0   :  { %vm6524_vm15 = vcmp.eq.s32.totalorder %v1201_v14, 1  ;;  %v9503_v14 = vmov 0 }
 0x1d1   :  { %v9498_v4 = vsel %vm6524_vm15, 4294967295, %v9497_v4 }
 0x1d2   :  { %1571 = vperm.xlu0 %5740, %v5397_v15   ;;  %v6493_v15 = vsel %vm1124_vm4, 1, %v9328_v3  ;;  %vm6512_vm4 = vcmp.eq.s32.totalorder %v1205_v60, 1  ;;  %v1257_v60 = vrot.slane %v6433_v48, %v6052_v33 }
 0x1d3   :  { %v1141_v47 = vrot.slane %v6493_v15, %v6007_v17 }
 0x1d6   :  { %1872 = vrot.lane.b32.xlu0 %v9330_v2, %s5829_s22 }
 0x1da   :  { %1800 = vrot.lane.b32.xlu0 %v9330_v2, %s5830_s25 }
 0x1de   :  { %1764 = vrot.lane.b32.xlu0 %v9330_v2, %s5831_s8 }
 0x1e2   :  { %1672 = vrot.lane.b32.xlu0 %v9330_v2, %s5833_s10 }
 0x1f3   :  { %v6368_v23 = vpop.permute.xlu1 %1279  ;;  %v1340_v24 = vpop.permute.xlu0 %1339 }
 0x1f7   :  { %v6370_v25 = vpop.permute.xlu1 %1155  ;;  %v6372_v26 = vpop.permute.xlu0 %1219 }
 0x200   :  { %v6378_v29 = vpop.permute.xlu1 %1275  ;;  %v1336_v12 = vpop.permute.xlu0 %1335 }
 0x204   :  { %v6385_v31 = vpop.permute.xlu1 %1062  ;;  %v6387_v32 = vpop.permute.xlu0 %1001 }
 0x208   :  { %v6397_v35 = vpop.permute.xlu1 %1215  ;;  %v6399_v36 = vpop.permute.xlu0 %1151 }
 0x20c   :  { %v6408_v37 = vpop.permute.xlu1 %1058  ;;  %v6410_v38 = vpop.permute.xlu0 %938 }
 0x210   :  { %v1282_v42 = vpop.permute.xlu1 %1281  ;;  %v6429_v43 = vpop.permute.xlu0 %878 }
 0x211   :  { %v1288_v50 = vsel %vm9311_vm1, %v6368_v23, %v1282_v42 }
 0x214   :  { %v1338_v51 = vpop.permute.xlu1 %1337  ;;  %v6450_v52 = vpop.permute.xlu0 %997 }
 0x215   :  { %v1346_v57 = vsel %vm9310_vm13, %v1336_v12, %v1338_v51  ;;  %v1347_v58 = vsel %vm9310_vm13, %v1338_v51, %v1340_v24 }
 0x216   :  { %5470 = vmatprep.subr.msk.mxu0 %vm6441_vm8, %v1347_v58 }
 0x217   :  { %5471 = vmatpush1.msk.msra.mxu0 %vm6452_vm7, %v1346_v57  ;;  %v1105_v57 = vrot.slane %v6499_v30, %v6007_v17 }
 0x218   :  { %v6480_v61 = vpop.permute.xlu1 %1153  ;;  %v1342_v63 = vpop.permute.xlu0 %1341 }
 0x219   :  { %v1348_v27 = vsel %vm9310_vm13, %v1340_v24, %v1342_v63  ;;  %v1349_v12 = vsel %vm9310_vm13, %v1342_v63, %v6352_v19  ;;  %v1289_v24 = vsel %vm9311_vm1, %v1282_v42, %v6362_v1  ;;  %v9495_v19 = vmov 0 }
 0x21a   :  { %5488 = vmatprep.subr.msk.mxu1 %vm6474_vm0, %v1349_v12  ;;  %v9496_v19 = vsel %vm6512_vm4, 4294967295, %v9495_v19  ;;  %v1137_v1 = vrot.slane %v6493_v15, %v6010_v18  ;;  %vm9499_vm13 = vcmp.ge.s32.totalorder %v6395_v34, 0 }
 0x21b   :  { %5489 = vmatpush1.msk.msra.mxu1 %vm6482_vm12, %v1348_v27  ;;  %vm1028_vm1 = vmand %vm6425_vm6, %vm9499_vm13  ;;  %vm840_vm12 = vcmp.le.s32.totalorder %v837_v39, 14  ;;  %vm6548_vm6 = vcmp.eq.s32.totalorder %v1141_v47, 1  ;;  %vm9502_vm13 = vcmp.le.s32.totalorder %v6395_v34, 14  ;;  %v1253_v27 = vrot.slane %v6433_v48, %v6079_v46 }
 0x21c   :  { %v6520_v51 = vpop.permute.xlu1 %1003  ;;  %5490 = vmatprep.subr.msk.mxu1 %vm6486_vm3, %v1289_v24  ;;  %v1222_v16 = vpop.permute.xlu0 %1221  ;;  %vm839_vm3 = vcmp.ge.s32.totalorder %v837_v39, 0  ;;  %v9501_v41 = vsel %vm6548_vm6, 4294967295, %v9500_v41  ;;  %v9507_v47 = vmov 0  ;;  %v9511_v48 = vmov 0 }
 0x21d   :  { %v1228_v42 = vsel %vm9314_vm9, %v6372_v26, %v1222_v16  ;;  %5491 = vmatpush1.msk.msra.mxu1 %vm6504_vm10, %v1288_v50  ;;  %v1229_v58 = vsel %vm9314_vm9, %v1222_v16, %v6358_v20  ;;  %vm1029_vm9 = vmand %vm1028_vm1, %vm9502_vm13  ;;  %vm9318_vm10 = vcmask 1031168   ;;  %vm6572_vm1 = vcmp.eq.s32.totalorder %v1105_v57, 1 }
 0x21e   :  { %5492 = vmatprep.subr.msk.mxu1 %vm6512_vm4, %v1229_v58  ;;  %vm6558_vm4 = vcmp.eq.s32.totalorder %v1137_v1, 1  ;;  %v9508_v47 = vsel %vm6572_vm1, 4294967295, %v9507_v47  ;;  %vm6578_vm13 = vcmp.eq.s32.totalorder %v1101_v5, 1  ;;  %v9509_v50 = vmov 0 }
 0x21f   :  { %5493 = vmatpush1.msk.msra.mxu1 %vm6524_vm15, %v1228_v42  ;;  %v9504_v14 = vsel %vm6558_vm4, 4294967295, %v9503_v14  ;;  %vm6564_vm15 = vmand %vm839_vm3, %vm840_vm12  ;;  %v9510_v50 = vsel %vm6578_vm13, 4294967295, %v9509_v50  ;;  %vm6584_vm12 = vcmp.eq.s32.totalorder %v1257_v60, 1  ;;  %v6591_v16 = vsel %vm1029_vm9, 1, %v9328_v3 }
 0x220   :  { %v6556_v20 = vpop.permute.xlu1 %999  ;;  %v1158_v63 = vpop.permute.xlu0 %1157  ;;  %v9512_v48 = vsel %vm6584_vm12, 4294967295, %v9511_v48  ;;  %vm9513_vm3 = vcmp.ge.s32.totalorder %v6376_v28, 0  ;;  %v9516_v58 = vmov 0  ;;  %v1193_v5 = vrot.slane %v6460_v56, %v6079_v46 }
 0x221   :  { %v1164_v39 = vsel %vm9318_vm10, %v6370_v25, %v1158_v63  ;;  %v1165_v24 = vsel %vm9318_vm10, %v1158_v63, %v6360_v0  ;;  %v1197_v0 = vrot.slane %v6460_v56, %v6052_v33  ;;  %vm6597_vm10 = vmand %vm6564_vm15, %vm9513_vm3  ;;  %vm9518_vm9 = vcmask 785408  }
 0x222   :  { %5494 = vmatprep.subr.msk.mxu1 %vm6548_vm6, %v1165_v24  ;;  %vm9519_vm3 = vmmov %vm9518_vm9  ;;  %v1097_v56 = vrot.slane %v6499_v30, %v6052_v33  ;;  %v9522_v24 = vmov 0  ;;  %vm6653_vm7 = vcmp.eq.s32.totalorder %v1193_v5, 1 }
 0x223   :  { %5495 = vmatpush1.msk.msra.mxu1 %vm6558_vm4, %v1164_v39  ;;  %vm6606_vm4 = vcmp.eq.s32.totalorder %v1253_v27, 1  ;;  %v1133_v39 = vrot.slane %v6493_v15, %v6052_v33  ;;  %v1093_v27 = vrot.slane %v6499_v30, %v6079_v46 }
 0x224   :  { %v6601_v57 = vpop.permute.xlu1 %940  ;;  %5496 = vmatprep.subr.msk.mxu1 %vm6572_vm1, %v6281_v6  ;;  %v1278_v42 = vpop.permute.xlu0 %1277  ;;  %v9517_v58 = vsel %vm6606_vm4, 4294967295, %v9516_v58  ;;  %vm9520_vm1 = vcmp.ge.s32.totalorder %v5980_v10, 0 }
 0x225   :  { %v1286_v60 = vsel %vm9518_vm9, %v6378_v29, %v1278_v42  ;;  %5497 = vmatpush1.msk.msra.mxu1 %vm6578_vm13, %v6238_v45  ;;  %v1287_v63 = vsel %vm9519_vm3, %v1278_v42, %v6368_v23  ;;  %vm904_vm6 = vmand %vm6564_vm15, %vm9520_vm1  ;;  %v1129_v29 = vrot.slane %v6493_v15, %v6079_v46  ;;  %v1046_v23 = vrot.slane %v6591_v16, %v6007_v17 }
 0x226   :  { %5472 = vmatprep.subr.msk.mxu0 %vm6584_vm12, %v1287_v63  ;;  %vm9521_vm9 = vcmp.le.s32.totalorder %v6376_v28, 14  ;;  %vm6641_vm3 = vcmp.eq.s32.totalorder %v1197_v0, 1  ;;  %vm9524_vm12 = vcmp.ge.s32.totalorder %v6395_v34, 0  ;;  %v9534_v42 = vmov 0 }
 0x227   :  { %vm968_vm1 = vmand %vm6597_vm10, %vm9521_vm9  ;;  %5473 = vmatpush1.msk.msra.mxu0 %vm6606_vm4, %v1286_v60  ;;  %v9523_v24 = vsel %vm6641_vm3, 4294967295, %v9522_v24  ;;  %vm9529_vm10 = vcmp.le.s32.totalorder %v5980_v10, 14  ;;  %vm9532_vm4 = vcmask 801792   ;;  %v9536_v63 = vmov 0 }
 0x228   :  { %vm6649_vm13 = vmand %vm6564_vm15, %vm9524_vm12  ;;  %v1218_v28 = vpop.permute.xlu0 %1217  ;;  %vm6667_vm12 = vcmp.eq.s32.totalorder %v1133_v39, 1  ;;  %v969_v5 = vsel %vm968_vm1, 1, %v9328_v3  ;;  %v6672_v60 = vpop.permute.xlu1 %880  ;;  %v9542_v39 = vmov 0  ;;  %vm9544_vm1 = vcmp.le.s32.totalorder %v6395_v34, 14 }
 0x229   :  { %vm6659_vm9 = vmand %vm904_vm6, %vm9529_vm10  ;;  %v1226_v1 = vsel %vm9532_vm4, %v6397_v35, %v1218_v28  ;;  %v9535_v42 = vsel %vm6667_vm12, 4294967295, %v9534_v42  ;;  %vm6676_vm6 = vcmp.eq.s32.totalorder %v1129_v29, 1  ;;  %vm6680_vm10 = vcmp.eq.s32.totalorder %v1097_v56, 1 }
 0x22a   :  { %vm9533_vm15 = vmmov %vm9532_vm4  ;;  %v9537_v63 = vsel %vm6676_vm6, 4294967295, %v9536_v63  ;;  %v9538_v35 = vmov 0  ;;  %vm6684_vm4 = vcmp.eq.s32.totalorder %v1046_v23, 1  ;;  %v1038_v56 = vrot.slane %v6591_v16, %v6052_v33 }
 0x22b   :  { %v1227_v12 = vsel %vm9533_vm15, %v1218_v28, %v6372_v26  ;;  %v9539_v35 = vsel %vm6680_vm10, 4294967295, %v9538_v35  ;;  %v9540_v26 = vmov 0  ;;  %vm6688_vm15 = vcmp.eq.s32.totalorder %v1093_v27, 1  ;;  %vm845_vm0 = vmand %vm6649_vm13, %vm9544_vm1 }
 0x22c   :  { %5474 = vmatprep.subr.msk.mxu0 %vm6641_vm3, %v1227_v12  ;;  %v9541_v26 = vsel %vm6684_vm4, 4294967295, %v9540_v26  ;;  %v9543_v39 = vsel %vm6688_vm15, 4294967295, %v9542_v39  ;;  %vm9545_vm3 = vcmask 1031168   ;;  %v1042_v23 = vrot.slane %v6591_v16, %v6010_v18  ;;  %v1065_v15 = vpop.permute.xlu0 %1064 }
 0x22d   :  { %5475 = vmatpush1.msk.msra.mxu0 %vm6653_vm7, %v1226_v1  ;;  %v1163_v29 = vsel %vm9545_vm3, %v6480_v61, %v6370_v25  ;;  %v6708_v34 = vsel %vm6659_vm9, 1, %v9328_v3  ;;  %vm9546_vm13 = vmmov %vm9545_vm3  ;;  %v1034_v25 = vrot.slane %v6591_v16, %v6079_v46  ;;  %v985_v28 = vrot.slane %v969_v5, %v6007_v17 }
 0x22e   :  { %v1162_v27 = vsel %vm9546_vm13, %v6399_v36, %v6480_v61  ;;  %5476 = vmatprep.subr.msk.mxu0 %vm6667_vm12, %v1163_v29  ;;  %v977_v1 = vrot.slane %v969_v5, %v6052_v33  ;;  %vm9547_vm3 = vcmask 15360   ;;  %v981_v12 = vrot.slane %v969_v5, %v6010_v18 }
 0x22f   :  { %v1070_v0 = vsel %vm9547_vm3, %v6385_v31, %v1065_v15  ;;  %5477 = vmatpush1.msk.msra.mxu0 %vm6676_vm6, %v1162_v27  ;;  %v6725_v36 = vsel %vm845_vm0, 1, %v9328_v3  ;;  %v973_v61 = vrot.slane %v969_v5, %v6079_v46  ;;  %v922_v16 = vrot.slane %v6708_v34, %v6007_v17  ;;  %v877_v5 = vpop.permute.xlu1 %876 }
 0x230   :  { %5478 = vmatprep.subr.msk.mxu0 %vm6680_vm10, %v6293_v11  ;;  %5498 = vmatprep.subr.msk.mxu1 %vm6684_vm4, %v1070_v0  ;;  %vm6738_vm0 = vcmp.eq.s32.totalorder %v1038_v56, 1  ;;  %vm6742_vm3 = vcmp.eq.s32.totalorder %v1042_v23, 1  ;;  %v9550_v27 = vmov 0  ;;  %v918_v15 = vrot.slane %v6708_v34, %v6010_v18  ;;  %v1061_v0 = vpop.permute.xlu0 %1060 }
 0x231   :  { %5479 = vmatpush1.msk.msra.mxu0 %vm6688_vm15, %v6255_v55  ;;  %v9551_v27 = vsel %vm6742_vm3, 4294967295, %v9550_v27  ;;  %vm6748_vm1 = vcmp.eq.s32.totalorder %v1034_v25, 1  ;;  %v9552_v3 = vmov 0  ;;  %vm6752_vm13 = vcmp.eq.s32.totalorder %v985_v28, 1 }
 0x232   :  { %v9553_v3 = vsel %vm6748_vm1, 4294967295, %v9552_v3  ;;  %vm6756_vm9 = vcmp.eq.s32.totalorder %v977_v1, 1  ;;  %v862_v23 = vrot.slane %v6725_v36, %v6007_v17  ;;  %vm9558_vm15 = vcmask 15360  }
 0x233   :  { %v1069_v9 = vsel %vm9558_vm15, %v1061_v0, %v6385_v31  ;;  %vm9559_vm4 = vmmov %vm9558_vm15  ;;  %vm6766_vm10 = vcmp.eq.s32.totalorder %v981_v12, 1  ;;  %v9560_v10 = vmov 0  ;;  %v858_v28 = vrot.slane %v6725_v36, %v6010_v18 }
 0x234   :  { %v1068_v25 = vsel %vm9559_vm4, %v6408_v37, %v1061_v0  ;;  %v9561_v10 = vsel %vm6766_vm10, 4294967295, %v9560_v10  ;;  %vm9562_vm6 = vmmov %vm9559_vm4  ;;  %vm9563_vm12 = vcmask 244736   ;;  %5499 = vmatpush1.msk.msra.mxu1 %vm6742_vm3, %v1069_v9  ;;  %vm6782_vm4 = vcmp.eq.s32.totalorder %v973_v61, 1 }
 0x235   :  { %v1067_v1 = vsel %vm9562_vm6, %v6366_v22, %v6408_v37  ;;  %v1009_v17 = vsel %vm9563_vm12, %v6387_v32, %v6520_v51  ;;  %5480 = vmatprep.subr.msk.mxu0 %vm6738_vm0, %v1068_v25  ;;  %v9564_v31 = vmov 0  ;;  %vm6786_vm15 = vcmp.eq.s32.totalorder %v922_v16, 1  ;;  %vm9568_vm6 = vmmov %vm9563_vm12  ;;  %v933_v16 = vpop.permute.xlu1 %932 }
 0x236   :  { %v9565_v31 = vsel %vm6782_vm4, 4294967295, %v9564_v31  ;;  %v9566_v12 = vmov 0  ;;  %v1008_v22 = vsel %vm9568_vm6, %v6556_v20, %v6387_v32  ;;  %5481 = vmatpush1.msk.msra.mxu0 %vm6748_vm1, %v1067_v1  ;;  %5500 = vmatprep.subr.msk.mxu1 %vm6752_vm13, %v1009_v17  ;;  %vm9569_vm12 = vmmov %vm9568_vm6  ;;  %vm6800_vm3 = vcmp.eq.s32.totalorder %v918_v15, 1  ;;  %v937_v17 = vpop.permute.xlu0 %936 }
 0x237   :  { %v9567_v12 = vsel %vm6786_vm15, 4294967295, %v9566_v12  ;;  %v1007_v9 = vsel %vm9569_vm12, %v6450_v52, %v6556_v20  ;;  %v9570_v37 = vmov 0  ;;  %v914_v51 = vrot.slane %v6708_v34, %v6052_v33  ;;  %5501 = vmatpush1.msk.msra.mxu1 %vm6766_vm10, %v1008_v22 }
 0x238   :  { %v9571_v37 = vsel %vm6800_vm3, 4294967295, %v9570_v37  ;;  %v1006_v32 = vsel %vm9568_vm6, %v6364_v21, %v6450_v52  ;;  %vm9572_vm1 = vcmask 261120   ;;  %5482 = vmatprep.subr.msk.mxu0 %vm6756_vm9, %v1007_v9  ;;  %vm6816_vm12 = vcmp.eq.s32.totalorder %v862_v23, 1 }
 0x239   :  { %v946_v61 = vsel %vm9572_vm1, %v6410_v38, %v6601_v57  ;;  %v9573_v20 = vmov 0  ;;  %v910_v15 = vrot.slane %v6708_v34, %v6079_v46  ;;  %vm9575_vm6 = vmmov %vm9572_vm1  ;;  %5483 = vmatpush1.msk.msra.mxu0 %vm6782_vm4, %v1006_v32  ;;  %vm6828_vm1 = vcmp.eq.s32.totalorder %v858_v28, 1  ;;  %v873_v22 = vpop.permute.xlu1 %872 }
 0x23a   :  { %v9574_v20 = vsel %vm6816_vm12, 4294967295, %v9573_v20  ;;  %v945_v21 = vsel %vm9575_vm6, %v937_v17, %v6410_v38  ;;  %5502 = vmatprep.subr.msk.mxu1 %vm6786_vm15, %v946_v61  ;;  %v9576_v52 = vmov 0  ;;  %vm9578_vm10 = vcmask 277504   ;;  %v5392_v38 = vld [vmem:[%s9290_s1 + $0x8] sm:$0xff]  ;;  %v935_v23 = vpop.permute.xlu0 %934 }
 0x23b   :  { %v9577_v52 = vsel %vm6828_vm1, 4294967295, %v9576_v52  ;;  %v886_v57 = vsel %vm9578_vm10, %v6429_v43, %v6672_v60  ;;  %5503 = vmatpush1.msk.msra.mxu1 %vm6800_vm3, %v945_v21  ;;  %vm9579_vm6 = vmmov %vm9578_vm10  ;;  %vm6844_vm15 = vcmp.eq.s32.totalorder %v914_v51, 1  ;;  %v9580_v0 = vmov 0 }
 0x23c   :  { %v885_v34 = vsel %vm9579_vm6, %v877_v5, %v6429_v43  ;;  %5504 = vmatprep.subr.msk.mxu1 %vm6816_vm12, %v886_v57  ;;  %v9581_v0 = vsel %vm6844_vm15, 4294967295, %v9580_v0  ;;  %v854_v60 = vrot.slane %v6725_v36, %v6052_v33  ;;  %vm6852_vm10 = vcmp.eq.s32.totalorder %v910_v15, 1 }
 0x23d   :  { %9582 = vst [vmem:[#allocation13_spill] sm:$0xff] %v9581_v0  ;;  %5505 = vmatpush1.msk.msra.mxu1 %vm6828_vm1, %v885_v34  ;;  %v9583_v25 = vmov 0  ;;  %v850_v43 = vrot.slane %v6725_v36, %v6079_v46  ;;  %vm9586_vm6 = vcmask 261120   ;;  %vm9587_vm12 = vcmask 588800  }
 0x23e   :  { %v9584_v25 = vsel %vm6852_vm10, 4294967295, %v9583_v25  ;;  %v943_v28 = vsel %vm9586_vm6, %v933_v16, %v935_v23  ;;  %5395 = vmatmul.mubr.msk.f32.vlgmr.msra.gmra.mxu1 %vm9587_vm12, %v5392_v38  ;;  %vm9588_vm3 = vmmov %vm9586_vm6  ;;  %v9589_v9 = vmov 0.0   ;;  %vm6866_vm1 = vcmp.eq.s32.totalorder %v854_v60, 1  ;;  %v875_v36 = vpop.permute.xlu0 %874 }
 0x23f   :  { %9585 = vst [vmem:[#allocation14_spill] sm:$0xff] %v9584_v25  ;;  %v944_v1 = vsel %vm9588_vm3, %v935_v23, %v937_v17  ;;  %2073 = vmatprep.mubr.f32.mxu1 %v9589_v9  ;;  %v9590_v51 = vmov 0  ;;  %vm6870_vm4 = vcmp.eq.s32.totalorder %v850_v43, 1  ;;  %v9593_v32 = vmov 0 }
 0x240   :  { %5484 = vmatprep.subr.msk.mxu0 %vm6844_vm15, %v944_v1  ;;  %v9591_v51 = vsel %vm6866_vm1, 4294967295, %v9590_v51  ;;  %v9594_v32 = vsel %vm6870_vm4, 4294967295, %v9593_v32  ;;  %vm9596_vm12 = vcmask 277504   ;;  %vm9598_vm6 = vcmask 588800  }
 0x241   :  { %5485 = vmatpush1.msk.msra.mxu0 %vm6852_vm10, %v943_v28  ;;  %9592 = vst [vmem:[#allocation15_spill] sm:$0xff] %v9591_v51  ;;  %9595 = vst [vmem:[#allocation16_spill] sm:$0xff] %v9594_v32  ;;  %v883_v61 = vsel %vm9596_vm12, %v873_v22, %v875_v36  ;;  %v1561_v34 = vpop.permute.xlu1 %1560 }
 0x242   :  { %vm9597_vm3 = vmmov %vm9596_vm12 }
 0x243   :  { %v884_v17 = vsel %vm9597_vm3, %v875_v36, %v877_v5  ;;  %vm9604_vm3 = vnez %v9488_v59 }
 0x244   :  { %5486 = vmatprep.subr.msk.mxu0 %vm6866_vm1, %v884_v17 }
 0x245   :  { %5487 = vmatpush1.msk.msra.mxu0 %vm6870_vm4, %v883_v61 }
 0x246   :  { %5394 = vmatmul.mubr.msk.f32.vlgmr.msra.gmra.mxu0 %vm9598_vm6, %v5392_v38  ;;  %vm9605_vm6 = vnez %v9490_v7 }
 0x247   :  { %2002 = vmatprep.mubr.f32.mxu0 %v9589_v9 }
 0x249   :  { %v1405_v16 = vpop.permute.xlu0 %1404 }
 0x24d   :  { %v1572_v23 = vpop.permute.xlu0 %1571 }
 0x2fe   :  { %v1547_v15 = vpop.f32.mrf.mxu1 }
 0x2ff   :  { %v1548_v21 = vadd.f32 %v1547_v15, %v1405_v16 }
 0x300   :  { %v1549_v38 = vpop.f32.mrf.mxu1 }
 0x301   :  { %v1554_v57 = vmax.f32 %v1548_v21, 0.0  ;;  %v1550_v15 = vadd.f32 %v1549_v38, %v1405_v16  ;;  %v1837_v38 = vpop.permute.xlu1 %1836 }
 0x303   :  { %v1565_v60 = vmul.f32 %v1561_v34, %v1554_v57 }
 0x305   :  { %v1576_v43 = vadd.f32 %v1572_v23, %v1565_v60 }
 0x306   :  { %v1476_v28 = vpop.f32.mrf.mxu0 }
 0x307   :  { %v1477_v5 = vadd.f32 %v1476_v28, %v1405_v16  ;;  %v1580_v1 = vsel %vm6232_vm2, %v1576_v43, 0.0  ;;  %vm9599_vm2 = vcmask 769024  }
 0x308   :  { %v6885_v22 = vadd.f32 %v1580_v1, %v6238_v45  ;;  %v1478_v57 = vpop.f32.mrf.mxu0  ;;  %v1555_v45 = vmax.f32 %v1550_v15, 0.0  ;;  %vm9603_vm12 = vmmov %vm9599_vm2 }
 0x309   :  { %v1552_v36 = vmax.f32 %v1477_v5, 0.0  ;;  %v1479_v60 = vadd.f32 %v1478_v57, %v1405_v16 }
 0x30a   :  { %1832 = vrot.lane.b32.xlu0 %v6885_v22, %s5832_s9  ;;  %1868 = vrot.lane.b32.xlu1 %v6885_v22, %s5829_s22  ;;  %v1566_v53 = vmul.f32 %v1561_v34, %v1555_v45 }
 0x30b   :  { %v1563_v61 = vmul.f32 %v1561_v34, %v1552_v36  ;;  %v1553_v43 = vmax.f32 %v1479_v60, 0.0 }
 0x30c   :  { %v1577_v28 = vadd.f32 %v1572_v23, %v1566_v53 }
 0x30d   :  { %v1574_v17 = vadd.f32 %v1572_v23, %v1563_v61  ;;  %v1564_v5 = vmul.f32 %v1561_v34, %v1553_v43 }
 0x30e   :  { %1760 = vrot.lane.b32.xlu0 %v6885_v22, %s5831_s8  ;;  %1796 = vrot.lane.b32.xlu1 %v6885_v22, %s5830_s25 }
 0x30f   :  { %v1578_v21 = vsel %vm6249_vm14, %v1574_v17, 0.0  ;;  %v1575_v16 = vadd.f32 %v1572_v23, %v1564_v5  ;;  %v1873_v23 = vpop.permute.xlu0 %1872  ;;  %v6983_v17 = vpop.permute.xlu1 %1708  ;;  %vm9600_vm14 = vmmov %vm9599_vm2 }
 0x310   :  { %v6898_v44 = vadd.f32 %v1578_v21, %v6255_v55  ;;  %v1581_v55 = vsel %vm6270_vm11, %v1577_v28, 0.0  ;;  %vm9601_vm11 = vnez %v9485_v54 }
 0x311   :  { %v6919_v1 = vadd.f32 %v1581_v55, %v6281_v6  ;;  %v1579_v34 = vsel %vm6283_vm5, %v1575_v16, 0.0  ;;  %v5402_v6 = vld [vmem:[%s9292_s3 + $0x10] sm:$0xff]  ;;  %vm9602_vm5 = vmmov %vm9599_vm2 }
 0x312   :  { %1828 = vrot.lane.b32.xlu0 %v6898_v44, %s5832_s9  ;;  %1864 = vrot.lane.b32.xlu1 %v6898_v44, %s5829_s22  ;;  %v6928_v62 = vadd.f32 %v1579_v34, %v6293_v11  ;;  %v5403_v11 = vld [vmem:[%s9293_s4 + $0x10] sm:$0xff] }
 0x313   :  { %v1801_v36 = vpop.permute.xlu0 %1800 }
 0x316   :  { %1714 = vrot.lane.b32.xlu0 %v6885_v22, %s5834_s11  ;;  %1678 = vrot.lane.b32.xlu1 %v6885_v22, %s5833_s10 }
 0x317   :  { %v1765_v61 = vpop.permute.xlu0 %1764 }
 0x31a   :  { %1792 = vrot.lane.b32.xlu0 %v6898_v44, %s5830_s25  ;;  %1756 = vrot.lane.b32.xlu1 %v6898_v44, %s5831_s8 }
 0x31b   :  { %v6985_v15 = vpop.permute.xlu0 %1672 }
 0x31e   :  { %1710 = vrot.lane.b32.xlu0 %v6898_v44, %s5834_s11  ;;  %1642 = vrot.lane.b32.xlu1 %v6885_v22, %s5835_s12 }
 0x322   :  { %1834 = vrot.lane.b32.xlu0 %v6919_v1, %s5832_s9  ;;  %1606 = vrot.lane.b32.xlu1 %v6885_v22, %s5836_s13 }
 0x326   :  { %1866 = vrot.lane.b32.xlu0 %v6928_v62, %s5829_s22  ;;  %1674 = vrot.lane.b32.xlu1 %v6898_v44, %s5833_s10 }
 0x32a   :  { %1758 = vrot.lane.b32.xlu0 %v6928_v62, %s5831_s8  ;;  %1870 = vrot.lane.b32.xlu1 %v6919_v1, %s5829_s22 }
 0x32e   :  { %1680 = vrot.lane.b32.xlu0 %v6919_v1, %s5833_s10  ;;  %1798 = vrot.lane.b32.xlu1 %v6919_v1, %s5830_s25 }
 0x332   :  { %1676 = vrot.lane.b32.xlu0 %v6928_v62, %s5833_s10  ;;  %1762 = vrot.lane.b32.xlu1 %v6919_v1, %s5831_s8  ;;  %s5839_s10 = smov 64  }
 0x336   :  { %1644 = vrot.lane.b32.xlu0 %v6919_v1, %s5835_s12  ;;  %1830 = vrot.lane.b32.xlu1 %v6928_v62, %s5832_s9 }
 0x33a   :  { %1608 = vrot.lane.b32.xlu0 %v6919_v1, %s5836_s13  ;;  %1794 = vrot.lane.b32.xlu1 %v6928_v62, %s5830_s25 }
 0x33e   :  { %1604 = vrot.lane.b32.xlu0 %v6928_v62, %s5836_s13  ;;  %1716 = vrot.lane.b32.xlu1 %v6919_v1, %s5834_s11 }
 0x342   :  { %1636 = vrot.lane.b32.xlu0 %v9589_v9, %s5835_s12  ;;  %1712 = vrot.lane.b32.xlu1 %v6928_v62, %s5834_s11  ;;  %s5840_s11 = smov 124  }
 0x346   :  { %1600 = vrot.lane.b32.xlu0 %v9589_v9, %s5836_s13  ;;  %1640 = vrot.lane.b32.xlu1 %v6928_v62, %s5835_s12 }
 0x34a   :  { %2088 = vperm.xlu0 %5740, %v5402_v6   ;;  %1638 = vrot.lane.b32.xlu1 %v6898_v44, %s5835_s12  ;;  %s5841_s12 = smov 4  }
 0x34e   :  { %1602 = vrot.lane.b32.xlu1 %v6898_v44, %s5836_s13 }
 0x352   :  { %1932 = vperm.xlu1 %5741, %v5399_v8  }
 0x356   :  { %2099 = vperm.xlu1 %5741, %v5403_v11  }
 0x35a   :  { %2653 = vrot.lane.b32.xlu1 %v9589_v9, %s5837_s28 }
 0x35e   :  { %2535 = vrot.lane.b32.xlu1 %v9589_v9, %s5838_s30 }
 0x37c   :  { %v1869_v21 = vpop.permute.xlu1 %1868  ;;  %v1833_v57 = vpop.permute.xlu0 %1832 }
 0x380   :  { %v1797_v45 = vpop.permute.xlu1 %1796  ;;  %v1761_v60 = vpop.permute.xlu0 %1760 }
 0x384   :  { %v1865_v53 = vpop.permute.xlu1 %1864  ;;  %v1829_v43 = vpop.permute.xlu0 %1828 }
 0x388   :  { %v6987_v28 = vpop.permute.xlu1 %1678  ;;  %v1715_v5 = vpop.permute.xlu0 %1714 }
 0x38c   :  { %v1757_v55 = vpop.permute.xlu1 %1756  ;;  %v1793_v16 = vpop.permute.xlu0 %1792 }
 0x390   :  { %v6989_v34 = vpop.permute.xlu1 %1642  ;;  %v1711_v6 = vpop.permute.xlu0 %1710 }
 0x394   :  { %v6991_v8 = vpop.permute.xlu1 %1606  ;;  %v1835_v11 = vpop.permute.xlu0 %1834 }
 0x398   :  { %v6993_v33 = vpop.permute.xlu1 %1674  ;;  %v1867_v46 = vpop.permute.xlu0 %1866 }
 0x399   :  { %v1874_v18 = vsel %vm9599_vm2, %v1865_v53, %v1867_v46  ;;  %v1875_v32 = vsel %vm9600_vm14, %v1867_v46, %v1869_v21  ;;  %vm9606_vm2 = vcmask 785408   ;;  %v9664_v53 = vmov 0  }
 0x39a   :  { %5506 = vmatprep.subr.msk.mxu0 %vm6441_vm8, %v1875_v32  ;;  %v1841_v46 = vsel %vm9606_vm2, %v1835_v11, %v1837_v38  ;;  %vm9607_vm14 = vmmov %vm9606_vm2  ;;  %vm9608_vm8 = vnez %v9492_v13  ;;  %vm9614_vm2 = vcmask 1031168  }
 0x39b   :  { %5507 = vmatpush1.msk.msra.mxu0 %vm9601_vm11, %v1874_v18  ;;  %v1840_v49 = vsel %vm9607_vm14, %v1833_v57, %v1835_v11  ;;  %vm9609_vm11 = vcmask 801792   ;;  %vm9615_vm14 = vmmov %vm9614_vm2 }
 0x39c   :  { %v1871_v51 = vpop.permute.xlu1 %1870  ;;  %v1759_v25 = vpop.permute.xlu0 %1758 }
 0x39d   :  { %v1876_v9 = vsel %vm9602_vm5, %v1869_v21, %v1871_v51  ;;  %v1877_v0 = vsel %vm9603_vm12, %v1871_v51, %v1873_v23  ;;  %vm9610_vm5 = vnez %v9494_v40  ;;  %vm9611_vm12 = vmmov %vm9609_vm11  ;;  %v7131_v21 = vld [vmem:[%s9294_s5] sm:$0xf] }
 0x39e   :  { %5524 = vmatprep.subr.msk.mxu1 %vm9604_vm3, %v1877_v0  ;;  %vm9612_vm3 = vnez %v9496_v19 }
 0x39f   :  { %5525 = vmatpush1.msk.msra.mxu1 %vm9605_vm6, %v1876_v9  ;;  %vm9613_vm6 = vnez %v9498_v4 }
 0x3a0   :  { %v1799_v32 = vpop.permute.xlu1 %1798  ;;  %5526 = vmatprep.subr.msk.mxu1 %vm9608_vm8, %v1841_v46  ;;  %v1681_v18 = vpop.permute.xlu0 %1680  ;;  %vm9616_vm8 = vnez %v9501_v41 }
 0x3a1   :  { %v1804_v54 = vsel %vm9609_vm11, %v1797_v45, %v1799_v32  ;;  %5527 = vmatpush1.msk.msra.mxu1 %vm9610_vm5, %v1840_v49  ;;  %v1805_v59 = vsel %vm9611_vm12, %v1799_v32, %v1801_v36  ;;  %vm9617_vm11 = vnez %v9504_v14  ;;  %vm9618_vm5 = vnez %v9508_v47 }
 0x3a2   :  { %5528 = vmatprep.subr.msk.mxu1 %vm9612_vm3, %v1805_v59  ;;  %vm9619_vm12 = vcmask 785408   ;;  %vm9620_vm3 = vnez %v9510_v50  ;;  %v9657_v36 = vmov 0.0  }
 0x3a3   :  { %5529 = vmatpush1.msk.msra.mxu1 %vm9613_vm6, %v1804_v54  ;;  %vm9621_vm6 = vmmov %vm9619_vm12  ;;  %2594 = vrot.lane.b32.xlu0 %v9657_v36, %s5839_s10 }
 0x3a4   :  { %v1763_v7 = vpop.permute.xlu1 %1762  ;;  %v1677_v0 = vpop.permute.xlu0 %1676  ;;  %2471 = vrot.lane.b32.xlu1 %v9657_v36, %s5840_s11 }
 0x3a5   :  { %v1768_v9 = vsel %vm9614_vm2, %v1761_v60, %v1763_v7  ;;  %v1769_v13 = vsel %vm9615_vm14, %v1763_v7, %v1765_v61  ;;  %vm9622_vm2 = vnez %v9512_v48  ;;  %vm9623_vm14 = vnez %v9517_v58  ;;  %v9668_v7 = vld [vmem:[#allocation12_spill] sm:$0xff] }
 0x3a6   :  { %5530 = vmatprep.subr.msk.mxu1 %vm9616_vm8, %v1769_v13  ;;  %vm9624_vm8 = vcmask 801792  }
 0x3a7   :  { %5531 = vmatpush1.msk.msra.mxu1 %vm9617_vm11, %v1768_v9  ;;  %vm9625_vm11 = vmmov %vm9624_vm8  ;;  %2368 = vrot.lane.b32.xlu0 %v9657_v36, %s5841_s12 }
 0x3a8   :  { %v1831_v40 = vpop.permute.xlu1 %1830  ;;  %5532 = vmatprep.subr.msk.mxu1 %vm9618_vm5, %v6919_v1  ;;  %v1645_v19 = vpop.permute.xlu0 %1644  ;;  %vm9626_vm5 = vnez %v9523_v24  ;;  %2307 = vrot.lane.b32.xlu1 %v9657_v36, %s5837_s28 }
 0x3a9   :  { %v1838_v4 = vsel %vm9619_vm12, %v1829_v43, %v1831_v40  ;;  %5533 = vmatpush1.msk.msra.mxu1 %vm9620_vm3, %v6885_v22  ;;  %v1839_v51 = vsel %vm9621_vm6, %v1831_v40, %v1833_v57  ;;  %vm9627_vm12 = vcmask 1031168   ;;  %vm9629_vm6 = vnez %v9535_v42 }
 0x3aa   :  { %5508 = vmatprep.subr.msk.mxu0 %vm9622_vm2, %v1839_v51  ;;  %v1767_v50 = vsel %vm9627_vm12, %v1759_v25, %v1761_v60  ;;  %vm9628_vm3 = vmmov %vm9627_vm12  ;;  %vm9630_vm2 = vcmask 15360   ;;  %v2106_v57 = vand.u32 3, %v7131_v21 }
 0x3ab   :  { %5509 = vmatpush1.msk.msra.mxu0 %vm9623_vm14, %v1838_v4  ;;  %v1766_v48 = vsel %vm9628_vm3, %v1757_v55, %v1759_v25  ;;  %vm9631_vm14 = vnez %v9537_v63  ;;  %vm9636_vm12 = vmmov %vm9630_vm2 }
 0x3ac   :  { %v1795_v41 = vpop.permute.xlu1 %1794  ;;  %v1609_v1 = vpop.permute.xlu0 %1608  ;;  %vm9637_vm3 = vmmov %vm9630_vm2 }
 0x3ad   :  { %v1802_v14 = vsel %vm9624_vm8, %v1793_v16, %v1795_v41  ;;  %v1803_v47 = vsel %vm9625_vm11, %v1795_v41, %v1797_v45  ;;  %vm9632_vm8 = vnez %v9539_v35  ;;  %vm9633_vm11 = vnez %v9541_v26  ;;  %v7137_v45 = vld [vmem:[%s9295_s6] sm:$0xf]  ;;  %v9665_v16 = vld [vmem:[#allocation10_spill] sm:$0xff] }
 0x3ae   :  { %5510 = vmatprep.subr.msk.mxu0 %vm9626_vm5, %v1803_v47  ;;  %vm9635_vm5 = vmmov %vm9630_vm2  ;;  %v1718_v63 = vsel %vm9637_vm3, %v6983_v17, %v1711_v6  ;;  %vm9648_vm3 = vnez %v9567_v12  ;;  %v2110_v60 = vand.u32 3, %v7137_v45 }
 0x3af   :  { %5511 = vmatpush1.msk.msra.mxu0 %vm6653_vm7, %v1802_v14  ;;  %vm9634_vm7 = vnez %v9543_v39 }
 0x3b0   :  { %v1717_v22 = vpop.permute.xlu1 %1716  ;;  %5512 = vmatprep.subr.msk.mxu0 %vm9629_vm6, %v1767_v50  ;;  %v1605_v24 = vpop.permute.xlu0 %1604  ;;  %vm9638_vm6 = vcmask 244736  }
 0x3b1   :  { %v1721_v58 = vsel %vm9630_vm2, %v1715_v5, %v1717_v22  ;;  %5513 = vmatpush1.msk.msra.mxu0 %vm9631_vm14, %v1766_v48  ;;  %v1685_v35 = vsel %vm9638_vm6, %v6987_v28, %v1681_v18  ;;  %vm9639_vm2 = vnez %v9551_v27  ;;  %vm9640_vm14 = vmmov %vm9638_vm6  ;;  %v9671_v22 = vld [vmem:[#allocation9_spill] sm:$0xff] }
 0x3b2   :  { %5514 = vmatprep.subr.msk.mxu0 %vm9632_vm8, %v6928_v62  ;;  %5534 = vmatprep.subr.msk.mxu1 %vm9633_vm11, %v1721_v58  ;;  %v1684_v26 = vsel %vm9640_vm14, %v1677_v0, %v6987_v28  ;;  %vm9641_vm8 = vnez %v9553_v3  ;;  %vm9642_vm11 = vmmov %vm9638_vm6  ;;  %vm9652_vm14 = vnez %v9574_v20 }
 0x3b3   :  { %5515 = vmatpush1.msk.msra.mxu0 %vm9634_vm7, %v6898_v44  ;;  %v1683_v39 = vsel %vm9642_vm11, %v6993_v33, %v1677_v0  ;;  %vm9643_vm7 = vmmov %vm9638_vm6  ;;  %vm9649_vm6 = vcmask 277504  }
 0x3b4   :  { %v1713_v30 = vpop.permute.xlu1 %1712  ;;  %v1682_v29 = vsel %vm9643_vm7, %v6985_v15, %v6993_v33  ;;  %v1637_v3 = vpop.permute.xlu0 %1636  ;;  %v1613_v33 = vsel %vm9649_vm6, %v6991_v8, %v1609_v1  ;;  %vm9655_vm7 = vcmask 588800  }
 0x3b5   :  { %v1720_v42 = vsel %vm9635_vm5, %v1713_v30, %v1715_v5  ;;  %v1719_v25 = vsel %vm9636_vm12, %v1711_v6, %v1713_v30  ;;  %vm9645_vm5 = vnez %v9561_v10  ;;  %vm9647_vm12 = vnez %v9565_v31  ;;  %v5398_v10 = vld [vmem:[%s9290_s1 + $0x10] sm:$0xff] }
 0x3b6   :  { %5516 = vmatprep.subr.msk.mxu0 %vm6738_vm0, %v1719_v25  ;;  %5535 = vmatpush1.msk.msra.mxu1 %vm9639_vm2, %v1720_v42  ;;  %vm9644_vm0 = vcmask 261120   ;;  %vm9650_vm2 = vnez %v9571_v37  ;;  %v9674_v25 = vld [vmem:[#allocation11_spill] sm:$0xff] }
 0x3b7   :  { %5517 = vmatpush1.msk.msra.mxu0 %vm9641_vm8, %v1718_v63  ;;  %5536 = vmatprep.subr.msk.mxu1 %vm6752_vm13, %v1685_v35  ;;  %v1649_v27 = vsel %vm9644_vm0, %v6989_v34, %v1645_v19  ;;  %vm9646_vm13 = vmmov %vm9644_vm0  ;;  %vm9653_vm8 = vnez %v9577_v52 }
 0x3b8   :  { %v1641_v44 = vpop.permute.xlu1 %1640  ;;  %5518 = vmatprep.subr.msk.mxu0 %vm6756_vm9, %v1683_v39  ;;  %5537 = vmatpush1.msk.msra.mxu1 %vm9645_vm5, %v1684_v26  ;;  %vm9651_vm9 = vmmov %vm9649_vm6  ;;  %v1601_v23 = vpop.permute.xlu0 %1600  ;;  %v5411_v39 = vld [vmem:[%s9291_s2 + $0x20] sm:$0xff] }
 0x3b9   :  { %v1648_v2 = vsel %vm9646_vm13, %v1641_v44, %v6989_v34  ;;  %5519 = vmatpush1.msk.msra.mxu0 %vm9647_vm12, %v1682_v29  ;;  %5538 = vmatprep.subr.msk.mxu1 %vm9648_vm3, %v1649_v27  ;;  %v1612_v56 = vsel %vm9651_vm9, %v1605_v24, %v6991_v8  ;;  %vm9654_vm11 = vmmov %vm9644_vm0  ;;  %v5408_v27 = vld [vmem:[%s9292_s3 + $0x18] sm:$0xff] }
 0x3ba   :  { %5539 = vmatpush1.msk.msra.mxu1 %vm9650_vm2, %v1648_v2  ;;  %vm9659_vm5 = vmmov %vm9649_vm6  ;;  %vm9366_vm6 = vcmp.le.s32.totalorder %v7137_v45, 12 }
 0x3bb   :  { %5540 = vmatprep.subr.msk.mxu1 %vm9652_vm14, %v1613_v33  ;;  %vm9660_vm13 = vmmov %vm9659_vm5 }
 0x3bc   :  { %v1639_v31 = vpop.permute.xlu1 %1638  ;;  %5541 = vmatpush1.msk.msra.mxu1 %vm9653_vm8, %v1612_v56  ;;  %vm9663_vm12 = vmmov %vm9655_vm7 }
 0x3bd   :  { %v1646_v12 = vsel %vm9654_vm11, %v1637_v3, %v1639_v31  ;;  %5401 = vmatmul.mubr.msk.f32.vlgmr.msra.gmra.mxu1 %vm9655_vm7, %v5398_v10  ;;  %v1647_v37 = vsel %vm9644_vm0, %v1639_v31, %v1641_v44  ;;  %v5405_v44 = vld [vmem:[%s9291_s2 + $0x18] sm:$0xff] }
 0x3be   :  { %5520 = vmatprep.subr.msk.mxu0 %vm6844_vm15, %v1647_v37  ;;  %2854 = vmatprep.mubr.f32.mxu1 %v9657_v36  ;;  %vm2108_vm15 = vcmp.le.s32.totalorder %v7131_v21, 12  ;;  %v5409_v3 = vld [vmem:[%s9293_s4 + $0x18] sm:$0xff] }
 0x3bf   :  { %5521 = vmatpush1.msk.msra.mxu0 %vm6852_vm10, %v1646_v12  ;;  %vm2111_vm10 = vcmp.eq.s32.totalorder %v2110_v60, 0 }
 0x3c0   :  { %v1603_v20 = vpop.permute.xlu1 %1602 }
 0x3c1   :  { %v1610_v61 = vsel %vm9659_vm5, %v1601_v23, %v1603_v20  ;;  %v1611_v52 = vsel %vm9660_vm13, %v1603_v20, %v1605_v24  ;;  %v2495_v20 = vadd.s32 4, %v7131_v21 }
 0x3c2   :  { %5522 = vmatprep.subr.msk.mxu0 %vm6866_vm1, %v1611_v52 }
 0x3c3   :  { %5523 = vmatpush1.msk.msra.mxu0 %vm6870_vm4, %v1610_v61  ;;  %vm2107_vm4 = vcmp.eq.s32.totalorder %v2106_v57, 0  ;;  %v7292_v61 = vadd.s32 4, %v7137_v45  ;;  %vm2496_vm7 = vcmp.ge.s32.totalorder %v2495_v20, 0  ;;  %vm2497_vm0 = vcmp.le.s32.totalorder %v2495_v20, 12 }
 0x3c4   :  { %5400 = vmatmul.mubr.msk.f32.vlgmr.msra.gmra.mxu0 %vm9663_vm12, %v5398_v10  ;;  %vm2109_vm1 = vmand %vm2107_vm4, %vm2108_vm15 }
 0x3c5   :  { %2783 = vmatprep.mubr.f32.mxu0 %v9657_v36  ;;  %vm2112_vm3 = vmand %vm2109_vm1, %vm2111_vm10  ;;  %v2089_v8 = vpop.permute.xlu0 %2088  ;;  %vm9363_vm5 = vcmp.ge.s32.totalorder %v7292_v61, 0  ;;  %vm9362_vm12 = vcmp.le.s32.totalorder %v7292_v61, 12 }
 0x3c6   :  { %vm2114_vm2 = vmand %vm2112_vm3, %vm9366_vm6 }
 0x3c7   :  { %v2115_v43 = vsel %vm2114_vm2, 1, %v9664_v53  ;;  %vm7297_vm13 = vmand %vm2496_vm7, %vm2497_vm0 }
 0x3c8   :  { %v2127_v34 = vrot.slane %v2115_v43, %v9665_v16  ;;  %v2119_v0 = vrot.slane %v2115_v43, %v9668_v7  ;;  %v2131_v58 = vrot.slane %v2115_v43, %v9671_v22  ;;  %v2123_v63 = vrot.slane %v2115_v43, %v9674_v25  ;;  %vm2617_vm4 = vmand %vm7297_vm13, %vm9363_vm5 }
 0x3c9   :  { %v7311_v43 = vadd.s32 4294967292, %v7137_v45  ;;  %vm2618_vm1 = vmand %vm2617_vm4, %vm9362_vm12 }
 0x3ca   :  { %vm7148_vm9 = vcmp.eq.s32.totalorder %v2127_v34, 1  ;;  %vm7161_vm14 = vcmp.eq.s32.totalorder %v2119_v0, 1  ;;  %vm7186_vm8 = vcmp.eq.s32.totalorder %v2131_v58, 1  ;;  %vm7199_vm11 = vcmp.eq.s32.totalorder %v2123_v63, 1 }
 0x3cb   :  { %vm9365_vm2 = vcmp.ge.s32.totalorder %v7311_v43, 0  ;;  %vm9364_vm0 = vcmp.le.s32.totalorder %v7311_v43, 12 }
 0x3cc   :  { %vm2499_vm4 = vmand %vm7297_vm13, %vm9365_vm2  ;;  %vm9368_vm2 = vcmask 523264  }
 0x3cd   :  { %v1933_v28 = vpop.permute.xlu1 %1932 }
 0x3d1   :  { %v2100_v46 = vpop.permute.xlu1 %2099 }
 0x3d5   :  { %v7270_v2 = vpop.permute.xlu1 %2653 }
 0x3d9   :  { %v7274_v33 = vpop.permute.xlu1 %2535 }
 0x415   :  { %v7278_v56 = vpop.permute.xlu0 %2594 }
 0x416   :  { %v7276_v10 = vpop.permute.xlu1 %2471 }
 0x419   :  { %v7282_v12 = vpop.permute.xlu0 %2368 }
 0x41a   :  { %v7280_v31 = vpop.permute.xlu1 %2307 }
 0x47d   :  { %v2075_v5 = vpop.f32.mrf.mxu1 }
 0x47e   :  { %v2076_v55 = vadd.f32 %v2075_v5, %v1933_v28 }
 0x47f   :  { %v2077_v19 = vpop.f32.mrf.mxu1 }
 0x480   :  { %v2082_v6 = vmax.f32 %v2076_v55, 0.0  ;;  %v2078_v41 = vadd.f32 %v2077_v19, %v1933_v28  ;;  %v9679_v55 = vld [vmem:[#allocation8_spill] sm:$0xff] }
 0x481   :  { %vm9680_vm10 = vcmp.ge.s32.totalorder %v9679_v55, 0 }
 0x482   :  { %v2093_v11 = vmul.f32 %v2089_v8, %v2082_v6  ;;  %v2083_v47 = vmax.f32 %v2078_v41, 0.0  ;;  %vm2558_vm3 = vmand %vm7297_vm13, %vm9680_vm10 }
 0x483   :  { %vm2559_vm7 = vmand %vm2558_vm3, %vm9366_vm6 }
 0x484   :  { %v2104_v32 = vadd.f32 %v2100_v46, %v2093_v11  ;;  %v2004_v18 = vpop.f32.mrf.mxu0  ;;  %v2094_v50 = vmul.f32 %v2089_v8, %v2083_v47  ;;  %vm2500_vm13 = vmand %vm2499_vm4, %vm9364_vm0 }
 0x485   :  { %v2005_v54 = vadd.f32 %v2004_v18, %v1933_v28 }
 0x486   :  { %v7154_v59 = vsel %vm7148_vm9, %v2104_v32, 0.0  ;;  %v2006_v14 = vpop.f32.mrf.mxu0  ;;  %v2105_v24 = vadd.f32 %v2100_v46, %v2094_v50  ;;  %v7376_v50 = vsel %vm2500_vm13, 1, %v9664_v53  ;;  %v9704_v32 = vmov 0 }
 0x487   :  { %v2080_v9 = vmax.f32 %v2005_v54, 0.0  ;;  %2590 = vrot.lane.b32.xlu1 %v7154_v59, %s5839_s10  ;;  %2649 = vrot.lane.b32.xlu0 %v7154_v59, %s5837_s28  ;;  %v2007_v1 = vadd.f32 %v2006_v14, %v1933_v28  ;;  %v9688_v14 = vmov 0  ;;  %v2517_v63 = vrot.slane %v7376_v50, %v9671_v22 }
 0x488   :  { %v7197_v35 = vsel %vm7186_vm8, %v2105_v24, 0.0  ;;  %v2513_v20 = vrot.slane %v7376_v50, %v9665_v16 }
 0x489   :  { %v2091_v13 = vmul.f32 %v2089_v8, %v2080_v9  ;;  %v2081_v48 = vmax.f32 %v2007_v1, 0.0  ;;  %v7349_v9 = vsel %vm2559_vm7, 1, %v9664_v53 }
 0x48a   :  { %v2576_v1 = vrot.slane %v7349_v9, %v9671_v22  ;;  %v2572_v24 = vrot.slane %v7349_v9, %v9665_v16 }
 0x48b   :  { %v2102_v4 = vadd.f32 %v2100_v46, %v2091_v13  ;;  %2467 = vrot.lane.b32.xlu1 %v7154_v59, %s5840_s11  ;;  %2531 = vrot.lane.b32.xlu0 %v7154_v59, %s5838_s30  ;;  %v2092_v30 = vmul.f32 %v2089_v8, %v2081_v48  ;;  %v2619_v8 = vsel %vm2618_vm1, 1, %v9664_v53  ;;  %vm9367_vm1 = vcmask 490496  }
 0x48c   :  { %v2627_v11 = vrot.slane %v2619_v8, %v9674_v25  ;;  %v2623_v0 = vrot.slane %v2619_v8, %v9668_v7  ;;  %v9685_v13 = vmov 0  ;;  %v2635_v19 = vrot.slane %v2619_v8, %v9671_v22 }
 0x48d   :  { %v7171_v51 = vsel %vm7161_vm14, %v2102_v4, 0.0  ;;  %v2103_v26 = vadd.f32 %v2100_v46, %v2092_v30  ;;  %v9681_v46 = vld [vmem:[#allocation7_spill] sm:$0xff]  ;;  %v2631_v47 = vrot.slane %v2619_v8, %v9665_v16  ;;  %v9691_v30 = vmov 0 }
 0x48e   :  { %vm9682_vm10 = vcmp.ge.s32.totalorder %v9681_v46, 0  ;;  %vm7357_vm3 = vcmp.eq.s32.totalorder %v2627_v11, 1  ;;  %vm7368_vm4 = vcmp.eq.s32.totalorder %v2623_v0, 1  ;;  %vm7390_vm13 = vcmp.eq.s32.totalorder %v2635_v19, 1 }
 0x48f   :  { %2586 = vrot.lane.b32.xlu1 %v7171_v51, %s5839_s10  ;;  %2645 = vrot.lane.b32.xlu0 %v7171_v51, %s5837_s28  ;;  %v7209_v29 = vsel %vm7199_vm11, %v2103_v26, 0.0  ;;  %vm7341_vm12 = vmand %vm9682_vm10, %vm2108_vm15  ;;  %v9686_v13 = vsel %vm7357_vm3, 4294967295, %v9685_v13  ;;  %vm9687_vm10 = vcmp.ge.s32.totalorder %v9679_v55, 0  ;;  %v9689_v14 = vsel %vm7368_vm4, 4294967295, %v9688_v14 }
 0x490   :  { %vm2435_vm15 = vmand %vm7341_vm12, %vm9363_vm5  ;;  %v9692_v30 = vsel %vm7390_vm13, 4294967295, %v9691_v30  ;;  %v2149_v0 = vadd.s32 4294967292, %v7131_v21  ;;  %v9697_v19 = vmov 0 }
 0x491   :  { %vm2399_vm7 = vmand %vm7341_vm12, %vm9687_vm10  ;;  %vm9690_vm10 = vcmp.le.s32.totalorder %v7292_v61, 12 }
 0x492   :  { %vm2436_vm5 = vmand %vm2435_vm15, %vm9690_vm10  ;;  %vm7398_vm15 = vcmp.eq.s32.totalorder %v2631_v47, 1  ;;  %vm7402_vm10 = vcmp.eq.s32.totalorder %v2576_v1, 1 }
 0x493   :  { %2374 = vrot.lane.b32.xlu1 %v7154_v59, %s5841_s12  ;;  %2313 = vrot.lane.b32.xlu0 %v7154_v59, %s5837_s28  ;;  %vm2400_vm0 = vmand %vm2399_vm7, %vm9366_vm6  ;;  %vm9371_vm7 = vcmask 556032   ;;  %vm7420_vm6 = vcmp.eq.s32.totalorder %v2572_v24, 1 }
 0x494   :  { %v7415_v11 = vsel %vm2400_vm0, 1, %v9664_v53  ;;  %v9698_v19 = vsel %vm7420_vm6, 4294967295, %v9697_v19  ;;  %vm7440_vm0 = vcmp.eq.s32.totalorder %v2513_v20, 1 }
 0x497   :  { %2527 = vrot.lane.b32.xlu1 %v7171_v51, %s5838_s30  ;;  %2463 = vrot.lane.b32.xlu0 %v7171_v51, %s5840_s11 }
 0x49b   :  { %2370 = vrot.lane.b32.xlu1 %v7171_v51, %s5841_s12  ;;  %2250 = vrot.lane.b32.xlu0 %v7154_v59, %s5839_s10 }
 0x49f   :  { %2592 = vrot.lane.b32.xlu1 %v7197_v35, %s5839_s10  ;;  %2190 = vrot.lane.b32.xlu0 %v7154_v59, %s5838_s30 }
 0x4a3   :  { %2647 = vrot.lane.b32.xlu1 %v7209_v29, %s5837_s28  ;;  %2309 = vrot.lane.b32.xlu0 %v7171_v51, %s5837_s28 }
 0x4a7   :  { %2465 = vrot.lane.b32.xlu1 %v7209_v29, %s5840_s11  ;;  %2651 = vrot.lane.b32.xlu0 %v7197_v35, %s5837_s28 }
 0x4ab   :  { %2315 = vrot.lane.b32.xlu1 %v7197_v35, %s5837_s28  ;;  %2533 = vrot.lane.b32.xlu0 %v7197_v35, %s5838_s30 }
 0x4af   :  { %2311 = vrot.lane.b32.xlu1 %v7209_v29, %s5837_s28  ;;  %2469 = vrot.lane.b32.xlu0 %v7197_v35, %s5840_s11 }
 0x4b3   :  { %2252 = vrot.lane.b32.xlu1 %v7197_v35, %s5839_s10  ;;  %2588 = vrot.lane.b32.xlu0 %v7209_v29, %s5839_s10 }
 0x4b7   :  { %2192 = vrot.lane.b32.xlu1 %v7197_v35, %s5838_s30  ;;  %2529 = vrot.lane.b32.xlu0 %v7209_v29, %s5838_s30 }
 0x4bb   :  { %2188 = vrot.lane.b32.xlu1 %v7209_v29, %s5838_s30  ;;  %2376 = vrot.lane.b32.xlu0 %v7197_v35, %s5841_s12 }
 0x4bf   :  { %2244 = vrot.lane.b32.xlu1 %v9657_v36, %s5839_s10  ;;  %2372 = vrot.lane.b32.xlu0 %v7209_v29, %s5841_s12 }
 0x4c3   :  { %2184 = vrot.lane.b32.xlu1 %v9657_v36, %s5838_s30  ;;  %2248 = vrot.lane.b32.xlu0 %v7209_v29, %s5839_s10 }
 0x4c7   :  { %2869 = vperm.xlu1 %5741, %v5408_v27   ;;  %2246 = vrot.lane.b32.xlu0 %v7171_v51, %s5839_s10 }
 0x4cb   :  { %2186 = vrot.lane.b32.xlu0 %v7171_v51, %s5838_s30  ;;  %3145 = vrot.lane.b32.xlu1 %v9657_v36, %s5839_s10 }
 0x4cf   :  { %2713 = vperm.xlu0 %5740, %v5405_v44   ;;  %3017 = vrot.lane.b32.xlu1 %v9657_v36, %s5841_s12  ;;  %v9693_v44 = vmov 0 }
 0x4d0   :  { %v9694_v44 = vsel %vm7398_vm15, 4294967295, %v9693_v44 }
 0x4d3   :  { %2880 = vperm.xlu0 %5740, %v5409_v3   ;;  %v9695_v3 = vmov 0 }
 0x4d4   :  { %v9696_v3 = vsel %vm7402_vm10, 4294967295, %v9695_v3 }
 0x4d7   :  { %3181 = vrot.lane.b32.xlu0 %v9657_v36, %s5837_s28 }
 0x4db   :  { %3109 = vrot.lane.b32.xlu0 %v9657_v36, %s5838_s30 }
 0x4df   :  { %3073 = vrot.lane.b32.xlu0 %v9657_v36, %s5840_s11 }
 0x4e3   :  { %2981 = vrot.lane.b32.xlu0 %v9657_v36, %s5837_s28 }
 0x4f9   :  { %v7284_v37 = vpop.permute.xlu1 %2590  ;;  %v2650_v62 = vpop.permute.xlu0 %2649 }
 0x4fd   :  { %v7286_v23 = vpop.permute.xlu1 %2467  ;;  %v7288_v38 = vpop.permute.xlu0 %2531 }
 0x501   :  { %v7294_v52 = vpop.permute.xlu1 %2586  ;;  %v2646_v17 = vpop.permute.xlu0 %2645 }
 0x505   :  { %v7301_v57 = vpop.permute.xlu1 %2374  ;;  %v7303_v60 = vpop.permute.xlu0 %2313 }
 0x509   :  { %v7313_v28 = vpop.permute.xlu1 %2527  ;;  %v7315_v5 = vpop.permute.xlu0 %2463 }
 0x50d   :  { %v7324_v34 = vpop.permute.xlu1 %2370  ;;  %v7326_v6 = vpop.permute.xlu0 %2250 }
 0x511   :  { %v2593_v18 = vpop.permute.xlu1 %2592  ;;  %v7345_v54 = vpop.permute.xlu0 %2190 }
 0x515   :  { %v2648_v4 = vpop.permute.xlu1 %2647  ;;  %v7366_v41 = vpop.permute.xlu0 %2309 }
 0x516   :  { %v2655_v48 = vsel %vm9367_vm1, %v2646_v17, %v2648_v4  ;;  %v2656_v58 = vsel %vm9367_vm1, %v2648_v4, %v2650_v62  ;;  %v7409_v17 = vsel %vm2436_vm5, 1, %v9664_v53  ;;  %vm7428_vm5 = vcmp.eq.s32.totalorder %v2517_v63, 1 }
 0x517   :  { %5542 = vmatprep.subr.msk.mxu0 %vm7357_vm3, %v2656_v58  ;;  %v2453_v21 = vrot.slane %v7409_v17, %v9671_v22  ;;  %v2598_v4 = vsel %vm9368_vm2, %v7284_v37, %v2593_v18  ;;  %v2417_v58 = vrot.slane %v7415_v11, %v9671_v22  ;;  %v2413_v63 = vrot.slane %v7415_v11, %v9665_v16 }
 0x518   :  { %5543 = vmatpush1.msk.msra.mxu0 %vm7368_vm4, %v2655_v48  ;;  %v9701_v48 = vmov 0 }
 0x519   :  { %v7396_v26 = vpop.permute.xlu1 %2465  ;;  %v2652_v27 = vpop.permute.xlu0 %2651  ;;  %v9702_v48 = vsel %vm7440_vm0, 4294967295, %v9701_v48 }
 0x51a   :  { %v2657_v15 = vsel %vm9367_vm1, %v2650_v62, %v2652_v27  ;;  %v2658_v8 = vsel %vm9367_vm1, %v2652_v27, %v7270_v2  ;;  %v2599_v62 = vsel %vm9368_vm2, %v2593_v18, %v7278_v56  ;;  %v9699_v2 = vmov 0 }
 0x51b   :  { %5560 = vmatprep.subr.msk.mxu1 %vm7390_vm13, %v2658_v8  ;;  %v9700_v2 = vsel %vm7428_vm5, 4294967295, %v9699_v2  ;;  %v2449_v56 = vrot.slane %v7409_v17, %v9665_v16  ;;  %vm9703_vm1 = vcmp.ge.s32.totalorder %v7311_v43, 0  ;;  %v2568_v27 = vrot.slane %v7349_v9, %v9674_v25 }
 0x51c   :  { %5561 = vmatpush1.msk.msra.mxu1 %vm7398_vm15, %v2657_v15  ;;  %vm2340_vm2 = vmand %vm7341_vm12, %vm9703_vm1  ;;  %vm2152_vm15 = vcmp.le.s32.totalorder %v2149_v0, 12  ;;  %vm7464_vm12 = vcmp.eq.s32.totalorder %v2453_v21, 1  ;;  %vm9706_vm1 = vcmp.le.s32.totalorder %v7311_v43, 12  ;;  %v9707_v15 = vmov 0 }
 0x51d   :  { %v7436_v47 = vpop.permute.xlu1 %2315  ;;  %5562 = vmatprep.subr.msk.mxu1 %vm7402_vm10, %v2599_v62  ;;  %v2534_v1 = vpop.permute.xlu0 %2533  ;;  %vm2151_vm10 = vcmp.ge.s32.totalorder %v2149_v0, 0  ;;  %v9705_v32 = vsel %vm7464_vm12, 4294967295, %v9704_v32  ;;  %v2564_v8 = vrot.slane %v7349_v9, %v9668_v7  ;;  %v9715_v9 = vmov 0 }
 0x51e   :  { %v2539_v18 = vsel %vm9371_vm7, %v7288_v38, %v2534_v1  ;;  %5563 = vmatpush1.msk.msra.mxu1 %vm7420_vm6, %v2598_v4  ;;  %v2540_v24 = vsel %vm9371_vm7, %v2534_v1, %v7274_v33  ;;  %vm2341_vm7 = vmand %vm2340_vm2, %vm9706_vm1  ;;  %vm9375_vm6 = vcmask 1014784   ;;  %vm7488_vm2 = vcmp.eq.s32.totalorder %v2417_v58, 1 }
 0x51f   :  { %5564 = vmatprep.subr.msk.mxu1 %vm7428_vm5, %v2540_v24  ;;  %vm7474_vm5 = vcmp.eq.s32.totalorder %v2449_v56, 1  ;;  %v9711_v4 = vmov 0  ;;  %vm7494_vm1 = vcmp.eq.s32.totalorder %v2413_v63, 1  ;;  %v9713_v1 = vmov 0 }
 0x520   :  { %5565 = vmatpush1.msk.msra.mxu1 %vm7440_vm0, %v2539_v18  ;;  %v9708_v15 = vsel %vm7474_vm5, 4294967295, %v9707_v15  ;;  %vm7480_vm0 = vmand %vm2151_vm10, %vm2152_vm15  ;;  %v9712_v4 = vsel %vm7488_vm2, 4294967295, %v9711_v4  ;;  %v9714_v1 = vsel %vm7494_vm1, 4294967295, %v9713_v1  ;;  %vm7500_vm15 = vcmp.eq.s32.totalorder %v2568_v27, 1 }
 0x521   :  { %v7472_v33 = vpop.permute.xlu1 %2311  ;;  %v2470_v20 = vpop.permute.xlu0 %2469  ;;  %v9716_v9 = vsel %vm7500_vm15, 4294967295, %v9715_v9  ;;  %v2342_v56 = vsel %vm2341_vm7, 1, %v9664_v53  ;;  %vm9717_vm10 = vcmp.ge.s32.totalorder %v7292_v61, 0  ;;  %v9720_v63 = vmov 0 }
 0x522   :  { %v2476_v62 = vsel %vm9375_vm6, %v7286_v23, %v2470_v20  ;;  %v2477_v21 = vsel %vm9375_vm6, %v2470_v20, %v7276_v10  ;;  %v2509_v10 = vrot.slane %v7376_v50, %v9674_v25  ;;  %vm7511_vm6 = vmand %vm7480_vm0, %vm9717_vm10  ;;  %v2505_v27 = vrot.slane %v7376_v50, %v9668_v7 }
 0x523   :  { %5566 = vmatprep.subr.msk.mxu1 %vm7464_vm12, %v2477_v21  ;;  %vm9722_vm7 = vcmask 523264   ;;  %v2445_v21 = vrot.slane %v7409_v17, %v9674_v25  ;;  %v2409_v50 = vrot.slane %v7415_v11, %v9674_v25 }
 0x524   :  { %5567 = vmatpush1.msk.msra.mxu1 %vm7474_vm5, %v2476_v62  ;;  %vm7520_vm5 = vcmp.eq.s32.totalorder %v2564_v8, 1  ;;  %vm9723_vm10 = vmmov %vm9722_vm7  ;;  %v2358_v8 = vrot.slane %v2342_v56, %v9671_v22  ;;  %vm7566_vm4 = vcmp.eq.s32.totalorder %v2505_v27, 1 }
 0x525   :  { %v7515_v18 = vpop.permute.xlu1 %2252  ;;  %5568 = vmatprep.subr.msk.mxu1 %vm7488_vm2, %v7197_v35  ;;  %v2589_v24 = vpop.permute.xlu0 %2588  ;;  %v9721_v63 = vsel %vm7520_vm5, 4294967295, %v9720_v63  ;;  %vm9724_vm2 = vcmp.ge.s32.totalorder %v9679_v55, 0 }
 0x526   :  { %v2596_v20 = vsel %vm9722_vm7, %v7294_v52, %v2589_v24  ;;  %5569 = vmatpush1.msk.msra.mxu1 %vm7494_vm1, %v7154_v59  ;;  %v2597_v62 = vsel %vm9723_vm10, %v2589_v24, %v7284_v37  ;;  %vm2216_vm12 = vmand %vm7480_vm0, %vm9724_vm2  ;;  %v2441_v52 = vrot.slane %v7409_v17, %v9668_v7  ;;  %v2405_v37 = vrot.slane %v7415_v11, %v9668_v7 }
 0x527   :  { %5544 = vmatprep.subr.msk.mxu0 %vm7500_vm15, %v2597_v62  ;;  %vm9725_vm7 = vcmp.le.s32.totalorder %v7292_v61, 12  ;;  %vm7554_vm2 = vcmp.eq.s32.totalorder %v2509_v10, 1  ;;  %v9726_v24 = vmov 0  ;;  %vm9728_vm15 = vcmp.ge.s32.totalorder %v7311_v43, 0 }
 0x528   :  { %vm2280_vm10 = vmand %vm7511_vm6, %vm9725_vm7  ;;  %5545 = vmatpush1.msk.msra.mxu0 %vm7520_vm5, %v2596_v20  ;;  %v9727_v24 = vsel %vm7554_vm2, 4294967295, %v9726_v24  ;;  %vm9733_vm6 = vcmp.le.s32.totalorder %v7137_v45, 12  ;;  %vm9736_vm5 = vcmask 556032   ;;  %v9740_v45 = vmov 0 }
 0x529   :  { %vm7562_vm1 = vmand %vm7480_vm0, %vm9728_vm15  ;;  %v2530_v61 = vpop.permute.xlu0 %2529  ;;  %vm7580_vm15 = vcmp.eq.s32.totalorder %v2445_v21, 1  ;;  %v2281_v27 = vsel %vm2280_vm10, 1, %v9664_v53  ;;  %v7585_v62 = vpop.permute.xlu1 %2192  ;;  %v9746_v21 = vmov 0  ;;  %vm9749_vm10 = vcmp.le.s32.totalorder %v7311_v43, 12 }
 0x52a   :  { %vm7572_vm7 = vmand %vm2216_vm12, %vm9733_vm6  ;;  %v2537_v58 = vsel %vm9736_vm5, %v7313_v28, %v2530_v61  ;;  %vm7589_vm12 = vcmp.eq.s32.totalorder %v2441_v52, 1  ;;  %vm7593_vm6 = vcmp.eq.s32.totalorder %v2409_v50, 1  ;;  %v9742_v28 = vmov 0 }
 0x52b   :  { %vm9737_vm0 = vmmov %vm9736_vm5  ;;  %v9741_v45 = vsel %vm7589_vm12, 4294967295, %v9740_v45  ;;  %v9743_v28 = vsel %vm7593_vm6, 4294967295, %v9742_v28  ;;  %vm7597_vm5 = vcmp.eq.s32.totalorder %v2358_v8, 1  ;;  %v2350_v50 = vrot.slane %v2342_v56, %v9674_v25 }
 0x52c   :  { %v2538_v0 = vsel %vm9737_vm0, %v2530_v61, %v7288_v38  ;;  %v9744_v38 = vmov 0  ;;  %vm7601_vm0 = vcmp.eq.s32.totalorder %v2405_v37, 1  ;;  %vm2157_vm13 = vmand %vm7562_vm1, %vm9749_vm10  ;;  %v2354_v8 = vrot.slane %v2342_v56, %v9665_v16 }
 0x52d   :  { %5546 = vmatprep.subr.msk.mxu0 %vm7554_vm2, %v2538_v0  ;;  %v9745_v38 = vsel %vm7597_vm5, 4294967295, %v9744_v38  ;;  %v9747_v21 = vsel %vm7601_vm0, 4294967295, %v9746_v21  ;;  %vm9750_vm2 = vcmask 1014784   ;;  %v2218_v37 = vsel %vm7572_vm7, 1, %v9664_v53  ;;  %v2377_v17 = vpop.permute.xlu0 %2376  ;;  %v2189_v55 = vpop.permute.xlu1 %2188 }
 0x52e   :  { %9748 = vst [vmem:[#allocation13_spill] sm:$0xff] %v9747_v21  ;;  %5547 = vmatpush1.msk.msra.mxu0 %vm7566_vm4, %v2537_v58  ;;  %v2475_v52 = vsel %vm9750_vm2, %v7396_v26, %v7286_v23  ;;  %vm9751_vm3 = vmmov %vm9750_vm2  ;;  %v2346_v61 = vrot.slane %v2342_v56, %v9668_v7  ;;  %v2297_v23 = vrot.slane %v2281_v27, %v9671_v22  ;;  %vm9752_vm1 = vcmask 31744  }
 0x52f   :  { %v2474_v43 = vsel %vm9751_vm3, %v7315_v5, %v7396_v26  ;;  %5548 = vmatprep.subr.msk.mxu0 %vm7580_vm15, %v2475_v52  ;;  %v2289_v58 = vrot.slane %v2281_v27, %v9674_v25  ;;  %v2382_v0 = vsel %vm9752_vm1, %v7301_v57, %v2377_v17  ;;  %v2293_v10 = vrot.slane %v2281_v27, %v9665_v16 }
 0x530   :  { %5549 = vmatpush1.msk.msra.mxu0 %vm7589_vm12, %v2474_v43  ;;  %v7633_v5 = vsel %vm2157_vm13, 1, %v9664_v53  ;;  %5570 = vmatprep.subr.msk.mxu1 %vm7597_vm5, %v2382_v0  ;;  %v2285_v26 = vrot.slane %v2281_v27, %v9668_v7  ;;  %v2234_v56 = vrot.slane %v2218_v37, %v9671_v22  ;;  %vm7645_vm3 = vcmp.eq.s32.totalorder %v2350_v50, 1 }
 0x531   :  { %5550 = vmatprep.subr.msk.mxu0 %vm7593_vm6, %v7209_v29  ;;  %v9753_v52 = vmov 0  ;;  %vm7649_vm13 = vcmp.eq.s32.totalorder %v2354_v8, 1  ;;  %v9755_v43 = vmov 0  ;;  %v2230_v17 = vrot.slane %v2218_v37, %v9665_v16  ;;  %v2373_v0 = vpop.permute.xlu0 %2372 }
 0x532   :  { %5551 = vmatpush1.msk.msra.mxu0 %vm7601_vm0, %v7171_v51  ;;  %v9754_v52 = vsel %vm7645_vm3, 4294967295, %v9753_v52  ;;  %v9756_v43 = vsel %vm7649_vm13, 4294967295, %v9755_v43  ;;  %vm7654_vm2 = vcmp.eq.s32.totalorder %v2346_v61, 1  ;;  %vm7658_vm7 = vcmp.eq.s32.totalorder %v2297_v23, 1  ;;  %vm9763_vm0 = vmmov %vm9752_vm1 }
 0x533   :  { %vm7662_vm10 = vcmp.eq.s32.totalorder %v2289_v58, 1  ;;  %v2174_v8 = vrot.slane %v7633_v5, %v9671_v22  ;;  %v2381_v53 = vsel %vm9752_vm1, %v2373_v0, %v7301_v57  ;;  %v2380_v61 = vsel %vm9763_vm0, %v7324_v34, %v2373_v0  ;;  %vm9766_vm6 = vmmov %vm9763_vm0  ;;  %v8031_v0 = vld [vmem:[%s9294_s5] sm:$0xf] }
 0x534   :  { %vm7672_vm5 = vcmp.eq.s32.totalorder %v2293_v10, 1  ;;  %v9764_v21 = vmov 0  ;;  %v2170_v23 = vrot.slane %v7633_v5, %v9665_v16  ;;  %v2379_v58 = vsel %vm9766_vm6, %v7282_v12, %v7324_v34  ;;  %5552 = vmatprep.subr.msk.mxu0 %vm7645_vm3, %v2380_v61  ;;  %5571 = vmatpush1.msk.msra.mxu1 %vm7649_vm13, %v2381_v53 }
 0x535   :  { %v9765_v21 = vsel %vm7672_vm5, 4294967295, %v9764_v21  ;;  %vm9767_vm12 = vcmask 490496   ;;  %vm7688_vm0 = vcmp.eq.s32.totalorder %v2285_v26, 1  ;;  %v9768_v57 = vmov 0  ;;  %5553 = vmatpush1.msk.msra.mxu0 %vm7654_vm2, %v2379_v58 }
 0x536   :  { %v2321_v22 = vsel %vm9767_vm12, %v7303_v60, %v7436_v47  ;;  %v9769_v57 = vsel %vm7688_vm0, 4294967295, %v9768_v57  ;;  %vm7692_vm1 = vcmp.eq.s32.totalorder %v2234_v56, 1  ;;  %v9770_v10 = vmov 0  ;;  %vm9772_vm6 = vmmov %vm9767_vm12  ;;  %v2245_v56 = vpop.permute.xlu1 %2244 }
 0x537   :  { %v9771_v10 = vsel %vm7692_vm1, 4294967295, %v9770_v10  ;;  %v2320_v12 = vsel %vm9772_vm6, %v7472_v33, %v7303_v60  ;;  %5572 = vmatprep.subr.msk.mxu1 %vm7658_vm7, %v2321_v22  ;;  %vm9773_vm12 = vmmov %vm9772_vm6  ;;  %vm7706_vm13 = vcmp.eq.s32.totalorder %v2230_v17, 1  ;;  %v9774_v34 = vmov 0  ;;  %v2249_v22 = vpop.permute.xlu0 %2248 }
 0x538   :  { %v2319_v53 = vsel %vm9773_vm12, %v7366_v41, %v7472_v33  ;;  %v9775_v34 = vsel %vm7706_vm13, 4294967295, %v9774_v34  ;;  %v2226_v47 = vrot.slane %v2218_v37, %v9674_v25  ;;  %vm9776_vm3 = vmmov %vm9772_vm6  ;;  %vm9777_vm6 = vcmask 523264   ;;  %5573 = vmatpush1.msk.msra.mxu1 %vm7672_vm5, %v2320_v12 }
 0x539   :  { %v2318_v60 = vsel %vm9776_vm3, %v7280_v31, %v7366_v41  ;;  %v2258_v26 = vsel %vm9777_vm6, %v7326_v6, %v7515_v18  ;;  %5554 = vmatprep.subr.msk.mxu0 %vm7662_vm10, %v2319_v53  ;;  %vm7721_vm12 = vcmp.eq.s32.totalorder %v2174_v8, 1  ;;  %v9778_v33 = vmov 0  ;;  %vm9780_vm3 = vmmov %vm9777_vm6 }
 0x53a   :  { %v9779_v33 = vsel %vm7721_vm12, 4294967295, %v9778_v33  ;;  %v2222_v17 = vrot.slane %v2218_v37, %v9668_v7  ;;  %v2257_v31 = vsel %vm9780_vm3, %v2249_v22, %v7326_v6  ;;  %5555 = vmatpush1.msk.msra.mxu0 %vm7688_vm0, %v2318_v60  ;;  %5574 = vmatprep.subr.msk.mxu1 %vm7692_vm1, %v2258_v26  ;;  %vm7732_vm6 = vcmp.eq.s32.totalorder %v2170_v23, 1  ;;  %v5404_v6 = vld [vmem:[%s9290_s1 + $0x18] sm:$0xff]  ;;  %v2185_v12 = vpop.permute.xlu1 %2184 }
 0x53b   :  { %v9781_v41 = vmov 0  ;;  %vm9783_vm5 = vcmask 556032   ;;  %5575 = vmatpush1.msk.msra.mxu1 %vm7706_vm13, %v2257_v31  ;;  %vm7748_vm1 = vcmp.eq.s32.totalorder %v2226_v47, 1  ;;  %v2247_v8 = vpop.permute.xlu0 %2246  ;;  %v9787_v61 = vmov 0 }
 0x53c   :  { %v9782_v41 = vsel %vm7732_vm6, 4294967295, %v9781_v41  ;;  %v2198_v18 = vsel %vm9783_vm5, %v7345_v54, %v7585_v62  ;;  %vm9784_vm3 = vmmov %vm9783_vm5  ;;  %v2166_v62 = vrot.slane %v7633_v5, %v9674_v25  ;;  %vm7756_vm5 = vcmp.eq.s32.totalorder %v2222_v17, 1 }
 0x53d   :  { %v2197_v37 = vsel %vm9784_vm3, %v2189_v55, %v7345_v54  ;;  %5576 = vmatprep.subr.msk.mxu1 %vm7721_vm12, %v2198_v18  ;;  %v9788_v61 = vsel %vm7756_vm5, 4294967295, %v9787_v61  ;;  %v2162_v54 = vrot.slane %v7633_v5, %v9668_v7  ;;  %vm9790_vm3 = vcmask 523264  }
 0x53e   :  { %5577 = vmatpush1.msk.msra.mxu1 %vm7732_vm6, %v2197_v37  ;;  %9789 = vst [vmem:[#allocation14_spill] sm:$0xff] %v9788_v61  ;;  %v2255_v23 = vsel %vm9790_vm3, %v2245_v56, %v2247_v8  ;;  %vm9791_vm12 = vcmask 588800   ;;  %vm9792_vm13 = vmmov %vm9790_vm3  ;;  %vm7770_vm6 = vcmp.eq.s32.totalorder %v2166_v62, 1  ;;  %v9793_v53 = vmov 0 }
 0x53f   :  { %5407 = vmatmul.mubr.msk.f32.vlgmr.msra.gmra.mxu1 %vm9791_vm12, %v5404_v6  ;;  %v2256_v58 = vsel %vm9792_vm13, %v2247_v8, %v2249_v22  ;;  %v9794_v53 = vsel %vm7770_vm6, 4294967295, %v9793_v53  ;;  %v2187_v5 = vpop.permute.xlu0 %2186  ;;  %vm7774_vm0 = vcmp.eq.s32.totalorder %v2162_v54, 1  ;;  %v9796_v47 = vmov 0 }
 0x540   :  { %5556 = vmatprep.subr.msk.mxu0 %vm7748_vm1, %v2256_v58  ;;  %3382 = vmatprep.mubr.f32.mxu1 %v9657_v36  ;;  %9795 = vst [vmem:[#allocation15_spill] sm:$0xff] %v9794_v53  ;;  %v9797_v47 = vsel %vm7774_vm0, 4294967295, %v9796_v47  ;;  %vm9799_vm12 = vcmask 556032   ;;  %vm9801_vm3 = vcmask 588800  }
 0x541   :  { %5557 = vmatpush1.msk.msra.mxu0 %vm7756_vm5, %v2255_v23  ;;  %9798 = vst [vmem:[#allocation16_spill] sm:$0xff] %v9797_v47  ;;  %v2195_v60 = vsel %vm9799_vm12, %v2185_v12, %v2187_v5  ;;  %vm9800_vm13 = vmmov %vm9799_vm12 }
 0x542   :  { %v2196_v26 = vsel %vm9800_vm13, %v2187_v5, %v2189_v55  ;;  %v2870_v18 = vpop.permute.xlu1 %2869 }
 0x543   :  { %5558 = vmatprep.subr.msk.mxu0 %vm7770_vm6, %v2196_v26 }
 0x544   :  { %5559 = vmatpush1.msk.msra.mxu0 %vm7774_vm0, %v2195_v60  ;;  %vm9809_vm0 = vnez %v9694_v44 }
 0x545   :  { %5406 = vmatmul.mubr.msk.f32.vlgmr.msra.gmra.mxu0 %vm9801_vm3, %v5404_v6  ;;  %vm9808_vm3 = vnez %v9692_v30 }
 0x546   :  { %3311 = vmatprep.mubr.f32.mxu0 %v9657_v36 }
 0x54a   :  { %v2714_v22 = vpop.permute.xlu0 %2713 }
 0x54e   :  { %v2881_v62 = vpop.permute.xlu0 %2880 }
 0x5ff   :  { %v2856_v56 = vpop.f32.mrf.mxu1 }
 0x600   :  { %v2857_v17 = vadd.f32 %v2856_v56, %v2714_v22 }
 0x601   :  { %v2858_v6 = vpop.f32.mrf.mxu1 }
 0x602   :  { %v2863_v31 = vmax.f32 %v2857_v17, 0.0  ;;  %v2859_v26 = vadd.f32 %v2858_v6, %v2714_v22 }
 0x604   :  { %v2874_v37 = vmul.f32 %v2870_v18, %v2863_v31 }
 0x605   :  { %v2785_v54 = vpop.f32.mrf.mxu0 }
 0x606   :  { %v2885_v8 = vadd.f32 %v2881_v62, %v2874_v37  ;;  %v2786_v55 = vadd.f32 %v2785_v54, %v2714_v22 }
 0x607   :  { %v2787_v17 = vpop.f32.mrf.mxu0 }
 0x608   :  { %v2889_v23 = vsel %vm7148_vm9, %v2885_v8, 0.0  ;;  %v2861_v12 = vmax.f32 %v2786_v55, 0.0  ;;  %v2788_v31 = vadd.f32 %v2787_v17, %v2714_v22  ;;  %vm9802_vm9 = vcmask 490496  }
 0x609   :  { %v7789_v58 = vadd.f32 %v2889_v23, %v7154_v59  ;;  %v2864_v59 = vmax.f32 %v2859_v26, 0.0  ;;  %vm9806_vm12 = vmmov %vm9802_vm9 }
 0x60a   :  { %v2872_v5 = vmul.f32 %v2870_v18, %v2861_v12  ;;  %v2862_v37 = vmax.f32 %v2788_v31, 0.0  ;;  %v3146_v12 = vpop.permute.xlu1 %3145  ;;  %vm9807_vm13 = vmmov %vm9802_vm9 }
 0x60b   :  { %3141 = vrot.lane.b32.xlu0 %v7789_v58, %s5839_s10  ;;  %3177 = vrot.lane.b32.xlu1 %v7789_v58, %s5837_s28  ;;  %v2875_v40 = vmul.f32 %v2870_v18, %v2864_v59 }
 0x60c   :  { %v2883_v60 = vadd.f32 %v2881_v62, %v2872_v5  ;;  %v2873_v54 = vmul.f32 %v2870_v18, %v2862_v37 }
 0x60d   :  { %v2886_v8 = vadd.f32 %v2881_v62, %v2875_v40 }
 0x60e   :  { %v2887_v56 = vsel %vm7161_vm14, %v2883_v60, 0.0  ;;  %v2884_v22 = vadd.f32 %v2881_v62, %v2873_v54  ;;  %v3182_v62 = vpop.permute.xlu0 %3181  ;;  %v7885_v5 = vpop.permute.xlu1 %3017  ;;  %vm9803_vm14 = vmmov %vm9802_vm9 }
 0x60f   :  { %3069 = vrot.lane.b32.xlu0 %v7789_v58, %s5840_s11  ;;  %3105 = vrot.lane.b32.xlu1 %v7789_v58, %s5838_s30  ;;  %v7802_v49 = vadd.f32 %v2887_v56, %v7171_v51  ;;  %v2890_v51 = vsel %vm7186_vm8, %v2886_v8, 0.0  ;;  %vm9804_vm8 = vnez %v9686_v13 }
 0x610   :  { %v7823_v55 = vadd.f32 %v2890_v51, %v7197_v35  ;;  %v2888_v18 = vsel %vm7199_vm11, %v2884_v22, 0.0  ;;  %v5414_v35 = vld [vmem:[%s9292_s3 + $0x20] sm:$0xff]  ;;  %vm9805_vm11 = vnez %v9689_v14 }
 0x611   :  { %v7832_v42 = vadd.f32 %v2888_v18, %v7209_v29  ;;  %v5415_v29 = vld [vmem:[%s9293_s4 + $0x20] sm:$0xff] }
 0x612   :  { %v3110_v23 = vpop.permute.xlu0 %3109 }
 0x613   :  { %3137 = vrot.lane.b32.xlu0 %v7802_v49, %s5839_s10  ;;  %3173 = vrot.lane.b32.xlu1 %v7802_v49, %s5837_s28 }
 0x616   :  { %v3074_v6 = vpop.permute.xlu0 %3073 }
 0x617   :  { %3023 = vrot.lane.b32.xlu0 %v7789_v58, %s5841_s12  ;;  %2987 = vrot.lane.b32.xlu1 %v7789_v58, %s5837_s28 }
 0x61a   :  { %v7887_v60 = vpop.permute.xlu0 %2981 }
 0x61b   :  { %3101 = vrot.lane.b32.xlu0 %v7802_v49, %s5838_s30  ;;  %3065 = vrot.lane.b32.xlu1 %v7802_v49, %s5840_s11 }
 0x61f   :  { %3019 = vrot.lane.b32.xlu0 %v7802_v49, %s5841_s12  ;;  %2951 = vrot.lane.b32.xlu1 %v7789_v58, %s5839_s10 }
 0x623   :  { %3143 = vrot.lane.b32.xlu0 %v7823_v55, %s5839_s10  ;;  %2915 = vrot.lane.b32.xlu1 %v7789_v58, %s5838_s30 }
 0x627   :  { %3175 = vrot.lane.b32.xlu0 %v7832_v42, %s5837_s28  ;;  %2983 = vrot.lane.b32.xlu1 %v7802_v49, %s5837_s28 }
 0x62b   :  { %3067 = vrot.lane.b32.xlu0 %v7832_v42, %s5840_s11  ;;  %3179 = vrot.lane.b32.xlu1 %v7823_v55, %s5837_s28 }
 0x62f   :  { %2989 = vrot.lane.b32.xlu0 %v7823_v55, %s5837_s28  ;;  %3107 = vrot.lane.b32.xlu1 %v7823_v55, %s5838_s30 }
 0x633   :  { %2985 = vrot.lane.b32.xlu0 %v7832_v42, %s5837_s28  ;;  %3071 = vrot.lane.b32.xlu1 %v7823_v55, %s5840_s11  ;;  %s5842_s11 = smov 8  }
 0x637   :  { %2953 = vrot.lane.b32.xlu0 %v7823_v55, %s5839_s10  ;;  %3139 = vrot.lane.b32.xlu1 %v7832_v42, %s5839_s10 }
 0x63b   :  { %2917 = vrot.lane.b32.xlu0 %v7823_v55, %s5838_s30  ;;  %3103 = vrot.lane.b32.xlu1 %v7832_v42, %s5838_s30 }
 0x63f   :  { %2913 = vrot.lane.b32.xlu0 %v7832_v42, %s5838_s30  ;;  %3025 = vrot.lane.b32.xlu1 %v7823_v55, %s5841_s12 }
 0x643   :  { %2945 = vrot.lane.b32.xlu0 %v9657_v36, %s5839_s10  ;;  %3021 = vrot.lane.b32.xlu1 %v7832_v42, %s5841_s12  ;;  %s5843_s12 = smov 120  }
 0x647   :  { %2909 = vrot.lane.b32.xlu0 %v9657_v36, %s5838_s30  ;;  %2949 = vrot.lane.b32.xlu1 %v7832_v42, %s5839_s10 }
 0x64b   :  { %3397 = vperm.xlu0 %5740, %v5414_v35   ;;  %2947 = vrot.lane.b32.xlu1 %v7802_v49, %s5839_s10 }
 0x64f   :  { %2911 = vrot.lane.b32.xlu1 %v7802_v49, %s5838_s30 }
 0x653   :  { %3241 = vperm.xlu1 %5741, %v5411_v39  }
 0x657   :  { %3408 = vperm.xlu1 %5741, %v5415_v29  }
 0x65b   :  { %3818 = vrot.lane.b32.xlu1 %v9657_v36, %s5842_s11 }
 0x67d   :  { %v3178_v26 = vpop.permute.xlu1 %3177  ;;  %v3142_v56 = vpop.permute.xlu0 %3141 }
 0x681   :  { %v3106_v17 = vpop.permute.xlu1 %3105  ;;  %v3070_v59 = vpop.permute.xlu0 %3069 }
 0x685   :  { %v3174_v31 = vpop.permute.xlu1 %3173  ;;  %v3138_v40 = vpop.permute.xlu0 %3137 }
 0x689   :  { %v7889_v37 = vpop.permute.xlu1 %2987  ;;  %v3024_v8 = vpop.permute.xlu0 %3023 }
 0x68d   :  { %v3066_v54 = vpop.permute.xlu1 %3065  ;;  %v3102_v51 = vpop.permute.xlu0 %3101 }
 0x691   :  { %v7891_v22 = vpop.permute.xlu1 %2951  ;;  %v3020_v18 = vpop.permute.xlu0 %3019 }
 0x695   :  { %v7893_v35 = vpop.permute.xlu1 %2915  ;;  %v3144_v39 = vpop.permute.xlu0 %3143 }
 0x699   :  { %v7895_v29 = vpop.permute.xlu1 %2983  ;;  %v3176_v25 = vpop.permute.xlu0 %3175 }
 0x69a   :  { %v3183_v7 = vsel %vm9802_vm9, %v3174_v31, %v3176_v25  ;;  %v3184_v16 = vsel %vm9803_vm14, %v3176_v25, %v3178_v26  ;;  %vm9810_vm9 = vcmask 523264  }
 0x69b   :  { %5578 = vmatprep.subr.msk.mxu0 %vm9804_vm8, %v3184_v16  ;;  %v3150_v25 = vsel %vm9810_vm9, %v3144_v39, %v3146_v12  ;;  %vm9811_vm14 = vmmov %vm9810_vm9  ;;  %vm9812_vm8 = vnez %v9696_v3  ;;  %vm9818_vm9 = vcmask 1014784  }
 0x69c   :  { %5579 = vmatpush1.msk.msra.mxu0 %vm9805_vm11, %v3183_v7  ;;  %v3149_v13 = vsel %vm9811_vm14, %v3142_v56, %v3144_v39  ;;  %vm9813_vm11 = vcmask 556032   ;;  %vm9819_vm14 = vmmov %vm9818_vm9 }
 0x69d   :  { %v3180_v47 = vpop.permute.xlu1 %3179  ;;  %v3068_v53 = vpop.permute.xlu0 %3067 }
 0x69e   :  { %v3185_v61 = vsel %vm9806_vm12, %v3178_v26, %v3180_v47  ;;  %v3186_v36 = vsel %vm9807_vm13, %v3180_v47, %v3182_v62  ;;  %vm9814_vm12 = vnez %v9698_v19  ;;  %vm9815_vm13 = vmmov %vm9813_vm11 }
 0x69f   :  { %5596 = vmatprep.subr.msk.mxu1 %vm9808_vm3, %v3186_v36  ;;  %vm9816_vm3 = vnez %v9700_v2 }
 0x6a0   :  { %5597 = vmatpush1.msk.msra.mxu1 %vm9809_vm0, %v3185_v61  ;;  %vm9817_vm0 = vnez %v9702_v48 }
 0x6a1   :  { %v3108_v16 = vpop.permute.xlu1 %3107  ;;  %5598 = vmatprep.subr.msk.mxu1 %vm9812_vm8, %v3150_v25  ;;  %v2990_v7 = vpop.permute.xlu0 %2989  ;;  %vm9820_vm8 = vnez %v9705_v32 }
 0x6a2   :  { %v3113_v14 = vsel %vm9813_vm11, %v3106_v17, %v3108_v16  ;;  %5599 = vmatpush1.msk.msra.mxu1 %vm9814_vm12, %v3149_v13  ;;  %v3114_v30 = vsel %vm9815_vm13, %v3108_v16, %v3110_v23  ;;  %vm9821_vm11 = vnez %v9708_v15  ;;  %vm9822_vm12 = vnez %v9712_v4  ;;  %v9876_v13 = vld [vmem:[#allocation9_spill] sm:$0xff] }
 0x6a3   :  { %5600 = vmatprep.subr.msk.mxu1 %vm9816_vm3, %v3114_v30  ;;  %vm9823_vm13 = vcmask 523264   ;;  %vm9824_vm3 = vnez %v9714_v1 }
 0x6a4   :  { %5601 = vmatpush1.msk.msra.mxu1 %vm9817_vm0, %v3113_v14  ;;  %vm9825_vm0 = vmmov %vm9823_vm13 }
 0x6a5   :  { %v3072_v36 = vpop.permute.xlu1 %3071  ;;  %v2986_v44 = vpop.permute.xlu0 %2985 }
 0x6a6   :  { %v3077_v61 = vsel %vm9818_vm9, %v3070_v59, %v3072_v36  ;;  %v3078_v3 = vsel %vm9819_vm14, %v3072_v36, %v3074_v6  ;;  %vm9826_vm9 = vnez %v9716_v9  ;;  %vm9827_vm14 = vnez %v9721_v63 }
 0x6a7   :  { %5602 = vmatprep.subr.msk.mxu1 %vm9820_vm8, %v3078_v3  ;;  %vm9828_vm8 = vcmask 556032   ;;  %v9861_v6 = vmov 0.0   ;;  %v9879_v3 = vld [vmem:[#allocation10_spill] sm:$0xff] }
 0x6a8   :  { %5603 = vmatpush1.msk.msra.mxu1 %vm9821_vm11, %v3077_v61  ;;  %vm9829_vm11 = vmmov %vm9828_vm8  ;;  %3755 = vrot.lane.b32.xlu1 %v9861_v6, %s5843_s12 }
 0x6a9   :  { %v3140_v19 = vpop.permute.xlu1 %3139  ;;  %5604 = vmatprep.subr.msk.mxu1 %vm9822_vm12, %v7823_v55  ;;  %v2954_v2 = vpop.permute.xlu0 %2953  ;;  %vm9830_vm12 = vnez %v9727_v24  ;;  %v9837_v24 = vld [vmem:[#allocation13_spill] sm:$0xff]  ;;  %5743 = vrot.lane.b32.xlu0 %v9861_v6, %s5843_s12 }
 0x6aa   :  { %v3147_v48 = vsel %vm9823_vm13, %v3138_v40, %v3140_v19  ;;  %5605 = vmatpush1.msk.msra.mxu1 %vm9824_vm3, %v7789_v58  ;;  %v3148_v47 = vsel %vm9825_vm0, %v3140_v19, %v3142_v56  ;;  %vm9831_vm13 = vcmask 1014784   ;;  %vm9833_vm0 = vcmask 31744   ;;  %v9866_v56 = vld [vmem:[#allocation16_spill] sm:$0xff] }
 0x6ab   :  { %5580 = vmatprep.subr.msk.mxu0 %vm9826_vm9, %v3148_v47  ;;  %v3076_v1 = vsel %vm9831_vm13, %v3068_v53, %v3070_v59  ;;  %vm9832_vm3 = vmmov %vm9831_vm13  ;;  %vm9834_vm9 = vnez %v9741_v45  ;;  %vm9842_vm13 = vcmask 490496   ;;  %v8038_v59 = vld [vmem:[%s9295_s6] sm:$0xf]  ;;  %v3778_v40 = vadd.s32 8, %v8031_v0 }
 0x6ac   :  { %5581 = vmatpush1.msk.msra.mxu0 %vm9827_vm14, %v3147_v48  ;;  %v3075_v9 = vsel %vm9832_vm3, %v3066_v54, %v3068_v53  ;;  %vm9835_vm14 = vnez %v9743_v28  ;;  %v2994_v28 = vsel %vm9842_vm13, %v7889_v37, %v2990_v7  ;;  %vm9843_vm3 = vnez %v9754_v52  ;;  %3653 = vrot.lane.b32.xlu1 %v9861_v6, %s5842_s11 }
 0x6ad   :  { %v3104_v32 = vpop.permute.xlu1 %3103  ;;  %v2918_v55 = vpop.permute.xlu0 %2917  ;;  %v3419_v31 = vand.u32 7, %v8038_v59 }
 0x6ae   :  { %v3111_v15 = vsel %vm9828_vm8, %v3102_v51, %v3104_v32  ;;  %v3112_v4 = vsel %vm9829_vm11, %v3104_v32, %v3106_v17  ;;  %vm9836_vm8 = vnez %v9745_v38  ;;  %vm9839_vm11 = vmmov %vm9833_vm0  ;;  %v3415_v17 = vand.u32 7, %v8031_v0 }
 0x6af   :  { %5582 = vmatprep.subr.msk.mxu0 %vm9830_vm12, %v3112_v4  ;;  %vm9841_vm12 = vmmov %vm9833_vm0 }
 0x6b0   :  { %5583 = vmatpush1.msk.msra.mxu0 %vm7566_vm4, %v3111_v15  ;;  %vm9838_vm4 = vnez %v9837_v24  ;;  %v3027_v45 = vsel %vm9841_vm12, %v7885_v5, %v3020_v18  ;;  %vm9853_vm12 = vcmask 556032  }
 0x6b1   :  { %v3026_v58 = vpop.permute.xlu1 %3025  ;;  %5584 = vmatprep.subr.msk.mxu0 %vm7580_vm15, %v3076_v1  ;;  %v2914_v11 = vpop.permute.xlu0 %2913  ;;  %vm9840_vm15 = vmmov %vm9833_vm0  ;;  %v2922_v23 = vsel %vm9853_vm12, %v7893_v35, %v2918_v55 }
 0x6b2   :  { %v3030_v63 = vsel %vm9833_vm0, %v3024_v8, %v3026_v58  ;;  %5585 = vmatpush1.msk.msra.mxu0 %vm9834_vm9, %v3075_v9  ;;  %vm9844_vm0 = vnez %v9756_v43  ;;  %vm9845_vm9 = vmmov %vm9842_vm13  ;;  %vm9854_vm13 = vnez %v9775_v34 }
 0x6b3   :  { %5586 = vmatprep.subr.msk.mxu0 %vm9835_vm14, %v7832_v42  ;;  %5606 = vmatprep.subr.msk.mxu1 %vm9836_vm8, %v3030_v63  ;;  %v2993_v38 = vsel %vm9845_vm9, %v2986_v44, %v7889_v37  ;;  %vm9846_vm14 = vmmov %vm9845_vm9  ;;  %v8043_v37 = vadd.s32 8, %v8038_v59  ;;  %v9882_v63 = vld [vmem:[#allocation12_spill] sm:$0xff] }
 0x6b4   :  { %5587 = vmatpush1.msk.msra.mxu0 %vm9838_vm4, %v7802_v49  ;;  %v2992_v49 = vsel %vm9846_vm14, %v7895_v29, %v2986_v44  ;;  %vm9847_vm8 = vmmov %vm9845_vm9  ;;  %vm9848_vm4 = vcmask 523264  }
 0x6b5   :  { %v3022_v53 = vpop.permute.xlu1 %3021  ;;  %v2991_v52 = vsel %vm9847_vm8, %v7887_v60, %v7895_v29  ;;  %v2958_v43 = vsel %vm9848_vm4, %v7891_v22, %v2954_v2  ;;  %v2946_v27 = vpop.permute.xlu0 %2945  ;;  %vm9860_vm8 = vcmask 588800  }
 0x6b6   :  { %v3029_v20 = vsel %vm9839_vm11, %v3022_v53, %v3024_v8  ;;  %v3028_v62 = vsel %vm9840_vm15, %v3020_v18, %v3022_v53  ;;  %vm9849_vm11 = vnez %v9765_v21  ;;  %vm9852_vm15 = vnez %v9771_v10  ;;  %v5410_v21 = vld [vmem:[%s9290_s1 + $0x20] sm:$0xff] }
 0x6b7   :  { %5588 = vmatprep.subr.msk.mxu0 %vm9843_vm3, %v3028_v62  ;;  %5607 = vmatpush1.msk.msra.mxu1 %vm9844_vm0, %v3029_v20  ;;  %vm9856_vm3 = vnez %v9779_v33  ;;  %vm9857_vm0 = vnez %v9782_v41 }
 0x6b8   :  { %5589 = vmatpush1.msk.msra.mxu0 %vm7654_vm2, %v3027_v45  ;;  %5608 = vmatprep.subr.msk.mxu1 %vm7658_vm7, %v2994_v28  ;;  %vm9850_vm2 = vmmov %vm9848_vm4  ;;  %vm9851_vm7 = vnez %v9769_v57 }
 0x6b9   :  { %v2950_v42 = vpop.permute.xlu1 %2949  ;;  %5590 = vmatprep.subr.msk.mxu0 %vm7662_vm10, %v2992_v49  ;;  %5609 = vmatpush1.msk.msra.mxu1 %vm9849_vm11, %v2993_v38  ;;  %vm9855_vm10 = vmmov %vm9853_vm12  ;;  %v2910_v34 = vpop.permute.xlu0 %2909  ;;  %vm3780_vm12 = vcmp.le.s32.totalorder %v3778_v40, 8  ;;  %v9885_v49 = vld [vmem:[#allocation7_spill] sm:$0xff] }
 0x6ba   :  { %v2957_v46 = vsel %vm9850_vm2, %v2950_v42, %v7891_v22  ;;  %5591 = vmatpush1.msk.msra.mxu0 %vm9851_vm7, %v2991_v52  ;;  %5610 = vmatprep.subr.msk.mxu1 %vm9852_vm15, %v2958_v43  ;;  %v2921_v50 = vsel %vm9855_vm10, %v2914_v11, %v7893_v35  ;;  %vm9858_vm9 = vmmov %vm9850_vm2  ;;  %vm3779_vm15 = vcmp.ge.s32.totalorder %v3778_v40, 0  ;;  %v9875_v35 = vmov 0   ;;  %v5421_v40 = vld [vmem:[%s9293_s4 + $0x28] sm:$0xff] }
 0x6bb   :  { %5611 = vmatpush1.msk.msra.mxu1 %vm9854_vm13, %v2957_v46  ;;  %vm9859_vm14 = vmmov %vm9850_vm2  ;;  %vm9867_vm2 = vnez %v9866_v56  ;;  %vm3562_vm13 = vcmp.ge.s32.totalorder %v8043_v37, 0  ;;  %v8228_v22 = vadd.s32 4294967288, %v8038_v59  ;;  %v9953_v56 = vmov 0 }
 0x6bc   :  { %5612 = vmatprep.subr.msk.mxu1 %vm9856_vm3, %v2922_v23  ;;  %vm9863_vm4 = vmmov %vm9855_vm10  ;;  %vm8056_vm3 = vcmp.eq.s32.totalorder %v3419_v31, 0  ;;  %v5417_v31 = vld [vmem:[%s9291_s2 + $0x28] sm:$0xff] }
 0x6bd   :  { %v2948_v57 = vpop.permute.xlu1 %2947  ;;  %5613 = vmatpush1.msk.msra.mxu1 %vm9857_vm0, %v2921_v50  ;;  %vm9864_vm11 = vmmov %vm9863_vm4  ;;  %vm3564_vm0 = vcmp.le.s32.totalorder %v8043_v37, 8 }
 0x6be   :  { %v2956_v10 = vsel %vm9858_vm9, %v2948_v57, %v2950_v42  ;;  %v2955_v12 = vsel %vm9859_vm14, %v2946_v27, %v2948_v57  ;;  %5413 = vmatmul.mubr.msk.f32.vlgmr.msra.gmra.mxu1 %vm9860_vm8, %v5410_v21  ;;  %vm9868_vm7 = vmmov %vm9860_vm8  ;;  %v9891_v57 = vmov 0 }
 0x6bf   :  { %5592 = vmatprep.subr.msk.mxu0 %vm7748_vm1, %v2956_v10  ;;  %4113 = vmatprep.mubr.f32.mxu1 %v9861_v6  ;;  %vm3416_vm1 = vcmp.eq.s32.totalorder %v3415_v17, 0  ;;  %vm8052_vm10 = vmand %vm3779_vm15, %vm3780_vm12  ;;  %vm9886_vm15 = vcmp.ge.s32.totalorder %v9885_v49, 0  ;;  %v9893_v10 = vld [vmem:[#allocation11_spill] sm:$0xff]  ;;  %v5420_v17 = vld [vmem:[%s9292_s3 + $0x28] sm:$0xff] }
 0x6c0   :  { %5593 = vmatpush1.msk.msra.mxu0 %vm7756_vm5, %v2955_v12  ;;  %vm3876_vm9 = vmand %vm8052_vm10, %vm3562_vm13 }
 0x6c1   :  { %v2912_v33 = vpop.permute.xlu1 %2911  ;;  %vm3877_vm14 = vmand %vm3876_vm9, %vm3564_vm0 }
 0x6c2   :  { %v2920_v60 = vsel %vm9863_vm4, %v2912_v33, %v2914_v11  ;;  %v2919_v41 = vsel %vm9864_vm11, %v2910_v34, %v2912_v33  ;;  %v8070_v39 = vsel %vm3877_vm14, 1, %v9875_v35  ;;  %vm9415_vm4 = vcmp.le.s32.totalorder %v8038_v59, 8 }
 0x6c3   :  { %5594 = vmatprep.subr.msk.mxu0 %vm7770_vm6, %v2920_v60  ;;  %vm3417_vm6 = vcmp.le.s32.totalorder %v8031_v0, 8  ;;  %v3894_v16 = vrot.slane %v8070_v39, %v9876_v13  ;;  %vm9410_vm11 = vcmask 982016   ;;  %v9894_v33 = vmov 0 }
 0x6c4   :  { %5595 = vmatpush1.msk.msra.mxu0 %vm9867_vm2, %v2919_v41  ;;  %vm8047_vm5 = vmand %vm3416_vm1, %vm3417_vm6  ;;  %v3459_v41 = vadd.s32 4294967288, %v8031_v0 }
 0x6c5   :  { %5412 = vmatmul.mubr.msk.f32.vlgmr.msra.gmra.mxu0 %vm9868_vm7, %v5410_v21  ;;  %vm3421_vm8 = vmand %vm8047_vm5, %vm8056_vm3  ;;  %vm8081_vm2 = vcmp.eq.s32.totalorder %v3894_v16, 1 }
 0x6c6   :  { %4042 = vmatprep.mubr.f32.mxu0 %v9861_v6  ;;  %v3398_v8 = vpop.permute.xlu0 %3397  ;;  %vm3423_vm7 = vmand %vm3421_vm8, %vm9415_vm4  ;;  %vm3461_vm8 = vcmp.ge.s32.totalorder %v3459_v41, 0 }
 0x6c7   :  { %v3424_v30 = vsel %vm3423_vm7, 1, %v9875_v35  ;;  %vm8119_vm12 = vmand %vm9886_vm15, %vm3417_vm6  ;;  %vm3462_vm7 = vcmp.le.s32.totalorder %v3459_v41, 8 }
 0x6c8   :  { %v3436_v19 = vrot.slane %v3424_v30, %v9879_v3  ;;  %v3428_v24 = vrot.slane %v3424_v30, %v9882_v63  ;;  %vm3719_vm3 = vmand %vm8119_vm12, %vm3562_vm13  ;;  %v3440_v23 = vrot.slane %v3424_v30, %v9876_v13  ;;  %v3432_v12 = vrot.slane %v3424_v30, %v9893_v10 }
 0x6c9   :  { %vm8133_vm9 = vmand %vm3719_vm3, %vm3564_vm0 }
 0x6ca   :  { %vm8094_vm1 = vcmp.eq.s32.totalorder %v3436_v19, 1  ;;  %vm8107_vm5 = vcmp.eq.s32.totalorder %v3428_v24, 1  ;;  %vm8142_vm6 = vcmp.eq.s32.totalorder %v3440_v23, 1  ;;  %vm8155_vm14 = vcmp.eq.s32.totalorder %v3432_v12, 1  ;;  %vm8172_vm15 = vmand %vm3461_vm8, %vm3462_vm7 }
 0x6cb   :  { %v9892_v57 = vsel %vm8142_vm6, 4294967295, %v9891_v57  ;;  %v9895_v33 = vsel %vm8155_vm14, 4294967295, %v9894_v33  ;;  %vm3563_vm3 = vmand %vm8172_vm15, %vm3562_vm13  ;;  %vm9416_vm13 = vcmp.ge.s32.totalorder %v8228_v22, 0  ;;  %vm9413_vm7 = vcmp.le.s32.totalorder %v8228_v22, 8 }
 0x6cc   :  { %v9913_v23 = vmov 0 }
 0x6ce   :  { %v3242_v36 = vpop.permute.xlu1 %3241 }
 0x6d2   :  { %v3409_v47 = vpop.permute.xlu1 %3408 }
 0x6d6   :  { %v3819_v37 = vpop.permute.xlu1 %3818 }
 0x71b   :  { %v8067_v18 = vpop.permute.xlu0 %5743 }
 0x71c   :  { %v5746_v29 = vunpack.i.h.bf16 %v8067_v18  ;;  %v5745_v25 = vunpack.i.l.bf16 %v8067_v18 }
 0x71e   :  { %v3917_v14 = vsel %vm9410_vm11, %v5745_v25, %v5746_v29  ;;  %vm8186_vm11 = vmand %vm3563_vm3, %vm3564_vm0 }
 0x71f   :  { %5631 = vmatprep.subr.msk.mxu1 %vm8081_vm2, %v3917_v14  ;;  %vm3782_vm3 = vmand %vm8052_vm10, %vm9416_vm13 }
 0x77e   :  { %v3384_v44 = vpop.f32.mrf.mxu1 }
 0x77f   :  { %v3385_v61 = vadd.f32 %v3384_v44, %v3242_v36 }
 0x780   :  { %v3386_v15 = vpop.f32.mrf.mxu1 }
 0x781   :  { %v3391_v2 = vmax.f32 %v3385_v61, 0.0  ;;  %v3387_v58 = vadd.f32 %v3386_v15, %v3242_v36 }
 0x783   :  { %v3402_v48 = vmul.f32 %v3398_v8, %v3391_v2  ;;  %v3392_v62 = vmax.f32 %v3387_v58, 0.0  ;;  %v3886_v2 = vrot.slane %v8070_v39, %v9893_v10 }
 0x785   :  { %v3413_v4 = vadd.f32 %v3409_v47, %v3402_v48  ;;  %v3313_v55 = vpop.f32.mrf.mxu0  ;;  %v3403_v42 = vmul.f32 %v3398_v8, %v3392_v62  ;;  %v3890_v48 = vrot.slane %v8070_v39, %v9879_v3 }
 0x786   :  { %v3314_v1 = vadd.f32 %v3313_v55, %v3242_v36 }
 0x787   :  { %v8100_v9 = vsel %vm8094_vm1, %v3413_v4, 0.0  ;;  %v3315_v53 = vpop.f32.mrf.mxu0  ;;  %v3414_v21 = vadd.f32 %v3409_v47, %v3403_v42 }
 0x788   :  { %v3389_v11 = vmax.f32 %v3314_v1, 0.0  ;;  %3906 = vrot.lane.b32.xlu1 %v8100_v9, %s5843_s12  ;;  %3814 = vrot.lane.b32.xlu0 %v8100_v9, %s5842_s11  ;;  %v3316_v28 = vadd.f32 %v3315_v53, %v3242_v36  ;;  %v9900_v36 = vld [vmem:[#allocation8_spill] sm:$0xff]  ;;  %v9905_v1 = vmov 0 }
 0x789   :  { %v8153_v34 = vsel %vm8142_vm6, %v3414_v21, 0.0  ;;  %vm9901_vm0 = vcmp.ge.s32.totalorder %v9900_v36, 0  ;;  %vm3783_vm6 = vmand %vm3782_vm3, %vm9413_vm7  ;;  %vm9907_vm3 = vcmask 982016  }
 0x78a   :  { %v3400_v20 = vmul.f32 %v3398_v8, %v3389_v11  ;;  %v3390_v27 = vmax.f32 %v3316_v28, 0.0  ;;  %vm3840_vm8 = vmand %vm8052_vm10, %vm9901_vm0  ;;  %v8266_v15 = vsel %vm3783_vm6, 1, %v9875_v35 }
 0x78b   :  { %vm9902_vm10 = vmmov %vm9901_vm0  ;;  %v3800_v58 = vrot.slane %v8266_v15, %v9876_v13  ;;  %v3796_v53 = vrot.slane %v8266_v15, %v9879_v3 }
 0x78c   :  { %v3411_v38 = vadd.f32 %v3409_v47, %v3400_v20  ;;  %3751 = vrot.lane.b32.xlu1 %v8100_v9, %s5843_s12  ;;  %3598 = vrot.lane.b32.xlu0 %v8100_v9, %s5843_s12  ;;  %v3401_v50 = vmul.f32 %v3398_v8, %v3390_v27  ;;  %v3756_v8 = vpop.permute.xlu1 %3755  ;;  %vm3683_vm0 = vmand %vm8119_vm12, %vm9902_vm10  ;;  %v8292_v20 = vsel %vm8133_vm9, 1, %v9875_v35  ;;  %v9911_v27 = vmov 0 }
 0x78d   :  { %vm3684_vm6 = vmand %vm3683_vm0, %vm9415_vm4  ;;  %vm8311_vm9 = vcmp.eq.s32.totalorder %v3800_v58, 1  ;;  %v3737_v18 = vrot.slane %v8292_v20, %v9876_v13  ;;  %vm9414_vm0 = vcmask 64512   ;;  %v3733_v21 = vrot.slane %v8292_v20, %v9879_v3 }
 0x78e   :  { %v8125_v43 = vsel %vm8107_vm5, %v3411_v38, 0.0  ;;  %v3412_v5 = vadd.f32 %v3409_v47, %v3401_v50  ;;  %vm9908_vm10 = vmmov %vm9907_vm3  ;;  %v9909_v38 = vmov 0  ;;  %v8308_v42 = vsel %vm3684_vm6, 1, %v9875_v35 }
 0x78f   :  { %v9912_v27 = vsel %vm8311_vm9, 4294967295, %v9911_v27  ;;  %vm3625_vm6 = vmand %vm8119_vm12, %vm9416_vm13  ;;  %v3697_v41 = vrot.slane %v8308_v42, %v9879_v3  ;;  %vm8351_vm12 = vcmp.eq.s32.totalorder %v3733_v21, 1  ;;  %vm9920_vm13 = vcmask 982016  }
 0x790   :  { %3659 = vrot.lane.b32.xlu1 %v8100_v9, %s5842_s11  ;;  %3747 = vrot.lane.b32.xlu0 %v8125_v43, %s5843_s12  ;;  %v8165_v60 = vsel %vm8155_vm14, %v3412_v5, 0.0  ;;  %v8225_v54 = vpop.permute.xlu1 %3653  ;;  %vm3841_vm14 = vmand %vm3840_vm8, %vm9415_vm4  ;;  %vm8277_vm8 = vcmp.eq.s32.totalorder %v3890_v48, 1  ;;  %v3701_v5 = vrot.slane %v8308_v42, %v9876_v13  ;;  %v9922_v58 = vmov 0 }
 0x791   :  { %v3842_v19 = vsel %vm3841_vm14, 1, %v9875_v35  ;;  %vm8273_vm14 = vcmp.eq.s32.totalorder %v3886_v2, 1  ;;  %v9906_v1 = vsel %vm8277_vm8, 4294967295, %v9905_v1 }
 0x792   :  { %v3854_v4 = vrot.slane %v3842_v19, %v9879_v3  ;;  %v3850_v2 = vrot.slane %v3842_v19, %v9893_v10 }
 0x794   :  { %3655 = vrot.lane.b32.xlu0 %v8125_v43, %s5842_s11  ;;  %3810 = vrot.lane.b32.xlu1 %v8125_v43, %s5842_s11  ;;  %vm8299_vm7 = vcmp.eq.s32.totalorder %v3854_v4, 1 }
 0x795   :  { %v9910_v38 = vsel %vm8299_vm7, 4294967295, %v9909_v38 }
 0x798   :  { %3502 = vrot.lane.b32.xlu0 %v8100_v9, %s5842_s11  ;;  %3908 = vrot.lane.b32.xlu1 %v8153_v34, %s5843_s12 }
 0x79c   :  { %3816 = vrot.lane.b32.xlu0 %v8153_v34, %s5842_s11  ;;  %3749 = vrot.lane.b32.xlu1 %v8165_v60, %s5843_s12 }
 0x7a0   :  { %3753 = vrot.lane.b32.xlu0 %v8153_v34, %s5843_s12  ;;  %3600 = vrot.lane.b32.xlu1 %v8153_v34, %s5843_s12 }
 0x7a4   :  { %3904 = vrot.lane.b32.xlu0 %v8165_v60, %s5843_s12  ;;  %3596 = vrot.lane.b32.xlu1 %v8165_v60, %s5843_s12 }
 0x7a8   :  { %3812 = vrot.lane.b32.xlu0 %v8165_v60, %s5842_s11  ;;  %3500 = vrot.lane.b32.xlu1 %v8165_v60, %s5842_s11 }
 0x7ac   :  { %3661 = vrot.lane.b32.xlu0 %v8153_v34, %s5842_s11  ;;  %3594 = vrot.lane.b32.xlu1 %v8125_v43, %s5843_s12 }
 0x7b0   :  { %3657 = vrot.lane.b32.xlu0 %v8165_v60, %s5842_s11  ;;  %5748 = vrot.lane.b32.xlu1 %v9861_v6, %s5842_s11 }
 0x7b4   :  { %3498 = vrot.lane.b32.xlu0 %v8125_v43, %s5842_s11  ;;  %4128 = vperm.xlu1 %5741, %v5420_v17   ;;  %v9915_v17 = vmov 0 }
 0x7b8   :  { %3592 = vrot.lane.b32.xlu0 %v9861_v6, %s5843_s12  ;;  %5753 = vrot.lane.b32.xlu1 %v9861_v6, %s5843_s12 }
 0x7bc   :  { %3972 = vperm.xlu0 %5740, %v5417_v31   ;;  %v3882_v31 = vrot.slane %v8070_v39, %v9882_v63  ;;  %v3846_v39 = vrot.slane %v3842_v19, %v9882_v63 }
 0x7c0   :  { %4139 = vperm.xlu0 %5740, %v5421_v40  }
 0x7c4   :  { %4344 = vrot.lane.b32.xlu0 %v9861_v6, %s5842_s11 }
 0x7c8   :  { %4308 = vrot.lane.b32.xlu0 %v9861_v6, %s5843_s12 }
 0x7cc   :  { %4252 = vrot.lane.b32.xlu0 %v9861_v6, %s5842_s11 }
 0x7fa   :  { %v8230_v29 = vpop.permute.xlu1 %3906  ;;  %v8232_v16 = vpop.permute.xlu0 %3814 }
 0x7fe   :  { %v8235_v14 = vpop.permute.xlu1 %3751  ;;  %v8237_v30 = vpop.permute.xlu0 %3598 }
 0x802   :  { %v8250_v44 = vpop.permute.xlu1 %3659  ;;  %v8252_v61 = vpop.permute.xlu0 %3747 }
 0x806   :  { %v8261_v51 = vpop.permute.xlu1 %3810  ;;  %v8263_v47 = vpop.permute.xlu0 %3655 }
 0x80a   :  { %v3909_v24 = vpop.permute.xlu1 %3908  ;;  %v8285_v11 = vpop.permute.xlu0 %3502 }
 0x80b   :  { %v3915_v62 = vsel %vm9907_vm3, %v8230_v29, %v3909_v24  ;;  %v3916_v28 = vsel %vm9908_vm10, %v3909_v24, %v5745_v25  ;;  %vm8322_vm3 = vcmp.eq.s32.totalorder %v3796_v53, 1  ;;  %vm8343_vm10 = vcmp.eq.s32.totalorder %v3737_v18, 1 }
 0x80c   :  { %5614 = vmatprep.subr.msk.mxu0 %vm8273_vm14, %v3915_v62  ;;  %5632 = vmatpush1.msk.msra.mxu1 %vm8277_vm8, %v3916_v28  ;;  %v9914_v23 = vsel %vm8322_vm3, 4294967295, %v9913_v23  ;;  %v9916_v17 = vsel %vm8343_vm10, 4294967295, %v9915_v17  ;;  %v9924_v24 = vmov 0  ;;  %v9926_v53 = vmov 0 }
 0x80d   :  { %4065 = vmatprep.subr.mxu1 %v9861_v6  ;;  %v9928_v18 = vmov 0 }
 0x80e   :  { %v8317_v25 = vpop.permute.xlu1 %3749  ;;  %v3817_v46 = vpop.permute.xlu0 %3816  ;;  %5633 = vmatpush1.msk.msra.mxu1 %vm8299_vm7, %v8153_v34  ;;  %vm8368_vm7 = vcmp.eq.s32.totalorder %v3697_v41, 1  ;;  %v3689_v41 = vrot.slane %v8308_v42, %v9882_v63 }
 0x80f   :  { %v3822_v50 = vsel %vm9414_vm0, %v8232_v16, %v3817_v46  ;;  %v3823_v12 = vsel %vm9414_vm0, %v3817_v46, %v3819_v37  ;;  %v9917_v37 = vmov 0  ;;  %vm9919_vm0 = vcmp.le.s32.totalorder %v8228_v22, 8 }
 0x810   :  { %5634 = vmatprep.subr.msk.mxu1 %vm8311_vm9, %v3823_v12  ;;  %v9918_v37 = vsel %vm8351_vm12, 4294967295, %v9917_v37  ;;  %vm3626_vm4 = vmand %vm3625_vm6, %vm9919_vm0  ;;  %vm8361_vm9 = vcmp.eq.s32.totalorder %v3701_v5, 1  ;;  %v9925_v24 = vsel %vm8368_vm7, 4294967295, %v9924_v24  ;;  %vm8374_vm0 = vcmp.eq.s32.totalorder %v3882_v31, 1 }
 0x811   :  { %5635 = vmatpush1.msk.msra.mxu1 %vm8322_vm3, %v3822_v50  ;;  %vm9921_vm3 = vmmov %vm9920_vm13  ;;  %v9923_v58 = vsel %vm8361_vm9, 4294967295, %v9922_v58  ;;  %v9927_v53 = vsel %vm8374_vm0, 4294967295, %v9926_v53  ;;  %v3627_v62 = vsel %vm3626_vm4, 1, %v9875_v35  ;;  %v3788_v46 = vrot.slane %v8266_v15, %v9882_v63 }
 0x812   :  { %v8349_v40 = vpop.permute.xlu1 %3600  ;;  %v3754_v52 = vpop.permute.xlu0 %3753  ;;  %vm8397_vm4 = vcmp.eq.s32.totalorder %v3846_v39, 1  ;;  %v9930_v50 = vmov 0  ;;  %v3729_v12 = vrot.slane %v8292_v20, %v9893_v10  ;;  %vm9932_vm6 = vcmp.ge.s32.totalorder %v9900_v36, 0 }
 0x813   :  { %v3759_v48 = vsel %vm9920_vm13, %v8235_v14, %v3754_v52  ;;  %v3760_v4 = vsel %vm9921_vm3, %v3754_v52, %v3756_v8  ;;  %v3792_v8 = vrot.slane %v8266_v15, %v9893_v10  ;;  %vm8386_vm13 = vcmp.eq.s32.totalorder %v3850_v2, 1 }
 0x814   :  { %5636 = vmatprep.subr.msk.mxu1 %vm8343_vm10, %v3760_v4  ;;  %v9929_v18 = vsel %vm8386_vm13, 4294967295, %v9928_v18  ;;  %v9931_v50 = vsel %vm8397_vm4, 4294967295, %v9930_v50  ;;  %v3693_v15 = vrot.slane %v8308_v42, %v9893_v10  ;;  %v3643_v5 = vrot.slane %v3627_v62, %v9876_v13 }
 0x815   :  { %5637 = vmatpush1.msk.msra.mxu1 %vm8351_vm12, %v3759_v48  ;;  %v9933_v31 = vmov 0  ;;  %vm8448_vm10 = vcmp.eq.s32.totalorder %v3729_v12, 1  ;;  %v9945_v4 = vmov 0  ;;  %v8455_v39 = vsel %vm8186_vm11, 1, %v9875_v35 }
 0x816   :  { %v8381_v19 = vpop.permute.xlu1 %3596  ;;  %v3905_v28 = vpop.permute.xlu0 %3904  ;;  %5638 = vmatprep.subr.msk.mxu1 %vm8361_vm9, %v8153_v34  ;;  %vm3525_vm9 = vmand %vm8172_vm15, %vm9932_vm6  ;;  %vm9935_vm6 = vcmp.ge.s32.totalorder %v8228_v22, 0  ;;  %v9946_v4 = vsel %vm8448_vm10, 4294967295, %v9945_v4  ;;  %vm9955_vm11 = vcmp.le.s32.totalorder %v8228_v22, 8  ;;  %v3639_v12 = vrot.slane %v3627_v62, %v9879_v3 }
 0x817   :  { %v3914_v21 = vsel %vm9921_vm3, %v3905_v28, %v8230_v29  ;;  %5639 = vmatpush1.msk.msra.mxu1 %vm8368_vm7, %v8100_v9  ;;  %v3725_v29 = vrot.slane %v8292_v20, %v9882_v63  ;;  %vm8419_vm3 = vcmp.eq.s32.totalorder %v3792_v8, 1  ;;  %vm8434_vm7 = vcmp.eq.s32.totalorder %v3788_v46, 1 }
 0x818   :  { %5615 = vmatpush1.msk.msra.mxu0 %vm8374_vm0, %v3914_v21  ;;  %v9934_v31 = vsel %vm8419_vm3, 4294967295, %v9933_v31  ;;  %vm8427_vm0 = vmand %vm8172_vm15, %vm9935_vm6  ;;  %vm9943_vm15 = vcmask 64512   ;;  %v9947_v28 = vmov 0  ;;  %v3635_v21 = vrot.slane %v3627_v62, %v9893_v10 }
 0x819   :  { %5616 = vmatprep.subr.msk.mxu0 %vm8386_vm13, %v8100_v9  ;;  %vm9940_vm13 = vcmp.le.s32.totalorder %v8038_v59, 8  ;;  %vm9944_vm6 = vmmov %vm9943_vm15 }
 0x81a   :  { %5617 = vmatpush1.msk.msra.mxu0 %vm8397_vm4, %v8165_v60  ;;  %v3813_v42 = vpop.permute.xlu0 %3812  ;;  %vm8440_vm12 = vmand %vm3525_vm9, %vm9940_vm13  ;;  %v8457_v8 = vpop.permute.xlu1 %3500  ;;  %vm8461_vm9 = vcmp.eq.s32.totalorder %v3725_v29, 1  ;;  %vm8465_vm13 = vcmp.eq.s32.totalorder %v3693_v15, 1  ;;  %vm9956_vm4 = vcmask 982016  }
 0x81b   :  { %v3820_v26 = vsel %vm9943_vm15, %v8261_v51, %v3813_v42  ;;  %v3821_v48 = vsel %vm9944_vm6, %v3813_v42, %v8232_v16  ;;  %v9948_v28 = vsel %vm8461_vm9, 4294967295, %v9947_v28  ;;  %v9949_v16 = vmov 0  ;;  %vm9957_vm8 = vmmov %vm9956_vm4  ;;  %v5422_v42 = vld [vmem:[%s9290_s1 + $0x30] sm:$0xff] }
 0x81c   :  { %5618 = vmatprep.subr.msk.mxu0 %vm8419_vm3, %v3821_v48  ;;  %v9950_v16 = vsel %vm8465_vm13, 4294967295, %v9949_v16  ;;  %vm8469_vm15 = vcmp.eq.s32.totalorder %v3643_v5, 1  ;;  %vm8473_vm6 = vcmp.eq.s32.totalorder %v3689_v41, 1  ;;  %vm3467_vm3 = vmand %vm8427_vm0, %vm9955_vm11  ;;  %v3758_v46 = vsel %vm9956_vm4, %v8317_v25, %v8235_v14 }
 0x81d   :  { %v9954_v56 = vsel %vm8473_vm6, 4294967295, %v9953_v56  ;;  %5619 = vmatpush1.msk.msra.mxu0 %vm8434_vm7, %v3820_v26  ;;  %v3527_v29 = vsel %vm8440_vm12, 1, %v9875_v35  ;;  %v3757_v22 = vsel %vm9957_vm8, %v8252_v61, %v8317_v25  ;;  %v3631_v14 = vrot.slane %v3627_v62, %v9882_v63 }
 0x81e   :  { %5620 = vmatprep.subr.msk.mxu0 %vm8448_vm10, %v3758_v46  ;;  %v3662_v15 = vpop.permute.xlu0 %3661  ;;  %v3582_v5 = vrot.slane %v8455_v39, %v9876_v13  ;;  %v3574_v41 = vrot.slane %v8455_v39, %v9893_v10  ;;  %vm9958_vm0 = vcmask 64512   ;;  %v3578_v61 = vrot.slane %v8455_v39, %v9879_v3  ;;  %v3595_v48 = vpop.permute.xlu1 %3594 }
 0x81f   :  { %v3666_v20 = vsel %vm9958_vm0, %v8250_v44, %v3662_v15  ;;  %5621 = vmatpush1.msk.msra.mxu0 %vm8461_vm9, %v3757_v22  ;;  %v3468_v25 = vsel %vm3467_vm3, 1, %v9875_v35  ;;  %v3543_v62 = vrot.slane %v3527_v29, %v9876_v13  ;;  %vm8517_vm8 = vcmp.eq.s32.totalorder %v3635_v21, 1  ;;  %vm9972_vm9 = vmmov %vm9958_vm0 }
 0x820   :  { %5622 = vmatprep.subr.msk.mxu0 %vm8465_vm13, %v8165_v60  ;;  %5640 = vmatprep.subr.msk.mxu1 %vm8469_vm15, %v3666_v20  ;;  %vm8521_vm12 = vcmp.eq.s32.totalorder %v3639_v12, 1  ;;  %v3539_v26 = vrot.slane %v3527_v29, %v9879_v3  ;;  %vm8526_vm4 = vcmp.eq.s32.totalorder %v3631_v14, 1  ;;  %v9963_v22 = vmov 0 }
 0x821   :  { %5623 = vmatpush1.msk.msra.mxu0 %vm8473_vm6, %v8125_v43  ;;  %v9964_v22 = vsel %vm8526_vm4, 4294967295, %v9963_v22  ;;  %vm8530_vm3 = vcmp.eq.s32.totalorder %v3582_v5, 1  ;;  %vm8534_vm11 = vcmp.eq.s32.totalorder %v3574_v41, 1  ;;  %v9967_v21 = vmov 0  ;;  %vm9969_vm6 = vmmov %vm9958_vm0 }
 0x822   :  { %v3658_v46 = vpop.permute.xlu0 %3657  ;;  %v9968_v21 = vsel %vm8534_vm11, 4294967295, %v9967_v21  ;;  %v3484_v12 = vrot.slane %v3468_v25, %v9876_v13  ;;  %vm8543_vm13 = vcmp.eq.s32.totalorder %v3578_v61, 1  ;;  %v3480_v5 = vrot.slane %v3468_v25, %v9879_v3 }
 0x823   :  { %v3664_v20 = vsel %vm9958_vm0, %v8263_v47, %v3658_v46  ;;  %v3665_v36 = vsel %vm9969_vm6, %v3658_v46, %v8250_v44  ;;  %v3663_v41 = vsel %vm9972_vm9, %v8225_v54, %v8263_v47  ;;  %vm9973_vm10 = vcmask 982016  }
 0x824   :  { %v3606_v49 = vsel %vm9973_vm10, %v8237_v30, %v8349_v40  ;;  %5624 = vmatprep.subr.msk.mxu0 %vm8517_vm8, %v3664_v20  ;;  %5641 = vmatpush1.msk.msra.mxu1 %vm8521_vm12, %v3665_v36  ;;  %vm8558_vm6 = vcmp.eq.s32.totalorder %v3543_v62, 1  ;;  %v9974_v44 = vmov 0  ;;  %vm9976_vm0 = vmmov %vm9973_vm10  ;;  %vm8571_vm10 = vcmp.eq.s32.totalorder %v3539_v26, 1 }
 0x825   :  { %v9975_v44 = vsel %vm8558_vm6, 4294967295, %v9974_v44  ;;  %v3605_v61 = vsel %vm9976_vm0, %v8381_v19, %v8237_v30  ;;  %vm9977_vm9 = vmmov %vm9976_vm0  ;;  %5625 = vmatpush1.msk.msra.mxu0 %vm8526_vm4, %v3663_v41  ;;  %5642 = vmatprep.subr.msk.mxu1 %vm8530_vm3, %v3606_v49  ;;  %v9978_v47 = vmov 0  ;;  %v3570_v36 = vrot.slane %v8455_v39, %v9882_v63 }
 0x826   :  { %v3604_v54 = vsel %vm9977_vm9, %v3595_v48, %v8381_v19  ;;  %v9979_v47 = vsel %vm8571_vm10, 4294967295, %v9978_v47  ;;  %v3499_v30 = vpop.permute.xlu0 %3498  ;;  %5643 = vmatpush1.msk.msra.mxu1 %vm8543_vm13, %v3605_v61  ;;  %vm8581_vm0 = vcmp.eq.s32.totalorder %v3484_v12, 1  ;;  %v9980_v40 = vmov 0  ;;  %v5749_v19 = vpop.permute.xlu1 %5748 }
 0x827   :  { %5626 = vmatprep.subr.msk.mxu0 %vm8534_vm11, %v3604_v54  ;;  %v9981_v40 = vsel %vm8581_vm0, 4294967295, %v9980_v40  ;;  %v3535_v49 = vrot.slane %v3527_v29, %v9893_v10  ;;  %5644 = vmatprep.subr.msk.mxu1 %vm8558_vm6, %v8100_v9  ;;  %vm8589_vm9 = vcmp.eq.s32.totalorder %v3480_v5, 1  ;;  %v9982_v39 = vmov 0  ;;  %v5416_v29 = vld [vmem:[%s9290_s1 + $0x28] sm:$0xff] }
 0x828   :  { %v9983_v39 = vsel %vm8589_vm9, 4294967295, %v9982_v39  ;;  %vm9984_vm11 = vcmask 64512   ;;  %5645 = vmatpush1.msk.msra.mxu1 %vm8571_vm10, %v8165_v60  ;;  %v3476_v26 = vrot.slane %v3468_v25, %v9893_v10  ;;  %v5751_v46 = vunpack.i.h.bf16 %v5749_v19 }
 0x829   :  { %v3508_v62 = vsel %vm9984_vm11, %v8457_v8, %v8285_v11  ;;  %vm9985_vm6 = vmmov %vm9984_vm11  ;;  %vm8607_vm4 = vcmp.eq.s32.totalorder %v3570_v36, 1  ;;  %v9986_v20 = vmov 0  ;;  %v3472_v11 = vrot.slane %v3468_v25, %v9882_v63 }
 0x82a   :  { %v3507_v12 = vsel %vm9985_vm6, %v3499_v30, %v8457_v8  ;;  %5646 = vmatprep.subr.msk.mxu1 %vm8581_vm0, %v3508_v62  ;;  %v9987_v20 = vsel %vm8607_vm4, 4294967295, %v9986_v20  ;;  %v5750_v5 = vunpack.i.l.bf16 %v5749_v19  ;;  %v3593_v41 = vpop.permute.xlu0 %3592  ;;  %vm8614_vm11 = vcmp.eq.s32.totalorder %v3535_v49, 1 }
 0x82b   :  { %5647 = vmatpush1.msk.msra.mxu1 %vm8589_vm9, %v3507_v12  ;;  %vm9990_vm10 = vcmask 982016   ;;  %vm9991_vm6 = vcmask 588800   ;;  %vm8622_vm0 = vcmp.eq.s32.totalorder %v3476_v26, 1  ;;  %vm8630_vm9 = vcmp.eq.s32.totalorder %v3472_v11, 1 }
 0x82c   :  { %v3603_v8 = vsel %vm9990_vm10, %v3593_v41, %v3595_v48  ;;  %5419 = vmatmul.mubr.msk.f32.vlgmr.msra.gmra.mxu1 %vm9991_vm6, %v5416_v29  ;;  %v9994_v25 = vmov 0  ;;  %vm9996_vm10 = vcmask 64512  }
 0x82d   :  { %5627 = vmatpush1.msk.msra.mxu0 %vm8607_vm4, %v3603_v8  ;;  %4593 = vmatprep.mubr.f32.mxu1 %v9861_v6  ;;  %v9995_v25 = vsel %vm8630_vm9, 4294967295, %v9994_v25  ;;  %v3505_v48 = vsel %vm9996_vm10, %v5751_v46, %v5750_v5  ;;  %vm9997_vm6 = vmmov %vm9996_vm10  ;;  %vm9998_vm4 = vcmask 588800   ;;  %vm9999_vm10 = vcmask 982016  }
 0x82e   :  { %5628 = vmatprep.subr.msk.mxu0 %vm8614_vm11, %v8125_v43  ;;  %v3506_v36 = vsel %vm9997_vm6, %v5750_v5, %v3499_v30  ;;  %vm10005_vm6 = vnez %v9906_v1 }
 0x82f   :  { %4007 = vmatpush1.msra.mxu0 %v9861_v6  ;;  %v4129_v49 = vpop.permute.xlu1 %4128 }
 0x830   :  { %5629 = vmatprep.subr.msk.mxu0 %vm8622_vm0, %v3506_v36 }
 0x831   :  { %5630 = vmatpush1.msk.msra.mxu0 %vm8630_vm9, %v3505_v48  ;;  %vm10014_vm9 = vnez %v9918_v37 }
 0x832   :  { %5418 = vmatmul.mubr.msk.f32.vlgmr.msra.gmra.mxu0 %vm9998_vm4, %v5416_v29 }
 0x833   :  { %4522 = vmatprep.mubr.f32.mxu0 %v9861_v6  ;;  %v8645_v19 = vpop.permute.xlu1 %5753 }
 0x834   :  { %v5756_v30 = vunpack.i.h.bf16 %v8645_v19  ;;  %v9445_v62 = vunpack.i.l.bf16 %v8645_v19 }
 0x836   :  { %v4397_v26 = vsel %vm9999_vm10, %v9445_v62, %v5756_v30 }
 0x837   :  { %5665 = vmatprep.subr.msk.mxu1 %vm8081_vm2, %v4397_v26  ;;  %v3973_v29 = vpop.permute.xlu0 %3972  ;;  %vm10000_vm2 = vnez %v9892_v57 }
 0x83b   :  { %v4140_v8 = vpop.permute.xlu0 %4139 }
 0x8ec   :  { %v4115_v46 = vpop.f32.mrf.mxu1 }
 0x8ed   :  { %v4116_v12 = vadd.f32 %v4115_v46, %v3973_v29 }
 0x8ee   :  { %v4117_v5 = vpop.f32.mrf.mxu1 }
 0x8ef   :  { %v4122_v11 = vmax.f32 %v4116_v12, 0.0  ;;  %v4118_v10 = vadd.f32 %v4117_v5, %v3973_v29 }
 0x8f1   :  { %v4133_v41 = vmul.f32 %v4129_v49, %v4122_v11  ;;  %v4123_v7 = vmax.f32 %v4118_v10, 0.0 }
 0x8f2   :  { %v4044_v48 = vpop.f32.mrf.mxu0 }
 0x8f3   :  { %v4144_v36 = vadd.f32 %v4140_v8, %v4133_v41  ;;  %v4045_v63 = vadd.f32 %v4044_v48, %v3973_v29  ;;  %v4134_v46 = vmul.f32 %v4129_v49, %v4123_v7 }
 0x8f4   :  { %v4046_v62 = vpop.f32.mrf.mxu0 }
 0x8f5   :  { %v4148_v3 = vsel %vm8094_vm1, %v4144_v36, 0.0  ;;  %v4120_v13 = vmax.f32 %v4045_v63, 0.0  ;;  %v4047_v11 = vadd.f32 %v4046_v62, %v3973_v29  ;;  %vm10001_vm1 = vnez %v9895_v33  ;;  %v5423_v33 = vld [vmem:[%s9291_s2 + $0x30] sm:$0xff] }
 0x8f6   :  { %v8657_v30 = vadd.f32 %v4148_v3, %v8100_v9  ;;  %v4145_v3 = vadd.f32 %v4140_v8, %v4134_v46 }
 0x8f7   :  { %v4131_v26 = vmul.f32 %v4129_v49, %v4120_v13  ;;  %v4121_v32 = vmax.f32 %v4047_v11, 0.0 }
 0x8f8   :  { %4386 = vrot.lane.b32.xlu0 %v8657_v30, %s5843_s12  ;;  %4340 = vrot.lane.b32.xlu1 %v8657_v30, %s5842_s11  ;;  %v4149_v63 = vsel %vm10000_vm2, %v4145_v3, 0.0  ;;  %vm10007_vm2 = vcmask 64512  }
 0x8f9   :  { %v4142_v12 = vadd.f32 %v4140_v8, %v4131_v26  ;;  %v4132_v10 = vmul.f32 %v4129_v49, %v4121_v32  ;;  %v4153_v45 = vadd.f32 %v4149_v63, %v8153_v34  ;;  %v5426_v34 = vld [vmem:[%s9292_s3 + $0x30] sm:$0xff]  ;;  %v4345_v49 = vpop.permute.xlu0 %4344  ;;  %v10003_v32 = vunpack.i.l.bf16 %v8645_v19 }
 0x8fb   :  { %v4146_v13 = vsel %vm8107_vm5, %v4142_v12, 0.0  ;;  %v4143_v62 = vadd.f32 %v4140_v8, %v4132_v10  ;;  %vm10002_vm5 = vmmov %vm9999_vm10  ;;  %vm10006_vm10 = vnez %v9910_v38 }
 0x8fc   :  { %4304 = vrot.lane.b32.xlu0 %v8657_v30, %s5843_s12  ;;  %4222 = vrot.lane.b32.xlu1 %v8657_v30, %s5843_s12  ;;  %v8674_v9 = vadd.f32 %v4146_v13, %v8125_v43  ;;  %vm10004_vm4 = vmmov %vm10002_vm5 }
 0x8fd   :  { %v4147_v43 = vsel %vm10001_vm1, %v4143_v62, 0.0  ;;  %v4309_v29 = vpop.permute.xlu0 %4308  ;;  %vm10008_vm1 = vmmov %vm10007_vm2 }
 0x8fe   :  { %v8691_v57 = vadd.f32 %v4147_v43, %v8165_v60  ;;  %v5427_v60 = vld [vmem:[%s9293_s4 + $0x30] sm:$0xff] }
 0x900   :  { %4258 = vrot.lane.b32.xlu0 %v8657_v30, %s5842_s11  ;;  %4176 = vrot.lane.b32.xlu1 %v8657_v30, %s5842_s11 }
 0x901   :  { %v4253_v5 = vpop.permute.xlu0 %4252 }
 0x904   :  { %4336 = vrot.lane.b32.xlu0 %v8674_v9, %s5842_s11  ;;  %4300 = vrot.lane.b32.xlu1 %v8674_v9, %s5843_s12 }
 0x908   :  { %4388 = vrot.lane.b32.xlu0 %v4153_v45, %s5843_s12  ;;  %4254 = vrot.lane.b32.xlu1 %v8674_v9, %s5842_s11 }
 0x90c   :  { %4224 = vrot.lane.b32.xlu0 %v4153_v45, %s5843_s12  ;;  %4342 = vrot.lane.b32.xlu1 %v4153_v45, %s5842_s11 }
 0x910   :  { %4302 = vrot.lane.b32.xlu0 %v8691_v57, %s5843_s12  ;;  %4306 = vrot.lane.b32.xlu1 %v4153_v45, %s5843_s12 }
 0x914   :  { %4220 = vrot.lane.b32.xlu0 %v8691_v57, %s5843_s12  ;;  %4260 = vrot.lane.b32.xlu1 %v4153_v45, %s5842_s11 }
 0x918   :  { %4174 = vrot.lane.b32.xlu0 %v8691_v57, %s5842_s11  ;;  %4384 = vrot.lane.b32.xlu1 %v8691_v57, %s5843_s12 }
 0x91c   :  { %4218 = vrot.lane.b32.xlu0 %v8674_v9, %s5843_s12  ;;  %4338 = vrot.lane.b32.xlu1 %v8691_v57, %s5842_s11 }
 0x920   :  { %5758 = vrot.lane.b32.xlu0 %v9861_v6, %s5842_s11  ;;  %4256 = vrot.lane.b32.xlu1 %v8691_v57, %s5842_s11 }
 0x924   :  { %4608 = vperm.xlu0 %5740, %v5426_v34   ;;  %4172 = vrot.lane.b32.xlu1 %v8674_v9, %s5842_s11 }
 0x928   :  { %4216 = vrot.lane.b32.xlu1 %v9861_v6, %s5843_s12  ;;  %5768 = vrot.lane.b32.xlu0 %v9861_v6, %s5822_s29 }
 0x92c   :  { %4452 = vperm.xlu1 %5741, %v5423_v33   ;;  %5773 = vrot.lane.b32.xlu0 %v9861_v6, %s5827_s14 }
 0x930   :  { %4619 = vperm.xlu1 %5741, %v5427_v60   ;;  %5778 = vrot.lane.b32.xlu0 %v9861_v6, %s5827_s14 }
 0x934   :  { %5763 = vrot.lane.b32.xlu1 %v9861_v6, %s5822_s29 }
 0x938   :  { %5783 = vrot.lane.b32.xlu1 %v9861_v6, %s5822_s29 }
 0x96a   :  { %v4387_v41 = vpop.permute.xlu0 %4386  ;;  %v4341_v8 = vpop.permute.xlu1 %4340 }
 0x96e   :  { %v4305_v48 = vpop.permute.xlu0 %4304  ;;  %v4223_v36 = vpop.permute.xlu1 %4222 }
 0x972   :  { %v4259_v7 = vpop.permute.xlu0 %4258  ;;  %v8726_v26 = vpop.permute.xlu1 %4176 }
 0x976   :  { %v4337_v46 = vpop.permute.xlu0 %4336  ;;  %v4301_v12 = vpop.permute.xlu1 %4300 }
 0x97a   :  { %v4389_v11 = vpop.permute.xlu0 %4388  ;;  %v4255_v3 = vpop.permute.xlu1 %4254 }
 0x97b   :  { %v4395_v13 = vsel %vm10002_vm5, %v4387_v41, %v4389_v11  ;;  %v4396_v63 = vsel %vm10004_vm4, %v4389_v11, %v10003_v32  ;;  %vm10009_vm5 = vnez %v9912_v27  ;;  %vm10010_vm4 = vnez %v9914_v23  ;;  %v5432_v32 = vld [vmem:[%s9292_s3 + $0x38] sm:$0xff] }
 0x97c   :  { %5648 = vmatprep.subr.msk.mxu0 %vm8273_vm14, %v4395_v13  ;;  %5666 = vmatpush1.msk.msra.mxu1 %vm10005_vm6, %v4396_v63  ;;  %vm10011_vm14 = vcmask 982016   ;;  %v5433_v13 = vld [vmem:[%s9293_s4 + $0x38] sm:$0xff] }
 0x97d   :  { %4545 = vmatprep.subr.mxu1 %v9861_v6  ;;  %vm10012_vm6 = vmmov %vm10011_vm14 }
 0x97e   :  { %5667 = vmatpush1.msk.msra.mxu1 %vm10006_vm10, %v4153_v45  ;;  %v4225_v10 = vpop.permute.xlu0 %4224  ;;  %v4343_v62 = vpop.permute.xlu1 %4342  ;;  %vm10013_vm10 = vnez %v9916_v17 }
 0x97f   :  { %v4348_v43 = vsel %vm10007_vm2, %v4341_v8, %v4343_v62  ;;  %v4349_v34 = vsel %vm10008_vm1, %v4343_v62, %v4345_v49  ;;  %vm10015_vm2 = vnez %v9923_v58 }
 0x980   :  { %5668 = vmatprep.subr.msk.mxu1 %vm10009_vm5, %v4349_v34  ;;  %vm10016_vm5 = vnez %v9925_v24 }
 0x981   :  { %5669 = vmatpush1.msk.msra.mxu1 %vm10010_vm4, %v4348_v43  ;;  %vm10017_vm4 = vmmov %vm10012_vm6 }
 0x982   :  { %v4303_v55 = vpop.permute.xlu0 %4302  ;;  %v4307_v1 = vpop.permute.xlu1 %4306 }
 0x983   :  { %v4312_v19 = vsel %vm10011_vm14, %v4305_v48, %v4307_v1  ;;  %v4313_v33 = vsel %vm10012_vm6, %v4307_v1, %v4309_v29  ;;  %vm10018_vm14 = vnez %v9927_v53  ;;  %vm10020_vm6 = vnez %v9931_v50 }
 0x984   :  { %5670 = vmatprep.subr.msk.mxu1 %vm10013_vm10, %v4313_v33  ;;  %vm10021_vm10 = vmmov %vm10008_vm1 }
 0x985   :  { %5671 = vmatpush1.msk.msra.mxu1 %vm10014_vm9, %v4312_v19  ;;  %vm10019_vm9 = vnez %v9929_v18 }
 0x986   :  { %5672 = vmatprep.subr.msk.mxu1 %vm10015_vm2, %v4153_v45  ;;  %v4261_v38 = vpop.permute.xlu1 %4260  ;;  %v4221_v27 = vpop.permute.xlu0 %4220  ;;  %vm10022_vm2 = vmmov %vm10008_vm1 }
 0x987   :  { %v4265_v23 = vsel %vm10008_vm1, %v4259_v7, %v4261_v38  ;;  %5673 = vmatpush1.msk.msra.mxu1 %vm10016_vm5, %v8657_v30  ;;  %vm10024_vm1 = vmmov %vm10017_vm4 }
 0x988   :  { %5674 = vmatprep.subr.msk.mxu1 %vm8469_vm15, %v4265_v23  ;;  %vm10023_vm15 = vnez %v9934_v31  ;;  %v4311_v53 = vsel %vm10024_vm1, %v4303_v55, %v4305_v48  ;;  %vm10025_vm5 = vmmov %vm10024_vm1  ;;  %v10052_v48 = vld [vmem:[#allocation10_spill] sm:$0xff] }
 0x989   :  { %v4310_v18 = vsel %vm10025_vm5, %v4301_v12, %v4303_v55  ;;  %v8883_v12 = vadd.s32 4294967280, %v8038_v59 }
 0x98a   :  { %v4385_v60 = vpop.permute.xlu1 %4384  ;;  %v4175_v37 = vpop.permute.xlu0 %4174 }
 0x98b   :  { %v4394_v17 = vsel %vm10017_vm4, %v4385_v60, %v4387_v41  ;;  %vm10026_vm4 = vnez %v9946_v4  ;;  %v10051_v41 = vld [vmem:[#allocation9_spill] sm:$0xff] }
 0x98c   :  { %5649 = vmatpush1.msk.msra.mxu0 %vm10018_vm14, %v4394_v17  ;;  %vm10027_vm14 = vmmov %vm10022_vm2 }
 0x98d   :  { %5650 = vmatprep.subr.msk.mxu0 %vm10019_vm9, %v8657_v30  ;;  %vm10028_vm9 = vnez %v9948_v28 }
 0x98e   :  { %5651 = vmatpush1.msk.msra.mxu0 %vm10020_vm6, %v8691_v57  ;;  %v4339_v58 = vpop.permute.xlu1 %4338  ;;  %v4219_v45 = vpop.permute.xlu0 %4218  ;;  %vm10029_vm6 = vmmov %vm10024_vm1 }
 0x98f   :  { %v4346_v24 = vsel %vm10021_vm10, %v4337_v46, %v4339_v58  ;;  %v4347_v51 = vsel %vm10022_vm2, %v4339_v58, %v4341_v8  ;;  %v4229_v31 = vsel %vm10029_vm6, %v4223_v36, %v4225_v10  ;;  %vm10030_vm10 = vnez %v9950_v16 }
 0x990   :  { %5652 = vmatprep.subr.msk.mxu0 %vm10023_vm15, %v4347_v51  ;;  %vm10032_vm15 = vnez %v9954_v56  ;;  %vm10042_vm6 = vnez %v9983_v39  ;;  %v4988_v39 = vadd.s32 16, %v8031_v0 }
 0x991   :  { %5653 = vmatpush1.msk.msra.mxu0 %vm8434_vm7, %v4346_v24  ;;  %vm10031_vm7 = vmmov %vm10024_vm1  ;;  %v10060_v24 = vmov 0 }
 0x992   :  { %5654 = vmatprep.subr.msk.mxu0 %vm10026_vm4, %v4311_v53  ;;  %v4257_v50 = vpop.permute.xlu1 %4256  ;;  %v4228_v52 = vsel %vm10031_vm7, %v4221_v27, %v4223_v36  ;;  %vm10033_vm1 = vmmov %vm10022_vm2  ;;  %v5759_v29 = vpop.permute.xlu0 %5758  ;;  %vm10036_vm4 = vnez %v9975_v44 }
 0x993   :  { %v4264_v49 = vsel %vm10027_vm14, %v4257_v50, %v4259_v7  ;;  %5655 = vmatpush1.msk.msra.mxu0 %vm10028_vm9, %v4310_v18  ;;  %v4263_v4 = vsel %vm10022_vm2, %v4255_v3, %v4257_v50  ;;  %v4262_v28 = vsel %vm10033_vm1, %v4253_v5, %v4255_v3  ;;  %vm10038_vm14 = vnez %v9968_v21 }
 0x994   :  { %5656 = vmatprep.subr.msk.mxu0 %vm10030_vm10, %v8691_v57  ;;  %5675 = vmatpush1.msk.msra.mxu1 %vm8521_vm12, %v4264_v49  ;;  %vm10034_vm12 = vmmov %vm10025_vm5  ;;  %vm10035_vm5 = vnez %v9964_v22  ;;  %v5761_v22 = vunpack.i.h.bf16 %v5759_v29  ;;  %vm10041_vm9 = vnez %v9981_v40  ;;  %v5760_v14 = vunpack.i.l.bf16 %v5759_v29 }
 0x995   :  { %5657 = vmatpush1.msk.msra.mxu0 %vm10032_vm15, %v8674_v9  ;;  %5676 = vmatprep.subr.msk.mxu1 %vm8530_vm3, %v4229_v31  ;;  %v4227_v2 = vsel %vm10034_vm12, %v4219_v45, %v4221_v27  ;;  %vm10037_vm3 = vmmov %vm10033_vm1  ;;  %vm10045_vm2 = vnez %v9987_v20  ;;  %vm10047_vm12 = vnez %v9995_v25  ;;  %v8847_v20 = vadd.s32 16, %v8038_v59  ;;  %v10062_v31 = vld [vmem:[#allocation12_spill] sm:$0xff] }
 0x996   :  { %5658 = vmatprep.subr.msk.mxu0 %vm8517_vm8, %v4263_v4  ;;  %5677 = vmatpush1.msk.msra.mxu1 %vm8543_vm13, %v4228_v52  ;;  %v4173_v16 = vpop.permute.xlu1 %4172  ;;  %v4181_v56 = vsel %vm10037_vm3, %v4175_v37, %v8726_v26  ;;  %vm10039_vm13 = vnez %v9979_v47  ;;  %vm10040_vm8 = vmmov %vm10033_vm1  ;;  %v4630_v7 = vand.u32 15, %v8038_v59 }
 0x997   :  { %5659 = vmatpush1.msk.msra.mxu0 %vm10035_vm5, %v4262_v28  ;;  %5678 = vmatprep.subr.msk.mxu1 %vm10036_vm4, %v8657_v30  ;;  %v4180_v15 = vsel %vm10040_vm8, %v4173_v16, %v4175_v37  ;;  %vm10043_vm10 = vmmov %vm10031_vm7  ;;  %vm10044_vm7 = vcmask 588800   ;;  %v4179_v40 = vsel %vm10033_vm1, %v5760_v14, %v4173_v16  ;;  %vm4773_vm4 = vcmp.ge.s32.totalorder %v8847_v20, 0  ;;  %v10063_v16 = vld [vmem:[#allocation7_spill] sm:$0xff] }
 0x998   :  { %5660 = vmatprep.subr.msk.mxu0 %vm10038_vm14, %v4227_v2  ;;  %5679 = vmatpush1.msk.msra.mxu1 %vm10039_vm13, %v8691_v57  ;;  %vm10046_vm15 = vmmov %vm10033_vm1  ;;  %vm9447_vm14 = vcmp.le.s32.totalorder %v8847_v20, 0  ;;  %vm8894_vm1 = vcmp.eq.s32.totalorder %v4630_v7, 0 }
 0x999   :  { %5680 = vmatprep.subr.msk.mxu1 %vm10041_vm9, %v4181_v56  ;;  %v4178_v47 = vsel %vm10046_vm15, %v5761_v22, %v5760_v14  ;;  %vm10048_vm5 = vmmov %vm10044_vm7  ;;  %vm4676_vm15 = vcmp.ge.s32.totalorder %v8883_v12, 0 }
 0x99a   :  { %5681 = vmatpush1.msk.msra.mxu1 %vm10042_vm6, %v4180_v15  ;;  %v4217_v21 = vpop.permute.xlu1 %4216  ;;  %vm4628_vm6 = vcmp.le.s32.totalorder %v8031_v0, 0 }
 0x99b   :  { %v4226_v44 = vsel %vm10043_vm10, %v4217_v21, %v4219_v45  ;;  %5425 = vmatmul.mubr.msk.f32.vlgmr.msra.gmra.mxu1 %vm10044_vm7, %v5422_v42 }
 0x99c   :  { %5661 = vmatpush1.msk.msra.mxu0 %vm10045_vm2, %v4226_v44  ;;  %5323 = vmatprep.mubr.f32.mxu1 %v9861_v6 }
 0x99d   :  { %5662 = vmatprep.subr.msk.mxu0 %vm8614_vm11, %v8674_v9  ;;  %vm4990_vm11 = vcmp.le.s32.totalorder %v4988_v39, 0  ;;  %v4626_v9 = vand.u32 15, %v8031_v0 }
 0x99e   :  { %4487 = vmatpush1.msra.mxu0 %v9861_v6 }
 0x99f   :  { %5663 = vmatprep.subr.msk.mxu0 %vm8622_vm0, %v4179_v40  ;;  %vm4989_vm0 = vcmp.ge.s32.totalorder %v4988_v39, 0  ;;  %v8863_v25 = vpop.permute.xlu0 %4608  ;;  %vm4627_vm9 = vcmp.eq.s32.totalorder %v4626_v9, 0  ;;  %v5796_v40 = vld [vmem:[%s9294_s5] sm:$0xf] }
 0x9a0   :  { %5664 = vmatpush1.msk.msra.mxu0 %vm10047_vm12, %v4178_v47  ;;  %vm8850_vm3 = vmand %vm4989_vm0, %vm4990_vm11  ;;  %vm10057_vm12 = vcmask 916480   ;;  %vm4678_vm0 = vcmp.le.s32.totalorder %v8883_v12, 0  ;;  %v10071_v47 = vmov 0  ;;  %v4671_v39 = vadd.s32 4294967280, %v5796_v40  ;;  %v5429_v12 = vld [vmem:[%s9291_s2 + $0x38] sm:$0xff] }
 0x9a1   :  { %5424 = vmatmul.mubr.msk.f32.vlgmr.msra.gmra.mxu0 %vm10048_vm5, %v5422_v42  ;;  %vm5086_vm13 = vmand %vm8850_vm3, %vm4773_vm4 }
 0x9a2   :  { %5252 = vmatprep.mubr.f32.mxu0 %v9861_v6  ;;  %vm5087_vm8 = vmand %vm5086_vm13, %vm9447_vm14 }
 0x9a3   :  { %v8866_v30 = vsel %vm5087_vm8, 1, %v9875_v35  ;;  %v8871_v5 = vpop.permute.xlu0 %5768  ;;  %vm8889_vm7 = vmand %vm4627_vm9, %vm4628_vm6  ;;  %vm9449_vm9 = vcmp.le.s32.totalorder %v8038_v59, 0 }
 0x9a4   :  { %v5104_v8 = vrot.slane %v8866_v30, %v10051_v41  ;;  %v5100_v36 = vrot.slane %v8866_v30, %v10052_v48  ;;  %v5770_v26 = vunpack.i.l.bf16 %v8871_v5  ;;  %vm10058_vm5 = vmmov %vm10057_vm12 }
 0x9a5   :  { %vm4992_vm11 = vmand %vm8850_vm3, %vm4676_vm15 }
 0x9a6   :  { %vm5108_vm10 = vcmp.eq.s32.totalorder %v5104_v8, 1  ;;  %vm5107_vm2 = vcmp.eq.s32.totalorder %v5100_v36, 1  ;;  %vm4993_vm13 = vmand %vm4992_vm11, %vm4678_vm0  ;;  %v10073_v8 = vld [vmem:[#allocation11_spill] sm:$0xff] }
 0x9a7   :  { %v8859_v54 = vpop.permute.xlu1 %4452  ;;  %v8898_v63 = vpop.permute.xlu0 %5773  ;;  %v8914_v55 = vsel %vm4993_vm13, 1, %v9875_v35  ;;  %vm4632_vm8 = vmand %vm8889_vm7, %vm8894_vm1  ;;  %vm10064_vm1 = vcmp.ge.s32.totalorder %v10063_v16, 0 }
 0x9a8   :  { %v5776_v43 = vunpack.i.h.bf16 %v8898_v63  ;;  %v5775_v34 = vunpack.i.l.bf16 %v8898_v63  ;;  %v5010_v1 = vrot.slane %v8914_v55, %v10051_v41 }
 0x9ab   :  { %v8869_v57 = vpop.permute.xlu1 %4619 }
 0x9af   :  { %v8880_v46 = vpop.permute.xlu1 %5763 }
 0x9b0   :  { %v5766_v11 = vunpack.i.h.bf16 %v8880_v46  ;;  %v5765_v3 = vunpack.i.l.bf16 %v8880_v46 }
 0x9b2   :  { %v5127_v10 = vsel %vm10057_vm12, %v5766_v11, %v5770_v26  ;;  %v5126_v62 = vsel %vm10058_vm5, %v5765_v3, %v5766_v11  ;;  %vm5014_vm12 = vcmp.eq.s32.totalorder %v5010_v1, 1  ;;  %vm8955_vm5 = vmand %vm10064_vm1, %vm4628_vm6 }
 0x9b3   :  { %5698 = vmatprep.subr.msk.mxu1 %vm5108_vm10, %v5127_v10  ;;  %vm10059_vm10 = vcmask 130048   ;;  %vm4835_vm11 = vmand %vm8955_vm5, %vm4676_vm15  ;;  %v9061_v10 = vpop.permute.xlu0 %5778 }
 0x9b4   :  { %5699 = vmatpush1.msk.msra.mxu1 %vm5107_vm2, %v5126_v62  ;;  %v5033_v19 = vsel %vm10059_vm10, %v5775_v34, %v5776_v43  ;;  %vm4634_vm2 = vmand %vm4632_vm8, %vm9449_vm9  ;;  %vm4673_vm10 = vcmp.ge.s32.totalorder %v4671_v39, 0  ;;  %v9063_v62 = vpop.permute.xlu1 %5783  ;;  %v10080_v43 = vld [vmem:[#allocation8_spill] sm:$0xff] }
 0x9b5   :  { %5275 = vmatprep.subr.mxu1 %v9861_v6  ;;  %v4635_v33 = vsel %vm4634_vm2, 1, %v9875_v35  ;;  %vm8977_vm6 = vmand %vm4835_vm11, %vm4678_vm0  ;;  %vm4674_vm2 = vcmp.le.s32.totalorder %v4671_v39, 0 }
 0x9b6   :  { %5276 = vmatpush1.msra.mxu1 %v9861_v6  ;;  %v4647_v23 = vrot.slane %v4635_v33, %v10052_v48  ;;  %v4639_v52 = vrot.slane %v4635_v33, %v10062_v31  ;;  %v4651_v22 = vrot.slane %v4635_v33, %v10051_v41  ;;  %v4643_v36 = vrot.slane %v4635_v33, %v10073_v8 }
 0x9b7   :  { %5700 = vmatprep.subr.msk.mxu1 %vm5014_vm12, %v5033_v19  ;;  %vm9008_vm12 = vmand %vm4673_vm10, %vm4674_vm2  ;;  %v9115_v16 = vsel %vm8977_vm6, 1, %v9875_v35 }
 0x9b8   :  { %vm8935_vm7 = vcmp.eq.s32.totalorder %v4647_v23, 1  ;;  %vm8967_vm13 = vcmp.eq.s32.totalorder %v4639_v52, 1  ;;  %vm8986_vm8 = vcmp.eq.s32.totalorder %v4651_v22, 1  ;;  %vm9012_vm1 = vcmp.eq.s32.totalorder %v4643_v36, 1  ;;  %vm4677_vm11 = vmand %vm9008_vm12, %vm4676_vm15 }
 0x9b9   :  { %v10061_v24 = vsel %vm8935_vm7, 4294967295, %v10060_v24  ;;  %v10072_v47 = vsel %vm8986_vm8, 4294967295, %v10071_v47  ;;  %vm9026_vm10 = vmand %vm4677_vm11, %vm4678_vm0  ;;  %vm10081_vm15 = vcmp.ge.s32.totalorder %v10080_v43, 0  ;;  %v5006_v23 = vrot.slane %v8914_v55, %v10052_v48 }
 0x9ba   :  { %vm5050_vm0 = vmand %vm8850_vm3, %vm10081_vm15  ;;  %v5771_v22 = vunpack.i.h.bf16 %v8871_v5  ;;  %v4998_v5 = vrot.slane %v8914_v55, %v10062_v31  ;;  %v4853_v63 = vrot.slane %v9115_v16, %v10051_v41 }
 0x9bb   :  { %vm5051_vm2 = vmand %vm5050_vm0, %vm9449_vm9 }
 0x9bc   :  { %vm4929_vm11 = vmand %vm8955_vm5, %vm4773_vm4  ;;  %v5052_v61 = vsel %vm5051_vm2, 1, %v9875_v35 }
 0x9bd   :  { %vm10082_vm14 = vmmov %vm10081_vm15  ;;  %vm10083_vm15 = vcmp.le.s32.totalorder %v8847_v20, 0 }
 0x9be   :  { %vm4893_vm3 = vmand %vm8955_vm5, %vm10082_vm14  ;;  %vm5013_vm5 = vcmp.eq.s32.totalorder %v5006_v23, 1 }
 0x9bf   :  { %vm4894_vm0 = vmand %vm4893_vm3, %vm9449_vm9  ;;  %vm10104_vm9 = vcmp.ge.s32.totalorder %v10080_v43, 0  ;;  %v4845_v43 = vrot.slane %v9115_v16, %v10073_v8 }
 0xa5b   :  { %v4595_v38 = vpop.f32.mrf.mxu1 }
 0xa5c   :  { %v4596_v27 = vadd.f32 %v4595_v38, %v8859_v54 }
 0xa5d   :  { %v4597_v60 = vpop.f32.mrf.mxu1 }
 0xa5e   :  { %v4602_v17 = vmax.f32 %v4596_v27, 0.0  ;;  %v4598_v58 = vadd.f32 %v4597_v60, %v8859_v54  ;;  %v5096_v27 = vrot.slane %v8866_v30, %v10073_v8 }
 0xa60   :  { %v4613_v37 = vmul.f32 %v8863_v25, %v4602_v17  ;;  %v4603_v45 = vmax.f32 %v4598_v58, 0.0  ;;  %v5060_v58 = vrot.slane %v5052_v61, %v10073_v8  ;;  %vm5106_vm14 = vcmp.eq.s32.totalorder %v5096_v27, 1 }
 0xa61   :  { %v4524_v51 = vpop.f32.mrf.mxu0 }
 0xa62   :  { %v4624_v53 = vadd.f32 %v8869_v57, %v4613_v37  ;;  %v4525_v18 = vadd.f32 %v4524_v51, %v8859_v54  ;;  %v4614_v29 = vmul.f32 %v8863_v25, %v4603_v45  ;;  %v5092_v37 = vrot.slane %v8866_v30, %v10062_v31 }
 0xa63   :  { %v4526_v4 = vpop.f32.mrf.mxu0  ;;  %v5002_v45 = vrot.slane %v8914_v55, %v10073_v8 }
 0xa64   :  { %v8943_v50 = vsel %vm8935_vm7, %v4624_v53, 0.0  ;;  %v4600_v49 = vmax.f32 %v4525_v18, 0.0  ;;  %v4527_v42 = vadd.f32 %v4526_v4, %v8859_v54  ;;  %v4625_v14 = vadd.f32 %v8869_v57, %v4614_v29  ;;  %vm4736_vm7 = vmand %vm9008_vm12, %vm10104_vm9 }
 0xa65   :  { %5022 = vrot.lane.b32.xlu0 %v8943_v50, %s5827_s14  ;;  %5114 = vrot.lane.b32.xlu1 %v8943_v50, %s5822_s29  ;;  %v5056_v53 = vrot.slane %v5052_v61, %v10062_v31  ;;  %v4895_v18 = vsel %vm4894_vm0, 1, %v9875_v35  ;;  %vm5105_vm2 = vcmp.eq.s32.totalorder %v5092_v37, 1  ;;  %vm9131_vm6 = vcmp.eq.s32.totalorder %v5002_v45, 1 }
 0xa66   :  { %v4611_v28 = vmul.f32 %v8863_v25, %v4600_v49  ;;  %v4601_v44 = vmax.f32 %v4527_v42, 0.0  ;;  %v8999_v54 = vsel %vm8986_vm8, %v4625_v14, 0.0  ;;  %vm4930_vm8 = vmand %vm4929_vm11, %vm10083_vm15  ;;  %vm9107_vm11 = vcmp.eq.s32.totalorder %v5060_v58, 1 }
 0xa67   :  { %v4931_v51 = vsel %vm4930_vm8, 1, %v9875_v35  ;;  %vm10086_vm8 = vcmask 916480   ;;  %vm10088_vm15 = vcmask 130048   ;;  %v4911_v42 = vrot.slane %v4895_v18, %v10051_v41 }
 0xa68   :  { %v4622_v56 = vadd.f32 %v8869_v57, %v4611_v28  ;;  %v4612_v9 = vmul.f32 %v8863_v25, %v4601_v44  ;;  %v4947_v49 = vrot.slane %v4931_v51, %v10051_v41  ;;  %v4943_v28 = vrot.slane %v4931_v51, %v10052_v48  ;;  %vm10087_vm3 = vmmov %vm10086_vm8 }
 0xa69   :  { %4869 = vrot.lane.b32.xlu0 %v8943_v50, %s5827_s14  ;;  %4961 = vrot.lane.b32.xlu1 %v8943_v50, %s5822_s29  ;;  %vm9126_vm0 = vcmp.eq.s32.totalorder %v5056_v53, 1  ;;  %v4907_v14 = vrot.slane %v4895_v18, %v10052_v48  ;;  %v4939_v55 = vrot.slane %v4931_v51, %v10073_v8  ;;  %v4935_v39 = vrot.slane %v4931_v51, %v10062_v31 }
 0xa6a   :  { %v8984_v21 = vsel %vm8967_vm13, %v4622_v56, 0.0  ;;  %v4623_v7 = vadd.f32 %v8869_v57, %v4612_v9  ;;  %v5780_v45 = vunpack.i.l.bf16 %v9061_v10 }
 0xa6c   :  { %v9032_v57 = vsel %vm9012_vm1, %v4623_v7, 0.0 }
 0xa6d   :  { %4865 = vrot.lane.b32.xlu0 %v8984_v21, %s5827_s14  ;;  %4957 = vrot.lane.b32.xlu1 %v8984_v21, %s5822_s29 }
 0xa71   :  { %5116 = vrot.lane.b32.xlu0 %v8999_v54, %s5822_s29  ;;  %5024 = vrot.lane.b32.xlu1 %v8999_v54, %s5827_s14 }
 0xa75   :  { %4963 = vrot.lane.b32.xlu0 %v8999_v54, %s5822_s29  ;;  %4871 = vrot.lane.b32.xlu1 %v8999_v54, %s5827_s14 }
 0xa79   :  { %4959 = vrot.lane.b32.xlu0 %v9032_v57, %s5822_s29  ;;  %5020 = vrot.lane.b32.xlu1 %v9032_v57, %s5827_s14 }
 0xa7d   :  { %4807 = vrot.lane.b32.xlu0 %v8984_v21, %s5822_s29  ;;  %5788 = vrot.lane.b32.xlu1 %v9861_v6, %s5827_s14 }
 0xa81   :  { %4811 = vrot.lane.b32.xlu0 %v8943_v50, %s5822_s29  ;;  %4867 = vrot.lane.b32.xlu1 %v9032_v57, %s5827_s14 }
 0xa85   :  { %4712 = vrot.lane.b32.xlu0 %v8984_v21, %s5827_s14  ;;  %4809 = vrot.lane.b32.xlu1 %v9032_v57, %s5822_s29 }
 0xa89   :  { %5182 = vperm.xlu0 %5740, %v5429_v12   ;;  %4714 = vrot.lane.b32.xlu1 %v9032_v57, %s5827_s14 }
 0xa8d   :  { %5349 = vperm.xlu0 %5740, %v5433_v13   ;;  %5338 = vperm.xlu1 %5741, %v5432_v32   ;;  %v4903_v13 = vrot.slane %v4895_v18, %v10073_v8  ;;  %v4899_v32 = vrot.slane %v4895_v18, %v10062_v31  ;;  %v5781_v18 = vunpack.i.h.bf16 %v9061_v10 }
 0xad7   :  { %v9069_v1 = vpop.permute.xlu0 %5022  ;;  %v5115_v19 = vpop.permute.xlu1 %5114 }
 0xadb   :  { %v9077_v33 = vpop.permute.xlu0 %4869  ;;  %v9079_v38 = vpop.permute.xlu1 %4961 }
 0xadf   :  { %v9094_v60 = vpop.permute.xlu0 %4865  ;;  %v9096_v17 = vpop.permute.xlu1 %4957 }
 0xae3   :  { %v5117_v52 = vpop.permute.xlu0 %5116  ;;  %v5025_v4 = vpop.permute.xlu1 %5024 }
 0xae4   :  { %v5124_v2 = vsel %vm10086_vm8, %v5115_v19, %v5117_v52  ;;  %v5125_v29 = vsel %vm10087_vm3, %v5117_v52, %v5765_v3  ;;  %v5032_v56 = vsel %vm10088_vm15, %v5025_v4, %v5775_v34  ;;  %vm9135_vm8 = vcmp.eq.s32.totalorder %v4947_v49, 1 }
 0xae5   :  { %5682 = vmatprep.subr.msk.mxu0 %vm5106_vm14, %v5125_v29  ;;  %5701 = vmatpush1.msk.msra.mxu1 %vm5013_vm5, %v5032_v56  ;;  %vm9147_vm14 = vmand %vm9008_vm12, %vm4773_vm4  ;;  %vm4950_vm5 = vcmp.eq.s32.totalorder %v4943_v28, 1  ;;  %vm4912_vm12 = vcmp.eq.s32.totalorder %v4899_v32, 1  ;;  %v4680_v49 = vsel %vm9026_vm10, 1, %v9875_v35  ;;  %v5785_v28 = vunpack.i.l.bf16 %v9063_v62 }
 0xae6   :  { %5683 = vmatpush1.msk.msra.mxu0 %vm5105_vm2, %v5124_v2  ;;  %vm10097_vm2 = vmmov %vm10088_vm15  ;;  %vm4915_vm15 = vcmp.eq.s32.totalorder %v4911_v42, 1  ;;  %v4684_v46 = vrot.slane %v4680_v49, %v10062_v31 }
 0xae7   :  { %v4964_v44 = vpop.permute.xlu0 %4963  ;;  %v4872_v40 = vpop.permute.xlu1 %4871  ;;  %5684 = vmatprep.subr.msk.mxu0 %vm9107_vm11, %v8999_v54  ;;  %v5031_v9 = vsel %vm10097_vm2, %v9069_v1, %v5025_v4  ;;  %vm10098_vm4 = vmmov %vm10087_vm3  ;;  %vm9168_vm11 = vcmp.eq.s32.totalorder %v4907_v14, 1  ;;  %vm10101_vm2 = vcmp.le.s32.totalorder %v8847_v20, 0  ;;  %v5786_v4 = vunpack.i.h.bf16 %v9063_v62 }
 0xae8   :  { %v4969_v36 = vsel %vm10087_vm3, %v9079_v38, %v4964_v44  ;;  %v4970_v7 = vsel %vm10098_vm4, %v4964_v44, %v5771_v22  ;;  %5685 = vmatpush1.msk.msra.mxu0 %vm9126_vm0, %v8943_v50  ;;  %vm4776_vm3 = vmand %vm9147_vm14, %vm10101_vm2  ;;  %vm5011_vm0 = vcmp.eq.s32.totalorder %v4998_v5, 1  ;;  %vm4857_vm4 = vcmp.eq.s32.totalorder %v4853_v63, 1 }
 0xae9   :  { %5686 = vmatprep.subr.msk.mxu0 %vm9131_vm6, %v5031_v9  ;;  %5702 = vmatprep.subr.msk.mxu1 %vm9135_vm8, %v4970_v7  ;;  %vm4949_vm6 = vcmp.eq.s32.totalorder %v4939_v55, 1  ;;  %vm9179_vm8 = vcmp.eq.s32.totalorder %v4935_v39, 1  ;;  %vm10105_vm14 = vcmask 130048   ;;  %v4777_v58 = vsel %vm4776_vm3, 1, %v9875_v35 }
 0xaea   :  { %5703 = vmatpush1.msk.msra.mxu1 %vm4950_vm5, %v4969_v36  ;;  %v4876_v20 = vsel %vm10105_vm14, %v9077_v33, %v4872_v40  ;;  %vm10106_vm5 = vcmask 916480   ;;  %vm10107_vm2 = vmmov %vm10105_vm14  ;;  %vm10109_vm14 = vcmp.le.s32.totalorder %v8038_v59, 0  ;;  %v4785_v53 = vrot.slane %v4777_v58, %v10073_v8  ;;  %v5428_v40 = vld [vmem:[%s9290_s1 + $0x38] sm:$0xff]  ;;  %s5844_s1 = smov [#allocation4]  }
 0xaeb   :  { %v4960_v19 = vpop.permute.xlu0 %4959  ;;  %v5021_v61 = vpop.permute.xlu1 %5020  ;;  %5704 = vmatprep.subr.msk.mxu1 %vm4915_vm15, %v8999_v54  ;;  %vm4913_vm15 = vcmp.eq.s32.totalorder %v4903_v13, 1  ;;  %vm10108_vm9 = vmmov %vm10106_vm5  ;;  %v4781_v59 = vrot.slane %v4777_v58, %v10062_v31  ;;  %v4793_v30 = vrot.slane %v4777_v58, %v10051_v41  ;;  %v4789_v25 = vrot.slane %v4777_v58, %v10052_v48  ;;  %s5382_s4 = sshll.u32 %s5844_s1, 4  ;;  %s5383_s4 = int_to_ptr.vmem [resolvable:$true] %s5382_s4 }
 0xaec   :  { %v4968_v23 = vsel %vm10106_vm5, %v4960_v19, %v9079_v38  ;;  %v5030_v37 = vsel %vm10107_vm2, %v5021_v61, %v9069_v1  ;;  %5705 = vmatpush1.msk.msra.mxu1 %vm9168_vm11, %v8943_v50  ;;  %v4967_v26 = vsel %vm10108_vm9, %v9096_v17, %v4960_v19  ;;  %v4849_v1 = vrot.slane %v9115_v16, %v10052_v48  ;;  %vm4737_vm5 = vmand %vm4736_vm7, %vm10109_vm14  ;;  %s5797_s29 = scalar_lea.vmem %s5383_s4, 512  ;;  %p5802_p1 = scmp.lt.s32.totalorder %s5383_s4, %s5383_s4 }
 0xaed   :  { %5687 = vmatpush1.msk.msra.mxu0 %vm5011_vm0, %v5030_v37  ;;  %5706 = vmatprep.subr.msk.mxu1 %vm4857_vm4, %v4876_v20  ;;  %v4841_v17 = vrot.slane %v9115_v16, %v10062_v31  ;;  %v4738_v52 = vsel %vm4737_vm5, 1, %v9875_v35  ;;  %vm4855_vm7 = vcmp.eq.s32.totalorder %v4845_v43, 1  ;;  %vm9228_vm0 = vcmp.eq.s32.totalorder %v4785_v53, 1  ;;  %vm10114_vm10 = vmmov %vm10107_vm2  ;;  %p5798_p0 = scmp.ne.s32.totalorder %s5383_s4, %s5797_s29  ;;  %p5803_p2 = scmp.lt.s32.totalorder %s5797_s29, %s5797_s29 }
 0xaee   :  { %5688 = vmatprep.subr.msk.mxu0 %vm4949_vm6, %v4968_v23  ;;  %vm4856_vm11 = vcmp.eq.s32.totalorder %v4849_v1, 1  ;;  %vm10115_vm4 = vmmov %vm10107_vm2  ;;  %v4688_v62 = vrot.slane %v4680_v49, %v10073_v8  ;;  %v4754_v42 = vrot.slane %v4738_v52, %v10051_v41  ;;  %v4750_v14 = vrot.slane %v4738_v52, %v10052_v48 }
 0xaef   :  { %v4808_v38 = vpop.permute.xlu0 %4807  ;;  %v9205_v51 = vpop.permute.xlu1 %5788  ;;  %5689 = vmatpush1.msk.msra.mxu0 %vm9179_vm8, %v4967_v26  ;;  %vm9224_vm3 = vcmp.eq.s32.totalorder %v4841_v17, 1  ;;  %vm10116_vm6 = vmmov %vm10107_vm2  ;;  %vm9241_vm8 = vcmp.eq.s32.totalorder %v4781_v59, 1  ;;  %v4696_v8 = vrot.slane %v4680_v49, %v10051_v41  ;;  %v4692_v31 = vrot.slane %v4680_v49, %v10052_v48  ;;  %p5804_p3 = por %p5803_p2, %p5802_p1 }
 0xaf0   :  { %5690 = vmatprep.subr.msk.mxu0 %vm4913_vm15, %v9032_v57  ;;  %v4873_v22 = vsel %vm10116_vm6, %v5780_v45, %v9094_v60  ;;  %vm10119_vm2 = vmmov %vm10108_vm9  ;;  %vm4797_vm15 = vcmp.eq.s32.totalorder %v4793_v30, 1 }
 0xaf1   :  { %5691 = vmatpush1.msk.msra.mxu0 %vm4912_vm12, %v8984_v21  ;;  %v4814_v3 = vsel %vm10119_vm2, %v5785_v28, %v4808_v38  ;;  %vm10120_vm9 = vmmov %vm10119_vm2  ;;  %vm4796_vm12 = vcmp.eq.s32.totalorder %v4789_v25, 1  ;;  %p5805_p4 = pnand %p5804_p3, %p5798_p0 }
 0xaf2   :  { %v4813_v63 = vsel %vm10120_vm9, %v5786_v4, %v5785_v28  ;;  %vm10121_vm14 = vmmov %vm10119_vm2  ;;  %vm10127_vm9 = vcmask 588800  }
 0xaf3   :  { %v4868_v16 = vpop.permute.xlu1 %4867  ;;  %v4812_v35 = vpop.permute.xlu0 %4811  ;;  %vm10122_vm5 = vmmov %vm10119_vm2 }
 0xaf4   :  { %v4874_v29 = vsel %vm10114_vm10, %v9094_v60, %v4868_v16  ;;  %v4875_v56 = vsel %vm10115_vm4, %v4868_v16, %v9077_v33  ;;  %v5790_v33 = vunpack.i.l.bf16 %v9205_v51  ;;  %v5791_v60 = vunpack.i.h.bf16 %v9205_v51 }
 0xaf5   :  { %5692 = vmatprep.subr.msk.mxu0 %vm4855_vm7, %v4874_v29  ;;  %5707 = vmatpush1.msk.msra.mxu1 %vm4856_vm11, %v4875_v56  ;;  %vm4698_vm7 = vcmp.eq.s32.totalorder %v4688_v62, 1  ;;  %vm4758_vm11 = vcmp.eq.s32.totalorder %v4754_v42, 1  ;;  %vm4757_vm10 = vcmp.eq.s32.totalorder %v4750_v14, 1 }
 0xaf6   :  { %5693 = vmatpush1.msk.msra.mxu0 %vm9224_vm3, %v4873_v22  ;;  %vm4697_vm3 = vcmp.eq.s32.totalorder %v4684_v46, 1 }
 0xaf7   :  { %v4810_v5 = vpop.permute.xlu1 %4809  ;;  %5694 = vmatprep.subr.msk.mxu0 %vm9228_vm0, %v4814_v3  ;;  %v4713_v41 = vpop.permute.xlu0 %4712  ;;  %vm10123_vm0 = vmmov %vm10115_vm4  ;;  %vm4700_vm4 = vcmp.eq.s32.totalorder %v4696_v8, 1 }
 0xaf8   :  { %v4815_v34 = vsel %vm10121_vm14, %v4808_v38, %v4810_v5  ;;  %v4816_v44 = vsel %vm10122_vm5, %v4810_v5, %v4812_v35  ;;  %5695 = vmatpush1.msk.msra.mxu0 %vm9241_vm8, %v4813_v63  ;;  %v4717_v48 = vsel %vm10123_vm0, %v5781_v18, %v5790_v33  ;;  %vm10124_vm6 = vmmov %vm10123_vm0  ;;  %vm4699_vm8 = vcmp.eq.s32.totalorder %v4692_v31, 1 }
 0xaf9   :  { %5216 = vmatprep.subr.mxu0 %v9861_v6  ;;  %5708 = vmatprep.subr.msk.mxu1 %vm4797_vm15, %v4816_v44  ;;  %v4716_v39 = vsel %vm10124_vm6, %v5791_v60, %v5781_v18  ;;  %vm10125_vm2 = vmmov %vm10123_vm0  ;;  %vm10129_vm14 = vnez %v10061_v24 }
 0xafa   :  { %5217 = vmatpush1.msra.mxu0 %v9861_v6  ;;  %5709 = vmatpush1.msk.msra.mxu1 %vm4796_vm12, %v4815_v34  ;;  %vm10126_vm15 = vmmov %vm10123_vm0 }
 0xafb   :  { %v4715_v55 = vpop.permute.xlu1 %4714  ;;  %5696 = vmatprep.subr.msk.mxu0 %vm4698_vm7, %v4717_v48  ;;  %5710 = vmatprep.subr.msk.mxu1 %vm4758_vm11, %v9032_v57  ;;  %v4718_v6 = vsel %vm10126_vm15, %v5790_v33, %v4713_v41  ;;  %vm10128_vm12 = vmmov %vm10127_vm9 }
 0xafc   :  { %v4719_v9 = vsel %vm10125_vm2, %v4713_v41, %v4715_v55  ;;  %5697 = vmatpush1.msk.msra.mxu0 %vm4697_vm3, %v4716_v39  ;;  %5711 = vmatpush1.msk.msra.mxu1 %vm4757_vm10, %v8984_v21 }
 0xafd   :  { %5430 = vmatmul.mubr.msk.f32.vlgmr.msra.gmra.mxu0 %vm10127_vm9, %v5428_v40  ;;  %5712 = vmatprep.subr.msk.mxu1 %vm4700_vm4, %v4719_v9 }
 0xafe   :  { %5713 = vmatpush1.msk.msra.mxu1 %vm4699_vm8, %v4718_v6 }
 0xaff   :  { %5431 = vmatmul.mubr.msk.f32.vlgmr.msra.gmra.mxu1 %vm10128_vm12, %v5428_v40 }
 0xb04   :  { %v5183_v36 = vpop.permute.xlu0 %5182 }
 0xb08   :  { %v5339_v20 = vpop.permute.xlu1 %5338  ;;  %v5350_v1 = vpop.permute.xlu0 %5349 }
 0xbbd   :  { %v5254_v7 = vpop.f32.mrf.mxu0 }
 0xbbe   :  { %v5255_v12 = vadd.f32 %v5254_v7, %v5183_v36 }
 0xbbf   :  { %v5256_v13 = vpop.f32.mrf.mxu0  ;;  %v5325_v32 = vpop.f32.mrf.mxu1 }
 0xbc0   :  { %v5330_v19 = vmax.f32 %v5255_v12, 0.0  ;;  %v5257_v61 = vadd.f32 %v5256_v13, %v5183_v36  ;;  %v5326_v27 = vadd.f32 %v5325_v32, %v5183_v36 }
 0xbc1   :  { %v5327_v23 = vpop.f32.mrf.mxu1 }
 0xbc2   :  { %v5341_v37 = vmul.f32 %v5339_v20, %v5330_v19  ;;  %v5331_v58 = vmax.f32 %v5257_v61, 0.0  ;;  %v5332_v26 = vmax.f32 %v5326_v27, 0.0  ;;  %v5328_v43 = vadd.f32 %v5327_v23, %v5183_v36 }
 0xbc4   :  { %v5352_v38 = vadd.f32 %v5350_v1, %v5341_v37  ;;  %v5342_v51 = vmul.f32 %v5339_v20, %v5331_v58  ;;  %v5343_v17 = vmul.f32 %v5339_v20, %v5332_v26  ;;  %v5333_v53 = vmax.f32 %v5328_v43, 0.0 }
 0xbc6   :  { %v5356_v18 = vsel %vm8967_vm13, %v5352_v38, 0.0  ;;  %v5353_v45 = vadd.f32 %v5350_v1, %v5342_v51  ;;  %v5354_v59 = vadd.f32 %v5350_v1, %v5343_v17  ;;  %v5344_v49 = vmul.f32 %v5339_v20, %v5333_v53 }
 0xbc7   :  { %v5360_v52 = vadd.f32 %v5356_v18, %v8984_v21  ;;  %vm10130_vm13 = vnez %v10072_v47 }
 0xbc8   :  { %v5357_v4 = vsel %vm9012_vm1, %v5353_v45, 0.0  ;;  %v5358_v30 = vsel %vm10129_vm14, %v5354_v59, 0.0  ;;  %v5355_v28 = vadd.f32 %v5350_v1, %v5344_v49 }
 0xbc9   :  { %5372 = vst [vmem:[#allocation4] sm:$0xff] %v5360_v52  ;;  %v5361_v16 = vadd.f32 %v5357_v4, %v9032_v57  ;;  %v5362_v0 = vadd.f32 %v5358_v30, %v8943_v50 }
 0xbca   :  { %v5359_v10 = vsel %vm10130_vm13, %v5355_v28, 0.0 }
 0xbcb   :  { %5373 = vst [vmem:[#allocation4 + $0x8] sm:$0xff] %v5361_v16  ;;  %5374 = vst [vmem:[#allocation4 + $0x10] sm:$0xff] %v5362_v0  ;;  %v5363_v21 = vadd.f32 %v5359_v10, %v8999_v54 }
 0xbcd   :  { %5375 = vst [vmem:[#allocation4 + $0x18] sm:$0xff] %v5363_v21 }
 0xbce   :  { %5808 = shalt.err (!%p5805_p4)
}
 0xbcf   :  { %5385 = dma.vmem_to_hbm [thread:$0]  %s5383_s4, 512, %s9296_s7, [#allocation5]  }
 0xbd0   :  { %5817 = dma.done.wait [#allocation5], 512  }
 0xbd1   :  { %5818 = vsyncadd [#allocation5], 4294966784 }
 0xbd2   :  { %5389 = vsyncpa [#allocation5], 1 }

</bundles_post_ra>
